<compile_context>
chip_gen: v6e
topology: v6e:2x2x1
jax: 0.10.0
libtpu: 0.0.40
codegen_flags: <defaults>
</compile_context>

<pallas_src>
import jax
import jax.numpy as jnp
import numpy as np
from jax import lax
from jax.experimental import pallas as pl
from jax.experimental.pallas import tpu as pltpu

TILE_B_MAX = 32   # per-step footprint ~15 MB at 32 -> fits v7x's 64 MiB/TC


def _round_up(x, m):
    return -(-x // m) * m


def _pick_tile_b(batch):
    # Aim for >= 2 grid steps (keeps both v7x TensorCores busy) while capping
    # the tile so VMEM stays comfortable on the 64 MiB/TC chips.
    half = -(-batch // 2)
    return int(max(8, min(TILE_B_MAX, _round_up(half, 8))))


# ----------------------------- Pallas kernel --------------------------------

def fused_cnn_kernel(x_ref, w1_ref, b1_ref, w2_ref, b2_ref,
                     fw1_ref, fb1_ref, fw2_ref, fb2_ref, o_ref, pad_ref):
    tb = x_ref.shape[0]

    # ---- conv1 (3x3 SAME, 1->16) + ReLU + 2x2 maxpool: one K=384 matmul ----
    # x_ref: (tb, 30, 128); H halo rows 0/29 and W lanes 28..127 are zero.
    a1 = jnp.concatenate(
        [x_ref[:, 0:28, :], x_ref[:, 1:29, :], x_ref[:, 2:30, :]],
        axis=-1).reshape(tb * 28, 384).astype(jnp.bfloat16)
    y = jnp.dot(a1, w1_ref[...], preferred_element_type=jnp.float32)
    y = jnp.maximum(y + b1_ref[...], 0.0)
    # output lanes: [0:256) even output columns, [256:512) odd output columns;
    # dead lanes [224:256)/[480:512) are exactly zero (zero weights+bias, ReLU)
    y = jnp.maximum(y[:, :256], y[:, 256:])            # W-pool -> (tb*28, 256)
    y = y.reshape(tb * 14, 512)                        # pair adjacent H rows
    p1 = jnp.maximum(y[:, :256], y[:, 256:])           # H-pool -> (tb*14, 256)

    # ---- H-pad pooled conv1 into scratch (only halo rows are zeroed) -------
    zrow = jnp.zeros((tb, 1, 256), jnp.float32)
    pad_ref[:, 0:1, :] = zrow
    pad_ref[:, 15:16, :] = zrow
    pad_ref[:, 1:15, :] = p1.reshape(tb, 14, 256)

    # ---- conv2 (3x3 SAME, 16->32) + ReLU + 2x2 maxpool: one K=768 matmul ---
    a2 = jnp.concatenate(
        [pad_ref[:, 0:14, :], pad_ref[:, 1:15, :], pad_ref[:, 2:16, :]],
        axis=-1).reshape(tb * 14, 768).astype(jnp.bfloat16)
    y = jnp.dot(a2, w2_ref[...], preferred_element_type=jnp.float32)
    y = jnp.maximum(y + b2_ref[...], 0.0)
    y = jnp.maximum(y[:, :256], y[:, 256:])            # W-pool -> (tb*14, 256)
    y = y.reshape(tb * 7, 512)
    p2 = jnp.maximum(y[:, :256], y[:, 256:])           # H-pool -> (tb*7, 256)

    # ---- fc1 + ReLU + fc2 + log_softmax (128 lane-dense logits) ------------
    flat = p2.reshape(tb, 7 * 256).astype(jnp.bfloat16)  # NHWC flatten, dead lanes 0
    h = jnp.dot(flat, fw1_ref[...], preferred_element_type=jnp.float32) + fb1_ref[...]
    h = jnp.maximum(h, 0.0).astype(jnp.bfloat16)
    logits = jnp.dot(h, fw2_ref[...], preferred_element_type=jnp.float32) + fb2_ref[...]
    # padded logit lanes carry a -1e30 bias, so exp() kills them in the softmax
    z = logits - jnp.max(logits, axis=-1, keepdims=True)
    o_ref[...] = z - jnp.log(jnp.sum(jnp.exp(z), axis=-1, keepdims=True))


# ------------------- one-time host-side weight packing ----------------------

def pack_params(params):
    """Repack PyTorch-layout weights into the lane-dense, K-concatenated
    block-banded matrices the kernel consumes. Runs ONCE (NumPy, host)."""
    # conv1 (16,1,3,3) -> (3*128, 512); tap dy occupies K rows [dy*128, dy*128+28).
    # Output lanes: even w_out at (w_out//2)*16+co, odd at 256+(w_out//2)*16+co.
    w = np.transpose(np.asarray(params["conv1_w"], np.float32)[:, 0], (1, 2, 0))  # (dy,dx,co)
    w1 = np.zeros((3, 128, 512), np.float32)
    for w_out in range(28):
        col0 = (w_out % 2) * 256 + (w_out // 2) * 16
        for dx in range(3):
            w_in = w_out + dx - 1
            if 0 <= w_in < 28:
                w1[:, w_in, col0:col0 + 16] = w[:, dx, :]
    b = np.asarray(params["conv1_b"], np.float32)
    b1 = np.zeros((1, 512), np.float32)
    b1[0, 0:224] = np.tile(b, 14)
    b1[0, 256:480] = np.tile(b, 14)

    # conv2 (32,16,3,3) -> (3*256, 512); input lanes w_in*16+ci.
    # Output lanes: even w_out at (w_out//2)*32+co, odd at 256+(w_out//2)*32+co.
    w = np.transpose(np.asarray(params["conv2_w"], np.float32), (2, 3, 1, 0))  # (dy,dx,ci,co)
    w2 = np.zeros((3, 256, 512), np.float32)
    for w_out in range(14):
        col0 = (w_out % 2) * 256 + (w_out // 2) * 32
        for dx in range(3):
            w_in = w_out + dx - 1
            if 0 <= w_in < 14:
                w2[:, w_in * 16:(w_in + 1) * 16, col0:col0 + 32] = w[:, dx]
    b = np.asarray(params["conv2_b"], np.float32)
    b2 = np.zeros((1, 512), np.float32)
    b2[0, 0:224] = np.tile(b, 7)
    b2[0, 256:480] = np.tile(b, 7)

    # fc1 (128, 1568) expecting NCHW flatten -> (7*256, 128) consuming the
    # kernel's lane-padded NHWC flatten (7 row blocks x 256 lanes, last 32 dead).
    fw1 = np.asarray(params["fc1_w"], np.float32).reshape(128, 32, 7, 7)
    fw1 = np.transpose(fw1, (2, 3, 1, 0)).reshape(7, 224, 128)     # (h, (w,c), j)
    fw1p = np.zeros((7, 256, 128), np.float32)
    fw1p[:, 0:224, :] = fw1
    fb1 = np.asarray(params["fc1_b"], np.float32)[None, :]

    # fc2 (10, 128) -> (128, 128) lane-dense; padded logits get a -1e30 bias.
    fw2p = np.zeros((128, 128), np.float32)
    fw2p[:, 0:10] = np.asarray(params["fc2_w"], np.float32).T
    fb2 = np.full((1, 128), -1e30, np.float32)
    fb2[0, 0:10] = np.asarray(params["fc2_b"], np.float32)

    bf = jnp.bfloat16
    return {
        "w1": jnp.asarray(w1.reshape(384, 512), bf),  "b1": jnp.asarray(b1),
        "w2": jnp.asarray(w2.reshape(768, 512), bf),  "b2": jnp.asarray(b2),
        "fw1": jnp.asarray(fw1p.reshape(1792, 128), bf), "fb1": jnp.asarray(fb1),
        "fw2": jnp.asarray(fw2p, bf),                 "fb2": jnp.asarray(fb2),
    }


# ------------------------------- forward -------------------------------------

@jax.jit
def emnist_cnn_forward(x_nchw, packed):
    B = x_nchw.shape[0]
    tile_b = _pick_tile_b(B)
    bp = _round_up(B, tile_b)

    # (B,1,28,28) -> (bp,30,128): pad batch to tile, H halo of 1, W -> 128 lanes
    x = x_nchw[:, 0].astype(jnp.float32)
    x = jnp.pad(x, ((0, bp - B), (1, 1), (0, 100)))

    flops = 2 * bp * (28 * 384 * 512 + 14 * 768 * 512 + 1792 * 128 + 128 * 128)
    w_bytes = sum(int(np.prod(v.shape)) * v.dtype.itemsize for v in packed.values())
    cost = pl.CostEstimate(
        flops=int(flops), transcendentals=int(129 * bp),
        bytes_accessed=int(bp * 30 * 128 * 4 + w_bytes + bp * 128 * 4))

    def full(s):
        return pl.BlockSpec(s, lambda i: (0,) * len(s))

    out = pl.pallas_call(
        fused_cnn_kernel,
        grid=(bp // tile_b,),
        in_specs=[
            pl.BlockSpec((tile_b, 30, 128), lambda i: (i, 0, 0)),  # images
            full((384, 512)), full((1, 512)),                      # conv1
            full((768, 512)), full((1, 512)),                      # conv2
            full((1792, 128)), full((1, 128)),                     # fc1
            full((128, 128)), full((1, 128)),                      # fc2
        ],
        out_specs=pl.BlockSpec((tile_b, 128), lambda i: (i, 0)),
        out_shape=jax.ShapeDtypeStruct((bp, 128), jnp.float32),
        scratch_shapes=[pltpu.VMEM((tile_b, 16, 256), jnp.float32)],
        compiler_params=pltpu.CompilerParams(
            dimension_semantics=("parallel",),
            vmem_limit_bytes=48 * 1024 * 1024),   # 48 MiB: safe on v7x, roomy on v5e/v6e
        cost_estimate=cost,
    )(x, packed["w1"], packed["b1"], packed["w2"], packed["b2"],
      packed["fw1"], packed["fb1"], packed["fw2"], packed["fb2"])
    return out[:B, :10]


# -------------------------- pure-JAX reference ------------------------------

def ref_forward(x, params):
    def conv(z, w, b):
        y = lax.conv_general_dilated(z, w, (1, 1), "SAME",
                                     dimension_numbers=("NCHW", "OIHW", "NCHW"),
                                     precision=lax.Precision.HIGHEST)
        return jnp.maximum(y + b[None, :, None, None], 0.0)

    def pool(z):
        return lax.reduce_window(z, -jnp.inf, lax.max,
                                 (1, 1, 2, 2), (1, 1, 2, 2), "VALID")

    y = pool(conv(x, params["conv1_w"], params["conv1_b"]))
    y = pool(conv(y, params["conv2_w"], params["conv2_b"]))
    flat = y.reshape(y.shape[0], -1)
    h = jnp.maximum(flat @ params["fc1_w"].T + params["fc1_b"], 0.0)
    logits = h @ params["fc2_w"].T + params["fc2_b"]
    return jax.nn.log_softmax(logits, axis=1)


# ------------------------------- params -------------------------------------

def init_params(key):
    ks = jax.random.split(key, 8)

    def u(k, shape, fan_in):
        bound = 1.0 / np.sqrt(fan_in)
        return jax.random.uniform(k, shape, jnp.float32, -bound, bound)

    return {
        "conv1_w": u(ks[0], (16, 1, 3, 3), 1 * 9),
        "conv1_b": u(ks[1], (16,), 1 * 9),
        "conv2_w": u(ks[2], (32, 16, 3, 3), 16 * 9),
        "conv2_b": u(ks[3], (32,), 16 * 9),
        "fc1_w": u(ks[4], (128, 7 * 7 * 32), 7 * 7 * 32),
        "fc1_b": u(ks[5], (128,), 7 * 7 * 32),
        "fc2_w": u(ks[6], (10, 128), 128),
        "fc2_b": u(ks[7], (10,), 128),
    }


if __name__ == "__main__":
    key = jax.random.PRNGKey(0)
    pkey, xkey = jax.random.split(key)
    params = init_params(pkey)
    # fc1 expects 7*7*32 features, which pins the input to (B, 1, 28, 28).
    x = jax.random.normal(xkey, (2, 1, 28, 28), jnp.float32)

    packed = pack_params(params)              # one-time host-side weight packing
    out = jax.block_until_ready(emnist_cnn_forward(x, packed))
    ref = jax.block_until_ready(ref_forward(x, params))
    # bf16 matmul operands (per perf review) -> slightly looser parity tolerance
    np.testing.assert_allclose(np.asarray(out), np.asarray(ref),
                               rtol=2e-2, atol=2e-2)
    assert out.shape == (2, 10)
    print("KERNEL_OK")
</pallas_src>

<mosaic_0001>
module attributes {stable_mosaic.version = 11 : i64} {
  func.func @fused_cnn_kernel(%arg0: i32, %arg1: memref<8x30x128xf32, #tpu.memory_space<vmem>>, %arg2: memref<384x512xbf16, #tpu.memory_space<vmem>>, %arg3: memref<1x512xf32, #tpu.memory_space<vmem>>, %arg4: memref<768x512xbf16, #tpu.memory_space<vmem>>, %arg5: memref<1x512xf32, #tpu.memory_space<vmem>>, %arg6: memref<1792x128xbf16, #tpu.memory_space<vmem>>, %arg7: memref<1x128xf32, #tpu.memory_space<vmem>>, %arg8: memref<128x128xbf16, #tpu.memory_space<vmem>>, %arg9: memref<1x128xf32, #tpu.memory_space<vmem>>, %arg10: memref<8x128xf32, #tpu.memory_space<vmem>>, %arg11: memref<8x16x256xf32, #tpu.memory_space<vmem>>) attributes {dimension_semantics = [#tpu.dimension_semantics<parallel>], iteration_bounds = array<i64: 1>, scalar_prefetch = 0 : i64, scratch_operands = 1 : i64, tpu.core_type = #tpu.core_type<tc>, window_params = [{transform_indices = @transform_0, window_bounds = array<i64: 8, 30, 128>}, {pipeline_mode = #tpu.pipeline_mode<synchronous>, transform_indices = @transform_1, window_bounds = array<i64: 384, 512>}, {pipeline_mode = #tpu.pipeline_mode<synchronous>, transform_indices = @transform_2, window_bounds = array<i64: 1, 512>}, {pipeline_mode = #tpu.pipeline_mode<synchronous>, transform_indices = @transform_3, window_bounds = array<i64: 768, 512>}, {pipeline_mode = #tpu.pipeline_mode<synchronous>, transform_indices = @transform_4, window_bounds = array<i64: 1, 512>}, {pipeline_mode = #tpu.pipeline_mode<synchronous>, transform_indices = @transform_5, window_bounds = array<i64: 1792, 128>}, {pipeline_mode = #tpu.pipeline_mode<synchronous>, transform_indices = @transform_6, window_bounds = array<i64: 1, 128>}, {pipeline_mode = #tpu.pipeline_mode<synchronous>, transform_indices = @transform_7, window_bounds = array<i64: 128, 128>}, {pipeline_mode = #tpu.pipeline_mode<synchronous>, transform_indices = @transform_8, window_bounds = array<i64: 1, 128>}, {transform_indices = @transform_9, window_bounds = array<i64: 8, 128>}]} {
    %c0 = arith.constant 0 : index
    %c0_0 = arith.constant 0 : index
    %c0_1 = arith.constant 0 : index
    %0 = vector.load %arg1[%c0, %c0_0, %c0_1] : memref<8x30x128xf32, #tpu.memory_space<vmem>>, vector<8x28x128xf32>
    %c0_2 = arith.constant 0 : index
    %c1 = arith.constant 1 : index
    %c0_3 = arith.constant 0 : index
    %1 = vector.load %arg1[%c0_2, %c1, %c0_3] : memref<8x30x128xf32, #tpu.memory_space<vmem>>, vector<8x28x128xf32>
    %c0_4 = arith.constant 0 : index
    %c2 = arith.constant 2 : index
    %c0_5 = arith.constant 0 : index
    %2 = vector.load %arg1[%c0_4, %c2, %c0_5] : memref<8x30x128xf32, #tpu.memory_space<vmem>>, vector<8x28x128xf32>
    %3 = tpu.concatenate %0, %1, %2 in 2 : vector<8x28x128xf32>, vector<8x28x128xf32>, vector<8x28x128xf32> -> vector<8x28x384xf32>
    %4 = vector.shape_cast %3 : vector<8x28x384xf32> to vector<224x384xf32>
    %5 = arith.truncf %4 : vector<224x384xf32> to vector<224x384xbf16>
    %c0_6 = arith.constant 0 : index
    %c0_7 = arith.constant 0 : index
    %6 = vector.load %arg2[%c0_6, %c0_7] : memref<384x512xbf16, #tpu.memory_space<vmem>>, vector<384x512xbf16>
    %cst = arith.constant dense<0.000000e+00> : vector<224x512xf32>
    %7 = tpu.matmul %5, %6, %cst {dimension_numbers = #tpu.dot_dimension_numbers<[1], [0], [0], [1], [0, 0, 1, 1], [], []>} : vector<224x384xbf16>, vector<384x512xbf16>, vector<224x512xf32> -> vector<224x512xf32>
    %c0_8 = arith.constant 0 : index
    %c0_9 = arith.constant 0 : index
    %8 = vector.load %arg3[%c0_8, %c0_9] : memref<1x512xf32, #tpu.memory_space<vmem>>, vector<1x512xf32>
    %9 = vector.broadcast %8 : vector<1x512xf32> to vector<224x512xf32>
    %10 = arith.addf %7, %9 : vector<224x512xf32>
    %cst_10 = arith.constant 0.000000e+00 : f32
    %11 = vector.broadcast %cst_10 : f32 to vector<224x512xf32>
    %12 = arith.maximumf %10, %11 : vector<224x512xf32>
    %13 = vector.extract_strided_slice %12 {offsets = [0, 0], sizes = [224, 256], strides = [1, 1]} : vector<224x512xf32> to vector<224x256xf32>
    %14 = vector.extract_strided_slice %12 {offsets = [0, 256], sizes = [224, 256], strides = [1, 1]} : vector<224x512xf32> to vector<224x256xf32>
    %15 = arith.maximumf %13, %14 : vector<224x256xf32>
    %16 = vector.shape_cast %15 : vector<224x256xf32> to vector<112x512xf32>
    %17 = vector.extract_strided_slice %16 {offsets = [0, 0], sizes = [112, 256], strides = [1, 1]} : vector<112x512xf32> to vector<112x256xf32>
    %18 = vector.extract_strided_slice %16 {offsets = [0, 256], sizes = [112, 256], strides = [1, 1]} : vector<112x512xf32> to vector<112x256xf32>
    %19 = arith.maximumf %17, %18 : vector<112x256xf32>
    %cst_11 = arith.constant 0.000000e+00 : f32
    %20 = vector.broadcast %cst_11 : f32 to vector<8x1x256xf32>
    %c0_12 = arith.constant 0 : index
    %c0_13 = arith.constant 0 : index
    %c0_14 = arith.constant 0 : index
    %21 = vector.load %arg11[%c0_12, %c0_13, %c0_14] : memref<8x16x256xf32, #tpu.memory_space<vmem>>, vector<8x1x256xf32>
    tpu.vector_store %arg11[%c0_12, %c0_13, %c0_14], %20 {strides = array<i32>} : memref<8x16x256xf32, #tpu.memory_space<vmem>>, vector<8x1x256xf32>,
    %c0_15 = arith.constant 0 : index
    %c15 = arith.constant 15 : index
    %c0_16 = arith.constant 0 : index
    %22 = vector.load %arg11[%c0_15, %c15, %c0_16] : memref<8x16x256xf32, #tpu.memory_space<vmem>>, vector<8x1x256xf32>
    tpu.vector_store %arg11[%c0_15, %c15, %c0_16], %20 {strides = array<i32>} : memref<8x16x256xf32, #tpu.memory_space<vmem>>, vector<8x1x256xf32>,
    %23 = vector.shape_cast %19 : vector<112x256xf32> to vector<8x14x256xf32>
    %c0_17 = arith.constant 0 : index
    %c1_18 = arith.constant 1 : index
    %c0_19 = arith.constant 0 : index
    %24 = vector.load %arg11[%c0_17, %c1_18, %c0_19] : memref<8x16x256xf32, #tpu.memory_space<vmem>>, vector<8x14x256xf32>
    tpu.vector_store %arg11[%c0_17, %c1_18, %c0_19], %23 {strides = array<i32>} : memref<8x16x256xf32, #tpu.memory_space<vmem>>, vector<8x14x256xf32>,
    %c0_20 = arith.constant 0 : index
    %c0_21 = arith.constant 0 : index
    %c0_22 = arith.constant 0 : index
    %25 = vector.load %arg11[%c0_20, %c0_21, %c0_22] : memref<8x16x256xf32, #tpu.memory_space<vmem>>, vector<8x14x256xf32>
    %c0_23 = arith.constant 0 : index
    %c1_24 = arith.constant 1 : index
    %c0_25 = arith.constant 0 : index
    %26 = vector.load %arg11[%c0_23, %c1_24, %c0_25] : memref<8x16x256xf32, #tpu.memory_space<vmem>>, vector<8x14x256xf32>
    %c0_26 = arith.constant 0 : index
    %c2_27 = arith.constant 2 : index
    %c0_28 = arith.constant 0 : index
    %27 = vector.load %arg11[%c0_26, %c2_27, %c0_28] : memref<8x16x256xf32, #tpu.memory_space<vmem>>, vector<8x14x256xf32>
    %28 = tpu.concatenate %25, %26, %27 in 2 : vector<8x14x256xf32>, vector<8x14x256xf32>, vector<8x14x256xf32> -> vector<8x14x768xf32>
    %29 = vector.shape_cast %28 : vector<8x14x768xf32> to vector<112x768xf32>
    %30 = arith.truncf %29 : vector<112x768xf32> to vector<112x768xbf16>
    %c0_29 = arith.constant 0 : index
    %c0_30 = arith.constant 0 : index
    %31 = vector.load %arg4[%c0_29, %c0_30] : memref<768x512xbf16, #tpu.memory_space<vmem>>, vector<768x512xbf16>
    %cst_31 = arith.constant dense<0.000000e+00> : vector<112x512xf32>
    %32 = tpu.matmul %30, %31, %cst_31 {dimension_numbers = #tpu.dot_dimension_numbers<[1], [0], [0], [1], [0, 0, 1, 1], [], []>} : vector<112x768xbf16>, vector<768x512xbf16>, vector<112x512xf32> -> vector<112x512xf32>
    %c0_32 = arith.constant 0 : index
    %c0_33 = arith.constant 0 : index
    %33 = vector.load %arg5[%c0_32, %c0_33] : memref<1x512xf32, #tpu.memory_space<vmem>>, vector<1x512xf32>
    %34 = vector.broadcast %33 : vector<1x512xf32> to vector<112x512xf32>
    %35 = arith.addf %32, %34 : vector<112x512xf32>
    %cst_34 = arith.constant 0.000000e+00 : f32
    %36 = vector.broadcast %cst_34 : f32 to vector<112x512xf32>
    %37 = arith.maximumf %35, %36 : vector<112x512xf32>
    %38 = vector.extract_strided_slice %37 {offsets = [0, 0], sizes = [112, 256], strides = [1, 1]} : vector<112x512xf32> to vector<112x256xf32>
    %39 = vector.extract_strided_slice %37 {offsets = [0, 256], sizes = [112, 256], strides = [1, 1]} : vector<112x512xf32> to vector<112x256xf32>
    %40 = arith.maximumf %38, %39 : vector<112x256xf32>
    %41 = vector.shape_cast %40 : vector<112x256xf32> to vector<56x512xf32>
    %42 = vector.extract_strided_slice %41 {offsets = [0, 0], sizes = [56, 256], strides = [1, 1]} : vector<56x512xf32> to vector<56x256xf32>
    %43 = vector.extract_strided_slice %41 {offsets = [0, 256], sizes = [56, 256], strides = [1, 1]} : vector<56x512xf32> to vector<56x256xf32>
    %44 = arith.maximumf %42, %43 : vector<56x256xf32>
    %45 = vector.shape_cast %44 : vector<56x256xf32> to vector<8x1792xf32>
    %46 = arith.truncf %45 : vector<8x1792xf32> to vector<8x1792xbf16>
    %c0_35 = arith.constant 0 : index
    %c0_36 = arith.constant 0 : index
    %47 = vector.load %arg6[%c0_35, %c0_36] : memref<1792x128xbf16, #tpu.memory_space<vmem>>, vector<1792x128xbf16>
    %cst_37 = arith.constant dense<0.000000e+00> : vector<8x128xf32>
    %48 = tpu.matmul %46, %47, %cst_37 {dimension_numbers = #tpu.dot_dimension_numbers<[1], [0], [0], [1], [0, 0, 1, 1], [], []>} : vector<8x1792xbf16>, vector<1792x128xbf16>, vector<8x128xf32> -> vector<8x128xf32>
    %c0_38 = arith.constant 0 : index
    %c0_39 = arith.constant 0 : index
    %49 = vector.load %arg7[%c0_38, %c0_39] : memref<1x128xf32, #tpu.memory_space<vmem>>, vector<1x128xf32>
    %50 = vector.broadcast %49 : vector<1x128xf32> to vector<8x128xf32>
    %51 = arith.addf %48, %50 : vector<8x128xf32>
    %cst_40 = arith.constant 0.000000e+00 : f32
    %52 = vector.broadcast %cst_40 : f32 to vector<8x128xf32>
    %53 = arith.maximumf %51, %52 : vector<8x128xf32>
    %54 = arith.truncf %53 : vector<8x128xf32> to vector<8x128xbf16>
    %c0_41 = arith.constant 0 : index
    %c0_42 = arith.constant 0 : index
    %55 = vector.load %arg8[%c0_41, %c0_42] : memref<128x128xbf16, #tpu.memory_space<vmem>>, vector<128x128xbf16>
    %cst_43 = arith.constant dense<0.000000e+00> : vector<8x128xf32>
    %56 = tpu.matmul %54, %55, %cst_43 {dimension_numbers = #tpu.dot_dimension_numbers<[1], [0], [0], [1], [0, 0, 1, 1], [], []>} : vector<8x128xbf16>, vector<128x128xbf16>, vector<8x128xf32> -> vector<8x128xf32>
    %c0_44 = arith.constant 0 : index
    %c0_45 = arith.constant 0 : index
    %57 = vector.load %arg9[%c0_44, %c0_45] : memref<1x128xf32, #tpu.memory_space<vmem>>, vector<1x128xf32>
    %58 = vector.broadcast %57 : vector<1x128xf32> to vector<8x128xf32>
    %59 = arith.addf %56, %58 : vector<8x128xf32>
    %cst_46 = arith.constant dense<0xFF800000> : vector<8xf32>
    %60 = vector.multi_reduction <maximumf>, %59, %cst_46 [1] : vector<8x128xf32> to vector<8xf32>
    %61 = vector.shape_cast %60 : vector<8xf32> to vector<8x1xf32>
    %62 = vector.broadcast %61 : vector<8x1xf32> to vector<8x128xf32>
    %63 = arith.subf %59, %62 : vector<8x128xf32>
    %64 = math.exp %63 : vector<8x128xf32>
    %cst_47 = arith.constant dense<0.000000e+00> : vector<8xf32>
    %65 = vector.multi_reduction <add>, %64, %cst_47 [1] : vector<8x128xf32> to vector<8xf32>
    %66 = vector.shape_cast %65 : vector<8xf32> to vector<8x1xf32>
    %67 = math.log %66 : vector<8x1xf32>
    %68 = vector.broadcast %67 : vector<8x1xf32> to vector<8x128xf32>
    %69 = arith.subf %63, %68 : vector<8x128xf32>
    %c0_48 = arith.constant 0 : index
    %c0_49 = arith.constant 0 : index
    %70 = vector.load %arg10[%c0_48, %c0_49] : memref<8x128xf32, #tpu.memory_space<vmem>>, vector<8x128xf32>
    tpu.vector_store %arg10[%c0_48, %c0_49], %69 {strides = array<i32>} : memref<8x128xf32, #tpu.memory_space<vmem>>, vector<8x128xf32>,
    return
  }
  func.func @transform_0(%arg0: i32) -> (i32, i32, i32) {
    %c0_i32 = arith.constant 0 : i32
    %c0_i32_0 = arith.constant 0 : i32
    %c0_i32_1 = arith.constant 0 : i32
    return %arg0, %c0_i32, %c0_i32_0 : i32, i32, i32
  }
  func.func @transform_1(%arg0: i32) -> (i32, i32) {
    %c0_i32 = arith.constant 0 : i32
    %c0_i32_0 = arith.constant 0 : i32
    %c0_i32_1 = arith.constant 0 : i32
    return %c0_i32, %c0_i32_0 : i32, i32
  }
  func.func @transform_2(%arg0: i32) -> (i32, i32) {
    %c0_i32 = arith.constant 0 : i32
    %c0_i32_0 = arith.constant 0 : i32
    %c0_i32_1 = arith.constant 0 : i32
    return %c0_i32, %c0_i32_0 : i32, i32
  }
  func.func @transform_3(%arg0: i32) -> (i32, i32) {
    %c0_i32 = arith.constant 0 : i32
    %c0_i32_0 = arith.constant 0 : i32
    %c0_i32_1 = arith.constant 0 : i32
    return %c0_i32, %c0_i32_0 : i32, i32
  }
  func.func @transform_4(%arg0: i32) -> (i32, i32) {
    %c0_i32 = arith.constant 0 : i32
    %c0_i32_0 = arith.constant 0 : i32
    %c0_i32_1 = arith.constant 0 : i32
    return %c0_i32, %c0_i32_0 : i32, i32
  }
  func.func @transform_5(%arg0: i32) -> (i32, i32) {
    %c0_i32 = arith.constant 0 : i32
    %c0_i32_0 = arith.constant 0 : i32
    %c0_i32_1 = arith.constant 0 : i32
    return %c0_i32, %c0_i32_0 : i32, i32
  }
  func.func @transform_6(%arg0: i32) -> (i32, i32) {
    %c0_i32 = arith.constant 0 : i32
    %c0_i32_0 = arith.constant 0 : i32
    %c0_i32_1 = arith.constant 0 : i32
    return %c0_i32, %c0_i32_0 : i32, i32
  }
  func.func @transform_7(%arg0: i32) -> (i32, i32) {
    %c0_i32 = arith.constant 0 : i32
    %c0_i32_0 = arith.constant 0 : i32
    %c0_i32_1 = arith.constant 0 : i32
    return %c0_i32, %c0_i32_0 : i32, i32
  }
  func.func @transform_8(%arg0: i32) -> (i32, i32) {
    %c0_i32 = arith.constant 0 : i32
    %c0_i32_0 = arith.constant 0 : i32
    %c0_i32_1 = arith.constant 0 : i32
    return %c0_i32, %c0_i32_0 : i32, i32
  }
  func.func @transform_9(%arg0: i32) -> (i32, i32) {
    %c0_i32 = arith.constant 0 : i32
    %c0_i32_0 = arith.constant 0 : i32
    return %arg0, %c0_i32 : i32, i32
  }
}

</mosaic_0001>

<bundles_post_ra>
// kernel: emnist_cnn_forward.1
= control target key start
LH: loop header
LB: loop body
LE: loop exit
PB: predicated region body
PF: predicated region fallthrough
CT: control target
= control target key end

     0   :  { %14 = vsyncpa [#allocation4], 0  ;;  %s13760_s0 = inlined_call_operand.vmem [shape: f32[8,30,128], index: 0, kind: input, shape index: {}]   ;;  %s13761_s1 = inlined_call_operand.hbm [shape: bf16[384,512], index: 1, kind: input, shape index: {}]   ;;  %s13762_s2 = inlined_call_operand.vmem [shape: f32[1,512], index: 2, kind: input, shape index: {}]   ;;  %s13763_s3 = inlined_call_operand.hbm [shape: bf16[768,512], index: 3, kind: input, shape index: {}]   ;;  %s13764_s4 = inlined_call_operand.vmem [shape: f32[1,512], index: 4, kind: input, shape index: {}]   ;;  %s13765_s5 = inlined_call_operand.hbm [shape: bf16[1792,128], index: 5, kind: input, shape index: {}]   ;;  %s13766_s6 = inlined_call_operand.vmem [shape: f32[1,128], index: 6, kind: input, shape index: {}]   ;;  %s13767_s7 = inlined_call_operand.vmem [shape: bf16[128,128], index: 7, kind: input, shape index: {}]   ;;  %s13768_s8 = inlined_call_operand.vmem [shape: f32[1,128], index: 8, kind: input, shape index: {}]   ;;  %s13769_s9 = inlined_call_operand.vmem [shape: f32[8,128], index: 9, kind: output, shape index: {}]  }
   0x1   :  { %15 = vsyncpa [#allocation6], 0  ;;  %s10657_s30 = smov [#allocation5]   ;;  %s10658_s11 = smov [#allocation3]  }
   0x2   :  { %s37_s10 = sshll.u32 %s10657_s30, 4  ;;  %s23_s12 = sshll.u32 %s10658_s11, 4  ;;  %s38_s10 = int_to_ptr.vmem [resolvable:$true] %s37_s10  ;;  %s24_s12 = int_to_ptr.vmem [resolvable:$true] %s23_s12 }
   0x3   :  { %s10601_s13 = scalar_lea.vmem %s38_s10, 24576  ;;  %p10606_p1 = scmp.lt.s32.totalorder %s38_s10, %s38_s10 }
   0x4   :  { %p10602_p0 = scmp.ne.s32.totalorder %s38_s10, %s10601_s13  ;;  %p10607_p2 = scmp.lt.s32.totalorder %s10601_s13, %s10601_s13 }
   0x6   :  { %p10608_p3 = por %p10607_p2, %p10606_p1 }
   0x8   :  { %p10609_p4 = pnand %p10608_p3, %p10602_p0 }
   0xa   :  { %10612 = shalt.err (!%p10609_p4)
}
   0xb   :  { %s10659_s14 = smov 256   ;;  %s10660_s15 = smov 16  }
   0xc   :  { %43 = dma.hbm_to_vmem [thread:$0]  %s13763_s3, 24576, %s38_s10, [#allocation6], %s10659_s14, %s10659_s14, %s10660_s15  }
   0xd   :  { %s10621_s18 = scalar_lea.vmem %s24_s12, 12288  ;;  %p10626_p6 = scmp.lt.s32.totalorder %s24_s12, %s24_s12 }
   0xe   :  { %p10622_p5 = scmp.ne.s32.totalorder %s24_s12, %s10621_s18  ;;  %p10627_p7 = scmp.lt.s32.totalorder %s10621_s18, %s10621_s18 }
  0x10   :  { %p10628_p8 = por %p10627_p7, %p10626_p6 }
  0x12   :  { %p10629_p9 = pnand %p10628_p8, %p10622_p5 }
  0x14   :  { %10632 = shalt.err (!%p10629_p9)
}
  0x15   :  { %29 = dma.hbm_to_vmem [thread:$0]  %s13761_s1, 12288, %s24_s12, [#allocation4], %s10659_s14, %s10659_s14, %s10660_s15  }
  0x16   :  { %s10661_s21 = smov [#allocation7]  }
  0x17   :  { %s51_s22 = sshll.u32 %s10661_s21, 4  ;;  %s52_s22 = int_to_ptr.vmem [resolvable:$true] %s51_s22 }
  0x18   :  { %s10641_s23 = scalar_lea.vmem %s52_s22, 14336  ;;  %p10646_p11 = scmp.lt.s32.totalorder %s52_s22, %s52_s22 }
  0x19   :  { %p10642_p10 = scmp.ne.s32.totalorder %s52_s22, %s10641_s23  ;;  %p10647_p12 = scmp.lt.s32.totalorder %s10641_s23, %s10641_s23 }
  0x1b   :  { %p10648_p13 = por %p10647_p12, %p10646_p11 }
  0x1d   :  { %p10649_p0 = pnand %p10648_p13, %p10642_p10 }
  0x1f   :  { %10652 = shalt.err (!%p10649_p0)
}
  0x20   :  { %s10662_s3 = smov 64   ;;  %s10663_s24 = smov 4  }
  0x21   :  { %57 = dma.hbm_to_vmem [thread:$0]  %s13765_s5, 14336, %s52_s22, [#allocation6], %s10662_s3, %s10662_s3, %s10663_s24  }
  0x22   :  { %10653 = dma.done.wait [#allocation4], 12288  }
  0x23   :  { %10654 = vsyncadd [#allocation4], 4294955008 }
  0x24   :  { %10655 = dma.done.wait [#allocation6], 38912  }
  0x25   :  { %10656 = vsyncadd [#allocation6], 4294928384  ;;  %v10664_v0 = vmov 0   ;;  %v9953_v1 = vld [vmem:[#allocation3 + $0xe4] ss:$16 sps:$4 sm:$0xff]   ;;  %v139_v33 = vld [vmem:[%s13760_s0 + $0xa] sm:$0xff] }
  0x26   :  { %1359 = vmatprep.mubr.bf16.mxu1 %v10664_v0  ;;  %v9955_v2 = vld [vmem:[#allocation3 + $0xe0] ss:$16 sps:$4 sm:$0xff]   ;;  %1154 = vmatprep.subr.bf16.mxu0 %v9953_v1  ;;  %v9956_v3 = vld [vmem:[#allocation3 + $0xc4] ss:$16 sps:$4 sm:$0xff]   ;;  %v271_v36 = vcombine.high %v139_v33, %v139_v33  ;;  %v10029_v48 = vld [vmem:[#allocation3 + $0xec] ss:$16 sps:$4 sm:$0xff]  }
  0x27   :  { %1155 = vmatpush1.bf16.msra.mxu0 %v9955_v2  ;;  %v9958_v4 = vld [vmem:[#allocation3 + $0xc0] ss:$16 sps:$4 sm:$0xff]   ;;  %v9959_v5 = vld [vmem:[#allocation3 + $0xa4] ss:$16 sps:$4 sm:$0xff]   ;;  %v10027_v52 = vld [vmem:[#allocation3 + $0xe8] ss:$16 sps:$4 sm:$0xff]  }
  0x28   :  { %1156 = vmatprep.subr.bf16.mxu0 %v9956_v3  ;;  %v9961_v6 = vld [vmem:[#allocation3 + $0xa0] ss:$16 sps:$4 sm:$0xff]   ;;  %v9962_v7 = vld [vmem:[#allocation3 + $0x84] ss:$16 sps:$4 sm:$0xff]   ;;  %v351_v45 = vcombine.low %v139_v33, %v271_v36  ;;  %v141_v54 = vld [vmem:[%s13760_s0 + $0x1a] sm:$0xf] }
  0x29   :  { %v9974_v8 = vld [vmem:[#allocation3 + $0x2e4] ss:$16 sps:$4 sm:$0xff]   ;;  %v9976_v9 = vld [vmem:[#allocation3 + $0x2e0] ss:$16 sps:$4 sm:$0xff]   ;;  %v10037_v56 = vld [vmem:[#allocation3 + $0xcc] ss:$16 sps:$4 sm:$0xff]  }
  0x2a   :  { %v9964_v10 = vld [vmem:[#allocation3 + $0x80] ss:$16 sps:$4 sm:$0xff]   ;;  %v9965_v11 = vld [vmem:[#allocation3 + $0x64] ss:$16 sps:$4 sm:$0xff]   ;;  %1327 = vmatprep.subr.bf16.mxu1 %v9974_v8  ;;  %v10035_v61 = vld [vmem:[#allocation3 + $0xc8] ss:$16 sps:$4 sm:$0xff]  }
  0x2b   :  { %1157 = vmatpush1.bf16.msra.mxu0 %v9958_v4  ;;  %v9980_v12 = vld [vmem:[#allocation3 + $0x2c4] ss:$16 sps:$4 sm:$0xff]   ;;  %1328 = vmatpush1.bf16.msra.mxu1 %v9976_v9  ;;  %v9982_v13 = vld [vmem:[#allocation3 + $0x2c0] ss:$16 sps:$4 sm:$0xff]   ;;  %v10044_v63 = vld [vmem:[#allocation3 + $0xac] ss:$16 sps:$4 sm:$0xff]  }
  0x2c   :  { %1158 = vmatprep.subr.bf16.mxu0 %v9959_v5  ;;  %1329 = vmatprep.subr.bf16.mxu1 %v9980_v12  ;;  %v9967_v14 = vld [vmem:[#allocation3 + $0x60] ss:$16 sps:$4 sm:$0xff]   ;;  %v9986_v15 = vld [vmem:[#allocation3 + $0x2a4] ss:$16 sps:$4 sm:$0xff]   ;;  %v10052_v8 = vld [vmem:[#allocation3 + $0x8c] ss:$16 sps:$4 sm:$0xff]  }
  0x2d   :  { %v9968_v16 = vld [vmem:[#allocation3 + $0x44] ss:$16 sps:$4 sm:$0xff]   ;;  %v9988_v17 = vld [vmem:[#allocation3 + $0x2a0] ss:$16 sps:$4 sm:$0xff]   ;;  %vm3185_vm1 = vcmask 1040384   ;;  %vm3426_vm2 = vcmask 1046528  }
  0x2e   :  { %v9992_v18 = vld [vmem:[#allocation3 + $0x284] ss:$16 sps:$4 sm:$0xff]   ;;  %v9970_v19 = vld [vmem:[#allocation3 + $0x40] ss:$16 sps:$4 sm:$0xff]   ;;  %vm3507_vm3 = vcmask 1045504   ;;  %vm7756_vm4 = vcmask 1041409  }
  0x2f   :  { %1159 = vmatpush1.bf16.msra.mxu0 %v9961_v6  ;;  %1330 = vmatpush1.bf16.msra.mxu1 %v9982_v13  ;;  %v9971_v20 = vld [vmem:[#allocation3 + $0x24] ss:$16 sps:$4 sm:$0xff]   ;;  %v9994_v21 = vld [vmem:[#allocation3 + $0x280] ss:$16 sps:$4 sm:$0xff]   ;;  %vm7759_vm5 = vcmask 1042434   ;;  %vm7762_vm6 = vcmask 1043459  }
  0x30   :  { %1160 = vmatprep.subr.bf16.mxu0 %v9962_v7  ;;  %1331 = vmatprep.subr.bf16.mxu1 %v9986_v15  ;;  %v9998_v22 = vld [vmem:[#allocation3 + $0x264] ss:$16 sps:$4 sm:$0xff]   ;;  %v9973_v23 = vld [vmem:[#allocation3 + $0x20] ss:$16 sps:$4 sm:$0xff]   ;;  %v10042_v7 = vld [vmem:[#allocation3 + $0xa8] ss:$16 sps:$4 sm:$0xff]  }
  0x31   :  { %v9977_v24 = vld [vmem:[#allocation3 + $0x4] ss:$16 sps:$4 sm:$0xff]   ;;  %v10000_v25 = vld [vmem:[#allocation3 + $0x260] ss:$16 sps:$4 sm:$0xff]   ;;  %v10057_v15 = vld [vmem:[#allocation3 + $0x6c] ss:$16 sps:$4 sm:$0xff]  }
  0x32   :  { %v10004_v26 = vld [vmem:[#allocation3 + $0x244] ss:$16 sps:$4 sm:$0xff]   ;;  %v9979_v27 = vld [vmem:[#allocation3] ss:$16 sps:$4 sm:$0xff]   ;;  %vm7764_vm7 = vcmask 1044484   ;;  %vm7767_vm8 = vcmask 1045509  }
  0x33   :  { %1161 = vmatpush1.bf16.msra.mxu0 %v9964_v10  ;;  %1332 = vmatpush1.bf16.msra.mxu1 %v9988_v17  ;;  %v9983_v28 = vld [vmem:[#allocation3 + $0x1e4] ss:$16 sps:$4 sm:$0xff]   ;;  %v10006_v29 = vld [vmem:[#allocation3 + $0x240] ss:$16 sps:$4 sm:$0xff]   ;;  %vm7770_vm9 = vcmask 1046534   ;;  %vm7773_vm10 = vcmask 1047559  }
  0x34   :  { %1162 = vmatprep.subr.bf16.mxu0 %v9965_v11  ;;  %1333 = vmatprep.subr.bf16.mxu1 %v9992_v18  ;;  %v9985_v30 = vld [vmem:[#allocation3 + $0x1e0] ss:$16 sps:$4 sm:$0xff]   ;;  %v10010_v31 = vld [vmem:[#allocation3 + $0x224] ss:$16 sps:$4 sm:$0xff]   ;;  %v109_v18 = vld [vmem:[%s13760_s0 + $0x19] sm:$0xf] }
  0x35   :  { %v138_v32 = vld [vmem:[%s13760_s0 + $0x2] sm:$0xff]  ;;  %v140_v47 = vld [vmem:[%s13760_s0 + $0x12] sm:$0xff]  ;;  %v143_v62 = vld [vmem:[%s13760_s0 + $0x2a] sm:$0xff]  ;;  %vm10668_vm11 = vmmov 0  }
  0x36   :  { %v9989_v34 = vld [vmem:[#allocation3 + $0x1c4] ss:$16 sps:$4 sm:$0xff]   ;;  %v268_v35 = vcombine.high %v138_v32, %v138_v32  ;;  %v10012_v37 = vld [vmem:[#allocation3 + $0x220] ss:$16 sps:$4 sm:$0xff]   ;;  %v274_v53 = vcombine.high %v140_v47, %v140_v47  ;;  %v281_v5 = vcombine.high %v143_v62, %v143_v62 }
  0x37   :  { %1163 = vmatpush1.bf16.msra.mxu0 %v9967_v14  ;;  %1334 = vmatpush1.bf16.msra.mxu1 %v9994_v21  ;;  %v10016_v38 = vld [vmem:[#allocation3 + $0x204] ss:$16 sps:$4 sm:$0xff]   ;;  %v107_v40 = vld [vmem:[%s13760_s0 + $0x9] sm:$0xff] }
  0x38   :  { %1164 = vmatprep.subr.bf16.mxu0 %v9968_v16  ;;  %1335 = vmatprep.subr.bf16.mxu1 %v9998_v22  ;;  %v106_v39 = vld [vmem:[%s13760_s0 + $0x1] sm:$0xff]  ;;  %v348_v44 = vcombine.low %v138_v32, %v268_v35  ;;  %v354_v59 = vcombine.low %v140_v47, %v274_v53  ;;  %v144_v6 = vld [vmem:[%s13760_s0 + $0x32] sm:$0xff] }
  0x39   :  { %v9991_v41 = vld [vmem:[#allocation3 + $0x1c0] ss:$16 sps:$4 sm:$0xff]   ;;  %v10741_v42 = vpack.c.bf16 %v107_v40, %v106_v39  ;;  %v9995_v43 = vld [vmem:[#allocation3 + $0x1a4] ss:$16 sps:$4 sm:$0xff]   ;;  %v363_v12 = vcombine.low %v281_v5, %v144_v6  ;;  %v10050_v14 = vld [vmem:[#allocation3 + $0x88] ss:$16 sps:$4 sm:$0xff]   ;;  %v284_v21 = vcombine.high %v144_v6, %v144_v6 }
  0x3a   :  { %v10018_v46 = vld [vmem:[#allocation3 + $0x200] ss:$16 sps:$4 sm:$0xff]   ;;  %v10001_v50 = vld [vmem:[#allocation3 + $0x184] ss:$16 sps:$4 sm:$0xff]   ;;  %v10747_v51 = vpack.c.bf16 %v351_v45, %v348_v44  ;;  %v10796_v32 = vld [vmem:[%s13760_s0 + $0x28] sm:$0xff] }
  0x3b   :  { %1165 = vmatpush1.bf16.msra.mxu0 %v9970_v19  ;;  %1336 = vmatpush1.bf16.msra.mxu1 %v10000_v25  ;;  %v9997_v49 = vld [vmem:[#allocation3 + $0x1a0] ss:$16 sps:$4 sm:$0xff]   ;;  %v10007_v58 = vld [vmem:[#allocation3 + $0x164] ss:$16 sps:$4 sm:$0xff]   ;;  %v75_v25 = vld [vmem:[%s13760_s0 + $0x8] sm:$0xff] }
  0x3c   :  { %1166 = vmatprep.subr.bf16.mxu0 %v9971_v20  ;;  %1337 = vmatprep.subr.bf16.mxu1 %v10004_v26  ;;  %v142_v55 = vld [vmem:[%s13760_s0 + $0x22] sm:$0xff]  ;;  %v145_v26 = vld [vmem:[%s13760_s0 + $0x3a] sm:$0xf]  ;;  %v10801_v33 = vld [vmem:[%s13760_s0 + $0x30] sm:$0xff] }
  0x3d   :  { %1186 = vmatprep.mubr.bf16.mxu0 %v10741_v42  ;;  %v10003_v57 = vld [vmem:[#allocation3 + $0x180] ss:$16 sps:$4 sm:$0xff]   ;;  %v357_v60 = vcombine.low %v141_v54, %v142_v55  ;;  %v10013_v2 = vld [vmem:[#allocation3 + $0x144] ss:$16 sps:$4 sm:$0xff]   ;;  %v278_v4 = vcombine.high %v142_v55, %v142_v55  ;;  %v366_v36 = vcombine.low %v284_v21, %v145_v26  ;;  %v10063_v40 = vld [vmem:[#allocation3 + $0x48] ss:$16 sps:$4 sm:$0xff]  }
  0x3e   :  { %v10009_v1 = vld [vmem:[#allocation3 + $0x160] ss:$16 sps:$4 sm:$0xff]   ;;  %v10019_v10 = vld [vmem:[#allocation3 + $0x124] ss:$16 sps:$4 sm:$0xff]   ;;  %v10070_v44 = vld [vmem:[#allocation3 + $0x2c] ss:$16 sps:$4 sm:$0xff]  }
  0x3f   :  { %1167 = vmatpush1.bf16.msra.mxu0 %v9973_v23  ;;  %1338 = vmatpush1.bf16.msra.mxu1 %v10006_v29  ;;  %v10760_v3 = vpack.c.bf16 %v357_v60, %v354_v59  ;;  %v10015_v9 = vld [vmem:[#allocation3 + $0x140] ss:$16 sps:$4 sm:$0xff]   ;;  %v360_v11 = vcombine.low %v278_v4, %v143_v62  ;;  %v10024_v17 = vld [vmem:[#allocation3 + $0x104] ss:$16 sps:$4 sm:$0xff]   ;;  %v10068_v55 = vld [vmem:[#allocation3 + $0x28] ss:$16 sps:$4 sm:$0xff]  }
  0x40   :  { %1168 = vmatprep.subr.bf16.mxu0 %v9977_v24  ;;  %1339 = vmatprep.subr.bf16.mxu1 %v10010_v31  ;;  %v146_v13 = vld [vmem:[%s13760_s0 + $0x42] sm:$0xff]  ;;  %v108_v29 = vld [vmem:[%s13760_s0 + $0x11] sm:$0xff]  ;;  %v10060_v4 = vld [vmem:[#allocation3 + $0x2ac] ss:$16 sps:$4 sm:$0xff]  }
  0x41   :  { %v10021_v16 = vld [vmem:[#allocation3 + $0x120] ss:$16 sps:$4 sm:$0xff]   ;;  %v10778_v20 = vpack.c.bf16 %v363_v12, %v360_v11  ;;  %v288_v22 = vcombine.high %v146_v13, %v146_v13  ;;  %v10045_v59 = vld [vmem:[#allocation3 + $0x2c8] ss:$16 sps:$4 sm:$0xff]  }
  0x42   :  { %v10776_v19 = vld [vmem:[%s13760_s0 + $0x21] sm:$0xff]  ;;  %v10812_v35 = vld [vmem:[%s13760_s0 + $0x31] sm:$0xff] }
  0x43   :  { %1169 = vmatpush1.bf16.msra.mxu0 %v9979_v27  ;;  %1340 = vmatpush1.bf16.msra.mxu1 %v10012_v37  ;;  %v10026_v23 = vld [vmem:[#allocation3 + $0x100] ss:$16 sps:$4 sm:$0xff]   ;;  %v10055_v27 = vld [vmem:[#allocation3 + $0x68] ss:$16 sps:$4 sm:$0xff]   ;;  %v9285_v31 = vcombine.low %v109_v18, %v10776_v19  ;;  %v369_v37 = vcombine.low %v146_v13, %v288_v22 }
  0x44   :  { %1170 = vmatprep.subr.bf16.mxu0 %v9983_v28  ;;  %1341 = vmatprep.subr.bf16.mxu1 %v10016_v38  ;;  %v74_v24 = vld [vmem:[%s13760_s0] sm:$0xff]  ;;  %v10032_v28 = vld [vmem:[#allocation3 + $0x2ec] ss:$16 sps:$4 sm:$0xff]   ;;  %v148_v39 = vld [vmem:[%s13760_s0 + $0x52] sm:$0xff] }
  0x45   :  { %v147_v38 = vld [vmem:[%s13760_s0 + $0x4a] sm:$0xff]  ;;  %v10823_v45 = vpack.c.bf16 %v9285_v31, %v108_v29  ;;  %v78_v47 = vld [vmem:[%s13760_s0 + $0x20] sm:$0xff]  ;;  %v294_v54 = vcombine.high %v148_v39, %v148_v39  ;;  %v81_v62 = vld [vmem:[%s13760_s0 + $0x38] sm:$0xf] }
  0x46   :  { %v291_v53 = vcombine.high %v147_v38, %v147_v38  ;;  %v150_v5 = vld [vmem:[%s13760_s0 + $0x62] sm:$0xff]  ;;  %v151_v18 = vld [vmem:[%s13760_s0 + $0x6a] sm:$0xff] }
  0x47   :  { %1171 = vmatpush2.bf16.msra.mxu0 %v9985_v30  ;;  %1342 = vmatpush1.bf16.msra.mxu1 %v10018_v46  ;;  %v10065_v30 = vld [vmem:[#allocation3 + $0x4c] ss:$16 sps:$4 sm:$0xff]   ;;  %v77_v46 = vld [vmem:[%s13760_s0 + $0x18] sm:$0xf]  ;;  %v114_v26 = vld [vmem:[%s13760_s0 + $0x41] sm:$0xff] }
  0x48   :  { %1172 = vmatprep.subr.bf16.mxu0 %v9989_v34  ;;  %1500 = vmatprep.subr.bf16.mxu1 %v10029_v48  ;;  %v10806_v34 = vld [vmem:[%s13760_s0 + $0x29] sm:$0xff] }
  0x49   :  { %v279_v48 = vcombine.low %v10796_v32, %v10806_v34  ;;  %v10076_v6 = vld [vmem:[#allocation3 + $0x8] ss:$16 sps:$4 sm:$0xff]   ;;  %v10086_v29 = vld [vmem:[#allocation3 + $0x26c] ss:$16 sps:$4 sm:$0xff]  }
  0x4a   :  { %1360 = vmatmul.mubr.bf16.vlgmr.msra.gmra.mxu1 %v10747_v51  ;;  %v10058_v13 = vld [vmem:[#allocation3 + $0x2a8] ss:$16 sps:$4 sm:$0xff]  }
  0x4b   :  { %1173 = vmatpush2.bf16.msra.mxu0 %v9991_v41  ;;  %1501 = vmatpush1.bf16.msra.mxu1 %v10027_v52  ;;  %v10821_v41 = vpack.c.bf16 %v75_v25, %v74_v24  ;;  %v10835_v52 = vpack.c.bf16 %v369_v37, %v366_v36  ;;  %v9287_v60 = vcombine.high %v10776_v19, %v279_v48  ;;  %v10073_v25 = vld [vmem:[#allocation3 + $0x288] ss:$16 sps:$4 sm:$0xff]   ;;  %v10098_v36 = vld [vmem:[#allocation3 + $0x1ac] ss:$16 sps:$4 sm:$0xff]  }
  0x4c   :  { %1174 = vmatprep.subr.bf16.mxu0 %v9995_v43  ;;  %1369 = vmatprep.mubr.bf16.mxu1 %v10664_v0  ;;  %v10030_v43 = vld [vmem:[#allocation3 + $0x2e8] ss:$16 sps:$4 sm:$0xff]  }
  0x4d   :  { %1502 = vmatprep.subr.bf16.mxu1 %v10037_v56  ;;  %v76_v56 = vld [vmem:[%s13760_s0 + $0x10] sm:$0xff]  ;;  %v10089_v31 = vld [vmem:[#allocation3 + $0x1c8] ss:$16 sps:$4 sm:$0xff]  }
  0x4e   :  { %v115_v48 = vld [vmem:[%s13760_s0 + $0x49] sm:$0xff] }
  0x4f   :  { %1175 = vmatpush2.bf16.msra.mxu0 %v9997_v49  ;;  %1503 = vmatpush1.bf16.msra.mxu1 %v10035_v61  ;;  %v282_v49 = vcombine.low %v10801_v33, %v10812_v35 }
  0x50   :  { %1176 = vmatprep.subr.bf16.mxu0 %v10001_v50  ;;  %1504 = vmatprep.subr.bf16.mxu1 %v10044_v63  ;;  %v10047_v50 = vld [vmem:[#allocation3 + $0x2cc] ss:$16 sps:$4 sm:$0xff]  }
  0x51   :  { %v9289_v61 = vcombine.high %v10806_v34, %v282_v49  ;;  %v113_v63 = vld [vmem:[%s13760_s0 + $0x39] sm:$0xf]  ;;  %v116_v49 = vld [vmem:[%s13760_s0 + $0x51] sm:$0xff] }
  0x52   :  { %1370 = vmatmul.mubr.bf16.gmra.mxu1 %v10760_v3  ;;  %v285_v12 = vcombine.low %v81_v62, %v113_v63  ;;  %v10111_v63 = vld [vmem:[#allocation3 + $0x16c] ss:$16 sps:$4 sm:$0xff]  }
  0x53   :  { %1177 = vmatpush2.bf16.msra.mxu0 %v10003_v57  ;;  %1379 = vmatprep.mubr.bf16.mxu1 %v10664_v0  ;;  %v9284_v57 = vcombine.low %v77_v46, %v78_v47  ;;  %v10860_v11 = vpack.c.bf16 %v9289_v61, %v9287_v60  ;;  %v82_v46 = vld [vmem:[%s13760_s0 + $0x40] sm:$0xff]  ;;  %v155_v60 = vld [vmem:[%s13760_s0 + $0x8a] sm:$0xff] }
  0x54   :  { %1178 = vmatprep.subr.bf16.mxu0 %v10007_v58  ;;  %1505 = vmatpush1.bf16.msra.mxu1 %v10042_v7  ;;  %v10078_v58 = vld [vmem:[#allocation3 + $0xc] ss:$16 sps:$4 sm:$0xff]   ;;  %v9291_v24 = vcombine.high %v10812_v35, %v285_v12  ;;  %v10104_v61 = vld [vmem:[#allocation3 + $0x188] ss:$16 sps:$4 sm:$0xff]  }
  0x55   :  { %1506 = vmatprep.subr.bf16.mxu1 %v10052_v8  ;;  %v10855_v7 = vpack.c.bf16 %v9284_v57, %v76_v56  ;;  %v277_v8 = vcombine.high %v78_v47, %v10776_v19  ;;  %v10081_v19 = vld [vmem:[#allocation3 + $0x1e8] ss:$16 sps:$4 sm:$0xff]  }
  0x56   :  { %v10887_v37 = vpack.c.bf16 %v114_v26, %v9291_v24  ;;  %v83_v12 = vld [vmem:[%s13760_s0 + $0x48] sm:$0xff]  ;;  %v121_v24 = vld [vmem:[%s13760_s0 + $0x79] sm:$0xf] }
  0x57   :  { %1179 = vmatpush2.bf16.msra.mxu0 %v10009_v1  ;;  %v372_v1 = vcombine.low %v147_v38, %v291_v53  ;;  %v9286_v21 = vcombine.low %v277_v8, %v10796_v32  ;;  %v10084_v38 = vld [vmem:[#allocation3 + $0x268] ss:$16 sps:$4 sm:$0xff]  }
  0x58   :  { %1180 = vmatprep.subr.bf16.mxu0 %v10013_v2  ;;  %1507 = vmatpush1.bf16.msra.mxu1 %v10050_v14  ;;  %v375_v2 = vcombine.low %v148_v39, %v294_v54  ;;  %v10099_v53 = vld [vmem:[#allocation3 + $0x248] ss:$16 sps:$4 sm:$0xff]  }
  0x59   :  { %1508 = vmatprep.subr.bf16.mxu1 %v10057_v15  ;;  %v149_v15 = vld [vmem:[%s13760_s0 + $0x5a] sm:$0xf]  ;;  %v10909_v54 = vld [vmem:[%s13760_s0 + $0x68] sm:$0xff] }
  0x5a   :  { %1380 = vmatmul.mubr.bf16.gmra.mxu1 %v10778_v20  ;;  %v10862_v14 = vpack.c.bf16 %v375_v2, %v372_v1  ;;  %v10925_v1 = vpack.c.bf16 %v116_v49, %v115_v48  ;;  %v10117_v26 = vld [vmem:[#allocation3 + $0x148] ss:$16 sps:$4 sm:$0xff]   ;;  %v10132_v49 = vld [vmem:[#allocation3 + $0x10c] ss:$16 sps:$4 sm:$0xff]  }
  0x5b   :  { %1181 = vmatpush2.bf16.msra.mxu0 %v10015_v9  ;;  %1389 = vmatprep.mubr.bf16.mxu1 %v10664_v0  ;;  %v280_v9 = vcombine.high %v10796_v32, %v10806_v34  ;;  %v283_v34 = vcombine.high %v10801_v33, %v10812_v35  ;;  %v10096_v35 = vld [vmem:[#allocation3 + $0x1a8] ss:$16 sps:$4 sm:$0xff]  }
  0x5c   :  { %1182 = vmatprep.subr.bf16.mxu0 %v10019_v10  ;;  %1509 = vmatpush1.bf16.msra.mxu1 %v10055_v27  ;;  %v10083_v10 = vld [vmem:[#allocation3 + $0x1ec] ss:$16 sps:$4 sm:$0xff]   ;;  %v378_v27 = vcombine.low %v149_v15, %v150_v5  ;;  %v86_v15 = vld [vmem:[%s13760_s0 + $0x60] sm:$0xff] }
  0x5d   :  { %1510 = vmatprep.subr.bf16.mxu1 %v10065_v30  ;;  %v9288_v22 = vcombine.low %v280_v9, %v10801_v33  ;;  %v152_v30 = vld [vmem:[%s13760_s0 + $0x72] sm:$0xff]  ;;  %v153_v33 = vld [vmem:[%s13760_s0 + $0x7a] sm:$0xf]  ;;  %v9290_v47 = vcombine.low %v283_v34, %v81_v62 }
  0x5e   :  { %v85_v34 = vld [vmem:[%s13760_s0 + $0x58] sm:$0xf] }
  0x5f   :  { %1183 = vmatpush2.bf16.msra.mxu0 %v10021_v16  ;;  %v298_v16 = vcombine.high %v150_v5, %v150_v5  ;;  %v10883_v32 = vpack.c.bf16 %v9288_v22, %v9286_v21  ;;  %v10923_v62 = vpack.c.bf16 %v82_v46, %v9290_v47  ;;  %v117_v5 = vld [vmem:[%s13760_s0 + $0x59] sm:$0xf] }
  0x60   :  { %1184 = vmatprep.subr.bf16.mxu0 %v10024_v17  ;;  %1511 = vmatpush1.bf16.msra.mxu1 %v10063_v40  ;;  %v10075_v17 = vld [vmem:[#allocation3 + $0x28c] ss:$16 sps:$4 sm:$0xff]   ;;  %v301_v40 = vcombine.high %v151_v18, %v151_v18 }
  0x61   :  { %1512 = vmatprep.subr.bf16.mxu1 %v10070_v44  ;;  %v10101_v44 = vld [vmem:[#allocation3 + $0x24c] ss:$16 sps:$4 sm:$0xff]  }
  0x62   :  { %1390 = vmatmul.mubr.bf16.gmra.mxu1 %v10835_v52  ;;  %v384_v56 = vcombine.low %v301_v40, %v152_v30  ;;  %v10119_v21 = vld [vmem:[#allocation3 + $0x14c] ss:$16 sps:$4 sm:$0xff]  }
  0x63   :  { %1185 = vmatpush2.bf16.msra.mxu0 %v10026_v23  ;;  %1399 = vmatprep.mubr.bf16.mxu1 %v10664_v0  ;;  %v10091_v23 = vld [vmem:[#allocation3 + $0x1cc] ss:$16 sps:$4 sm:$0xff]  }
  0x64   :  { %1673 = vmatprep.subr.bf16.mxu0 %v10032_v28  ;;  %1513 = vmatpush1.bf16.msra.mxu1 %v10068_v55  ;;  %v381_v28 = vcombine.low %v298_v16, %v151_v18  ;;  %v10914_v55 = vld [vmem:[%s13760_s0 + $0x69] sm:$0xff]  ;;  %v89_v18 = vld [vmem:[%s13760_s0 + $0x78] sm:$0xf] }
  0x65   :  { %1514 = vmatprep.subr.bf16.mxu1 %v10078_v58  ;;  %v10114_v58 = vld [vmem:[#allocation3 + $0x22c] ss:$16 sps:$4 sm:$0xff]   ;;  %v299_v2 = vcombine.low %v10909_v54, %v10914_v55  ;;  %v10109_v16 = vld [vmem:[#allocation3 + $0x168] ss:$16 sps:$4 sm:$0xff]  }
  0x66   :  { %1187 = vmatmul.mubr.bf16.vlgmr.msra.gmra.mxu0 %v10821_v41  ;;  %v10889_v39 = vpack.c.bf16 %v381_v28, %v378_v27  ;;  %v157_v46 = vld [vmem:[%s13760_s0 + $0x9a] sm:$0xf] }
  0x67   :  { %1674 = vmatpush1.bf16.msra.mxu0 %v10030_v43  ;;  %1196 = vmatprep.mubr.bf16.mxu0 %v10823_v45  ;;  %v304_v43 = vcombine.high %v152_v30, %v152_v30  ;;  %v10129_v30 = vld [vmem:[#allocation3 + $0x20c] ss:$16 sps:$4 sm:$0xff]  }
  0x68   :  { %1675 = vmatprep.subr.bf16.mxu0 %v10047_v50  ;;  %1515 = vmatpush1.bf16.msra.mxu1 %v10076_v6  ;;  %v10106_v50 = vld [vmem:[#allocation3 + $0x18c] ss:$16 sps:$4 sm:$0xff]   ;;  %v118_v6 = vld [vmem:[%s13760_s0 + $0x61] sm:$0xff] }
  0x69   :  { %1516 = vmatprep.subr.bf16.mxu1 %v10083_v10  ;;  %v387_v57 = vcombine.low %v304_v43, %v153_v33  ;;  %v311_v10 = vcombine.high %v155_v60, %v155_v60  ;;  %v9293_v22 = vcombine.low %v117_v5, %v118_v6  ;;  %v158_v33 = vld [vmem:[%s13760_s0 + $0xa2] sm:$0xff] }
  0x6a   :  { %1400 = vmatmul.mubr.bf16.gmra.mxu1 %v10862_v14 }
  0x6b   :  { %1676 = vmatpush1.bf16.msra.mxu0 %v10045_v59  ;;  %1409 = vmatprep.mubr.bf16.mxu1 %v10664_v0  ;;  %v154_v59 = vld [vmem:[%s13760_s0 + $0x82] sm:$0xff]  ;;  %v10935_v8 = vpack.c.bf16 %v387_v57, %v384_v56  ;;  %v393_v28 = vcombine.low %v155_v60, %v311_v10  ;;  %v318_v10 = vcombine.high %v158_v33, %v158_v33 }
  0x6c   :  { %1677 = vmatprep.subr.bf16.mxu0 %v10060_v4  ;;  %1517 = vmatpush2.bf16.msra.mxu1 %v10081_v19  ;;  %v10112_v4 = vld [vmem:[#allocation3 + $0x228] ss:$16 sps:$4 sm:$0xff]   ;;  %v308_v9 = vcombine.high %v154_v59, %v154_v59 }
  0x6d   :  { %1518 = vmatprep.subr.bf16.mxu1 %v10091_v23  ;;  %v120_v19 = vld [vmem:[%s13760_s0 + $0x71] sm:$0xff]  ;;  %v9295_v23 = vcombine.high %v118_v6, %v299_v2  ;;  %v300_v2 = vcombine.high %v10909_v54, %v10914_v55 }
  0x6e   :  { %1197 = vmatmul.mubr.bf16.gmra.mxu0 %v10855_v7  ;;  %v390_v27 = vcombine.low %v154_v59, %v308_v9  ;;  %v10130_v59 = vld [vmem:[#allocation3 + $0x108] ss:$16 sps:$4 sm:$0xff]  }
  0x6f   :  { %1206 = vmatprep.mubr.bf16.mxu0 %v10860_v11  ;;  %1678 = vmatpush1.bf16.msra.mxu0 %v10058_v13  ;;  %v84_v13 = vld [vmem:[%s13760_s0 + $0x50] sm:$0xff]  ;;  %v10972_v40 = vpack.c.bf16 %v9295_v23, %v9293_v22  ;;  %v126_v22 = vld [vmem:[%s13760_s0 + $0xa1] sm:$0xff] }
  0x70   :  { %1679 = vmatprep.subr.bf16.mxu0 %v10075_v17  ;;  %1519 = vmatpush2.bf16.msra.mxu1 %v10089_v31  ;;  %v10950_v17 = vld [vmem:[%s13760_s0 + $0x70] sm:$0xff]  ;;  %v10967_v31 = vpack.c.bf16 %v84_v13, %v83_v12  ;;  %v10981_v47 = vpack.c.bf16 %v393_v28, %v390_v27  ;;  %v90_v28 = vld [vmem:[%s13760_s0 + $0x80] sm:$0xff] }
  0x71   :  { %1520 = vmatprep.subr.bf16.mxu1 %v10098_v36  ;;  %v297_v36 = vcombine.high %v86_v15, %v118_v6  ;;  %v302_v43 = vcombine.low %v10950_v17, %v120_v19  ;;  %v160_v6 = vld [vmem:[%s13760_s0 + $0xb2] sm:$0xff]  ;;  %v9296_v13 = vcombine.low %v300_v2, %v10950_v17 }
  0x72   :  { %1410 = vmatmul.mubr.bf16.gmra.mxu1 %v10889_v39  ;;  %v92_v2 = vld [vmem:[%s13760_s0 + $0x90] sm:$0xff] }
  0x73   :  { %1680 = vmatpush1.bf16.msra.mxu0 %v10073_v25  ;;  %1419 = vmatprep.mubr.bf16.mxu1 %v10664_v0  ;;  %v156_v25 = vld [vmem:[%s13760_s0 + $0x92] sm:$0xff]  ;;  %v9297_v56 = vcombine.high %v10914_v55, %v302_v43  ;;  %v123_v55 = vld [vmem:[%s13760_s0 + $0x89] sm:$0xff] }
  0x74   :  { %1681 = vmatprep.subr.bf16.mxu0 %v10086_v29  ;;  %1521 = vmatpush2.bf16.msra.mxu1 %v10096_v35  ;;  %v10127_v29 = vld [vmem:[#allocation3 + $0x208] ss:$16 sps:$4 sm:$0xff]   ;;  %v314_v48 = vcombine.high %v156_v25, %v156_v25 }
  0x75   :  { %1522 = vmatprep.subr.bf16.mxu1 %v10106_v50  ;;  %v10122_v35 = vld [vmem:[#allocation3 + $0x128] ss:$16 sps:$4 sm:$0xff]   ;;  %v9292_v50 = vcombine.low %v85_v34, %v86_v15 }
  0x76   :  { %1207 = vmatmul.mubr.bf16.gmra.mxu0 %v10883_v32  ;;  %v396_v60 = vcombine.low %v156_v25, %v314_v48  ;;  %v95_v34 = vld [vmem:[%s13760_s0 + $0xa8] sm:$0xff]  ;;  %v128_v43 = vld [vmem:[%s13760_s0 + $0xb1] sm:$0xff] }
  0x77   :  { %1216 = vmatprep.mubr.bf16.mxu0 %v10887_v37  ;;  %1682 = vmatpush1.bf16.msra.mxu0 %v10084_v38  ;;  %v10124_v38 = vld [vmem:[#allocation3 + $0x12c] ss:$16 sps:$4 sm:$0xff]  }
  0x78   :  { %1683 = vmatprep.subr.bf16.mxu0 %v10101_v44  ;;  %1523 = vmatpush2.bf16.msra.mxu1 %v10104_v61  ;;  %v305_v44 = vcombine.low %v89_v18, %v121_v24  ;;  %v399_v61 = vcombine.low %v157_v46, %v158_v33  ;;  %v161_v24 = vld [vmem:[%s13760_s0 + $0xba] sm:$0xf]  ;;  %v163_v46 = vld [vmem:[%s13760_s0 + $0xca] sm:$0xff]  ;;  %v164_v33 = vld [vmem:[%s13760_s0 + $0xd2] sm:$0xff] }
  0x79   :  { %1524 = vmatprep.subr.bf16.mxu1 %v10111_v63 }
  0x7a   :  { %1420 = vmatmul.mubr.bf16.gmra.mxu1 %v10935_v8  ;;  %v9299_v57 = vcombine.high %v120_v19, %v305_v44  ;;  %v11002_v9 = vpack.c.bf16 %v399_v61, %v396_v60  ;;  %v331_v60 = vcombine.high %v163_v46, %v163_v46  ;;  %v334_v61 = vcombine.high %v164_v33, %v164_v33 }
  0x7b   :  { %1684 = vmatpush1.bf16.msra.mxu0 %v10099_v53  ;;  %1429 = vmatprep.mubr.bf16.mxu1 %v10664_v0  ;;  %v9294_v53 = vcombine.low %v297_v36, %v10909_v54  ;;  %v122_v54 = vld [vmem:[%s13760_s0 + $0x81] sm:$0xff]  ;;  %v11049_v36 = vld [vmem:[%s13760_s0 + $0xb0] sm:$0xff] }
  0x7c   :  { %1685 = vmatprep.subr.bf16.mxu0 %v10114_v58  ;;  %1525 = vmatpush2.bf16.msra.mxu1 %v10109_v16  ;;  %v159_v58 = vld [vmem:[%s13760_s0 + $0xaa] sm:$0xff]  ;;  %v10997_v5 = vpack.c.bf16 %v9299_v57, %v9297_v56  ;;  %v162_v16 = vld [vmem:[%s13760_s0 + $0xc2] sm:$0xff]  ;;  %v11026_v23 = vpack.c.bf16 %v123_v55, %v122_v54  ;;  %v414_v54 = vcombine.low %v163_v46, %v331_v60  ;;  %v168_v46 = vld [vmem:[%s13760_s0 + $0xf2] sm:$0xff] }
  0x7d   :  { %1526 = vmatprep.subr.bf16.mxu1 %v10119_v21  ;;  %v10992_v63 = vpack.c.bf16 %v9294_v53, %v9292_v50  ;;  %v321_v12 = vcombine.high %v159_v58, %v159_v58  ;;  %v328_v27 = vcombine.high %v162_v16, %v162_v16  ;;  %v94_v50 = vld [vmem:[%s13760_s0 + $0xa0] sm:$0xff]  ;;  %v417_v55 = vcombine.low %v164_v33, %v334_v61 }
  0x7e   :  { %1217 = vmatmul.mubr.bf16.gmra.mxu0 %v10923_v62  ;;  %v344_v60 = vcombine.high %v168_v46, %v168_v46  ;;  %v98_v61 = vld [vmem:[%s13760_s0 + $0xc0] sm:$0xff] }
  0x7f   :  { %1226 = vmatprep.mubr.bf16.mxu0 %v10925_v1  ;;  %1686 = vmatpush1.bf16.msra.mxu0 %v10112_v4  ;;  %v303_v4 = vcombine.high %v10950_v17, %v120_v19  ;;  %v402_v19 = vcombine.low %v318_v10, %v159_v58  ;;  %v405_v21 = vcombine.low %v321_v12, %v160_v6  ;;  %v129_v10 = vld [vmem:[%s13760_s0 + $0xb9] sm:$0xf] }
  0x80   :  { %1687 = vmatprep.subr.bf16.mxu0 %v10129_v30  ;;  %1527 = vmatpush2.bf16.msra.mxu1 %v10117_v26  ;;  %v324_v26 = vcombine.high %v160_v6, %v160_v6  ;;  %v124_v30 = vld [vmem:[%s13760_s0 + $0x91] sm:$0xff]  ;;  %v411_v48 = vcombine.low %v162_v16, %v328_v27  ;;  %v322_v58 = vcombine.low %v11049_v36, %v128_v43 }
  0x81   :  { %1528 = vmatprep.subr.bf16.mxu1 %v10124_v38  ;;  %v9298_v15 = vcombine.low %v303_v4, %v89_v18  ;;  %v125_v18 = vld [vmem:[%s13760_s0 + $0x99] sm:$0xf]  ;;  %v11031_v25 = vpack.c.bf16 %v405_v21, %v402_v19  ;;  %v127_v38 = vld [vmem:[%s13760_s0 + $0xa9] sm:$0xff]  ;;  %v317_v19 = vcombine.high %v94_v50, %v126_v22 }
  0x82   :  { %1430 = vmatmul.mubr.bf16.gmra.mxu1 %v10981_v47  ;;  %v9301_v44 = vcombine.low %v125_v18, %v126_v22  ;;  %v319_v57 = vcombine.low %v95_v34, %v127_v38  ;;  %v97_v6 = vld [vmem:[%s13760_s0 + $0xb8] sm:$0xf]  ;;  %v320_v21 = vcombine.high %v95_v34, %v127_v38  ;;  %v167_v27 = vld [vmem:[%s13760_s0 + $0xea] sm:$0xff] }
  0x83   :  { %1688 = vmatpush1.bf16.msra.mxu0 %v10127_v29  ;;  %1439 = vmatprep.mubr.bf16.mxu1 %v10664_v0  ;;  %v11018_v17 = vpack.c.bf16 %v9298_v15, %v9296_v13  ;;  %v91_v29 = vld [vmem:[%s13760_s0 + $0x88] sm:$0xff]  ;;  %v9305_v13 = vcombine.high %v127_v38, %v322_v58  ;;  %v341_v58 = vcombine.high %v167_v27, %v167_v27 }
  0x84   :  { %1529 = vmatpush2.bf16.msra.mxu1 %v10122_v35  ;;  %v408_v35 = vcombine.low %v324_v26, %v161_v24  ;;  %v11072_v53 = vpack.c.bf16 %v91_v29, %v90_v28  ;;  %v11074_v56 = vpack.c.bf16 %v9301_v44, %v124_v30  ;;  %v9303_v12 = vcombine.high %v126_v22, %v319_v57  ;;  %v166_v15 = vld [vmem:[%s13760_s0 + $0xe2] sm:$0xff]  ;;  %v165_v26 = vld [vmem:[%s13760_s0 + $0xda] sm:$0xf] }
  0x85   :  { %1530 = vmatprep.subr.bf16.mxu1 %v10132_v49  ;;  %v93_v49 = vld [vmem:[%s13760_s0 + $0x98] sm:$0xf]  ;;  %v325_v24 = vcombine.low %v97_v6, %v129_v10  ;;  %v11105_v28 = vpack.c.bf16 %v417_v55, %v414_v54  ;;  %v338_v29 = vcombine.high %v166_v15, %v166_v15  ;;  %v9302_v30 = vcombine.low %v317_v19, %v95_v34  ;;  %v130_v38 = vld [vmem:[%s13760_s0 + $0xc1] sm:$0xff]  ;;  %v135_v10 = vld [vmem:[%s13760_s0 + $0xe9] sm:$0xff] }
  0x86   :  { %1227 = vmatmul.mubr.bf16.gmra.mxu0 %v10967_v31  ;;  %v9300_v4 = vcombine.low %v93_v49, %v94_v50  ;;  %v11097_v18 = vpack.c.bf16 %v9305_v13, %v9303_v12  ;;  %v9304_v22 = vcombine.low %v320_v21, %v11049_v36  ;;  %v420_v33 = vcombine.low %v165_v26, %v166_v15  ;;  %v169_v50 = vld [vmem:[%s13760_s0 + $0xfa] sm:$0xf]  ;;  %v134_v54 = vld [vmem:[%s13760_s0 + $0xe1] sm:$0xff]  ;;  %v100_v26 = vld [vmem:[%s13760_s0 + $0xd0] sm:$0xff] }
  0x87   :  { %1236 = vmatprep.mubr.bf16.mxu0 %v10972_v40  ;;  %v9307_v44 = vcombine.high %v128_v43, %v325_v24  ;;  %v429_v12 = vcombine.low %v344_v60, %v169_v50  ;;  %v133_v15 = vld [vmem:[%s13760_s0 + $0xd9] sm:$0xf]  ;;  %v99_v24 = vld [vmem:[%s13760_s0 + $0xc8] sm:$0xff] }
  0x88   :  { %1531 = vmatpush2.bf16.msra.mxu1 %v10130_v59  ;;  %v11077_v59 = vpack.c.bf16 %v411_v48, %v408_v35  ;;  %v11095_v16 = vpack.c.bf16 %v9300_v4, %v92_v2  ;;  %v423_v35 = vcombine.low %v338_v29, %v167_v27  ;;  %v11118_v34 = vpack.c.bf16 %v9304_v22, %v9302_v30  ;;  %v103_v4 = vld [vmem:[%s13760_s0 + $0xe8] sm:$0xff]  ;;  %v102_v27 = vld [vmem:[%s13760_s0 + $0xe0] sm:$0xff]  ;;  %v104_v29 = vld [vmem:[%s13760_s0 + $0xf0] sm:$0xff] }
  0x89   :  { %v323_v48 = vcombine.high %v11049_v36, %v128_v43  ;;  %v11121_v49 = vpack.c.bf16 %v130_v38, %v9307_v44  ;;  %v131_v36 = vld [vmem:[%s13760_s0 + $0xc9] sm:$0xff]  ;;  %v132_v43 = vld [vmem:[%s13760_s0 + $0xd1] sm:$0xff]  ;;  %v339_v19 = vcombine.low %v103_v4, %v135_v10  ;;  %v137_v38 = vld [vmem:[%s13760_s0 + $0xf9] sm:$0xf]  ;;  %v9309_v44 = vcombine.low %v133_v15, %v134_v54 }
  0x8a   :  { %1440 = vmatmul.mubr.bf16.gmra.mxu1 %v11002_v9  ;;  %v11126_v57 = vpack.c.bf16 %v423_v35, %v420_v33  ;;  %v11155_v55 = vpack.c.bf16 %v132_v43, %v131_v36  ;;  %v105_v30 = vld [vmem:[%s13760_s0 + $0xf8] sm:$0xf]  ;;  %v11187_v35 = vpack.c.bf16 %v100_v26, %v99_v24  ;;  %v10159_v26 = vld [vmem:[#allocation5 + $0x64] ss:$16 sps:$4 sm:$0xff]  }
  0x8b   :  { %1449 = vmatprep.mubr.bf16.mxu1 %v10664_v0  ;;  %v9306_v2 = vcombine.low %v323_v48, %v97_v6  ;;  %v426_v6 = vcombine.low %v341_v58, %v168_v46  ;;  %v136_v22 = vld [vmem:[%s13760_s0 + $0xf1] sm:$0xff]  ;;  %v9311_v46 = vcombine.high %v134_v54, %v339_v19  ;;  %v337_v48 = vcombine.high %v102_v27, %v134_v54 }
  0x8c   :  { %v101_v33 = vld [vmem:[%s13760_s0 + $0xd8] sm:$0xf]  ;;  %v342_v58 = vcombine.low %v104_v29, %v136_v22  ;;  %v345_v60 = vcombine.low %v105_v30, %v137_v38 }
  0x8d   :  { %v11147_v13 = vpack.c.bf16 %v98_v61, %v9306_v2  ;;  %v11157_v21 = vpack.c.bf16 %v429_v12, %v426_v6  ;;  %v11189_v50 = vpack.c.bf16 %v9311_v46, %v9309_v44  ;;  %v9308_v61 = vcombine.low %v101_v33, %v102_v27 }
  0x8e   :  { %1237 = vmatmul.mubr.bf16.gmra.mxu0 %v10992_v63  ;;  %v9310_v2 = vcombine.low %v337_v48, %v103_v4  ;;  %v9313_v36 = vcombine.high %v135_v10, %v342_v58  ;;  %v9315_v43 = vcombine.high %v136_v22, %v345_v60  ;;  %v340_v6 = vcombine.high %v103_v4, %v135_v10  ;;  %v10156_v48 = vld [vmem:[#allocation5 + $0x284] ss:$16 sps:$4 sm:$0xff]  }
  0x8f   :  { %1246 = vmatprep.mubr.bf16.mxu0 %v10997_v5  ;;  %v343_v12 = vcombine.high %v104_v29, %v136_v22  ;;  %v10157_v22 = vld [vmem:[#allocation5 + $0x60] ss:$16 sps:$4 sm:$0xff]  }
  0x90   :  { %v11197_v15 = vpack.c.bf16 %v9315_v43, %v9313_v36  ;;  %v9312_v54 = vcombine.low %v340_v6, %v104_v29 }
  0x91   :  { %v9314_v19 = vcombine.low %v343_v12, %v105_v30  ;;  %v10148_v30 = vld [vmem:[#allocation5 + $0x2a0] ss:$16 sps:$4 sm:$0xff]  }
  0x92   :  { %1450 = vmatmul.mubr.bf16.gmra.mxu1 %v11031_v25 }
  0x93   :  { %1459 = vmatprep.mubr.bf16.mxu1 %v10664_v0  ;;  %v11203_v24 = vpack.c.bf16 %v9314_v19, %v9312_v54  ;;  %v10165_v54 = vld [vmem:[#allocation5 + $0x264] ss:$16 sps:$4 sm:$0xff]  }
  0x96   :  { %1247 = vmatmul.mubr.bf16.gmra.mxu0 %v11018_v17 }
  0x97   :  { %1256 = vmatprep.mubr.bf16.mxu0 %v11026_v23 }
  0x9a   :  { %1460 = vmatmul.mubr.bf16.gmra.mxu1 %v11077_v59 }
  0x9b   :  { %1469 = vmatprep.mubr.bf16.mxu1 %v10664_v0 }
  0x9e   :  { %1257 = vmatmul.mubr.bf16.gmra.mxu0 %v11072_v53 }
  0x9f   :  { %1266 = vmatprep.mubr.bf16.mxu0 %v11074_v56 }
  0xa2   :  { %1470 = vmatmul.mubr.bf16.gmra.mxu1 %v11105_v28 }
  0xa3   :  { %1479 = vmatprep.mubr.bf16.mxu1 %v10664_v0 }
  0xa6   :  { %1267 = vmatmul.mubr.bf16.gmra.mxu0 %v11095_v16 }
  0xa7   :  { %1276 = vmatprep.mubr.bf16.mxu0 %v11097_v18 }
  0xaa   :  { %1480 = vmatmul.mubr.bf16.gmra.mxu1 %v11126_v57 }
  0xab   :  { %1489 = vmatprep.mubr.bf16.mxu1 %v10664_v0 }
  0xae   :  { %1277 = vmatmul.mubr.bf16.gmra.mxu0 %v11118_v34 }
  0xaf   :  { %1286 = vmatprep.mubr.bf16.mxu0 %v11121_v49 }
  0xb2   :  { %1490 = vmatmul.mubr.bf16.gmra.mxu1 %v11157_v21 }
  0xb3   :  { %1532 = vmatprep.mubr.bf16.mxu1 %v10741_v42  ;;  %v11195_v42 = vpack.c.bf16 %v9310_v2, %v9308_v61  ;;  %v10154_v61 = vld [vmem:[#allocation5 + $0x280] ss:$16 sps:$4 sm:$0xff]  }
  0xb4   :  { %v10160_v2 = vld [vmem:[#allocation5 + $0x40] ss:$16 sps:$4 sm:$0xff]  }
  0xb6   :  { %1287 = vmatmul.mubr.bf16.gmra.mxu0 %v11147_v13 }
  0xb7   :  { %1296 = vmatprep.mubr.bf16.mxu0 %v11155_v55 }
  0xba   :  { %1533 = vmatmul.mubr.bf16.vlgmr.msra.gmra.mxu1 %v10821_v41  ;;  %v10135_v41 = vld [vmem:[#allocation5 + $0xe4] ss:$16 sps:$4 sm:$0xff]  }
  0xbb   :  { %1542 = vmatprep.mubr.bf16.mxu1 %v10823_v45  ;;  %6492 = vmatprep.subr.bf16.mxu1 %v10135_v41  ;;  %v10166_v41 = vld [vmem:[#allocation5 + $0x20] ss:$16 sps:$4 sm:$0xff]  }
  0xbe   :  { %1297 = vmatmul.mubr.bf16.gmra.mxu0 %v11187_v35 }
  0xbf   :  { %1306 = vmatprep.mubr.bf16.mxu0 %v11189_v50 }
  0xc2   :  { %1543 = vmatmul.mubr.bf16.gmra.mxu1 %v10855_v7  ;;  %v10138_v7 = vld [vmem:[#allocation5 + $0x2e4] ss:$16 sps:$4 sm:$0xff]  }
  0xc3   :  { %1552 = vmatprep.mubr.bf16.mxu1 %v10860_v11  ;;  %6595 = vmatprep.subr.bf16.mxu0 %v10138_v7 }
  0xc6   :  { %1307 = vmatmul.mubr.bf16.gmra.mxu0 %v11195_v42 }
  0xc7   :  { %1316 = vmatprep.mubr.bf16.mxu0 %v11197_v15 }
  0xca   :  { %1553 = vmatmul.mubr.bf16.gmra.mxu1 %v10883_v32 }
  0xcb   :  { %1562 = vmatprep.mubr.bf16.mxu1 %v10887_v37  ;;  %v10139_v37 = vld [vmem:[#allocation5 + $0xc0] ss:$16 sps:$4 sm:$0xff]  }
  0xce   :  { %1317 = vmatmul.mubr.bf16.gmra.mxu0 %v11203_v24 }
  0xcf   :  { %1705 = vmatprep.mubr.bf16.mxu0 %v10664_v0 }
  0xd2   :  { %1563 = vmatmul.mubr.bf16.gmra.mxu1 %v10923_v62 }
  0xd3   :  { %1572 = vmatprep.mubr.bf16.mxu1 %v10925_v1 }
  0xd6   :  { %1706 = vmatmul.mubr.bf16.vlgmr.msra.gmra.mxu0 %v10747_v51 }
  0xd7   :  { %1715 = vmatprep.mubr.bf16.mxu0 %v10664_v0 }
  0xda   :  { %1573 = vmatmul.mubr.bf16.gmra.mxu1 %v10967_v31  ;;  %v10144_v31 = vld [vmem:[#allocation5 + $0x2c4] ss:$16 sps:$4 sm:$0xff]  }
  0xdb   :  { %1582 = vmatprep.mubr.bf16.mxu1 %v10972_v40 }
  0xde   :  { %1716 = vmatmul.mubr.bf16.gmra.mxu0 %v10760_v3 }
  0xdf   :  { %1725 = vmatprep.mubr.bf16.mxu0 %v10664_v0 }
  0xe2   :  { %1583 = vmatmul.mubr.bf16.gmra.mxu1 %v10992_v63 }
  0xe3   :  { %1592 = vmatprep.mubr.bf16.mxu1 %v10997_v5  ;;  %v10145_v5 = vld [vmem:[#allocation5 + $0xa0] ss:$16 sps:$4 sm:$0xff]  }
  0xe6   :  { %1726 = vmatmul.mubr.bf16.gmra.mxu0 %v10778_v20  ;;  %v10133_v20 = vld [vmem:[#allocation5 + $0xe0] ss:$16 sps:$4 sm:$0xff]  }
  0xe7   :  { %1735 = vmatprep.mubr.bf16.mxu0 %v10664_v0  ;;  %6493 = vmatpush1.bf16.msra.mxu1 %v10133_v20 }
  0xea   :  { %1593 = vmatmul.mubr.bf16.gmra.mxu1 %v11018_v17  ;;  %v11270_v17 = vld [vmem:[%s13762_s2] sm:$0xf] }
  0xeb   :  { %1602 = vmatprep.mubr.bf16.mxu1 %v11026_v23 }
  0xee   :  { %1736 = vmatmul.mubr.bf16.gmra.mxu0 %v10835_v52  ;;  %v10136_v52 = vld [vmem:[#allocation5 + $0x2e0] ss:$16 sps:$4 sm:$0xff]  }
  0xef   :  { %1745 = vmatprep.mubr.bf16.mxu0 %v10664_v0  ;;  %6596 = vmatpush1.bf16.msra.mxu0 %v10136_v52 }
  0xf0   :  { %6597 = vmatprep.subr.bf16.mxu0 %v10144_v31  ;;  %v10171_v31 = vld [vmem:[#allocation5 + $0x244] ss:$16 sps:$4 sm:$0xff]  }
  0xf2   :  { %1603 = vmatmul.mubr.bf16.gmra.mxu1 %v11072_v53 }
  0xf3   :  { %1612 = vmatprep.mubr.bf16.mxu1 %v11074_v56  ;;  %v10153_v56 = vld [vmem:[#allocation5 + $0x84] ss:$16 sps:$4 sm:$0xff]  }
  0xf6   :  { %1746 = vmatmul.mubr.bf16.gmra.mxu0 %v10862_v14  ;;  %v654_v14 = vlaneseq }
  0xf7   :  { %1755 = vmatprep.mubr.bf16.mxu0 %v10664_v0 }
  0xf8   :  { %v11258_v1 = vshrl.u32 %v654_v14, 7  ;;  %vm11375_vm0 = vcmp.lt.s32.totalorder %v654_v14, 256 }
  0xfa   :  { %1613 = vmatmul.mubr.bf16.gmra.mxu1 %v11095_v16  ;;  %13820 = vst [vmem:[#allocation10_spill] sm:$0xff] %v11258_v1 }
  0xfb   :  { %1622 = vmatprep.mubr.bf16.mxu1 %v11097_v18  ;;  %v10151_v18 = vld [vmem:[#allocation5 + $0x80] ss:$16 sps:$4 sm:$0xff]  }
  0xfe   :  { %1756 = vmatmul.mubr.bf16.gmra.mxu0 %v10889_v39  ;;  %v10141_v39 = vld [vmem:[#allocation5 + $0xc4] ss:$16 sps:$4 sm:$0xff]  }
  0xff   :  { %1765 = vmatprep.mubr.bf16.mxu0 %v10664_v0  ;;  %6494 = vmatprep.subr.bf16.mxu1 %v10141_v39 }
 0x100   :  { %6495 = vmatpush1.bf16.msra.mxu1 %v10139_v37 }
 0x102   :  { %1623 = vmatmul.mubr.bf16.gmra.mxu1 %v11118_v34 }
 0x103   :  { %1632 = vmatprep.mubr.bf16.mxu1 %v11121_v49 }
 0x106   :  { %1766 = vmatmul.mubr.bf16.gmra.mxu0 %v10935_v8  ;;  %v10142_v8 = vld [vmem:[#allocation5 + $0x2c0] ss:$16 sps:$4 sm:$0xff]  }
 0x107   :  { %1775 = vmatprep.mubr.bf16.mxu0 %v10664_v0  ;;  %6598 = vmatpush1.bf16.msra.mxu0 %v10142_v8 }
 0x10a   :  { %v11239_v51 = vpop.f32.mrf.mxu1  ;;  %1633 = vmatmul.mubr.bf16.gmra.mxu1 %v11147_v13 }
 0x10b   :  { %1642 = vmatprep.mubr.bf16.mxu1 %v11155_v55  ;;  %v10150_v55 = vld [vmem:[#allocation5 + $0x2a4] ss:$16 sps:$4 sm:$0xff]  }
 0x10c   :  { %v11243_v3 = vpop.f32.mrf.mxu1  ;;  %6599 = vmatprep.subr.bf16.mxu0 %v10150_v55 }
 0x10d   :  { %6600 = vmatpush1.bf16.msra.mxu0 %v10148_v30 }
 0x10e   :  { %1776 = vmatmul.mubr.bf16.gmra.mxu0 %v10981_v47  ;;  %v11245_v45 = vpop.f32.mrf.mxu1  ;;  %v10147_v47 = vld [vmem:[#allocation5 + $0xa4] ss:$16 sps:$4 sm:$0xff]   ;;  %6601 = vmatprep.subr.bf16.mxu0 %v10156_v48 }
 0x10f   :  { %1785 = vmatprep.mubr.bf16.mxu0 %v10664_v0  ;;  %6496 = vmatprep.subr.bf16.mxu1 %v10147_v47  ;;  %v10169_v47 = vld [vmem:[#allocation5 + $0x240] ss:$16 sps:$4 sm:$0xff]  }
 0x110   :  { %v11248_v11 = vpop.f32.mrf.mxu1  ;;  %6497 = vmatpush1.bf16.msra.mxu1 %v10145_v5 }
 0x111   :  { %6498 = vmatprep.subr.bf16.mxu1 %v10153_v56  ;;  %6602 = vmatpush1.bf16.msra.mxu0 %v10154_v61 }
 0x112   :  { %v11251_v32 = vpop.f32.mrf.mxu1  ;;  %1643 = vmatmul.mubr.bf16.gmra.mxu1 %v11187_v35  ;;  %6603 = vmatprep.subr.bf16.mxu0 %v10165_v54 }
 0x113   :  { %1652 = vmatprep.mubr.bf16.mxu1 %v11189_v50  ;;  %v10162_v50 = vld [vmem:[#allocation5 + $0x44] ss:$16 sps:$4 sm:$0xff]  }
 0x114   :  { %v11255_v62 = vpop.f32.mrf.mxu1  ;;  %6499 = vmatpush1.bf16.msra.mxu1 %v10151_v18  ;;  %v10174_v18 = vld [vmem:[#allocation5 + $0x4] ss:$16 sps:$4 sm:$0xff]  }
 0x115   :  { %6500 = vmatprep.subr.bf16.mxu1 %v10159_v26 }
 0x116   :  { %1786 = vmatmul.mubr.bf16.gmra.mxu0 %v11002_v9  ;;  %v11260_v40 = vpop.f32.mrf.mxu1  ;;  %v13773_v9 = vsub.s32 0, %v11258_v1 }
 0x117   :  { %1795 = vmatprep.mubr.bf16.mxu0 %v10664_v0 }
 0x118   :  { %v11263_v63 = vpop.f32.mrf.mxu1  ;;  %v11282_v16 = vrot.slane %v11270_v17, %v13773_v9  ;;  %6501 = vmatpush1.bf16.msra.mxu1 %v10157_v22  ;;  %v10222_v9 = vld [vmem:[#allocation5 + $0x344] ss:$16 sps:$4 sm:$0xff]  }
 0x119   :  { %6502 = vmatprep.subr.bf16.mxu1 %v10162_v50 }
 0x11a   :  { %v11272_v23 = vpop.f32.mrf.mxu1  ;;  %1653 = vmatmul.mubr.bf16.gmra.mxu1 %v11195_v42 }
 0x11b   :  { %1662 = vmatprep.mubr.bf16.mxu1 %v11197_v15 }
 0x11c   :  { %v11277_v53 = vpop.f32.mrf.mxu1  ;;  %6503 = vmatpush1.bf16.msra.mxu1 %v10160_v2 }
 0x11e   :  { %1796 = vmatmul.mubr.bf16.gmra.mxu0 %v11031_v25  ;;  %v13772_v25 = vsub.s32 1, %v11258_v1  ;;  %v11284_v34 = vpop.f32.mrf.mxu1 }
 0x11f   :  { %1805 = vmatprep.mubr.bf16.mxu0 %v10664_v0 }
 0x120   :  { %v11289_v49 = vrot.slane %v11270_v17, %v13772_v25  ;;  %v11292_v10 = vpop.f32.mrf.mxu1 }
 0x122   :  { %v11296_v29 = vpop.f32.mrf.mxu1  ;;  %1663 = vmatmul.mubr.bf16.gmra.mxu1 %v11203_v24 }
 0x124   :  { %v11303_v46 = vpop.f32.mrf.mxu1 }
 0x126   :  { %v1188_v4 = vpop.f32.mrf.mxu0  ;;  %1806 = vmatmul.mubr.bf16.gmra.mxu0 %v11077_v59  ;;  %v11311_v60 = vpop.f32.mrf.mxu1 }
 0x127   :  { %v1189_v13 = vadd.f32 %v1188_v4, %v11282_v16  ;;  %1815 = vmatprep.mubr.bf16.mxu0 %v10664_v0 }
 0x128   :  { %v1190_v27 = vpop.f32.mrf.mxu0  ;;  %v11317_v42 = vpop.f32.mrf.mxu1 }
 0x129   :  { %v11300_v38 = vadd.f32 %v11239_v51, %v1189_v13  ;;  %v1191_v59 = vadd.f32 %v1190_v27, %v11289_v49  ;;  %v10163_v51 = vld [vmem:[#allocation5 + $0x260] ss:$16 sps:$4 sm:$0xff]  }
 0x12a   :  { %v1192_v44 = vpop.f32.mrf.mxu0  ;;  %v11321_v15 = vpop.f32.mrf.mxu1  ;;  %6604 = vmatpush1.bf16.msra.mxu0 %v10163_v51  ;;  %v10172_v13 = vld [vmem:[#allocation5] ss:$16 sps:$4 sm:$0xff]  }
 0x12b   :  { %v11306_v33 = vadd.f32 %v11243_v3, %v1191_v59  ;;  %v1193_v35 = vadd.f32 %v1192_v44, %v11282_v16  ;;  %v10168_v3 = vld [vmem:[#allocation5 + $0x24] ss:$16 sps:$4 sm:$0xff]   ;;  %6605 = vmatprep.subr.bf16.mxu0 %v10171_v31  ;;  %v10175_v59 = vld [vmem:[#allocation5 + $0x1e0] ss:$16 sps:$4 sm:$0xff]  }
 0x12c   :  { %v11309_v58 = vpop.f32.mrf.mxu0  ;;  %v11327_v20 = vpop.f32.mrf.mxu1  ;;  %6504 = vmatprep.subr.bf16.mxu1 %v10168_v3  ;;  %v10180_v44 = vld [vmem:[#allocation5 + $0x224] ss:$16 sps:$4 sm:$0xff]   ;;  %v10184_v3 = vld [vmem:[#allocation5 + $0x200] ss:$16 sps:$4 sm:$0xff]  }
 0x12d   :  { %v11314_v36 = vadd.f32 %v11245_v45, %v1193_v35  ;;  %6505 = vmatpush1.bf16.msra.mxu1 %v10166_v41  ;;  %v13770_v41 = vmov 0.0  }
 0x12e   :  { %v1198_v43 = vpop.f32.mrf.mxu0  ;;  %1816 = vmatmul.mubr.bf16.gmra.mxu0 %v11105_v28  ;;  %6506 = vmatprep.subr.bf16.mxu1 %v10174_v18  ;;  %2802 = vst.msk [vmem:[#allocation2] ss:$8 sm:$0x3] %vm11375_vm0, %v13770_v41  ;;  %2805 = vst.msk [vmem:[#allocation2 + $0x20] ss:$8 sm:$0x3] %vm11375_vm0, %v13770_v41 }
 0x12f   :  { %v1199_v6 = vadd.f32 %v1198_v43, %v11282_v16  ;;  %1825 = vmatprep.mubr.bf16.mxu0 %v10664_v0  ;;  %6606 = vmatpush1.bf16.msra.mxu0 %v10169_v47  ;;  %v10183_v43 = vld [vmem:[#allocation5 + $0x1c4] ss:$16 sps:$4 sm:$0xff]   ;;  %2808 = vst.msk [vmem:[#allocation2 + $0x40] ss:$8 sm:$0x3] %vm11375_vm0, %v13770_v41 }
 0x130   :  { %v1200_v12 = vpop.f32.mrf.mxu0  ;;  %6607 = vmatprep.subr.bf16.mxu0 %v10180_v44  ;;  %2811 = vst.msk [vmem:[#allocation2 + $0x60] ss:$8 sm:$0x3] %vm11375_vm0, %v13770_v41  ;;  %2814 = vst.msk [vmem:[#allocation2 + $0x80] ss:$8 sm:$0x3] %vm11375_vm0, %v13770_v41 }
 0x131   :  { %v11324_v19 = vadd.f32 %v11251_v32, %v1199_v6  ;;  %v1201_v24 = vadd.f32 %v1200_v12, %v11289_v49  ;;  %v11335_v32 = vpop.f32.mrf.mxu1  ;;  %6507 = vmatpush1.bf16.msra.mxu1 %v10172_v13  ;;  %v10181_v12 = vld [vmem:[#allocation5 + $0x1c0] ss:$16 sps:$4 sm:$0xff]   ;;  %2817 = vst.msk [vmem:[#allocation2 + $0xa0] ss:$8 sm:$0x3] %vm11375_vm0, %v13770_v41 }
 0x132   :  { %v1202_v28 = vpop.f32.mrf.mxu0  ;;  %2820 = vst.msk [vmem:[#allocation2 + $0xc0] ss:$8 sm:$0x3] %vm11375_vm0, %v13770_v41  ;;  %2823 = vst.msk [vmem:[#allocation2 + $0xe0] ss:$8 sm:$0x3] %vm11375_vm0, %v13770_v41 }
 0x133   :  { %v11330_v45 = vadd.f32 %v11255_v62, %v1201_v24  ;;  %v1203_v52 = vadd.f32 %v1202_v28, %v11282_v16  ;;  %v11341_v8 = vpop.f32.mrf.mxu1  ;;  %2826 = vst.msk [vmem:[#allocation2 + $0x17] ss:$8 sm:$0x3] %vm11375_vm0, %v13770_v41  ;;  %2829 = vst.msk [vmem:[#allocation2 + $0x37] ss:$8 sm:$0x3] %vm11375_vm0, %v13770_v41 }
 0x134   :  { %v11333_v7 = vpop.f32.mrf.mxu0  ;;  %2832 = vst.msk [vmem:[#allocation2 + $0x57] ss:$8 sm:$0x3] %vm11375_vm0, %v13770_v41  ;;  %2835 = vst.msk [vmem:[#allocation2 + $0x77] ss:$8 sm:$0x3] %vm11375_vm0, %v13770_v41 }
 0x135   :  { %v11338_v37 = vadd.f32 %v11260_v40, %v1203_v52  ;;  %v11345_v56 = vpop.f32.mrf.mxu1  ;;  %2838 = vst.msk [vmem:[#allocation2 + $0x97] ss:$8 sm:$0x3] %vm11375_vm0, %v13770_v41  ;;  %2841 = vst.msk [vmem:[#allocation2 + $0xb7] ss:$8 sm:$0x3] %vm11375_vm0, %v13770_v41 }
 0x136   :  { %v1208_v39 = vpop.f32.mrf.mxu0  ;;  %1826 = vmatmul.mubr.bf16.gmra.mxu0 %v11126_v57  ;;  %2844 = vst.msk [vmem:[#allocation2 + $0xd7] ss:$8 sm:$0x3] %vm11375_vm0, %v13770_v41  ;;  %2847 = vst.msk [vmem:[#allocation2 + $0xf7] ss:$8 sm:$0x3] %vm11375_vm0, %v13770_v41 }
 0x137   :  { %v1209_v62 = vadd.f32 %v1208_v39, %v11282_v16  ;;  %1835 = vmatprep.mubr.bf16.mxu0 %v10664_v0  ;;  %v11351_v55 = vpop.f32.mrf.mxu1  ;;  %v10189_v47 = vld [vmem:[#allocation5 + $0x1a4] ss:$16 sps:$4 sm:$0xff]  }
 0x138   :  { %v1210_v5 = vpop.f32.mrf.mxu0  ;;  %v10192_v13 = vld [vmem:[#allocation5 + $0x3e4] ss:$16 sps:$4 sm:$0xff]  }
 0x139   :  { %v11348_v4 = vadd.f32 %v11272_v23, %v1209_v62  ;;  %v1211_v40 = vadd.f32 %v1210_v5, %v11289_v49  ;;  %v11359_v30 = vpop.f32.mrf.mxu1  ;;  %v10177_v23 = vld [vmem:[#allocation5 + $0x1e4] ss:$16 sps:$4 sm:$0xff]  }
 0x13a   :  { %v1212_v57 = vpop.f32.mrf.mxu0  ;;  %6508 = vmatprep.subr.bf16.mxu1 %v10177_v23  ;;  %v10190_v23 = vld [vmem:[#allocation5 + $0x3e0] ss:$16 sps:$4 sm:$0xff]  }
 0x13b   :  { %v11354_v26 = vadd.f32 %v11277_v53, %v1211_v40  ;;  %v1213_v0 = vadd.f32 %v1212_v57, %v11282_v16  ;;  %v11365_v48 = vpop.f32.mrf.mxu1  ;;  %v10178_v53 = vld [vmem:[#allocation5 + $0x220] ss:$16 sps:$4 sm:$0xff]   ;;  %6509 = vmatpush2.bf16.msra.mxu1 %v10175_v59 }
 0x13c   :  { %v11357_v27 = vpop.f32.mrf.mxu0  ;;  %6608 = vmatpush1.bf16.msra.mxu0 %v10178_v53  ;;  %6510 = vmatprep.subr.bf16.mxu1 %v10183_v43  ;;  %v10187_v40 = vld [vmem:[#allocation5 + $0x1a0] ss:$16 sps:$4 sm:$0xff]   ;;  %v10195_v53 = vld [vmem:[#allocation5 + $0x184] ss:$16 sps:$4 sm:$0xff]  }
 0x13d   :  { %v11362_v22 = vadd.f32 %v11284_v34, %v1213_v0  ;;  %v11368_v2 = vpop.f32.mrf.mxu1  ;;  %v10198_v43 = vld [vmem:[#allocation5 + $0x3c4] ss:$16 sps:$4 sm:$0xff]  }
 0x13e   :  { %v1218_v35 = vpop.f32.mrf.mxu0  ;;  %1836 = vmatmul.mubr.bf16.gmra.mxu0 %v11157_v21  ;;  %v10186_v21 = vld [vmem:[#allocation5 + $0x204] ss:$16 sps:$4 sm:$0xff]  }
 0x13f   :  { %13821 = vst [vmem:[#allocation11_spill] sm:$0xff] %v11362_v22  ;;  %v1219_v50 = vadd.f32 %v1218_v35, %v11282_v16  ;;  %v11379_v51 = vpop.f32.mrf.mxu1  ;;  %6609 = vmatprep.subr.bf16.mxu0 %v10186_v21  ;;  %6511 = vmatpush2.bf16.msra.mxu1 %v10181_v12  ;;  %v10196_v12 = vld [vmem:[#allocation5 + $0x3c0] ss:$16 sps:$4 sm:$0xff]  }
 0x140   :  { %v1220_v61 = vpop.f32.mrf.mxu0  ;;  %6610 = vmatpush1.bf16.msra.mxu0 %v10184_v3  ;;  %6512 = vmatprep.subr.bf16.mxu1 %v10189_v47 }
 0x141   :  { %v11371_v34 = vadd.f32 %v11296_v29, %v1219_v50  ;;  %v1221_v6 = vadd.f32 %v1220_v61, %v11289_v49  ;;  %6611 = vmatprep.subr.bf16.mxu0 %v10192_v13  ;;  %v10193_v61 = vld [vmem:[#allocation5 + $0x180] ss:$16 sps:$4 sm:$0xff]  }
 0x142   :  { %v1222_v24 = vpop.f32.mrf.mxu0 }
 0x143   :  { %v11382_v28 = vadd.f32 %v11303_v46, %v1221_v6  ;;  %v1223_v29 = vadd.f32 %v1222_v24, %v11282_v16  ;;  %v11435_v46 = vpop.f32.mrf.mxu1  ;;  %6513 = vmatpush2.bf16.msra.mxu1 %v10187_v40  ;;  %v10201_v24 = vld [vmem:[#allocation5 + $0x164] ss:$16 sps:$4 sm:$0xff]  }
 0x144   :  { %v11433_v14 = vpop.f32.mrf.mxu0  ;;  %6612 = vmatpush2.bf16.msra.mxu0 %v10190_v23  ;;  %6514 = vmatprep.subr.bf16.mxu1 %v10195_v53  ;;  %v10205_v53 = vld [vmem:[#allocation5 + $0x140] ss:$16 sps:$4 sm:$0xff]  }
 0x145   :  { %13824 = vst [vmem:[#allocation12_spill] sm:$0xff] %v11382_v28  ;;  %v11438_v52 = vadd.f32 %v11311_v60, %v1223_v29  ;;  %v11440_v31 = vpop.f32.mrf.mxu1  ;;  %6613 = vmatprep.subr.bf16.mxu0 %v10198_v43 }
 0x146   :  { %v1228_v39 = vpop.f32.mrf.mxu0 }
 0x147   :  { %v1229_v62 = vadd.f32 %v1228_v39, %v11282_v16  ;;  %v11443_v18 = vpop.f32.mrf.mxu1  ;;  %6515 = vmatpush2.bf16.msra.mxu1 %v10193_v61  ;;  %v10199_v39 = vld [vmem:[#allocation5 + $0x160] ss:$16 sps:$4 sm:$0xff]   ;;  %v10210_v61 = vld [vmem:[#allocation5 + $0x384] ss:$16 sps:$4 sm:$0xff]  }
 0x148   :  { %v1230_v5 = vpop.f32.mrf.mxu0  ;;  %6614 = vmatpush2.bf16.msra.mxu0 %v10196_v12  ;;  %6516 = vmatprep.subr.bf16.mxu1 %v10201_v24  ;;  %v10208_v12 = vld [vmem:[#allocation5 + $0x380] ss:$16 sps:$4 sm:$0xff]  }
 0x149   :  { %v11446_v57 = vadd.f32 %v11321_v15, %v1229_v62  ;;  %v1231_v0 = vadd.f32 %v1230_v5, %v11289_v49  ;;  %v11449_v59 = vpop.f32.mrf.mxu1  ;;  %v10204_v62 = vld [vmem:[#allocation5 + $0x3a4] ss:$16 sps:$4 sm:$0xff]   ;;  %v10202_v5 = vld [vmem:[#allocation5 + $0x3a0] ss:$16 sps:$4 sm:$0xff]  }
 0x14a   :  { %v1232_v60 = vpop.f32.mrf.mxu0  ;;  %6615 = vmatprep.subr.bf16.mxu0 %v10204_v62 }
 0x14b   :  { %v11452_v44 = vadd.f32 %v11327_v20, %v1231_v0  ;;  %v1233_v35 = vadd.f32 %v1232_v60, %v11282_v16  ;;  %v11457_v15 = vpop.f32.mrf.mxu1  ;;  %6517 = vmatpush2.bf16.msra.mxu1 %v10199_v39  ;;  %v10207_v60 = vld [vmem:[#allocation5 + $0x144] ss:$16 sps:$4 sm:$0xff]  }
 0x14c   :  { %v11455_v50 = vpop.f32.mrf.mxu0  ;;  %6616 = vmatpush2.bf16.msra.mxu0 %v10202_v5  ;;  %6518 = vmatprep.subr.bf16.mxu1 %v10207_v60 }
 0x14d   :  { %v11460_v6 = vadd.f32 %v11335_v32, %v1233_v35  ;;  %v11462_v54 = vpop.f32.mrf.mxu1  ;;  %6617 = vmatprep.subr.bf16.mxu0 %v10210_v61 }
 0x14e   :  { %v1238_v21 = vpop.f32.mrf.mxu0 }
 0x14f   :  { %13825 = vst [vmem:[#allocation13_spill] sm:$0xff] %v11460_v6  ;;  %v1239_v20 = vadd.f32 %v1238_v21, %v11282_v16  ;;  %v11465_v29 = vpop.f32.mrf.mxu1  ;;  %6519 = vmatpush2.bf16.msra.mxu1 %v10205_v53  ;;  %v10213_v53 = vld [vmem:[#allocation5 + $0x124] ss:$16 sps:$4 sm:$0xff]  }
 0x150   :  { %v1240_v3 = vpop.f32.mrf.mxu0  ;;  %6618 = vmatpush2.bf16.msra.mxu0 %v10208_v12  ;;  %v10211_v12 = vld [vmem:[#allocation5 + $0x120] ss:$16 sps:$4 sm:$0xff]   ;;  %6520 = vmatprep.subr.bf16.mxu1 %v10213_v53 }
 0x151   :  { %v11468_v47 = vadd.f32 %v11345_v56, %v1239_v20  ;;  %v1241_v32 = vadd.f32 %v1240_v3, %v11289_v49  ;;  %v11471_v13 = vpop.f32.mrf.mxu1  ;;  %v10220_v53 = vld [vmem:[#allocation5 + $0x340] ss:$16 sps:$4 sm:$0xff]  }
 0x152   :  { %v1242_v40 = vpop.f32.mrf.mxu0 }
 0x153   :  { %13826 = vst [vmem:[#allocation14_spill] sm:$0xff] %v11468_v47  ;;  %v11474_v0 = vadd.f32 %v11351_v55, %v1241_v32  ;;  %v1243_v23 = vadd.f32 %v1242_v40, %v11282_v16  ;;  %v11479_v56 = vpop.f32.mrf.mxu1  ;;  %6521 = vmatpush2.bf16.msra.mxu1 %v10211_v12 }
 0x154   :  { %v11477_v35 = vpop.f32.mrf.mxu0 }
 0x155   :  { %13827 = vst [vmem:[#allocation15_spill] sm:$0xff] %v11474_v0  ;;  %v11482_v43 = vadd.f32 %v11359_v30, %v1243_v23  ;;  %v11484_v20 = vpop.f32.mrf.mxu1 }
 0x156   :  { %v1248_v21 = vpop.f32.mrf.mxu0  ;;  %13829 = vst [vmem:[#allocation17_spill] sm:$0xff] %v11484_v20 }
 0x157   :  { %13828 = vst [vmem:[#allocation16_spill] sm:$0xff] %v11482_v43  ;;  %v1249_v55 = vadd.f32 %v1248_v21, %v11282_v16  ;;  %v1451_v3 = vpop.f32.mrf.mxu1  ;;  %v10216_v21 = vld [vmem:[#allocation5 + $0x364] ss:$16 sps:$4 sm:$0xff]  }
 0x158   :  { %v1250_v24 = vpop.f32.mrf.mxu0  ;;  %6619 = vmatprep.subr.bf16.mxu0 %v10216_v21 }
 0x159   :  { %v11488_v39 = vadd.f32 %v11368_v2, %v1249_v55  ;;  %v1251_v62 = vadd.f32 %v1250_v24, %v11289_v49  ;;  %v1453_v30 = vpop.f32.mrf.mxu1  ;;  %v10214_v24 = vld [vmem:[#allocation5 + $0x360] ss:$16 sps:$4 sm:$0xff]  }
 0x15a   :  { %v1252_v32 = vpop.f32.mrf.mxu0  ;;  %6620 = vmatpush2.bf16.msra.mxu0 %v10214_v24 }
 0x15b   :  { %13830 = vst [vmem:[#allocation18_spill] sm:$0xff] %v11488_v39  ;;  %v11492_v5 = vadd.f32 %v11379_v51, %v1251_v62  ;;  %v1253_v40 = vadd.f32 %v1252_v32, %v11282_v16  ;;  %v1455_v60 = vpop.f32.mrf.mxu1  ;;  %v10219_v32 = vld [vmem:[#allocation5 + $0x104] ss:$16 sps:$4 sm:$0xff]   ;;  %6621 = vmatprep.subr.bf16.mxu0 %v10222_v9 }
 0x15c   :  { %v11495_v23 = vpop.f32.mrf.mxu0  ;;  %6522 = vmatprep.subr.bf16.mxu1 %v10219_v32 }
 0x15d   :  { %13831 = vst [vmem:[#allocation19_spill] sm:$0xff] %v11492_v5  ;;  %v11498_v61 = vadd.f32 %v11435_v46, %v1253_v40  ;;  %v11500_v55 = vpop.f32.mrf.mxu1  ;;  %v10217_v40 = vld [vmem:[#allocation5 + $0x100] ss:$16 sps:$4 sm:$0xff]  }
 0x15e   :  { %v1258_v2 = vpop.f32.mrf.mxu0  ;;  %13833 = vst [vmem:[#allocation21_spill] sm:$0xff] %v11500_v55  ;;  %6523 = vmatpush2.bf16.msra.mxu1 %v10217_v40  ;;  %6622 = vmatpush2.bf16.msra.mxu0 %v10220_v53 }
 0x15f   :  { %13832 = vst [vmem:[#allocation20_spill] sm:$0xff] %v11498_v61  ;;  %v1259_v41 = vadd.f32 %v1258_v2, %v11282_v16  ;;  %v1461_v62 = vpop.f32.mrf.mxu1 }
 0x160   :  { %v1260_v51 = vpop.f32.mrf.mxu0 }
 0x161   :  { %v11504_v25 = vadd.f32 %v11443_v18, %v1259_v41  ;;  %v1261_v46 = vadd.f32 %v1260_v51, %v11289_v49  ;;  %v1463_v20 = vpop.f32.mrf.mxu1 }
 0x162   :  { %v1262_v61 = vpop.f32.mrf.mxu0 }
 0x163   :  { %13834 = vst [vmem:[#allocation22_spill] sm:$0xff] %v11504_v25  ;;  %v11508_v55 = vadd.f32 %v11449_v59, %v1261_v46  ;;  %v1263_v12 = vadd.f32 %v1262_v61, %v11282_v16  ;;  %v1465_v2 = vpop.f32.mrf.mxu1 }
 0x164   :  { %v11511_v21 = vpop.f32.mrf.mxu0 }
 0x165   :  { %13835 = vst [vmem:[#allocation23_spill] sm:$0xff] %v11508_v55  ;;  %v11514_v41 = vadd.f32 %v11457_v15, %v1263_v12  ;;  %v11516_v24 = vpop.f32.mrf.mxu1 }
 0x166   :  { %v1268_v18 = vpop.f32.mrf.mxu0  ;;  %13837 = vst [vmem:[#allocation25_spill] sm:$0xff] %v11516_v24 }
 0x167   :  { %13836 = vst [vmem:[#allocation24_spill] sm:$0xff] %v11514_v41  ;;  %v1269_v51 = vadd.f32 %v1268_v18, %v11282_v16  ;;  %v1471_v25 = vpop.f32.mrf.mxu1 }
 0x168   :  { %v1270_v32 = vpop.f32.mrf.mxu0 }
 0x169   :  { %v11520_v59 = vadd.f32 %v11465_v29, %v1269_v51  ;;  %v1271_v9 = vadd.f32 %v1270_v32, %v11289_v49  ;;  %v11523_v46 = vpop.f32.mrf.mxu1 }
 0x16a   :  { %v1272_v61 = vpop.f32.mrf.mxu0 }
 0x16b   :  { %13838 = vst [vmem:[#allocation26_spill] sm:$0xff] %v11520_v59  ;;  %v11526_v40 = vadd.f32 %v11471_v13, %v1271_v9  ;;  %v1273_v15 = vadd.f32 %v1272_v61, %v11282_v16  ;;  %v11531_v12 = vpop.f32.mrf.mxu1 }
 0x16c   :  { %v11529_v53 = vpop.f32.mrf.mxu0 }
 0x16d   :  { %13839 = vst [vmem:[#allocation27_spill] sm:$0xff] %v11526_v40  ;;  %v11534_v18 = vadd.f32 %v11479_v56, %v1273_v15  ;;  %v11536_v29 = vpop.f32.mrf.mxu1 }
 0x16e   :  { %v1278_v24 = vpop.f32.mrf.mxu0  ;;  %13841 = vst [vmem:[#allocation29_spill] sm:$0xff] %v11536_v29 }
 0x16f   :  { %13840 = vst [vmem:[#allocation28_spill] sm:$0xff] %v11534_v18  ;;  %v1279_v51 = vadd.f32 %v1278_v24, %v11282_v16  ;;  %v11539_v59 = vpop.f32.mrf.mxu1 }
 0x170   :  { %v1280_v32 = vpop.f32.mrf.mxu0 }
 0x171   :  { %v11541_v41 = vadd.f32 %v1451_v3, %v1279_v51  ;;  %v1281_v13 = vadd.f32 %v1280_v32, %v11289_v49  ;;  %v11544_v61 = vpop.f32.mrf.mxu1  ;;  %v10666_v32 = vmov 1966171168  }
 0x172   :  { %v1282_v9 = vpop.f32.mrf.mxu0 }
 0x173   :  { %13842 = vst [vmem:[#allocation30_spill] sm:$0xff] %v11541_v41  ;;  %v11546_v40 = vadd.f32 %v1453_v30, %v1281_v13  ;;  %v1283_v56 = vadd.f32 %v1282_v9, %v11282_v16  ;;  %v11551_v18 = vpop.f32.mrf.mxu1  ;;  %v2183_v41 = vunpack.c.l.s4 %v10666_v32  ;;  %v10667_v9 = vmov 1983009808  }
 0x174   :  { %v11549_v15 = vpop.f32.mrf.mxu0  ;;  %13844 = vst [vmem:[#allocation32_spill] sm:$0xff] %v11551_v18 }
 0x175   :  { %13843 = vst [vmem:[#allocation31_spill] sm:$0xff] %v11546_v40  ;;  %v11553_v29 = vadd.f32 %v1455_v60, %v1283_v56  ;;  %v11555_v55 = vpop.f32.mrf.mxu1  ;;  %v2908_v40 = vunpack.c.l.s4 %v10667_v9  ;;  %v2184_v32 = vunpack.c.0.s8 %v2183_v41  ;;  %v1205_v9 = vadd.f32 %v11333_v7, %v11289_v49 }
 0x176   :  { %v1288_v24 = vpop.f32.mrf.mxu0  ;;  %13846 = vst [vmem:[#allocation34_spill] sm:$0xff] %v11555_v55  ;;  %v1215_v41 = vadd.f32 %v11357_v27, %v11289_v49  ;;  %v13853_v27 = vsub.s32 2, %v11258_v1 }
 0x177   :  { %13845 = vst [vmem:[#allocation33_spill] sm:$0xff] %v11553_v29  ;;  %v1289_v3 = vadd.f32 %v1288_v24, %v11282_v16  ;;  %v11558_v5 = vpop.f32.mrf.mxu1  ;;  %v1195_v24 = vadd.f32 %v11309_v58, %v11289_v49  ;;  %v10234_v58 = vld [vmem:[#allocation5 + $0x324] ss:$16 sps:$4 sm:$0xff]  }
 0x178   :  { %v1290_v51 = vpop.f32.mrf.mxu0  ;;  %6623 = vmatprep.subr.bf16.mxu0 %v10234_v58 }
 0x179   :  { %v11560_v30 = vadd.f32 %v1461_v62, %v1289_v3  ;;  %v1291_v13 = vadd.f32 %v1290_v51, %v11289_v49  ;;  %v11563_v18 = vpop.f32.mrf.mxu1  ;;  %v2909_v51 = vunpack.c.0.s8 %v2908_v40  ;;  %v11589_v40 = vsub.s32 %v2184_v32, %v11258_v1 }
 0x17a   :  { %v1292_v39 = vpop.f32.mrf.mxu0  ;;  %v13854_v32 = vsub.s32 3, %v11258_v1 }
 0x17b   :  { %v11565_v60 = vadd.f32 %v1463_v20, %v1291_v13  ;;  %v1293_v56 = vadd.f32 %v1292_v39, %v11282_v16  ;;  %v11572_v29 = vpop.f32.mrf.mxu1  ;;  %13850 = vst [vmem:[#allocation38_spill] sm:$0xff] %v11589_v40 }
 0x17c   :  { %v11570_v55 = vpop.f32.mrf.mxu0  ;;  %13848 = vst [vmem:[#allocation36_spill] sm:$0xff] %v11572_v29 }
 0x17d   :  { %13847 = vst [vmem:[#allocation35_spill] sm:$0xff] %v11565_v60  ;;  %v11574_v62 = vadd.f32 %v1465_v2, %v1293_v56  ;;  %v11580_v39 = vpop.f32.mrf.mxu1  ;;  %v10232_v60 = vld [vmem:[#allocation5 + $0x320] ss:$16 sps:$4 sm:$0xff]   ;;  %v11586_v2 = vadd.f32 %v11248_v11, %v1195_v24  ;;  %v11606_v24 = vadd.f32 %v11263_v63, %v1205_v9 }
 0x17e   :  { %v1298_v20 = vpop.f32.mrf.mxu0  ;;  %13849 = vst [vmem:[#allocation37_spill] sm:$0xff] %v11580_v39  ;;  %v11597_v39 = vsub.s32 %v2909_v51, %v11258_v1  ;;  %6624 = vmatpush2.bf16.msra.mxu0 %v10232_v60  ;;  %v11613_v51 = vrot.slane %v11270_v17, %v13854_v32  ;;  %v11619_v60 = vadd.f32 %v11292_v10, %v1215_v41 }
 0x17f   :  { %v1299_v29 = vadd.f32 %v1298_v20, %v11282_v16  ;;  %v11591_v7 = vpop.f32.mrf.mxu1  ;;  %v11602_v20 = vrot.slane %v11270_v17, %v13853_v27  ;;  %v1235_v17 = vadd.f32 %v11455_v50, %v11289_v49  ;;  %v1275_v50 = vadd.f32 %v11529_v53, %v11289_v49  ;;  %v13879_v53 = vld [vmem:[#allocation33_spill] sm:$0xff] }
 0x180   :  { %v1300_v56 = vpop.f32.mrf.mxu0  ;;  %13852 = vst [vmem:[#allocation40_spill] sm:$0xff] %v11597_v39 }
 0x181   :  { %v11593_v13 = vadd.f32 %v1471_v25, %v1299_v29  ;;  %v1301_v3 = vadd.f32 %v1300_v56, %v11289_v49  ;;  %v1225_v25 = vadd.f32 %v11433_v14, %v11289_v49  ;;  %v11615_v58 = vpop.f32.mrf.mxu1 }
 0x182   :  { %v1302_v29 = vpop.f32.mrf.mxu0 }
 0x183   :  { %13851 = vst [vmem:[#allocation39_spill] sm:$0xff] %v11593_v13  ;;  %v11622_v27 = vadd.f32 %v11523_v46, %v1301_v3  ;;  %v1303_v63 = vadd.f32 %v1302_v29, %v11282_v16  ;;  %v11632_v56 = vpop.f32.mrf.mxu1  ;;  %v1245_v3 = vadd.f32 %v11477_v35, %v11289_v49  ;;  %v11645_v9 = vadd.f32 %v11317_v42, %v1225_v25  ;;  %v10237_v29 = vld [vmem:[#allocation5 + $0x304] ss:$16 sps:$4 sm:$0xff]  }
 0x184   :  { %v11630_v32 = vpop.f32.mrf.mxu0  ;;  %v1255_v35 = vadd.f32 %v11495_v23, %v11289_v49  ;;  %v11657_v42 = vadd.f32 %v11341_v8, %v1235_v17  ;;  %v1265_v25 = vadd.f32 %v11511_v21, %v11289_v49  ;;  %6625 = vmatprep.subr.bf16.mxu0 %v10237_v29  ;;  %v13864_v8 = vld [vmem:[#allocation17_spill] sm:$0xff]  ;;  %v13881_v6 = vld [vmem:[#allocation35_spill] sm:$0xff] }
 0x185   :  { %13855 = vst [vmem:[#allocation41_spill] sm:$0xff] %v11622_v27  ;;  %v11639_v41 = vadd.f32 %v11531_v12, %v1303_v63  ;;  %v11647_v1 = vpop.f32.mrf.mxu1  ;;  %v10235_v63 = vld [vmem:[#allocation5 + $0x300] ss:$16 sps:$4 sm:$0xff]   ;;  %v11665_v23 = vadd.f32 %v11365_v48, %v1245_v3 }
 0x186   :  { %v1308_v14 = vpop.f32.mrf.mxu0  ;;  %13856 = vst [vmem:[#allocation42_spill] sm:$0xff] %v11657_v42  ;;  %6626 = vmatpush2.bf16.msra.mxu0 %v10235_v63  ;;  %v11690_v21 = vadd.f32 %v11462_v54, %v1265_v25  ;;  %v11704_v54 = vadd.f32 %v13864_v8, %v1275_v50  ;;  %v1295_v25 = vadd.f32 %v11570_v55, %v11289_v49  ;;  %v13880_v50 = vld [vmem:[#allocation29_spill] sm:$0xff] }
 0x187   :  { %v1309_v12 = vadd.f32 %v1308_v14, %v11282_v16  ;;  %v11661_v22 = vpop.f32.mrf.mxu1  ;;  %13857 = vst [vmem:[#allocation43_spill] sm:$0xff] %v11665_v23  ;;  %v1305_v55 = vadd.f32 %v11630_v32, %v11289_v49  ;;  %v13871_v23 = vld [vmem:[#allocation21_spill] sm:$0xff] }
 0x188   :  { %v1310_v46 = vpop.f32.mrf.mxu0  ;;  %13859 = vst [vmem:[#allocation45_spill] sm:$0xff] %v11690_v21  ;;  %13865 = vst [vmem:[#allocation17_spill] sm:$0xff] %v11704_v54  ;;  %v13875_v21 = vld [vmem:[#allocation25_spill] sm:$0xff] }
 0x189   :  { %v11668_v14 = vadd.f32 %v11539_v59, %v1309_v12  ;;  %v1311_v11 = vadd.f32 %v1310_v46, %v11289_v49  ;;  %v11676_v10 = vpop.f32.mrf.mxu1  ;;  %v11680_v59 = vadd.f32 %v11440_v31, %v1255_v35  ;;  %v11731_v32 = vadd.f32 %v13875_v21, %v1295_v25 }
 0x18a   :  { %v1312_v28 = vpop.f32.mrf.mxu0  ;;  %v11743_v54 = vadd.f32 %v13880_v50, %v1305_v55 }
 0x18b   :  { %v11683_v46 = vadd.f32 %v11544_v61, %v1311_v11  ;;  %v1313_v3 = vadd.f32 %v1312_v28, %v11282_v16  ;;  %v11692_v17 = vpop.f32.mrf.mxu1  ;;  %v1285_v61 = vadd.f32 %v11549_v15, %v11289_v49  ;;  %v13860_v28 = vld [vmem:[#allocation32_spill] sm:$0xff] }
 0x18c   :  { %v1314_v63 = vpop.f32.mrf.mxu0 }
 0x18d   :  { %13858 = vst [vmem:[#allocation44_spill] sm:$0xff] %v11683_v46  ;;  %v11699_v11 = vadd.f32 %v13860_v28, %v1313_v3  ;;  %v11708_v31 = vpop.f32.mrf.mxu1  ;;  %v11721_v35 = vadd.f32 %v13871_v23, %v1285_v61  ;;  %v1535_v23 = vadd.f32 %v11591_v7, %v11602_v20  ;;  %v1315_v21 = vadd.f32 %v1314_v63, %v11289_v49 }
 0x18e   :  { %v1318_v0 = vpop.f32.mrf.mxu0  ;;  %v1537_v63 = vadd.f32 %v11615_v58, %v11613_v51  ;;  %v1539_v7 = vadd.f32 %v11632_v56, %v11602_v20  ;;  %v1541_v58 = vadd.f32 %v11647_v1, %v11613_v51  ;;  %v1545_v56 = vadd.f32 %v11661_v22, %v11602_v20 }
 0x18f   :  { %13861 = vst [vmem:[#allocation32_spill] sm:$0xff] %v11699_v11  ;;  %v1319_v28 = vadd.f32 %v1318_v0, %v11282_v16  ;;  %v1554_v47 = vpop.f32.mrf.mxu1  ;;  %v1549_v1 = vadd.f32 %v11692_v17, %v11602_v20  ;;  %v1551_v22 = vadd.f32 %v11708_v31, %v11613_v51  ;;  %v13888_v11 = vmax.f32 %v11300_v38, 0.0 }
 0x190   :  { %v1320_v8 = vpop.f32.mrf.mxu0  ;;  %v13891_v38 = vmax.f32 %v11586_v2, 0.0  ;;  %v13892_v2 = vmax.f32 %v11324_v19, 0.0 }
 0x191   :  { %v11724_v3 = vadd.f32 %v11558_v5, %v1319_v28  ;;  %v1321_v0 = vadd.f32 %v1320_v8, %v11289_v49  ;;  %v1556_v43 = vpop.f32.mrf.mxu1  ;;  %v13878_v28 = vld [vmem:[#allocation31_spill] sm:$0xff] }
 0x192   :  { %v1322_v12 = vpop.f32.mrf.mxu0 }
 0x193   :  { %13872 = vst [vmem:[#allocation21_spill] sm:$0xff] %v11724_v3  ;;  %v11737_v5 = vadd.f32 %v11563_v18, %v1321_v0  ;;  %v1323_v61 = vadd.f32 %v1322_v12, %v11282_v16  ;;  %v1558_v48 = vpop.f32.mrf.mxu1  ;;  %v13882_v0 = vld [vmem:[#allocation36_spill] sm:$0xff]  ;;  %v13884_v12 = vld [vmem:[#allocation34_spill] sm:$0xff]  ;;  %v13886_v16 = vld [vmem:[#allocation37_spill] sm:$0xff] }
 0x194   :  { %v1324_v25 = vpop.f32.mrf.mxu0  ;;  %v11764_v8 = vadd.f32 %v13884_v12, %v1315_v21  ;;  %v1547_v21 = vadd.f32 %v11676_v10, %v11613_v51  ;;  %v1555_v10 = vadd.f32 %v1554_v47, %v11602_v20  ;;  %v11795_v3 = vadd.f32 %v1558_v48, %v11602_v20 }
 0x195   :  { %13877 = vst [vmem:[#allocation25_spill] sm:$0xff] %v11737_v5  ;;  %v11750_v29 = vadd.f32 %v13882_v0, %v1323_v61  ;;  %v1560_v15 = vpop.f32.mrf.mxu1  ;;  %v1325_v18 = vadd.f32 %v1324_v25, %v11289_v49  ;;  %v13893_v5 = vmax.f32 %v11330_v45, 0.0 }
 0x196   :  { %v1707_v55 = vpop.f32.mrf.mxu0  ;;  %13885 = vst [vmem:[#allocation33_spill] sm:$0xff] %v11764_v8  ;;  %v11798_v47 = vadd.f32 %v1560_v15, %v11613_v51 }
 0x197   :  { %13883 = vst [vmem:[#allocation31_spill] sm:$0xff] %v11750_v29  ;;  %v1708_v61 = vadd.f32 %v1707_v55, %v1535_v23  ;;  %v1564_v13 = vpop.f32.mrf.mxu1  ;;  %v11778_v0 = vadd.f32 %v13886_v16, %v1325_v18  ;;  %v11786_v23 = vadd.f32 %v1556_v43, %v11613_v51  ;;  %v13889_v16 = vmax.f32 %v11306_v33, 0.0 }
 0x198   :  { %v1709_v50 = vpop.f32.mrf.mxu0 }
 0x199   :  { %v1848_v27 = vmax.f32 %v1708_v61, 0.0  ;;  %v1710_v49 = vadd.f32 %v1709_v50, %v1537_v63  ;;  %v1566_v55 = vpop.f32.mrf.mxu1  ;;  %13887 = vst [vmem:[#allocation29_spill] sm:$0xff] %v11778_v0 }
 0x19a   :  { %v1711_v12 = vpop.f32.mrf.mxu0  ;;  %v11807_v48 = vadd.f32 %v1566_v55, %v11613_v51 }
 0x19b   :  { %v1849_v61 = vmax.f32 %v1710_v49, 0.0  ;;  %v1712_v42 = vadd.f32 %v1711_v12, %v1539_v7  ;;  %v1568_v17 = vpop.f32.mrf.mxu1  ;;  %v1958_v18 = vmax.f32 %v13888_v11, %v1848_v27 }
 0x19c   :  { %v1713_v25 = vpop.f32.mrf.mxu0 }
 0x19d   :  { %v1959_v7 = vmax.f32 %v13889_v16, %v1849_v61  ;;  %v1852_v49 = vmax.f32 %v1712_v42, 0.0  ;;  %v1714_v12 = vadd.f32 %v1713_v25, %v1541_v58  ;;  %v1570_v43 = vpop.f32.mrf.mxu1  ;;  %v13890_v42 = vmax.f32 %v11314_v36, 0.0 }
 0x19e   :  { %v1717_v63 = vpop.f32.mrf.mxu0  ;;  %v11804_v16 = vadd.f32 %v1564_v13, %v11602_v20  ;;  %v11817_v13 = vadd.f32 %v1570_v43, %v11613_v51 }
 0x19f   :  { %v2070_v27 = vcombine.low %v1958_v18, %v1959_v7  ;;  %v2071_v11 = vcombine.high %v1958_v18, %v1959_v7  ;;  %v1853_v33 = vmax.f32 %v1714_v12, 0.0  ;;  %v1960_v58 = vmax.f32 %v13890_v42, %v1852_v49  ;;  %v1574_v50 = vpop.f32.mrf.mxu1 }
 0x1a0   :  { %v1718_v25 = vadd.f32 %v1717_v63, %v1545_v56  ;;  %v1719_v61 = vpop.f32.mrf.mxu0  ;;  %v11814_v56 = vadd.f32 %v1568_v17, %v11602_v20  ;;  %v11820_v55 = vadd.f32 %v1574_v50, %v11602_v20 }
 0x1a1   :  { %v2188_v15 = vrot.slane %v2070_v27, %v11589_v40  ;;  %v2195_v31 = vrot.slane %v2071_v11, %v11589_v40  ;;  %v1961_v18 = vmax.f32 %v13891_v38, %v1853_v33  ;;  %v1720_v7 = vadd.f32 %v1719_v61, %v1547_v21  ;;  %v1576_v63 = vpop.f32.mrf.mxu1 }
 0x1a2   :  { %v1856_v12 = vmax.f32 %v1718_v25, 0.0  ;;  %v1721_v36 = vpop.f32.mrf.mxu0  ;;  %v11825_v17 = vadd.f32 %v1576_v63, %v11613_v51 }
 0x1a3   :  { %v2630_v49 = vrot.slane %v2188_v15, 4  ;;  %v2631_v27 = vrot.slane %v2195_v31, 4  ;;  %v2072_v42 = vcombine.low %v1960_v58, %v1961_v18  ;;  %v2073_v11 = vcombine.high %v1960_v58, %v1961_v18  ;;  %v1578_v61 = vpop.f32.mrf.mxu1 }
 0x1a4   :  { %v1962_v38 = vmax.f32 %v13892_v2, %v1856_v12  ;;  %v1857_v21 = vmax.f32 %v1720_v7, 0.0  ;;  %v1722_v33 = vadd.f32 %v1721_v36, %v1549_v1  ;;  %v1723_v25 = vpop.f32.mrf.mxu0  ;;  %v11832_v7 = vadd.f32 %v1578_v61, %v11602_v20 }
 0x1a5   :  { %v2742_v43 = vmax.f32 %v2188_v15, %v2630_v49  ;;  %v2743_v0 = vmax.f32 %v2195_v31, %v2631_v27  ;;  %v2202_v50 = vrot.slane %v2072_v42, %v11589_v40  ;;  %v2209_v29 = vrot.slane %v2073_v11, %v11589_v40  ;;  %v1580_v1 = vpop.f32.mrf.mxu1 }
 0x1a6   :  { %v1963_v8 = vmax.f32 %v13893_v5, %v1857_v21  ;;  %v1860_v58 = vmax.f32 %v1722_v33, 0.0  ;;  %v1724_v18 = vadd.f32 %v1723_v25, %v1551_v22  ;;  %v1727_v19 = vpop.f32.mrf.mxu0  ;;  %v13894_v49 = vmax.f32 %v11338_v37, 0.0 }
 0x1a7   :  { %v2905_v12 = vcombine.low %v2742_v43, %v2743_v0  ;;  %v2632_v36 = vrot.slane %v2202_v50, 4  ;;  %v2633_v63 = vrot.slane %v2209_v29, 4  ;;  %v1728_v2 = vadd.f32 %v1727_v19, %v1555_v10  ;;  %v11836_v45 = vpop.f32.mrf.mxu1 }
 0x1a8   :  { %v2074_v15 = vcombine.low %v1962_v38, %v1963_v8  ;;  %v2075_v31 = vcombine.high %v1962_v38, %v1963_v8  ;;  %v1964_v27 = vmax.f32 %v13894_v49, %v1860_v58  ;;  %v1861_v42 = vmax.f32 %v1724_v18, 0.0  ;;  %v1729_v11 = vpop.f32.mrf.mxu0 }
 0x1a9   :  { %v2913_v5 = vrot.slane %v2905_v12, %v11597_v39  ;;  %v2744_v22 = vmax.f32 %v2202_v50, %v2632_v36  ;;  %v2745_v21 = vmax.f32 %v2209_v29, %v2633_v63  ;;  %v1864_v33 = vmax.f32 %v1728_v2, 0.0  ;;  %v11844_v38 = vpop.f32.mrf.mxu1 }
 0x1aa   :  { %v2216_v25 = vrot.slane %v2074_v15, %v11589_v40  ;;  %v2223_v0 = vrot.slane %v2075_v31, %v11589_v40  ;;  %v13895_v10 = vmax.f32 %v11606_v24, 0.0  ;;  %v1730_v8 = vadd.f32 %v1729_v11, %v11786_v23  ;;  %v1731_v37 = vpop.f32.mrf.mxu0 }
 0x1ab   :  { %v2906_v43 = vcombine.low %v2744_v22, %v2745_v21  ;;  %v13896_v58 = vmax.f32 %v11348_v4, 0.0  ;;  %v1732_v50 = vadd.f32 %v1731_v37, %v11795_v3  ;;  %v11850_v29 = vadd.f32 %v1580_v1, %v11613_v51  ;;  %v11852_v2 = vpop.f32.mrf.mxu1 }
 0x1ac   :  { %v1965_v61 = vmax.f32 %v13895_v10, %v1861_v42  ;;  %v2634_v19 = vrot.slane %v2216_v25, 4  ;;  %v2635_v12 = vrot.slane %v2223_v0, 4  ;;  %v1733_v24 = vpop.f32.mrf.mxu0  ;;  %v1865_v15 = vmax.f32 %v1730_v8, 0.0 }
 0x1ad   :  { %v1966_v18 = vmax.f32 %v13896_v58, %v1864_v33  ;;  %v2920_v23 = vrot.slane %v2906_v43, %v11597_v39  ;;  %v1868_v31 = vmax.f32 %v1732_v50, 0.0  ;;  %v1734_v49 = vadd.f32 %v1733_v24, %v11798_v47  ;;  %v11858_v22 = vpop.f32.mrf.mxu1 }
 0x1ae   :  { %v2076_v36 = vcombine.low %v1964_v27, %v1965_v61  ;;  %v2077_v63 = vcombine.high %v1964_v27, %v1965_v61  ;;  %v2746_v4 = vmax.f32 %v2216_v25, %v2634_v19  ;;  %v2747_v42 = vmax.f32 %v2223_v0, %v2635_v12  ;;  %v1737_v11 = vpop.f32.mrf.mxu0  ;;  %v13898_v61 = vld [vmem:[#allocation11_spill] sm:$0xff] }
 0x1af   :  { %v2921_v21 = vcombine.low %v2913_v5, %v2920_v23  ;;  %v2922_v27 = vcombine.high %v2913_v5, %v2920_v23  ;;  %v13897_v33 = vmax.f32 %v11354_v26, 0.0  ;;  %v13899_v8 = vmax.f32 %v13898_v61, 0.0  ;;  %v11864_v50 = vpop.f32.mrf.mxu1 }
 0x1b0   :  { %v2230_v3 = vrot.slane %v2076_v36, %v11589_v40  ;;  %v2237_v1 = vrot.slane %v2077_v63, %v11589_v40  ;;  %v2923_v43 = vcombine.low %v2746_v4, %v2747_v42  ;;  %v1869_v0 = vmax.f32 %v1734_v49, 0.0  ;;  %v1739_v58 = vpop.f32.mrf.mxu0 }
 0x1b1   :  { %v1967_v10 = vmax.f32 %v13897_v33, %v1865_v15  ;;  %v1968_v37 = vmax.f32 %v13899_v8, %v1868_v31  ;;  %v3186_v19 = vrot.slane %v2921_v21, 7  ;;  %v3187_v12 = vrot.slane %v2922_v27, 7  ;;  %v11873_v21 = vpop.f32.mrf.mxu1 }
 0x1b2   :  { %v2636_v47 = vrot.slane %v2230_v3, 4  ;;  %v2637_v25 = vrot.slane %v2237_v1, 4  ;;  %v2930_v5 = vrot.slane %v2923_v43, %v11597_v39  ;;  %v13900_v26 = vmax.f32 %v11619_v60, 0.0  ;;  %v1741_v33 = vpop.f32.mrf.mxu0 }
 0x1b3   :  { %v2078_v36 = vcombine.low %v1966_v18, %v1967_v10  ;;  %v2079_v63 = vcombine.high %v1966_v18, %v1967_v10  ;;  %3266 = vst [vmem:[#allocation2] sm:$0xfe] %v3186_v19  ;;  %3267 = vst [vmem:[#allocation2 + $0x8] sm:$0xfe] %v3187_v12  ;;  %v1738_v4 = vadd.f32 %v1737_v11, %v11804_v16 }
 0x1b4   :  { %v2748_v24 = vmax.f32 %v2230_v3, %v2636_v47  ;;  %v2749_v23 = vmax.f32 %v2237_v1, %v2637_v25  ;;  %v1969_v15 = vmax.f32 %v13900_v26, %v1869_v0  ;;  %v1740_v42 = vadd.f32 %v1739_v58, %v11807_v48  ;;  %v1743_v27 = vpop.f32.mrf.mxu0  ;;  %v11883_v26 = vpop.f32.mrf.mxu1 }
 0x1b5   :  { %v2244_v31 = vrot.slane %v2078_v36, %v11589_v40  ;;  %v2251_v49 = vrot.slane %v2079_v63, %v11589_v40  ;;  %v1742_v60 = vadd.f32 %v1741_v33, %v11814_v56  ;;  %v1872_v8 = vmax.f32 %v1738_v4, 0.0 }
 0x1b6   :  { %v2937_v18 = vrot.slane %v2748_v24, %v11597_v39  ;;  %v2080_v3 = vcombine.low %v1968_v37, %v1969_v15  ;;  %v2081_v1 = vcombine.high %v1968_v37, %v1969_v15  ;;  %v1873_v43 = vmax.f32 %v1740_v42, 0.0  ;;  %v1747_v48 = vpop.f32.mrf.mxu0  ;;  %v13902_v37 = vld [vmem:[#allocation12_spill] sm:$0xff] }
 0x1b7   :  { %v2638_v10 = vrot.slane %v2244_v31, 4  ;;  %v2639_v61 = vrot.slane %v2251_v49, 4  ;;  %v13901_v36 = vmax.f32 %v11371_v34, 0.0  ;;  %v13903_v24 = vmax.f32 %v13902_v37, 0.0 }
 0x1b8   :  { %v2938_v47 = vcombine.low %v2930_v5, %v2937_v18  ;;  %v2939_v25 = vcombine.high %v2930_v5, %v2937_v18  ;;  %v2258_v0 = vrot.slane %v2080_v3, %v11589_v40  ;;  %v2265_v16 = vrot.slane %v2081_v1, %v11589_v40  ;;  %v1749_v5 = vpop.f32.mrf.mxu0 }
 0x1b9   :  { %v2750_v11 = vmax.f32 %v2244_v31, %v2638_v10  ;;  %v2751_v58 = vmax.f32 %v2251_v49, %v2639_v61  ;;  %v1970_v63 = vmax.f32 %v13901_v36, %v1872_v8  ;;  %v1971_v56 = vmax.f32 %v13903_v24, %v1873_v43 }
 0x1ba   :  { %v3188_v15 = vrot.slane %v2938_v47, 7  ;;  %v3190_v33 = vrot.slane %v2939_v25, 7  ;;  %v2640_v4 = vrot.slane %v2258_v0, 4  ;;  %v2641_v42 = vrot.slane %v2265_v16, 4  ;;  %v1751_v61 = vpop.f32.mrf.mxu0 }
 0x1bb   :  { %v2940_v18 = vcombine.low %v2749_v23, %v2750_v11  ;;  %v2082_v3 = vcombine.low %v1970_v63, %v1971_v56  ;;  %v2083_v46 = vcombine.high %v1970_v63, %v1971_v56  ;;  %v1876_v1 = vmax.f32 %v1742_v60, 0.0  ;;  %v11892_v11 = vpop.f32.mrf.mxu1 }
 0x1bc   :  { %v3189_v31 = vsel %vm3185_vm1, %v3186_v19, %v3188_v15  ;;  %v3191_v49 = vsel %vm3185_vm1, %v3187_v12, %v3190_v33  ;;  %v2752_v34 = vmax.f32 %v2258_v0, %v2640_v4  ;;  %v2753_v10 = vmax.f32 %v2265_v16, %v2641_v42  ;;  %v1753_v16 = vpop.f32.mrf.mxu0 }
 0x1bd   :  { %3268 = vst [vmem:[#allocation2 + $0x10] sm:$0x7f] %v3189_v31  ;;  %3269 = vst [vmem:[#allocation2 + $0x18] sm:$0x7f] %v3191_v49  ;;  %v2948_v8 = vrot.slane %v2940_v18, %v11597_v39  ;;  %v2272_v43 = vrot.slane %v2082_v3, %v11589_v40  ;;  %v2279_v47 = vrot.slane %v2083_v46, %v11589_v40  ;;  %v13904_v23 = vmax.f32 %v11438_v52, 0.0  ;;  %v11909_v15 = vpop.f32.mrf.mxu1 }
 0x1be   :  { %v2941_v60 = vcombine.low %v2751_v58, %v2752_v34  ;;  %v1744_v19 = vadd.f32 %v1743_v27, %v11817_v13  ;;  %v1748_v12 = vadd.f32 %v1747_v48, %v11820_v55  ;;  %v1585_v0 = vadd.f32 %v11836_v45, %v11602_v20  ;;  %v1757_v27 = vpop.f32.mrf.mxu0 }
 0x1bf   :  { %v1972_v25 = vmax.f32 %v13904_v23, %v1876_v1  ;;  %v2642_v36 = vrot.slane %v2272_v43, 4  ;;  %v2643_v63 = vrot.slane %v2279_v47, 4  ;;  %v1750_v37 = vadd.f32 %v1749_v5, %v11825_v17 }
 0x1c0   :  { %v11901_v46 = vadd.f32 %v11844_v38, %v11613_v51  ;;  %v2955_v52 = vrot.slane %v2941_v60, %v11597_v39  ;;  %v1877_v24 = vmax.f32 %v1744_v19, 0.0  ;;  %v1880_v58 = vmax.f32 %v1748_v12, 0.0  ;;  %v1759_v18 = vpop.f32.mrf.mxu0  ;;  %v13908_v60 = vld [vmem:[#allocation13_spill] sm:$0xff]  ;;  %v11921_v12 = vpop.f32.mrf.mxu1 }
 0x1c1   :  { %v1752_v13 = vadd.f32 %v1751_v61, %v11832_v7  ;;  %v2754_v55 = vmax.f32 %v2272_v43, %v2642_v36  ;;  %v2755_v48 = vmax.f32 %v2279_v47, %v2643_v63  ;;  %v1881_v56 = vmax.f32 %v1750_v37, 0.0 }
 0x1c2   :  { %v11907_v45 = vadd.f32 %v11852_v2, %v11602_v20  ;;  %v2956_v17 = vcombine.low %v2948_v8, %v2955_v52  ;;  %v2957_v33 = vcombine.high %v2948_v8, %v2955_v52  ;;  %v13905_v38 = vmax.f32 %v11645_v9, 0.0  ;;  %v1761_v47 = vpop.f32.mrf.mxu0 }
 0x1c3   :  { %v13906_v42 = vmax.f32 %v11446_v57, 0.0  ;;  %v2958_v7 = vcombine.low %v2753_v10, %v2754_v55  ;;  %v2972_v3 = vrot.slane %v2755_v48, %v11597_v39  ;;  %v13907_v1 = vmax.f32 %v11452_v44, 0.0 }
 0x1c4   :  { %v1973_v4 = vmax.f32 %v13905_v38, %v1877_v24  ;;  %v1884_v49 = vmax.f32 %v1752_v13, 0.0  ;;  %v3192_v2 = vrot.slane %v2956_v17, 7  ;;  %v3193_v34 = vrot.slane %v2957_v33, 7  ;;  %v1763_v63 = vpop.f32.mrf.mxu0 }
 0x1c5   :  { %v1974_v5 = vmax.f32 %v13906_v42, %v1880_v58  ;;  %v1975_v31 = vmax.f32 %v13907_v1, %v1881_v56  ;;  %v2965_v8 = vrot.slane %v2958_v7, %v11597_v39  ;;  %v13909_v57 = vmax.f32 %v13908_v60, 0.0 }
 0x1c6   :  { %v2084_v61 = vcombine.low %v1972_v25, %v1973_v4  ;;  %v2085_v43 = vcombine.high %v1972_v25, %v1973_v4  ;;  %3270 = vst [vmem:[#allocation2 + $0x20] sm:$0xfe] %v3192_v2  ;;  %3271 = vst [vmem:[#allocation2 + $0x28] sm:$0xfe] %v3193_v34  ;;  %v1754_v36 = vadd.f32 %v1753_v16, %v11850_v29  ;;  %v1767_v17 = vpop.f32.mrf.mxu0  ;;  %v11930_v29 = vpop.f32.mrf.mxu1 }
 0x1c7   :  { %v2086_v9 = vcombine.low %v1974_v5, %v1975_v31  ;;  %v2087_v23 = vcombine.high %v1974_v5, %v1975_v31  ;;  %v1976_v19 = vmax.f32 %v13909_v57, %v1884_v49  ;;  %v1591_v25 = vadd.f32 %v11858_v22, %v11613_v51  ;;  %v13910_v5 = vld [vmem:[#allocation42_spill] sm:$0xff] }
 0x1c8   :  { %v2286_v44 = vrot.slane %v2084_v61, %v11589_v40  ;;  %v2293_v10 = vrot.slane %v2085_v43, %v11589_v40  ;;  %v2973_v37 = vcombine.low %v2965_v8, %v2972_v3  ;;  %v2974_v52 = vcombine.high %v2965_v8, %v2972_v3  ;;  %v1769_v31 = vpop.f32.mrf.mxu0 }
 0x1c9   :  { %v2300_v24 = vrot.slane %v2086_v9, %v11589_v40  ;;  %v2307_v58 = vrot.slane %v2087_v23, %v11589_v40  ;;  %v1885_v48 = vmax.f32 %v1754_v36, 0.0  ;;  %v1758_v56 = vadd.f32 %v1757_v27, %v1585_v0  ;;  %v13912_v23 = vld [vmem:[#allocation14_spill] sm:$0xff] }
 0x1ca   :  { %v2644_v13 = vrot.slane %v2286_v44, 4  ;;  %v2645_v55 = vrot.slane %v2293_v10, 4  ;;  %v3194_v33 = vrot.slane %v2973_v37, 7  ;;  %v3196_v38 = vrot.slane %v2974_v52, 7 }
 0x1cb   :  { %v2646_v4 = vrot.slane %v2300_v24, 4  ;;  %v2647_v42 = vrot.slane %v2307_v58, 4  ;;  %v13911_v7 = vmax.f32 %v13910_v5, 0.0  ;;  %v1888_v1 = vmax.f32 %v1758_v56, 0.0 }
 0x1cc   :  { %v2756_v16 = vmax.f32 %v2286_v44, %v2644_v13  ;;  %v2757_v22 = vmax.f32 %v2293_v10, %v2645_v55  ;;  %v3195_v49 = vsel %vm3185_vm1, %v3192_v2, %v3194_v33  ;;  %v3197_v61 = vsel %vm3185_vm1, %v3193_v34, %v3196_v38  ;;  %v1771_v44 = vpop.f32.mrf.mxu0  ;;  %v11943_v34 = vpop.f32.mrf.mxu1 }
 0x1cd   :  { %v1977_v3 = vmax.f32 %v13911_v7, %v1885_v48  ;;  %v2758_v43 = vmax.f32 %v2300_v24, %v2646_v4  ;;  %v2759_v0 = vmax.f32 %v2307_v58, %v2647_v42  ;;  %3272 = vst [vmem:[#allocation2 + $0x30] sm:$0x7f] %v3195_v49  ;;  %3273 = vst [vmem:[#allocation2 + $0x38] sm:$0x7f] %v3197_v61  ;;  %v13913_v60 = vmax.f32 %v13912_v23, 0.0 }
 0x1ce   :  { %v2975_v27 = vcombine.low %v2756_v16, %v2757_v22  ;;  %v1595_v36 = vadd.f32 %v11864_v50, %v11602_v20  ;;  %v1760_v37 = vadd.f32 %v1759_v18, %v11901_v46  ;;  %v1597_v2 = vadd.f32 %v11873_v21, %v11613_v51  ;;  %v1773_v13 = vpop.f32.mrf.mxu0  ;;  %v10252_v18 = vld [vmem:[#allocation5 + $0x4e4] ss:$16 sps:$4 sm:$0xff]   ;;  %v13914_v16 = vld [vmem:[#allocation15_spill] sm:$0xff]  ;;  %v11956_v7 = vpop.f32.mrf.mxu1 }
 0x1cf   :  { %v2088_v8 = vcombine.low %v1976_v19, %v1977_v3  ;;  %v2089_v9 = vcombine.high %v1976_v19, %v1977_v3  ;;  %v1978_v57 = vmax.f32 %v13913_v60, %v1888_v1  ;;  %v2976_v10 = vcombine.low %v2758_v43, %v2759_v0  ;;  %6698 = vmatprep.subr.bf16.mxu1 %v10252_v18  ;;  %v10255_v3 = vld [vmem:[#allocation5 + $0xec] ss:$16 sps:$4 sm:$0xff]  }
 0x1d0   :  { %v2983_v52 = vrot.slane %v2975_v27, %v11597_v39  ;;  %v1762_v58 = vadd.f32 %v1761_v47, %v11907_v45  ;;  %v1889_v48 = vmax.f32 %v1760_v37, 0.0  ;;  %v1599_v50 = vadd.f32 %v11883_v26, %v11602_v20  ;;  %v1777_v5 = vpop.f32.mrf.mxu0  ;;  %6801 = vmatprep.subr.bf16.mxu0 %v10255_v3 }
 0x1d1   :  { %v2314_v24 = vrot.slane %v2088_v8, %v11589_v40  ;;  %v2321_v19 = vrot.slane %v2089_v9, %v11589_v40  ;;  %v2990_v55 = vrot.slane %v2976_v10, %v11597_v39  ;;  %v1764_v46 = vadd.f32 %v1763_v63, %v1591_v25  ;;  %v13916_v63 = vld [vmem:[#allocation16_spill] sm:$0xff]  ;;  %v13918_v9 = vld [vmem:[#allocation43_spill] sm:$0xff] }
 0x1d2   :  { %v1892_v33 = vmax.f32 %v1762_v58, 0.0  ;;  %v1601_v38 = vadd.f32 %v11892_v11, %v11613_v51  ;;  %v13915_v22 = vmax.f32 %v13914_v16, 0.0  ;;  %v13917_v1 = vmax.f32 %v13916_v63, 0.0 }
 0x1d3   :  { %v2648_v21 = vrot.slane %v2314_v24, 4  ;;  %v2649_v56 = vrot.slane %v2321_v19, 4  ;;  %v2991_v4 = vcombine.low %v2983_v52, %v2990_v55  ;;  %v2992_v42 = vcombine.high %v2983_v52, %v2990_v55 }
 0x1d4   :  { %v1979_v45 = vmax.f32 %v13915_v22, %v1889_v48  ;;  %v1893_v47 = vmax.f32 %v1764_v46, 0.0  ;;  %v1980_v49 = vmax.f32 %v13917_v1, %v1892_v33  ;;  %v1768_v61 = vadd.f32 %v1767_v17, %v1595_v36  ;;  %v13920_v46 = vld [vmem:[#allocation18_spill] sm:$0xff] }
 0x1d5   :  { %v2760_v26 = vmax.f32 %v2314_v24, %v2648_v21  ;;  %v2761_v25 = vmax.f32 %v2321_v19, %v2649_v56  ;;  %v11960_v43 = vrot.slane %v2991_v4, 7  ;;  %v11962_v11 = vrot.slane %v2992_v42, 7  ;;  %v1779_v24 = vpop.f32.mrf.mxu0  ;;  %v1616_v19 = vpop.f32.mrf.mxu1 }
 0x1d6   :  { %v2090_v0 = vcombine.low %v1978_v57, %v1979_v45  ;;  %v2091_v27 = vcombine.high %v1978_v57, %v1979_v45  ;;  %v13919_v23 = vmax.f32 %v13918_v9, 0.0  ;;  %v1896_v10 = vmax.f32 %v1768_v61, 0.0  ;;  %v13922_v45 = vld [vmem:[#allocation19_spill] sm:$0xff] }
 0x1d7   :  { %v2993_v8 = vcombine.low %v2760_v26, %v2761_v25  ;;  %v1605_v37 = vadd.f32 %v11909_v15, %v11602_v20  ;;  %3274 = vst [vmem:[#allocation2 + $0x40] sm:$0xfe] %v11960_v43  ;;  %3275 = vst [vmem:[#allocation2 + $0x48] sm:$0xfe] %v11962_v11  ;;  %v1770_v52 = vadd.f32 %v1769_v31, %v1597_v2  ;;  %v13921_v15 = vmax.f32 %v13920_v46, 0.0  ;;  %v1781_v25 = vpop.f32.mrf.mxu0  ;;  %v1618_v63 = vpop.f32.mrf.mxu1 }
 0x1d8   :  { %v1981_v60 = vmax.f32 %v13919_v23, %v1893_v47  ;;  %v2328_v17 = vrot.slane %v2090_v0, %v11589_v40  ;;  %v2335_v36 = vrot.slane %v2091_v27, %v11589_v40  ;;  %v1607_v57 = vadd.f32 %v11921_v12, %v11613_v51 }
 0x1d9   :  { %v3000_v58 = vrot.slane %v2993_v8, %v11597_v39  ;;  %v1982_v18 = vmax.f32 %v13921_v15, %v1896_v10  ;;  %v1897_v33 = vmax.f32 %v1770_v52, 0.0  ;;  %v1772_v4 = vadd.f32 %v1771_v44, %v1599_v50 }
 0x1da   :  { %v2092_v55 = vcombine.low %v1980_v49, %v1981_v60  ;;  %v2093_v48 = vcombine.high %v1980_v49, %v1981_v60  ;;  %v2650_v21 = vrot.slane %v2328_v17, 4  ;;  %v2651_v56 = vrot.slane %v2335_v36, 4 }
 0x1db   :  { %v1609_v12 = vadd.f32 %v11930_v29, %v11602_v20  ;;  %v1774_v2 = vadd.f32 %v1773_v13, %v1601_v38  ;;  %v13923_v47 = vmax.f32 %v13922_v45, 0.0  ;;  %v1900_v26 = vmax.f32 %v1772_v4, 0.0  ;;  %v13924_v29 = vld [vmem:[#allocation20_spill] sm:$0xff] }
 0x1dc   :  { %v2342_v42 = vrot.slane %v2092_v55, %v11589_v40  ;;  %v2349_v31 = vrot.slane %v2093_v48, %v11589_v40  ;;  %v2762_v16 = vmax.f32 %v2328_v17, %v2650_v21  ;;  %v2763_v22 = vmax.f32 %v2335_v36, %v2651_v56  ;;  %v1620_v48 = vpop.f32.mrf.mxu1 }
 0x1dd   :  { %v1983_v3 = vmax.f32 %v13923_v47, %v1897_v33  ;;  %v1901_v61 = vmax.f32 %v1774_v2, 0.0  ;;  %v1611_v44 = vadd.f32 %v11943_v34, %v11613_v51  ;;  %v13925_v13 = vmax.f32 %v13924_v29, 0.0  ;;  %v1783_v34 = vpop.f32.mrf.mxu0 }
 0x1de   :  { %v2652_v1 = vrot.slane %v2342_v42, 4  ;;  %v2653_v49 = vrot.slane %v2349_v31, 4  ;;  %v3007_v50 = vrot.slane %v2762_v16, %v11597_v39  ;;  %v13926_v23 = vmax.f32 %v11680_v59, 0.0 }
 0x1df   :  { %v2094_v0 = vcombine.low %v1982_v18, %v1983_v3  ;;  %v2095_v27 = vcombine.high %v1982_v18, %v1983_v3  ;;  %v1984_v38 = vmax.f32 %v13925_v13, %v1900_v26  ;;  %v1778_v10 = vadd.f32 %v1777_v5, %v1605_v37  ;;  %v1787_v3 = vpop.f32.mrf.mxu0  ;;  %v1624_v26 = vpop.f32.mrf.mxu1 }
 0x1e0   :  { %v2764_v8 = vmax.f32 %v2342_v42, %v2652_v1  ;;  %v2765_v9 = vmax.f32 %v2349_v31, %v2653_v49  ;;  %v1985_v60 = vmax.f32 %v13926_v23, %v1901_v61  ;;  %v3008_v17 = vcombine.low %v3000_v58, %v3007_v50 }
 0x1e1   :  { %v3009_v36 = vcombine.high %v3000_v58, %v3007_v50  ;;  %v2356_v52 = vrot.slane %v2094_v0, %v11589_v40  ;;  %v2363_v55 = vrot.slane %v2095_v27, %v11589_v40  ;;  %v1904_v21 = vmax.f32 %v1778_v10, 0.0  ;;  %v13927_v58 = vld [vmem:[#allocation22_spill] sm:$0xff] }
 0x1e2   :  { %v3010_v46 = vcombine.low %v2763_v22, %v2764_v8  ;;  %v2096_v15 = vcombine.low %v1984_v38, %v1985_v60  ;;  %v2097_v18 = vcombine.high %v1984_v38, %v1985_v60  ;;  %v3200_v56 = vrot.slane %v3008_v17, 7 }
 0x1e3   :  { %v3202_v33 = vrot.slane %v3009_v36, 7  ;;  %v2654_v4 = vrot.slane %v2356_v52, 4  ;;  %v2655_v42 = vrot.slane %v2363_v55, 4  ;;  %v13928_v31 = vmax.f32 %v13927_v58, 0.0 }
 0x1e4   :  { %v3018_v59 = vrot.slane %v3010_v46, %v11597_v39  ;;  %v2370_v5 = vrot.slane %v2096_v15, %v11589_v40  ;;  %v2377_v37 = vrot.slane %v2097_v18, %v11589_v40  ;;  %v3201_v16 = vsel %vm3185_vm1, %v11960_v43, %v3200_v56  ;;  %v10223_v15 = vld [vmem:[#allocation2] ss:$8 sps:$4 sm:$0xff]   ;;  %v10225_v18 = vld [vmem:[#allocation2 + $0x4] ss:$8 sps:$4 sm:$0xff]  }
 0x1e5   :  { %v1986_v2 = vmax.f32 %v13928_v31, %v1904_v21  ;;  %v3203_v22 = vsel %vm3185_vm1, %v11962_v11, %v3202_v33  ;;  %v2766_v45 = vmax.f32 %v2356_v52, %v2654_v4  ;;  %v2767_v47 = vmax.f32 %v2363_v55, %v2655_v42  ;;  %3276 = vst [vmem:[#allocation2 + $0x50] sm:$0x7f] %v3201_v16  ;;  %v13931_v55 = vld [vmem:[#allocation24_spill] sm:$0xff]  ;;  %v13933_v33 = vld [vmem:[#allocation45_spill] sm:$0xff]  ;;  %v13935_v31 = vld [vmem:[#allocation26_spill] sm:$0xff] }
 0x1e6   :  { %3277 = vst [vmem:[#allocation2 + $0x58] sm:$0x7f] %v3203_v22  ;;  %v2656_v1 = vrot.slane %v2370_v5, 4  ;;  %v2657_v49 = vrot.slane %v2377_v37, 4  ;;  %v1615_v61 = vadd.f32 %v11956_v7, %v11602_v20  ;;  %v1780_v50 = vadd.f32 %v1779_v24, %v1607_v57  ;;  %v1789_v57 = vpop.f32.mrf.mxu0  ;;  %v1626_v24 = vpop.f32.mrf.mxu1 }
 0x1e7   :  { %v3011_v0 = vcombine.low %v2765_v9, %v2766_v45  ;;  %v12004_v27 = vadd.f32 %v1616_v19, %v11613_v51  ;;  %v1782_v43 = vadd.f32 %v1781_v25, %v1609_v12  ;;  %v12007_v29 = vadd.f32 %v1618_v63, %v11602_v20  ;;  %v13929_v12 = vld [vmem:[#allocation23_spill] sm:$0xff]  ;;  %v10228_v45 = vld [vmem:[#allocation2 + $0x14] ss:$8 sps:$4 sm:$0x33]  }
 0x1e8   :  { %v2768_v11 = vmax.f32 %v2370_v5, %v2656_v1  ;;  %v2769_v13 = vmax.f32 %v2377_v37, %v2657_v49  ;;  %v1905_v38 = vmax.f32 %v1780_v50, 0.0  ;;  %v1784_v8 = vadd.f32 %v1783_v34, %v1611_v44  ;;  %v10226_v5 = vld [vmem:[#allocation2 + $0x10] ss:$8 sps:$4 sm:$0xff]  }
 0x1e9   :  { %v3025_v23 = vrot.slane %v3011_v0, %v11597_v39  ;;  %v1908_v60 = vmax.f32 %v1782_v43, 0.0  ;;  %v12011_v10 = vadd.f32 %v1620_v48, %v11613_v51  ;;  %v1788_v7 = vadd.f32 %v1787_v3, %v1615_v61  ;;  %v1628_v3 = vpop.f32.mrf.mxu1 }
 0x1ea   :  { %v3028_v9 = vcombine.low %v2767_v47, %v2768_v11  ;;  %v3042_v19 = vrot.slane %v2769_v13, %v11597_v39  ;;  %v13930_v25 = vmax.f32 %v13929_v12, 0.0  ;;  %v1909_v17 = vmax.f32 %v1784_v8, 0.0  ;;  %v1791_v47 = vpop.f32.mrf.mxu0  ;;  %v10229_v13 = vld [vmem:[#allocation2 + $0x20] ss:$8 sps:$4 sm:$0xff]  }
 0x1eb   :  { %v3026_v36 = vcombine.low %v3018_v59, %v3025_v23  ;;  %v3027_v52 = vcombine.high %v3018_v59, %v3025_v23  ;;  %v13932_v44 = vmax.f32 %v13931_v55, 0.0  ;;  %v1912_v46 = vmax.f32 %v1788_v7, 0.0 }
 0x1ec   :  { %v1987_v63 = vmax.f32 %v13930_v25, %v1905_v38  ;;  %v3035_v48 = vrot.slane %v3028_v9, %v11597_v39  ;;  %v13934_v4 = vmax.f32 %v13933_v33, 0.0  ;;  %v13936_v16 = vmax.f32 %v13935_v31, 0.0  ;;  %v1793_v12 = vpop.f32.mrf.mxu0  ;;  %v1630_v25 = vpop.f32.mrf.mxu1 }
 0x1ed   :  { %v1988_v34 = vmax.f32 %v13932_v44, %v1908_v60  ;;  %v3204_v37 = vrot.slane %v3026_v36, 7  ;;  %v3205_v58 = vrot.slane %v3027_v52, 7  ;;  %v1625_v59 = vadd.f32 %v1624_v26, %v11602_v20 }
 0x1ee   :  { %v2098_v21 = vcombine.low %v1986_v2, %v1987_v63  ;;  %v2099_v56 = vcombine.high %v1986_v2, %v1987_v63  ;;  %v1989_v42 = vmax.f32 %v13934_v4, %v1909_v17  ;;  %v12023_v22 = vmax.f32 %v13936_v16, %v1912_v46 }
 0x1ef   :  { %v3043_v1 = vcombine.low %v3035_v48, %v3042_v19  ;;  %v3044_v49 = vcombine.high %v3035_v48, %v3042_v19  ;;  %3278 = vst [vmem:[#allocation2 + $0x60] sm:$0xfe] %v3204_v37  ;;  %3279 = vst [vmem:[#allocation2 + $0x68] sm:$0xfe] %v3205_v58  ;;  %v3598_v43 = vrot.slane %v10223_v15, %v11597_v39 }
 0x1f0   :  { %v2384_v61 = vrot.slane %v2098_v21, %v11589_v40  ;;  %v2391_v2 = vrot.slane %v2099_v56, %v11589_v40  ;;  %v2100_v50 = vcombine.low %v1988_v34, %v1989_v42  ;;  %v2101_v0 = vcombine.high %v1988_v34, %v1989_v42 }
 0x1f1   :  { %v3605_v11 = vrot.slane %v10225_v18, %v11597_v39  ;;  %v3206_v38 = vrot.slane %v3043_v1, 7  ;;  %v3208_v26 = vrot.slane %v3044_v49, 7  ;;  %v3652_v9 = vrot.slane %v10226_v5, %v11597_v39  ;;  %v1797_v5 = vpop.f32.mrf.mxu0 }
 0x1f2   :  { %v2658_v8 = vrot.slane %v2384_v61, 4  ;;  %v2659_v23 = vrot.slane %v2391_v2, 4  ;;  %v2398_v60 = vrot.slane %v2100_v50, %v11589_v40  ;;  %v2405_v7 = vrot.slane %v2101_v0, %v11589_v40 }
 0x1f3   :  { %v3659_v19 = vrot.slane %v10228_v45, %v11597_v39  ;;  %v3207_v63 = vsel %vm3185_vm1, %v3204_v37, %v3206_v38  ;;  %v3209_v17 = vsel %vm3185_vm1, %v3205_v58, %v3208_v26  ;;  %v12037_v34 = vrot.slane %v10229_v13, %v11597_v39  ;;  %v1634_v37 = vpop.f32.mrf.mxu1 }
 0x1f4   :  { %v2770_v36 = vmax.f32 %v2384_v61, %v2658_v8  ;;  %v2771_v52 = vmax.f32 %v2391_v2, %v2659_v23  ;;  %3280 = vst [vmem:[#allocation2 + $0x70] sm:$0x7f] %v3207_v63  ;;  %3281 = vst [vmem:[#allocation2 + $0x78] sm:$0x7f] %v3209_v17  ;;  %v2660_v55 = vrot.slane %v2398_v60, 4  ;;  %v2661_v44 = vrot.slane %v2405_v7, 4  ;;  %v12060_v8 = vpop.f32.mrf.mxu0 }
 0x1f5   :  { %v4446_v46 = vrot.slane %v3598_v43, %v11597_v39  ;;  %v4460_v18 = vrot.slane %v3605_v11, %v11597_v39  ;;  %v4500_v48 = vrot.slane %v3652_v9, %v11597_v39  ;;  %v1790_v21 = vadd.f32 %v1789_v57, %v12004_v27  ;;  %v13937_v61 = vld [vmem:[#allocation27_spill] sm:$0xff] }
 0x1f6   :  { %v3045_v15 = vcombine.low %v2770_v36, %v2771_v52  ;;  %v2772_v56 = vmax.f32 %v2398_v60, %v2660_v55  ;;  %v2773_v33 = vmax.f32 %v2405_v7, %v2661_v44  ;;  %v9412_v4 = vcombine.low %v3659_v19, %v12037_v34  ;;  %v3331_v7 = vld [vmem:[#allocation2 + $0x8] sm:$0xfe]  ;;  %v13939_v36 = vld [vmem:[#allocation28_spill] sm:$0xff]  ;;  %v13941_v44 = vld [vmem:[#allocation17_spill] sm:$0xff] }
 0x1f7   :  { %v12045_v42 = vadd.f32 %v1626_v24, %v11613_v51  ;;  %v4468_v31 = vcombine.low %v4446_v46, %v4460_v18  ;;  %v4469_v16 = vcombine.high %v4446_v46, %v4460_v18  ;;  %v1913_v45 = vmax.f32 %v1790_v21, 0.0  ;;  %v3333_v18 = vld [vmem:[#allocation2 + $0x18] sm:$0x7f] }
 0x1f8   :  { %v3053_v58 = vrot.slane %v3045_v15, %v11597_v39  ;;  %v3046_v1 = vcombine.low %v2772_v56, %v2773_v33  ;;  %v4514_v49 = vrot.slane %v9412_v4, %v11597_v39  ;;  %v1792_v27 = vadd.f32 %v1791_v47, %v12007_v29  ;;  %v12062_v29 = vpop.f32.mrf.mxu1  ;;  %v3332_v15 = vld [vmem:[#allocation2 + $0x10] sm:$0x7f]  ;;  %v13943_v33 = vld [vmem:[#allocation30_spill] sm:$0xff] }
 0x1f9   :  { %v12051_v57 = vadd.f32 %v1628_v3, %v11602_v20  ;;  %v13938_v2 = vmax.f32 %v13937_v61, 0.0  ;;  %v1794_v50 = vadd.f32 %v1793_v12, %v12011_v10  ;;  %v12057_v0 = vadd.f32 %v1630_v25, %v11613_v51  ;;  %v3330_v10 = vld [vmem:[#allocation2] sm:$0xfe] }
 0x1fa   :  { %v1798_v43 = vadd.f32 %v1797_v5, %v1625_v59  ;;  %v3060_v11 = vrot.slane %v3046_v1, %v11597_v39  ;;  %v4522_v13 = vcombine.low %v4500_v48, %v4514_v49  ;;  %v4523_v38 = vcombine.high %v4500_v48, %v4514_v49  ;;  %v10250_v25 = vld [vmem:[#allocation5 + $0x4e0] ss:$16 sps:$4 sm:$0xff]   ;;  %v10264_v48 = vld [vmem:[#allocation5 + $0x4c4] ss:$16 sps:$4 sm:$0xff]  }
 0x1fb   :  { %v1991_v24 = vmax.f32 %v13938_v2, %v1913_v45  ;;  %v1916_v26 = vmax.f32 %v1792_v27, 0.0  ;;  %v1917_v23 = vmax.f32 %v1794_v50, 0.0  ;;  %v13940_v52 = vmax.f32 %v13939_v36, 0.0  ;;  %v12090_v45 = vpop.f32.mrf.mxu1  ;;  %v3335_v2 = vld [vmem:[#allocation2 + $0x28] sm:$0xfe] }
 0x1fc   :  { %v1920_v60 = vmax.f32 %v1798_v43, 0.0  ;;  %v3061_v9 = vcombine.low %v3053_v58, %v3060_v11  ;;  %v3062_v19 = vcombine.high %v3053_v58, %v3060_v11  ;;  %v12066_v59 = vpack.c.bf16 %v4522_v13, %v4468_v31  ;;  %v3334_v31 = vld [vmem:[#allocation2 + $0x20] sm:$0xfe] }
 0x1fd   :  { %v2102_v47 = vcombine.low %v12023_v22, %v1991_v24  ;;  %v2103_v3 = vcombine.high %v12023_v22, %v1991_v24  ;;  %v12068_v12 = vpack.c.bf16 %v4523_v38, %v4469_v16  ;;  %v1992_v55 = vmax.f32 %v13940_v52, %v1916_v26  ;;  %v12088_v16 = vpop.f32.mrf.mxu0  ;;  %v3336_v24 = vld [vmem:[#allocation2 + $0x30] sm:$0x7f] }
 0x1fe   :  { %v13942_v22 = vmax.f32 %v13941_v44, 0.0  ;;  %v12076_v21 = vrot.slane %v3061_v9, 7  ;;  %v12078_v56 = vrot.slane %v3062_v19, 7  ;;  %v13944_v4 = vmax.f32 %v13943_v33, 0.0  ;;  %v10262_v13 = vld [vmem:[#allocation5 + $0x4c0] ss:$16 sps:$4 sm:$0xff]  }
 0x1ff   :  { %v2412_v63 = vrot.slane %v2102_v47, %v11589_v40  ;;  %v2419_v17 = vrot.slane %v2103_v3, %v11589_v40  ;;  %6524 = vmatprep.mubr.bf16.mxu1 %v12068_v12  ;;  %v12086_v58 = vadd.f32 %v1634_v37, %v11602_v20  ;;  %v3427_v50 = vrot.slane %v3330_v10, 1 }
 0x200   :  { %v1993_v46 = vmax.f32 %v13942_v22, %v1917_v23  ;;  %v12083_v5 = vmax.f32 %v13944_v4, %v1920_v60  ;;  %6525 = vmatmul.mubr.bf16.vlgmr.msra.gmra.mxu1 %v12066_v59  ;;  %3282 = vst [vmem:[#allocation2 + $0x80] sm:$0xfe] %v12076_v21  ;;  %3283 = vst [vmem:[#allocation2 + $0x88] sm:$0xfe] %v12078_v56  ;;  %v3428_v37 = vrot.slane %v3332_v15, 1  ;;  %v3430_v43 = vrot.slane %v3331_v7, 1  ;;  %v12101_v7 = vpop.f32.mrf.mxu0 }
 0x201   :  { %v2662_v1 = vrot.slane %v2412_v63, 4  ;;  %v2663_v49 = vrot.slane %v2419_v17, 4  ;;  %v3431_v11 = vrot.slane %v3333_v18, 1  ;;  %6699 = vmatpush1.bf16.msra.mxu1 %v10250_v25  ;;  %v3337_v23 = vld [vmem:[#allocation2 + $0x38] sm:$0x7f]  ;;  %v3433_v36 = vrot.slane %v3334_v31, 1  ;;  %v12103_v25 = vpop.f32.mrf.mxu1 }
 0x202   :  { %v2104_v27 = vcombine.low %v1992_v55, %v1993_v46  ;;  %v2105_v61 = vcombine.high %v1992_v55, %v1993_v46  ;;  %6700 = vmatprep.subr.bf16.mxu1 %v10264_v48  ;;  %v10270_v60 = vld [vmem:[#allocation5 + $0x4a4] ss:$16 sps:$4 sm:$0xff]   ;;  %v3429_v9 = vsel %vm3426_vm2, %v3427_v50, %v3428_v37  ;;  %v12099_v10 = vrot.slane %v3336_v24, 1  ;;  %v10268_v18 = vld [vmem:[#allocation5 + $0x4a0] ss:$16 sps:$4 sm:$0xff]   ;;  %v12116_v24 = vpop.f32.mrf.mxu0 }
 0x203   :  { %v2774_v38 = vmax.f32 %v2412_v63, %v2662_v1  ;;  %v2775_v26 = vmax.f32 %v2419_v17, %v2663_v49  ;;  %v3432_v19 = vsel %vm3426_vm2, %v3430_v43, %v3431_v11  ;;  %v3436_v55 = vrot.slane %v3335_v2, 1  ;;  %v10276_v1 = vld [vmem:[#allocation5 + $0x484] ss:$16 sps:$4 sm:$0xff]   ;;  %v12118_v50 = vpop.f32.mrf.mxu1 }
 0x204   :  { %v2426_v47 = vrot.slane %v2104_v27, %v11589_v40  ;;  %v2433_v3 = vrot.slane %v2105_v61, %v11589_v40  ;;  %v3435_v44 = vsel %vm3426_vm2, %v3433_v36, %v12099_v10  ;;  %v12107_v22 = vrot.slane %v3337_v23, 1  ;;  %v10231_v43 = vld [vmem:[#allocation2 + $0x24] ss:$8 sps:$4 sm:$0xff]  }
 0x205   :  { %v3063_v63 = vcombine.low %v2774_v38, %v2775_v26  ;;  %v3590_v46 = vcombine.low %v3429_v9, %v3432_v19  ;;  %v3591_v15 = vcombine.high %v3429_v9, %v3432_v19  ;;  %6701 = vmatpush1.bf16.msra.mxu1 %v10262_v13  ;;  %v3644_v31 = vcombine.low %v3428_v37, %v3431_v11 }
 0x206   :  { %v2664_v17 = vrot.slane %v2426_v47, 4  ;;  %v2665_v52 = vrot.slane %v2433_v3, 4  ;;  %6702 = vmatprep.subr.bf16.mxu1 %v10270_v60  ;;  %v3438_v49 = vsel %vm3426_vm2, %v3436_v55, %v12107_v22  ;;  %v3645_v2 = vcombine.high %v3428_v37, %v3431_v11  ;;  %v10274_v11 = vld [vmem:[#allocation5 + $0x480] ss:$16 sps:$4 sm:$0xff]  }
 0x207   :  { %v3070_v48 = vrot.slane %v3063_v63, %v11597_v39  ;;  %v3612_v27 = vrot.slane %v3590_v46, %v11597_v39  ;;  %v3619_v61 = vrot.slane %v3591_v15, %v11597_v39  ;;  %v3666_v38 = vrot.slane %v3644_v31, %v11597_v39  ;;  %v10240_v15 = vld [vmem:[#allocation2 + $0x34] ss:$8 sps:$4 sm:$0x33]  }
 0x208   :  { %v2776_v33 = vmax.f32 %v2426_v47, %v2664_v17  ;;  %v12110_v4 = vmax.f32 %v2433_v3, %v2665_v52  ;;  %v3696_v26 = vcombine.low %v3435_v44, %v3438_v49  ;;  %v1800_v47 = vadd.f32 %v12060_v8, %v12045_v42  ;;  %v10238_v42 = vld [vmem:[#allocation2 + $0x30] ss:$8 sps:$4 sm:$0xff]   ;;  %v10282_v8 = vld [vmem:[#allocation5 + $0x464] ss:$16 sps:$4 sm:$0xff]  }
 0x209   :  { %v3673_v3 = vrot.slane %v3645_v2, %v11597_v39  ;;  %v4453_v23 = vrot.slane %v3612_v27, %v11597_v39  ;;  %v4467_v60 = vrot.slane %v3619_v61, %v11597_v39  ;;  %v12129_v37 = vadd.f32 %v12062_v29, %v11613_v51  ;;  %6703 = vmatpush1.bf16.msra.mxu1 %v10268_v18  ;;  %v12137_v29 = vpop.f32.mrf.mxu1  ;;  %v10241_v61 = vld [vmem:[#allocation2 + $0x40] ss:$8 sps:$4 sm:$0xff]  }
 0x20a   :  { %v3077_v13 = vrot.slane %v2776_v33, %v11597_v39  ;;  %v12132_v36 = vrot.slane %v3696_v26, %v11597_v39  ;;  %v4507_v63 = vrot.slane %v3666_v38, %v11597_v39  ;;  %6704 = vmatprep.subr.bf16.mxu1 %v10276_v1  ;;  %v1921_v55 = vmax.f32 %v1800_v47, 0.0  ;;  %v12135_v33 = vpop.f32.mrf.mxu0  ;;  %v10280_v38 = vld [vmem:[#allocation5 + $0x460] ss:$16 sps:$4 sm:$0xff]  }
 0x20b   :  { %v4470_v17 = vcombine.low %v4453_v23, %v4467_v60  ;;  %v4471_v52 = vcombine.high %v4453_v23, %v4467_v60  ;;  %v3697_v46 = vcombine.high %v3435_v44, %v3438_v49  ;;  %v12141_v27 = vrot.slane %v10231_v43, %v11597_v39 }
 0x20c   :  { %v3078_v9 = vcombine.low %v3070_v48, %v3077_v13  ;;  %v3079_v19 = vcombine.high %v3070_v48, %v3077_v13  ;;  %v9413_v48 = vcombine.low %v3673_v3, %v12132_v36  ;;  %v13945_v1 = vmax.f32 %v13878_v28, 0.0  ;;  %v10288_v3 = vld [vmem:[#allocation5 + $0x444] ss:$16 sps:$4 sm:$0xff]  }
 0x20d   :  { %v12146_v13 = vrot.slane %v3697_v46, %v11597_v39  ;;  %v3727_v44 = vcombine.high %v12037_v34, %v12132_v36  ;;  %v3750_v49 = vcombine.low %v12099_v10, %v12107_v22  ;;  %6705 = vmatpush1.bf16.msra.mxu1 %v10274_v11  ;;  %v12158_v47 = vrot.slane %v10238_v42, %v11597_v39  ;;  %v12169_v11 = vpop.f32.mrf.mxu1 }
 0x20e   :  { %v3212_v18 = vrot.slane %v3078_v9, 7  ;;  %v3214_v31 = vrot.slane %v3079_v19, 7  ;;  %v1995_v2 = vmax.f32 %v13945_v1, %v1921_v55  ;;  %v4521_v28 = vrot.slane %v9413_v48, %v11597_v39  ;;  %6706 = vmatprep.subr.bf16.mxu1 %v10282_v8  ;;  %v10253_v1 = vld [vmem:[#allocation5 + $0xe8] ss:$16 sps:$4 sm:$0xff]  }
 0x20f   :  { %v3729_v60 = vcombine.high %v12141_v27, %v12146_v13  ;;  %v12172_v42 = vrot.slane %v3750_v49, %v11597_v39  ;;  %v3810_v8 = vrot.slane %v10241_v61, %v11597_v39  ;;  %v9414_v46 = vcombine.low %v3727_v44, %v12141_v27  ;;  %v10286_v61 = vld [vmem:[#allocation5 + $0x440] ss:$16 sps:$4 sm:$0xff]  }
 0x210   :  { %v3213_v26 = vsel %vm3185_vm1, %v12076_v21, %v3212_v18  ;;  %v3215_v43 = vsel %vm3185_vm1, %v12078_v56, %v3214_v31  ;;  %v2106_v34 = vcombine.low %v12083_v5, %v1995_v2  ;;  %v2107_v23 = vcombine.high %v12083_v5, %v1995_v2  ;;  %v12167_v56 = vpop.f32.mrf.mxu0 }
 0x211   :  { %3284 = vst [vmem:[#allocation2 + $0x90] sm:$0x7f] %v3213_v26  ;;  %3285 = vst [vmem:[#allocation2 + $0x98] sm:$0x7f] %v3215_v43  ;;  %v12165_v21 = vrot.slane %v10240_v15, %v11597_v39  ;;  %v4524_v9 = vcombine.low %v4507_v63, %v4521_v28  ;;  %v4525_v19 = vcombine.high %v4507_v63, %v4521_v28  ;;  %6707 = vmatpush1.bf16.msra.mxu1 %v10280_v38 }
 0x212   :  { %v2440_v55 = vrot.slane %v2106_v34, %v11589_v40  ;;  %v2447_v5 = vrot.slane %v2107_v23, %v11589_v40  ;;  %v9416_v15 = vcombine.low %v3729_v60, %v12158_v47  ;;  %v3781_v63 = vcombine.high %v12158_v47, %v12172_v42  ;;  %6708 = vmatprep.subr.bf16.mxu1 %v10288_v3  ;;  %v12188_v43 = vpop.f32.mrf.mxu0  ;;  %v10294_v23 = vld [vmem:[#allocation5 + $0x424] ss:$16 sps:$4 sm:$0xff]  }
 0x213   :  { %v12179_v18 = vpack.c.bf16 %v4524_v9, %v4470_v17  ;;  %v12181_v31 = vpack.c.bf16 %v4525_v19, %v4471_v52  ;;  %v4622_v48 = vrot.slane %v3810_v8, %v11597_v39  ;;  %v4554_v26 = vrot.slane %v9414_v46, %v11597_v39  ;;  %v12190_v17 = vpop.f32.mrf.mxu1  ;;  %v10267_v52 = vld [vmem:[#allocation5 + $0xcc] ss:$16 sps:$4 sm:$0xff]  }
 0x214   :  { %v2666_v2 = vrot.slane %v2440_v55, 4  ;;  %v2667_v49 = vrot.slane %v2447_v5, 4  ;;  %v4568_v44 = vrot.slane %v9416_v15, %v11597_v39  ;;  %v9418_v38 = vcombine.low %v3781_v63, %v12165_v21 }
 0x215   :  { %6627 = vmatprep.mubr.bf16.mxu0 %v12181_v31  ;;  %v1802_v28 = vadd.f32 %v12088_v16, %v12051_v57  ;;  %v1639_v3 = vadd.f32 %v12090_v45, %v11602_v20  ;;  %v1804_v34 = vadd.f32 %v12101_v7, %v12057_v0  ;;  %v12206_v57 = vadd.f32 %v12103_v25, %v11613_v51  ;;  %v10265_v16 = vld [vmem:[#allocation5 + $0xc8] ss:$16 sps:$4 sm:$0xff]   ;;  %v10273_v25 = vld [vmem:[#allocation5 + $0xac] ss:$16 sps:$4 sm:$0xff]  }
 0x216   :  { %v2778_v60 = vmax.f32 %v2440_v55, %v2666_v2  ;;  %v12200_v9 = vmax.f32 %v2447_v5, %v2667_v49  ;;  %6628 = vmatmul.mubr.bf16.vlgmr.msra.gmra.mxu0 %v12179_v18  ;;  %v4577_v19 = vcombine.high %v4554_v26, %v4568_v44  ;;  %v4576_v8 = vcombine.low %v4554_v26, %v4568_v44  ;;  %v12217_v5 = vpop.f32.mrf.mxu0  ;;  %v12219_v2 = vpop.f32.mrf.mxu1  ;;  %v3338_v26 = vld [vmem:[#allocation2 + $0x40] sm:$0xfe] }
 0x217   :  { %v4608_v46 = vrot.slane %v9418_v38, %v11597_v39  ;;  %v1924_v15 = vmax.f32 %v1802_v28, 0.0  ;;  %v1925_v63 = vmax.f32 %v1804_v34, 0.0  ;;  %6802 = vmatpush1.bf16.msra.mxu0 %v10253_v1  ;;  %6709 = vmatpush1.bf16.msra.mxu1 %v10286_v61  ;;  %v1808_v45 = vadd.f32 %v12116_v24, %v12086_v58  ;;  %v3340_v38 = vld [vmem:[#allocation2 + $0x50] sm:$0x7f] }
 0x218   :  { %v3080_v0 = vcombine.low %v12110_v4, %v2778_v60  ;;  %v12213_v7 = vadd.f32 %v12118_v50, %v11602_v20  ;;  %v1810_v55 = vadd.f32 %v12135_v33, %v12129_v37  ;;  %6803 = vmatprep.subr.bf16.mxu0 %v10267_v52  ;;  %v13946_v61 = vmax.f32 %v13879_v53, 0.0  ;;  %v10292_v50 = vld [vmem:[#allocation5 + $0x420] ss:$16 sps:$4 sm:$0xff]   ;;  %6710 = vmatprep.subr.bf16.mxu1 %v10294_v23  ;;  %v10308_v28 = vld [vmem:[#allocation5 + $0x404] ss:$16 sps:$4 sm:$0xff]  }
 0x219   :  { %v4631_v1 = vcombine.high %v4608_v46, %v4622_v48  ;;  %v4630_v49 = vcombine.low %v4608_v46, %v4622_v48  ;;  %v13947_v58 = vmax.f32 %v11721_v35, 0.0  ;;  %v1928_v37 = vmax.f32 %v1808_v45, 0.0  ;;  %v3339_v60 = vld [vmem:[#allocation2 + $0x48] sm:$0xfe] }
 0x21a   :  { %v1996_v4 = vmax.f32 %v13946_v61, %v1924_v15  ;;  %v12226_v44 = vrot.slane %v3080_v0, %v11597_v39  ;;  %v1929_v33 = vmax.f32 %v1810_v55, 0.0  ;;  %v12230_v52 = vadd.f32 %v12137_v29, %v11613_v51  ;;  %v10271_v23 = vld [vmem:[#allocation5 + $0xa8] ss:$16 sps:$4 sm:$0xff]   ;;  %v12247_v55 = vpop.f32.mrf.mxu1 }
 0x21b   :  { %v1997_v24 = vmax.f32 %v13947_v58, %v1925_v63  ;;  %v12232_v53 = vpack.c.bf16 %v4631_v1, %v4577_v19  ;;  %v12234_v48 = vpack.c.bf16 %v4630_v49, %v4576_v8  ;;  %6804 = vmatpush1.bf16.msra.mxu0 %v10265_v16  ;;  %v13948_v46 = vmax.f32 %v11560_v30, 0.0  ;;  %v3341_v19 = vld [vmem:[#allocation2 + $0x58] sm:$0x7f]  ;;  %v12245_v8 = vpop.f32.mrf.mxu0  ;;  %6711 = vmatpush1.bf16.msra.mxu1 %v10292_v50 }
 0x21c   :  { %v13949_v63 = vmax.f32 %v13881_v6, 0.0  ;;  %v1812_v29 = vadd.f32 %v12167_v56, %v1639_v3  ;;  %v12243_v45 = vadd.f32 %v12169_v11, %v11602_v20  ;;  %6805 = vmatprep.subr.bf16.mxu0 %v10273_v25  ;;  %v10279_v16 = vld [vmem:[#allocation5 + $0x8c] ss:$16 sps:$4 sm:$0xff]   ;;  %v3439_v1 = vrot.slane %v3338_v26, 1  ;;  %v10306_v56 = vld [vmem:[#allocation5 + $0x400] ss:$16 sps:$4 sm:$0xff]   ;;  %6712 = vmatprep.subr.bf16.mxu1 %v10308_v28 }
 0x21d   :  { %v2108_v35 = vcombine.low %v1996_v4, %v1997_v24  ;;  %v2109_v34 = vcombine.high %v1996_v4, %v1997_v24  ;;  %v1998_v15 = vmax.f32 %v13948_v46, %v1928_v37  ;;  %6534 = vmatprep.mubr.bf16.mxu1 %v12232_v53  ;;  %v12252_v61 = vrot.slane %v3340_v38, 1  ;;  %v10314_v25 = vld [vmem:[#allocation5 + $0x5e4] ss:$16 sps:$4 sm:$0xff]   ;;  %v10277_v26 = vld [vmem:[#allocation5 + $0x88] ss:$16 sps:$4 sm:$0xff]   ;;  %v12271_v46 = vpop.f32.mrf.mxu1 }
 0x21e   :  { %v1999_v0 = vmax.f32 %v13949_v63, %v1929_v33  ;;  %6535 = vmatmul.mubr.bf16.gmra.mxu1 %v12234_v48  ;;  %v1932_v4 = vmax.f32 %v1812_v29, 0.0  ;;  %v3442_v49 = vrot.slane %v3339_v60, 1  ;;  %v12259_v33 = vrot.slane %v3341_v19, 1  ;;  %v12269_v60 = vpop.f32.mrf.mxu0  ;;  %v10312_v29 = vld [vmem:[#allocation5 + $0x5e0] ss:$16 sps:$4 sm:$0xff]  }
 0x21f   :  { %v2454_v30 = vrot.slane %v2108_v35, %v11589_v40  ;;  %v2461_v6 = vrot.slane %v2109_v34, %v11589_v40  ;;  %v12257_v37 = vsel %vm3426_vm2, %v3439_v1, %v12252_v61  ;;  %6806 = vmatpush1.bf16.msra.mxu0 %v10271_v23  ;;  %v13950_v35 = vmax.f32 %v11574_v62, 0.0  ;;  %6713 = vmatpush1.bf16.msra.mxu1 %v10306_v56 }
 0x220   :  { %v2110_v11 = vcombine.low %v1998_v15, %v1999_v0  ;;  %v2111_v3 = vcombine.high %v1998_v15, %v1999_v0  ;;  %v3728_v28 = vcombine.low %v12141_v27, %v12146_v13  ;;  %6807 = vmatprep.subr.bf16.mxu0 %v10279_v16  ;;  %v10285_v15 = vld [vmem:[#allocation5 + $0x6c] ss:$16 sps:$4 sm:$0xff]   ;;  %v12275_v0 = vsel %vm3426_vm2, %v3442_v49, %v12259_v33 }
 0x221   :  { %v2668_v58 = vrot.slane %v2454_v30, 4  ;;  %v2669_v24 = vrot.slane %v2461_v6, 4  ;;  %v12265_v34 = vmax.f32 %v13950_v35, %v1932_v4  ;;  %v3751_v62 = vcombine.high %v12099_v10, %v12107_v22  ;;  %6714 = vmatprep.subr.bf16.mxu1 %v10314_v25  ;;  %v10283_v22 = vld [vmem:[#allocation5 + $0x68] ss:$16 sps:$4 sm:$0xff]   ;;  %v12292_v25 = vpop.f32.mrf.mxu1 }
 0x222   :  { %v2468_v50 = vrot.slane %v2110_v11, %v11589_v40  ;;  %v2475_v38 = vrot.slane %v2111_v3, %v11589_v40  ;;  %v3780_v27 = vcombine.low %v12158_v47, %v12172_v42  ;;  %v3802_v16 = vcombine.low %v12257_v37, %v12275_v0 }
 0x223   :  { %v2780_v63 = vmax.f32 %v2454_v30, %v2668_v58  ;;  %v2781_v23 = vmax.f32 %v2461_v6, %v2669_v24  ;;  %v10326_v30 = vld [vmem:[#allocation5 + $0x5c4] ss:$16 sps:$4 sm:$0xff]   ;;  %v3779_v11 = vrot.slane %v3751_v62, %v11597_v39  ;;  %v9415_v3 = vcombine.high %v12132_v36, %v3728_v28  ;;  %6808 = vmatpush1.bf16.msra.mxu0 %v10277_v26  ;;  %v12290_v58 = vpop.f32.mrf.mxu0  ;;  %v10324_v26 = vld [vmem:[#allocation5 + $0x5c0] ss:$16 sps:$4 sm:$0xff]  }
 0x224   :  { %v2670_v19 = vrot.slane %v2468_v50, 4  ;;  %v2671_v1 = vrot.slane %v2475_v38, 4  ;;  %v1814_v10 = vadd.f32 %v12188_v43, %v12206_v57  ;;  %v3824_v47 = vrot.slane %v3802_v16, %v11597_v39  ;;  %6809 = vmatprep.subr.bf16.mxu0 %v10285_v15  ;;  %6715 = vmatpush2.bf16.msra.mxu1 %v10312_v29  ;;  %v10332_v28 = vld [vmem:[#allocation5 + $0x5a4] ss:$16 sps:$4 sm:$0xff]   ;;  %v10289_v29 = vld [vmem:[#allocation5 + $0x48] ss:$16 sps:$4 sm:$0xff]  }
 0x225   :  { %v3081_v6 = vcombine.low %v12200_v9, %v2780_v63  ;;  %v9417_v49 = vcombine.high %v12146_v13, %v3780_v27  ;;  %v10291_v9 = vld [vmem:[#allocation5 + $0x4c] ss:$16 sps:$4 sm:$0xff]   ;;  %v3782_v36 = vcombine.low %v12165_v21, %v3779_v11  ;;  %v4561_v43 = vrot.slane %v9415_v3, %v11597_v39  ;;  %6716 = vmatprep.subr.bf16.mxu1 %v10326_v30  ;;  %v12308_v30 = vpop.f32.mrf.mxu0 }
 0x226   :  { %v2782_v56 = vmax.f32 %v2468_v50, %v2670_v19  ;;  %v2783_v4 = vmax.f32 %v2475_v38, %v2671_v1  ;;  %v1933_v57 = vmax.f32 %v1814_v10, 0.0  ;;  %v4629_v35 = vrot.slane %v3824_v47, %v11597_v39  ;;  %v10330_v10 = vld [vmem:[#allocation5 + $0x5a0] ss:$16 sps:$4 sm:$0xff]   ;;  %v10338_v47 = vld [vmem:[#allocation5 + $0x584] ss:$16 sps:$4 sm:$0xff]  }
 0x227   :  { %v3095_v24 = vrot.slane %v3081_v6, %v11597_v39  ;;  %v4575_v13 = vrot.slane %v9417_v49, %v11597_v39  ;;  %v9419_v21 = vcombine.high %v12172_v42, %v3782_v36  ;;  %v13951_v62 = vmax.f32 %v11731_v32, 0.0  ;;  %6810 = vmatpush1.bf16.msra.mxu0 %v10283_v22  ;;  %v12310_v6 = vpop.f32.mrf.mxu1 }
 0x228   :  { %v3098_v50 = vcombine.low %v2781_v23, %v2782_v56  ;;  %v3112_v38 = vrot.slane %v2783_v4, %v11597_v39  ;;  %v1651_v16 = vadd.f32 %v12190_v17, %v11613_v51  ;;  %6811 = vmatprep.subr.bf16.mxu0 %v10291_v9  ;;  %6717 = vmatpush2.bf16.msra.mxu1 %v10324_v26 }
 0x229   :  { %v3096_v15 = vcombine.low %v12226_v44, %v3095_v24  ;;  %v3097_v63 = vcombine.high %v12226_v44, %v3095_v24  ;;  %v2001_v19 = vmax.f32 %v13951_v62, %v1933_v57  ;;  %v4579_v1 = vcombine.high %v4561_v43, %v4575_v13  ;;  %v10297_v44 = vld [vmem:[#allocation5 + $0x2c] ss:$16 sps:$4 sm:$0xff]   ;;  %6718 = vmatprep.subr.bf16.mxu1 %v10332_v28 }
 0x22a   :  { %v3105_v23 = vrot.slane %v3098_v50, %v11597_v39  ;;  %v4578_v27 = vcombine.low %v4561_v43, %v4575_v13  ;;  %v4615_v32 = vrot.slane %v9419_v21, %v11597_v39  ;;  %v1818_v17 = vadd.f32 %v12217_v5, %v12213_v7  ;;  %v10295_v43 = vld [vmem:[#allocation5 + $0x28] ss:$16 sps:$4 sm:$0xff]   ;;  %v1666_v7 = vpop.f32.mrf.mxu1 }
 0x22b   :  { %v3216_v11 = vrot.slane %v3096_v15, 7  ;;  %v3217_v42 = vrot.slane %v3097_v63, 7  ;;  %v2112_v3 = vcombine.low %v12265_v34, %v2001_v19  ;;  %v2113_v4 = vcombine.high %v12265_v34, %v2001_v19  ;;  %6812 = vmatpush1.bf16.msra.mxu0 %v10289_v29  ;;  %v10311_v15 = vld [vmem:[#allocation5 + $0xc] ss:$16 sps:$4 sm:$0xff]  }
 0x22c   :  { %v3113_v22 = vcombine.low %v3105_v23, %v3112_v38  ;;  %v3114_v56 = vcombine.high %v3105_v23, %v3112_v38  ;;  %v4633_v49 = vcombine.high %v4615_v32, %v4629_v35  ;;  %v4632_v24 = vcombine.low %v4615_v32, %v4629_v35  ;;  %v1829_v38 = vpop.f32.mrf.mxu0  ;;  %6813 = vmatprep.subr.bf16.mxu0 %v10297_v44  ;;  %v13952_v19 = vld [vmem:[#allocation39_spill] sm:$0xff] }
 0x22d   :  { %3286 = vst [vmem:[#allocation2 + $0xa0] sm:$0xfe] %v3216_v11  ;;  %3287 = vst [vmem:[#allocation2 + $0xa8] sm:$0xfe] %v3217_v42  ;;  %v2482_v9 = vrot.slane %v2112_v3, %v11589_v40  ;;  %v1655_v36 = vadd.f32 %v12219_v2, %v11602_v20  ;;  %v2489_v34 = vrot.slane %v2113_v4, %v11589_v40  ;;  %v1936_v50 = vmax.f32 %v1818_v17, 0.0 }
 0x22e   :  { %v3218_v57 = vrot.slane %v3113_v22, 7  ;;  %v3220_v26 = vrot.slane %v3114_v56, 7  ;;  %v12321_v5 = vpack.c.bf16 %v4633_v49, %v4579_v1  ;;  %v12323_v28 = vpack.c.bf16 %v4632_v24, %v4578_v27  ;;  %6719 = vmatpush2.bf16.msra.mxu1 %v10330_v10  ;;  %v10336_v2 = vld [vmem:[#allocation5 + $0x580] ss:$16 sps:$4 sm:$0xff]   ;;  %v10344_v1 = vld [vmem:[#allocation5 + $0x564] ss:$16 sps:$4 sm:$0xff]   ;;  %v1831_v22 = vpop.f32.mrf.mxu0  ;;  %v1668_v56 = vpop.f32.mrf.mxu1 }
 0x22f   :  { %v2672_v13 = vrot.slane %v2482_v9, 4  ;;  %v1820_v35 = vadd.f32 %v12245_v8, %v12230_v52  ;;  %v2673_v62 = vrot.slane %v2489_v34, 4  ;;  %v13953_v29 = vmax.f32 %v13952_v19, 0.0  ;;  %6720 = vmatprep.subr.bf16.mxu1 %v10338_v47  ;;  %6814 = vmatpush1.bf16.msra.mxu0 %v10295_v43  ;;  %v10317_v4 = vld [vmem:[#allocation5 + $0x1ec] ss:$16 sps:$4 sm:$0xff]  }
 0x230   :  { %v3219_v63 = vsel %vm3185_vm1, %v3216_v11, %v3218_v57  ;;  %v3221_v21 = vsel %vm3185_vm1, %v3217_v42, %v3220_v26  ;;  %6637 = vmatprep.mubr.bf16.mxu0 %v12321_v5  ;;  %v1657_v52 = vadd.f32 %v12247_v55, %v11613_v51  ;;  %v1822_v8 = vadd.f32 %v12269_v60, %v12243_v45  ;;  %v10309_v11 = vld [vmem:[#allocation5 + $0x8] ss:$16 sps:$4 sm:$0xff]   ;;  %v10350_v24 = vld [vmem:[#allocation5 + $0x544] ss:$16 sps:$4 sm:$0xff]  }
 0x231   :  { %v2002_v23 = vmax.f32 %v13953_v29, %v1936_v50  ;;  %3288 = vst [vmem:[#allocation2 + $0xb0] sm:$0x7f] %v3219_v63  ;;  %3289 = vst [vmem:[#allocation2 + $0xb8] sm:$0x7f] %v3221_v21  ;;  %v2784_v27 = vmax.f32 %v2482_v9, %v2672_v13  ;;  %v1937_v44 = vmax.f32 %v1820_v35, 0.0  ;;  %v2785_v42 = vmax.f32 %v2489_v34, %v2673_v62  ;;  %v13954_v55 = vld [vmem:[#allocation41_spill] sm:$0xff] }
 0x232   :  { %6638 = vmatmul.mubr.bf16.gmra.mxu0 %v12323_v28  ;;  %v1659_v32 = vadd.f32 %v12271_v46, %v11602_v20  ;;  %v1824_v3 = vadd.f32 %v12290_v58, %v1651_v16  ;;  %v1661_v10 = vadd.f32 %v12292_v25, %v11613_v51  ;;  %v13955_v17 = vmax.f32 %v13954_v55, 0.0  ;;  %6815 = vmatprep.subr.bf16.mxu0 %v10311_v15  ;;  %v10342_v46 = vld [vmem:[#allocation5 + $0x560] ss:$16 sps:$4 sm:$0xff]   ;;  %v1670_v15 = vpop.f32.mrf.mxu1 }
 0x233   :  { %v1940_v45 = vmax.f32 %v1822_v8, 0.0  ;;  %v1828_v60 = vadd.f32 %v12308_v30, %v1655_v36  ;;  %v12347_v49 = vadd.f32 %v12310_v6, %v11602_v20  ;;  %6721 = vmatpush2.bf16.msra.mxu1 %v10336_v2  ;;  %v3115_v58 = vcombine.low %v2784_v27, %v2785_v42  ;;  %6816 = vmatpush1.bf16.msra.mxu0 %v10309_v11  ;;  %v10315_v6 = vld [vmem:[#allocation5 + $0x1e8] ss:$16 sps:$4 sm:$0xff]   ;;  %v10329_v2 = vld [vmem:[#allocation5 + $0x1cc] ss:$16 sps:$4 sm:$0xff]   ;;  %v13959_v27 = vld [vmem:[#allocation44_spill] sm:$0xff] }
 0x234   :  { %v2003_v47 = vmax.f32 %v13955_v17, %v1937_v44  ;;  %v1941_v16 = vmax.f32 %v1824_v3, 0.0  ;;  %v1830_v9 = vadd.f32 %v1829_v38, %v1657_v52  ;;  %v12350_v25 = vadd.f32 %v1666_v7, %v11613_v51  ;;  %6722 = vmatprep.subr.bf16.mxu1 %v10344_v1  ;;  %v1833_v7 = vpop.f32.mrf.mxu0  ;;  %6817 = vmatprep.subr.bf16.mxu0 %v10317_v4  ;;  %v10348_v29 = vld [vmem:[#allocation5 + $0x540] ss:$16 sps:$4 sm:$0xff]  }
 0x235   :  { %v13956_v26 = vmax.f32 %v11639_v41, 0.0  ;;  %v1944_v36 = vmax.f32 %v1828_v60, 0.0  ;;  %v12355_v34 = vrot.slane %v3115_v58, %v11597_v39  ;;  %v13957_v50 = vmax.f32 %v11743_v54, 0.0  ;;  %v10363_v54 = vld [vmem:[#allocation5 + $0x524] ss:$16 sps:$4 sm:$0xff]  }
 0x236   :  { %v2114_v43 = vcombine.low %v2002_v23, %v2003_v47  ;;  %v2115_v57 = vcombine.high %v2002_v23, %v2003_v47  ;;  %v1945_v38 = vmax.f32 %v1830_v9, 0.0  ;;  %v1832_v35 = vadd.f32 %v1831_v22, %v1659_v32  ;;  %v3342_v55 = vld [vmem:[#allocation2 + $0x60] sm:$0xfe]  ;;  %v3344_v17 = vld [vmem:[#allocation2 + $0x70] sm:$0x7f] }
 0x237   :  { %v2004_v30 = vmax.f32 %v13956_v26, %v1940_v45  ;;  %v2005_v13 = vmax.f32 %v13957_v50, %v1941_v16  ;;  %v13958_v21 = vmax.f32 %v11668_v14, 0.0  ;;  %v12364_v19 = vadd.f32 %v1668_v56, %v11602_v20  ;;  %6723 = vmatpush2.bf16.msra.mxu1 %v10342_v46  ;;  %6818 = vmatpush2.bf16.msra.mxu0 %v10315_v6  ;;  %v10327_v14 = vld [vmem:[#allocation5 + $0x1c8] ss:$16 sps:$4 sm:$0xff]   ;;  %v10335_v47 = vld [vmem:[#allocation5 + $0x1ac] ss:$16 sps:$4 sm:$0xff]   ;;  %v13961_v46 = vld [vmem:[#allocation32_spill] sm:$0xff] }
 0x238   :  { %v2496_v63 = vrot.slane %v2114_v43, %v11589_v40  ;;  %v2503_v41 = vrot.slane %v2115_v57, %v11589_v40  ;;  %v13960_v44 = vmax.f32 %v13959_v27, 0.0  ;;  %v1948_v8 = vmax.f32 %v1832_v35, 0.0  ;;  %6724 = vmatprep.subr.bf16.mxu1 %v10350_v24  ;;  %6819 = vmatprep.subr.bf16.mxu0 %v10329_v2  ;;  %v10369_v26 = vld [vmem:[#allocation5 + $0x504] ss:$16 sps:$4 sm:$0xff]  }
 0x239   :  { %v2006_v62 = vmax.f32 %v13958_v21, %v1944_v36  ;;  %v2116_v23 = vcombine.low %v2004_v30, %v2005_v13  ;;  %v2117_v1 = vcombine.high %v2004_v30, %v2005_v13  ;;  %v1834_v32 = vadd.f32 %v1833_v7, %v1661_v10  ;;  %v13963_v36 = vld [vmem:[#allocation33_spill] sm:$0xff]  ;;  %v3343_v13 = vld [vmem:[#allocation2 + $0x68] sm:$0xfe] }
 0x23a   :  { %v2007_v52 = vmax.f32 %v13960_v44, %v1945_v38  ;;  %v2674_v11 = vrot.slane %v2496_v63, 4  ;;  %v2675_v42 = vrot.slane %v2503_v41, 4  ;;  %v12369_v3 = vadd.f32 %v1670_v15, %v11613_v51  ;;  %v10361_v51 = vld [vmem:[#allocation5 + $0x520] ss:$16 sps:$4 sm:$0xff]   ;;  %v10333_v7 = vld [vmem:[#allocation5 + $0x1a8] ss:$16 sps:$4 sm:$0xff]  }
 0x23b   :  { %v2510_v20 = vrot.slane %v2116_v23, %v11589_v40  ;;  %v2517_v22 = vrot.slane %v2117_v1, %v11589_v40  ;;  %v13962_v58 = vmax.f32 %v13961_v46, 0.0  ;;  %v1949_v16 = vmax.f32 %v1834_v32, 0.0  ;;  %6725 = vmatpush2.bf16.msra.mxu1 %v10348_v29  ;;  %6820 = vmatpush2.bf16.msra.mxu0 %v10327_v14  ;;  %v10243_v21 = vld [vmem:[#allocation2 + $0x44] ss:$8 sps:$4 sm:$0xff]   ;;  %v3345_v1 = vld [vmem:[#allocation2 + $0x78] sm:$0x7f] }
 0x23c   :  { %v2118_v56 = vcombine.low %v2006_v62, %v2007_v52  ;;  %v2119_v4 = vcombine.high %v2006_v62, %v2007_v52  ;;  %v2786_v45 = vmax.f32 %v2496_v63, %v2674_v11  ;;  %v2787_v60 = vmax.f32 %v2503_v41, %v2675_v42  ;;  %6726 = vmatprep.subr.bf16.mxu1 %v10363_v54  ;;  %v10341_v62 = vld [vmem:[#allocation5 + $0x18c] ss:$16 sps:$4 sm:$0xff]   ;;  %v10244_v44 = vld [vmem:[#allocation2 + $0x50] ss:$8 sps:$4 sm:$0xff]  }
 0x23d   :  { %v2008_v10 = vmax.f32 %v13962_v58, %v1948_v8  ;;  %v2676_v9 = vrot.slane %v2510_v20, 4  ;;  %v2677_v24 = vrot.slane %v2517_v22, 4  ;;  %v13964_v6 = vmax.f32 %v13963_v36, 0.0  ;;  %6821 = vmatprep.subr.bf16.mxu0 %v10335_v47  ;;  %v10367_v52 = vld [vmem:[#allocation5 + $0x500] ss:$16 sps:$4 sm:$0xff]   ;;  %v1837_v36 = vpop.f32.mrf.mxu0 }
 0x23e   :  { %v2524_v43 = vrot.slane %v2118_v56, %v11589_v40  ;;  %v2531_v57 = vrot.slane %v2119_v4, %v11589_v40  ;;  %v3116_v30 = vcombine.low %v2786_v45, %v2787_v60  ;;  %v3445_v38 = vrot.slane %v3342_v55, 1  ;;  %v10246_v14 = vld [vmem:[#allocation2 + $0x54] ss:$8 sps:$4 sm:$0x33]   ;;  %v10339_v47 = vld [vmem:[#allocation5 + $0x188] ss:$16 sps:$4 sm:$0xff]  }
 0x23f   :  { %v2009_v50 = vmax.f32 %v13964_v6, %v1949_v16  ;;  %v12379_v35 = vrot.slane %v3344_v17, 1  ;;  %v2788_v15 = vmax.f32 %v2510_v20, %v2676_v9  ;;  %v2789_v2 = vmax.f32 %v2517_v22, %v2677_v24  ;;  %6727 = vmatpush2.bf16.msra.mxu1 %v10361_v51  ;;  %v10375_v20 = vld [vmem:[#allocation5 + $0x2ec] ss:$16 sps:$4 sm:$0xff]   ;;  %v10247_v17 = vld [vmem:[#allocation2 + $0x60] ss:$8 sps:$4 sm:$0xff]   ;;  %6822 = vmatpush2.bf16.msra.mxu0 %v10333_v7 }
 0x240   :  { %v2678_v63 = vrot.slane %v2524_v43, 4  ;;  %v2679_v41 = vrot.slane %v2531_v57, 4  ;;  %v3130_v29 = vrot.slane %v3116_v30, %v11597_v39  ;;  %v3448_v32 = vrot.slane %v3343_v13, 1  ;;  %6728 = vmatprep.subr.bf16.mxu1 %v10369_v26  ;;  %6823 = vmatprep.subr.bf16.mxu0 %v10341_v62  ;;  %v10347_v16 = vld [vmem:[#allocation5 + $0x16c] ss:$16 sps:$4 sm:$0xff]  }
 0x241   :  { %v2120_v54 = vcombine.low %v2008_v10, %v2009_v50  ;;  %v2121_v23 = vcombine.high %v2008_v10, %v2009_v50  ;;  %v12384_v27 = vsel %vm3426_vm2, %v3445_v38, %v12379_v35  ;;  %v3133_v8 = vcombine.low %v2788_v15, %v2789_v2  ;;  %v10249_v10 = vld [vmem:[#allocation2 + $0x64] ss:$8 sps:$4 sm:$0xff]   ;;  %v10345_v7 = vld [vmem:[#allocation5 + $0x168] ss:$16 sps:$4 sm:$0xff]  }
 0x242   :  { %v2790_v11 = vmax.f32 %v2524_v43, %v2678_v63  ;;  %v2791_v42 = vmax.f32 %v2531_v57, %v2679_v41  ;;  %v3131_v22 = vcombine.low %v12355_v34, %v3130_v29  ;;  %v3132_v56 = vcombine.high %v12355_v34, %v3130_v29 }
 0x243   :  { %v2538_v4 = vrot.slane %v2120_v54, %v11589_v40  ;;  %v2545_v55 = vrot.slane %v2121_v23, %v11589_v40  ;;  %v3140_v45 = vrot.slane %v3133_v8, %v11597_v39  ;;  %v12392_v46 = vrot.slane %v3345_v1, 1  ;;  %6729 = vmatpush2.bf16.msra.mxu1 %v10367_v52  ;;  %6824 = vmatpush2.bf16.msra.mxu0 %v10339_v47  ;;  %v10366_v47 = vld [vmem:[#allocation5 + $0x12c] ss:$16 sps:$4 sm:$0xff]  }
 0x244   :  { %v3147_v60 = vrot.slane %v2790_v11, %v11597_v39  ;;  %v3817_v58 = vrot.slane %v10243_v21, %v11597_v39  ;;  %v3222_v51 = vrot.slane %v3131_v22, 7  ;;  %v3223_v34 = vrot.slane %v3132_v56, 7  ;;  %6904 = vmatprep.subr.bf16.mxu1 %v10375_v20  ;;  %6825 = vmatprep.subr.bf16.mxu0 %v10347_v16  ;;  %v10353_v21 = vld [vmem:[#allocation5 + $0x14c] ss:$16 sps:$4 sm:$0xff]   ;;  %v1839_v11 = vpop.f32.mrf.mxu0  ;;  %v10256_v22 = vld [vmem:[#allocation2 + $0x70] ss:$8 sps:$4 sm:$0xff]  }
 0x245   :  { %v2680_v9 = vrot.slane %v2538_v4, 4  ;;  %v2681_v24 = vrot.slane %v2545_v55, 4  ;;  %v3450_v26 = vsel %vm3426_vm2, %v3448_v32, %v12392_v46  ;;  %v3864_v30 = vrot.slane %v10244_v44, %v11597_v39  ;;  %v10351_v56 = vld [vmem:[#allocation5 + $0x148] ss:$16 sps:$4 sm:$0xff]  }
 0x246   :  { %v3148_v43 = vcombine.low %v3140_v45, %v3147_v60  ;;  %v3149_v57 = vcombine.high %v3140_v45, %v3147_v60  ;;  %3290 = vst [vmem:[#allocation2 + $0xc0] sm:$0xfe] %v3222_v51  ;;  %3291 = vst [vmem:[#allocation2 + $0xc8] sm:$0xfe] %v3223_v34  ;;  %v3871_v13 = vrot.slane %v10246_v14, %v11597_v39 }
 0x247   :  { %v2792_v6 = vmax.f32 %v2538_v4, %v2680_v9  ;;  %v12398_v50 = vmax.f32 %v2545_v55, %v2681_v24  ;;  %v3908_v38 = vcombine.low %v12384_v27, %v3450_v26  ;;  %v3916_v63 = vrot.slane %v10247_v17, %v11597_v39  ;;  %6826 = vmatpush2.bf16.msra.mxu0 %v10345_v7  ;;  %v10258_v17 = vld [vmem:[#allocation2 + $0x74] ss:$8 sps:$4 sm:$0x33]  }
 0x248   :  { %v3224_v15 = vrot.slane %v3148_v43, 7  ;;  %v3226_v2 = vrot.slane %v3149_v57, 7  ;;  %v12404_v41 = vrot.slane %v10249_v10, %v11597_v39  ;;  %v4662_v54 = vrot.slane %v3817_v58, %v11597_v39  ;;  %6827 = vmatprep.subr.bf16.mxu0 %v10353_v21  ;;  %v10261_v57 = vld [vmem:[#allocation2 + $0x84] ss:$8 sps:$4 sm:$0xff]  }
 0x249   :  { %v3150_v62 = vcombine.low %v2791_v42, %v2792_v6  ;;  %v3930_v29 = vrot.slane %v3908_v38, %v11597_v39  ;;  %v4676_v23 = vrot.slane %v3864_v30, %v11597_v39  ;;  %v9420_v52 = vcombine.low %v3871_v13, %v3916_v63  ;;  %v10372_v38 = vld [vmem:[#allocation5 + $0x10c] ss:$16 sps:$4 sm:$0xff]  }
 0x24a   :  { %v3225_v1 = vsel %vm3185_vm1, %v3222_v51, %v3224_v15  ;;  %v3227_v44 = vsel %vm3185_vm1, %v3223_v34, %v3226_v2  ;;  %v3803_v8 = vcombine.high %v12257_v37, %v12275_v0  ;;  %v3856_v20 = vcombine.low %v12252_v61, %v12259_v33  ;;  %v13965_v2 = vld [vmem:[#allocation21_spill] sm:$0xff] }
 0x24b   :  { %3292 = vst [vmem:[#allocation2 + $0xd0] sm:$0x7f] %v3225_v1  ;;  %3293 = vst [vmem:[#allocation2 + $0xd8] sm:$0x7f] %v3227_v44  ;;  %v12414_v32 = vrot.slane %v3150_v62, %v11597_v39  ;;  %v3939_v42 = vcombine.high %v3916_v63, %v3930_v29  ;;  %v4685_v14 = vcombine.high %v4662_v54, %v4676_v23  ;;  %6828 = vmatpush2.bf16.msra.mxu0 %v10351_v56 }
 0x24c   :  { %v4716_v4 = vrot.slane %v9420_v52, %v11597_v39  ;;  %v3831_v55 = vrot.slane %v3803_v8, %v11597_v39  ;;  %v3857_v37 = vcombine.high %v12252_v61, %v12259_v33  ;;  %v3909_v0 = vcombine.high %v12384_v27, %v3450_v26  ;;  %v10259_v33 = vld [vmem:[#allocation2 + $0x80] ss:$8 sps:$4 sm:$0xff]   ;;  %v1841_v27 = vpop.f32.mrf.mxu0  ;;  %6829 = vmatprep.subr.bf16.mxu0 %v10366_v47 }
 0x24d   :  { %v9422_v45 = vcombine.low %v3939_v42, %v12404_v41  ;;  %v3878_v60 = vrot.slane %v3856_v20, %v11597_v39  ;;  %v1838_v58 = vadd.f32 %v1837_v36, %v12347_v49  ;;  %v4684_v10 = vcombine.low %v4662_v54, %v4676_v23  ;;  %v10364_v26 = vld [vmem:[#allocation5 + $0x128] ss:$16 sps:$4 sm:$0xff]  }
 0x24e   :  { %v3885_v16 = vrot.slane %v3857_v37, %v11597_v39  ;;  %v12428_v51 = vrot.slane %v3909_v0, %v11597_v39  ;;  %v4669_v34 = vrot.slane %v3831_v55, %v11597_v39  ;;  %v3962_v61 = vcombine.low %v12379_v35, %v12392_v46 }
 0x24f   :  { %v4730_v9 = vrot.slane %v9422_v45, %v11597_v39  ;;  %v4683_v24 = vrot.slane %v3878_v60, %v11597_v39  ;;  %v1952_v43 = vmax.f32 %v1838_v58, 0.0  ;;  %v12436_v49 = vrot.slane %v10256_v22, %v11597_v39  ;;  %6830 = vmatpush2.bf16.msra.mxu0 %v10364_v26  ;;  %v10370_v22 = vld [vmem:[#allocation5 + $0x108] ss:$16 sps:$4 sm:$0xff]  }
 0x250   :  { %v3940_v30 = vcombine.low %v12404_v41, %v12428_v51  ;;  %v9421_v36 = vcombine.low %v3885_v16, %v3930_v29  ;;  %v3941_v6 = vcombine.high %v12404_v41, %v12428_v51  ;;  %v12443_v13 = vrot.slane %v10258_v17, %v11597_v39  ;;  %v1843_v41 = vpop.f32.mrf.mxu0  ;;  %6831 = vmatprep.subr.bf16.mxu0 %v10372_v38  ;;  %v13971_v38 = vld [vmem:[#allocation29_spill] sm:$0xff] }
 0x251   :  { %v4739_v7 = vcombine.high %v4716_v4, %v4730_v9  ;;  %v4687_v15 = vcombine.high %v4669_v34, %v4683_v24  ;;  %v13966_v63 = vmax.f32 %v13965_v2, 0.0  ;;  %v4738_v62 = vcombine.low %v4716_v4, %v4730_v9  ;;  %v3348_v9 = vld [vmem:[#allocation2 + $0x90] sm:$0x7f] }
 0x252   :  { %v9423_v54 = vcombine.high %v3930_v29, %v3940_v30  ;;  %v4723_v23 = vrot.slane %v9421_v36, %v11597_v39  ;;  %v4686_v1 = vcombine.low %v4669_v34, %v4683_v24  ;;  %v12451_v44 = vrot.slane %v3962_v61, %v11597_v39  ;;  %v13969_v30 = vld [vmem:[#allocation31_spill] sm:$0xff] }
 0x253   :  { %v12447_v21 = vmax.f32 %v13966_v63, %v1952_v43  ;;  %v12453_v52 = vpack.c.bf16 %v4739_v7, %v4685_v14  ;;  %v12455_v8 = vpack.c.bf16 %v4738_v62, %v4684_v10  ;;  %v4022_v42 = vrot.slane %v10259_v33, %v11597_v39  ;;  %v10378_v14 = vld [vmem:[#allocation5 + $0x4ec] ss:$16 sps:$4 sm:$0xff]   ;;  %6832 = vmatpush2.bf16.msra.mxu0 %v10370_v22 }
 0x254   :  { %v4029_v20 = vrot.slane %v10261_v57, %v11597_v39  ;;  %v4737_v56 = vrot.slane %v9423_v54, %v11597_v39  ;;  %v3993_v29 = vcombine.high %v12436_v49, %v12451_v44  ;;  %v9424_v4 = vcombine.low %v3941_v6, %v12436_v49  ;;  %v3347_v10 = vld [vmem:[#allocation2 + $0x88] sm:$0xfe]  ;;  %7007 = vmatprep.subr.bf16.mxu0 %v10378_v14  ;;  %v13967_v43 = vld [vmem:[#allocation25_spill] sm:$0xff] }
 0x255   :  { %v1840_v55 = vadd.f32 %v1839_v11, %v12350_v25  ;;  %6544 = vmatprep.mubr.bf16.mxu1 %v12453_v52  ;;  %v4824_v37 = vrot.slane %v4022_v42, %v11597_v39  ;;  %v1842_v17 = vadd.f32 %v1841_v27, %v12364_v19  ;;  %v1844_v47 = vadd.f32 %v1843_v41, %v12369_v3  ;;  %v3346_v11 = vld [vmem:[#allocation2 + $0x80] sm:$0xfe]  ;;  %v3349_v63 = vld [vmem:[#allocation2 + $0x98] sm:$0x7f] }
 0x256   :  { %v4838_v0 = vrot.slane %v4029_v20, %v11597_v39  ;;  %v4741_v45 = vcombine.high %v4723_v23, %v4737_v56  ;;  %6545 = vmatmul.mubr.bf16.gmra.mxu1 %v12455_v8  ;;  %v4740_v60 = vcombine.low %v4723_v23, %v4737_v56  ;;  %v9426_v58 = vcombine.low %v3993_v29, %v12443_v13  ;;  %v3350_v56 = vld [vmem:[#allocation2 + $0xa0] sm:$0xfe] }
 0x257   :  { %v4770_v25 = vrot.slane %v9424_v4, %v11597_v39  ;;  %v1953_v34 = vmax.f32 %v1840_v55, 0.0  ;;  %v1956_v61 = vmax.f32 %v1842_v17, 0.0  ;;  %v1957_v33 = vmax.f32 %v1844_v47, 0.0 }
 0x258   :  { %v4847_v16 = vcombine.high %v4824_v37, %v4838_v0  ;;  %v12472_v24 = vpack.c.bf16 %v4741_v45, %v4687_v15  ;;  %v12474_v19 = vpack.c.bf16 %v4740_v60, %v4686_v1  ;;  %v4784_v3 = vrot.slane %v9426_v58, %v11597_v39 }
 0x259   :  { %v4846_v27 = vcombine.low %v4824_v37, %v4838_v0  ;;  %v13968_v57 = vmax.f32 %v13967_v43, 0.0  ;;  %v13970_v36 = vmax.f32 %v13969_v30, 0.0  ;;  %v13972_v7 = vmax.f32 %v13971_v38, 0.0  ;;  %v10298_v38 = vld [vmem:[#allocation2 + $0x90] ss:$8 sps:$4 sm:$0xff]  }
 0x25a   :  { %v3451_v62 = vrot.slane %v3346_v11, 1  ;;  %6647 = vmatprep.mubr.bf16.mxu0 %v12472_v24  ;;  %v4793_v15 = vcombine.high %v4770_v25, %v4784_v3  ;;  %v4792_v54 = vcombine.low %v4770_v25, %v4784_v3  ;;  %v12484_v23 = vrot.slane %v3348_v9, 1  ;;  %v3352_v3 = vld [vmem:[#allocation2 + $0xb0] sm:$0x7f] }
 0x25b   :  { %v2011_v26 = vmax.f32 %v13968_v57, %v1953_v34  ;;  %v2012_v6 = vmax.f32 %v13970_v36, %v1956_v61  ;;  %v2013_v2 = vmax.f32 %v13972_v7, %v1957_v33  ;;  %v3454_v1 = vrot.slane %v3347_v10, 1  ;;  %6648 = vmatmul.mubr.bf16.gmra.mxu0 %v12474_v19  ;;  %v3351_v57 = vld [vmem:[#allocation2 + $0xa8] sm:$0xfe] }
 0x25c   :  { %v12489_v29 = vpack.c.bf16 %v4847_v16, %v4793_v15  ;;  %v12491_v4 = vpack.c.bf16 %v4846_v27, %v4792_v54  ;;  %v3453_v55 = vsel %vm3426_vm2, %v3451_v62, %v12484_v23  ;;  %v12495_v14 = vrot.slane %v3349_v63, 1 }
 0x25d   :  { %v2122_v41 = vcombine.low %v12447_v21, %v2011_v26  ;;  %v2123_v42 = vcombine.high %v12447_v21, %v2011_v26  ;;  %v2124_v20 = vcombine.low %v2012_v6, %v2013_v2  ;;  %v2125_v22 = vcombine.high %v2012_v6, %v2013_v2  ;;  %v3353_v6 = vld [vmem:[#allocation2 + $0xb8] sm:$0x7f] }
 0x25e   :  { %6554 = vmatprep.mubr.bf16.mxu1 %v12489_v29  ;;  %v3456_v47 = vsel %vm3426_vm2, %v3454_v1, %v12495_v14  ;;  %v3963_v45 = vcombine.high %v12379_v35, %v12392_v46  ;;  %v3992_v60 = vcombine.low %v12436_v49, %v12451_v44  ;;  %v3457_v58 = vrot.slane %v3350_v56, 1  ;;  %v10300_v1 = vld [vmem:[#allocation2 + $0x94] ss:$8 sps:$4 sm:$0x33]  }
 0x25f   :  { %v2552_v37 = vrot.slane %v2122_v41, %v11589_v40  ;;  %v2559_v0 = vrot.slane %v2123_v42, %v11589_v40  ;;  %v2566_v17 = vrot.slane %v2124_v20, %v11589_v40  ;;  %v2573_v21 = vrot.slane %v2125_v22, %v11589_v40  ;;  %6555 = vmatmul.mubr.bf16.gmra.mxu1 %v12491_v4 }
 0x260   :  { %v3991_v34 = vrot.slane %v3963_v45, %v11597_v39  ;;  %v4014_v61 = vcombine.low %v3453_v55, %v3456_v47  ;;  %v4015_v33 = vcombine.high %v3453_v55, %v3456_v47  ;;  %v9425_v9 = vcombine.high %v12428_v51, %v3992_v60  ;;  %v10301_v47 = vld [vmem:[#allocation2 + $0xa0] ss:$8 sps:$4 sm:$0xff]   ;;  %v10303_v45 = vld [vmem:[#allocation2 + $0xa4] ss:$8 sps:$4 sm:$0xff]  }
 0x261   :  { %v2682_v25 = vrot.slane %v2552_v37, 4  ;;  %v2683_v11 = vrot.slane %v2559_v0, 4  ;;  %v2684_v10 = vrot.slane %v2566_v17, 4  ;;  %v2685_v16 = vrot.slane %v2573_v21, 4 }
 0x262   :  { %v3994_v49 = vcombine.low %v12443_v13, %v3991_v34  ;;  %v4036_v26 = vrot.slane %v4014_v61, %v11597_v39  ;;  %v4043_v30 = vrot.slane %v4015_v33, %v11597_v39  ;;  %v4777_v36 = vrot.slane %v9425_v9, %v11597_v39 }
 0x263   :  { %v2794_v27 = vmax.f32 %v2552_v37, %v2682_v25  ;;  %v2795_v43 = vmax.f32 %v2559_v0, %v2683_v11  ;;  %v2796_v35 = vmax.f32 %v2566_v17, %v2684_v10  ;;  %v2797_v46 = vmax.f32 %v2573_v21, %v2685_v16  ;;  %v10304_v10 = vld [vmem:[#allocation2 + $0xb0] ss:$8 sps:$4 sm:$0xff]  }
 0x264   :  { %v12517_v63 = vrot.slane %v3352_v3, 1  ;;  %v9427_v62 = vcombine.high %v12451_v44, %v3994_v49  ;;  %v4831_v15 = vrot.slane %v4036_v26, %v11597_v39  ;;  %v4845_v13 = vrot.slane %v4043_v30, %v11597_v39 }
 0x265   :  { %v3151_v7 = vcombine.low %v12398_v50, %v2794_v27  ;;  %v3168_v2 = vcombine.low %v2795_v43, %v2796_v35  ;;  %v3182_v51 = vrot.slane %v2797_v46, %v11597_v39  ;;  %v3460_v54 = vrot.slane %v3351_v57, 1  ;;  %v10318_v43 = vld [vmem:[#allocation2 + $0xb4] ss:$8 sps:$4 sm:$0x33]  }
 0x266   :  { %v3459_v50 = vsel %vm3426_vm2, %v3457_v58, %v12517_v63  ;;  %v12526_v20 = vrot.slane %v3353_v6, 1  ;;  %v4791_v22 = vrot.slane %v9427_v62, %v11597_v39  ;;  %v4849_v56 = vcombine.high %v4831_v15, %v4845_v13 }
 0x267   :  { %v3165_v41 = vrot.slane %v3151_v7, %v11597_v39  ;;  %v3175_v42 = vrot.slane %v3168_v2, %v11597_v39  ;;  %v4848_v55 = vcombine.low %v4831_v15, %v4845_v13  ;;  %v4076_v44 = vrot.slane %v10298_v38, %v11597_v39  ;;  %v10319_v38 = vld [vmem:[#allocation2 + $0xc0] ss:$8 sps:$4 sm:$0xff]  }
 0x268   :  { %v4795_v60 = vcombine.high %v4777_v36, %v4791_v22  ;;  %v4794_v25 = vcombine.low %v4777_v36, %v4791_v22  ;;  %v3462_v58 = vsel %vm3426_vm2, %v3460_v54, %v12526_v20  ;;  %v4083_v11 = vrot.slane %v10300_v1, %v11597_v39 }
 0x269   :  { %v3166_v37 = vcombine.low %v12414_v32, %v3165_v41  ;;  %v3167_v0 = vcombine.high %v12414_v32, %v3165_v41  ;;  %v3183_v17 = vcombine.low %v3175_v42, %v3182_v51  ;;  %v3184_v21 = vcombine.high %v3175_v42, %v3182_v51 }
 0x26a   :  { %v12535_v9 = vpack.c.bf16 %v4849_v56, %v4795_v60  ;;  %v12537_v3 = vpack.c.bf16 %v4848_v55, %v4794_v25  ;;  %v4120_v32 = vcombine.low %v3459_v50, %v3462_v58  ;;  %v4121_v27 = vcombine.high %v3459_v50, %v3462_v58  ;;  %v10321_v56 = vld [vmem:[#allocation2 + $0xc4] ss:$8 sps:$4 sm:$0xff]  }
 0x26b   :  { %v3228_v16 = vrot.slane %v3166_v37, 7  ;;  %v3229_v34 = vrot.slane %v3167_v0, 7  ;;  %v3230_v61 = vrot.slane %v3183_v17, 7  ;;  %v3232_v33 = vrot.slane %v3184_v21, 7  ;;  %v10322_v37 = vld [vmem:[#allocation2 + $0xd0] ss:$8 sps:$4 sm:$0xff]  }
 0x26c   :  { %v4128_v57 = vrot.slane %v10301_v47, %v11597_v39  ;;  %v4135_v49 = vrot.slane %v10303_v45, %v11597_v39  ;;  %6657 = vmatprep.mubr.bf16.mxu0 %v12535_v9  ;;  %v4142_v26 = vrot.slane %v4120_v32, %v11597_v39  ;;  %v4149_v30 = vrot.slane %v4121_v27, %v11597_v39 }
 0x26d   :  { %3294 = vst [vmem:[#allocation2 + $0xe0] sm:$0xfe] %v3228_v16  ;;  %3295 = vst [vmem:[#allocation2 + $0xe8] sm:$0xfe] %v3229_v34  ;;  %v3231_v35 = vsel %vm3185_vm1, %v3228_v16, %v3230_v61  ;;  %v3233_v46 = vsel %vm3185_vm1, %v3229_v34, %v3232_v33  ;;  %v4182_v36 = vrot.slane %v10304_v10, %v11597_v39  ;;  %6658 = vmatmul.mubr.bf16.gmra.mxu0 %v12537_v3 }
 0x26e   :  { %3296 = vst [vmem:[#allocation2 + $0xf0] sm:$0x7f] %v3231_v35  ;;  %3297 = vst [vmem:[#allocation2 + $0xf8] sm:$0x7f] %v3233_v46  ;;  %v4878_v6 = vrot.slane %v4076_v44, %v11597_v39  ;;  %v9428_v7 = vcombine.low %v4083_v11, %v4128_v57  ;;  %v4068_v2 = vcombine.low %v12484_v23, %v12495_v14 }
 0x26f   :  { %v4069_v51 = vcombine.high %v12484_v23, %v12495_v14  ;;  %v4174_v62 = vcombine.low %v12517_v63, %v12526_v20  ;;  %v4151_v15 = vcombine.high %v4128_v57, %v4142_v26  ;;  %v4153_v13 = vcombine.high %v4135_v49, %v4149_v30 }
 0x270   :  { %v4152_v54 = vcombine.low %v4135_v49, %v4149_v30  ;;  %v12556_v1 = vrot.slane %v10318_v43, %v11597_v39  ;;  %v4892_v41 = vrot.slane %v9428_v7, %v11597_v39  ;;  %v4090_v42 = vrot.slane %v4068_v2, %v11597_v39  ;;  %v3354_v43 = vld [vmem:[#allocation2 + $0xc0] sm:$0xfe] }
 0x271   :  { %v4097_v50 = vrot.slane %v4069_v51, %v11597_v39  ;;  %v12562_v22 = vrot.slane %v4174_v62, %v11597_v39  ;;  %v9430_v23 = vcombine.low %v4151_v15, %v4135_v49  ;;  %v9432_v14 = vcombine.low %v4153_v13, %v4182_v36  ;;  %v3357_v15 = vld [vmem:[#allocation2 + $0xd8] sm:$0x7f] }
 0x272   :  { %v9431_v55 = vcombine.high %v4142_v26, %v4152_v54  ;;  %v4234_v44 = vrot.slane %v10319_v38, %v11597_v39  ;;  %v4901_v0 = vcombine.high %v4878_v6, %v4892_v41  ;;  %v4885_v47 = vrot.slane %v4090_v42, %v11597_v39 }
 0x273   :  { %v4204_v17 = vcombine.low %v4182_v36, %v12562_v22  ;;  %v9429_v21 = vcombine.low %v4097_v50, %v4142_v26  ;;  %v4932_v45 = vrot.slane %v9430_v23, %v11597_v39  ;;  %v4946_v60 = vrot.slane %v9432_v14, %v11597_v39  ;;  %v3355_v26 = vld [vmem:[#allocation2 + $0xc8] sm:$0xfe] }
 0x274   :  { %v4939_v25 = vrot.slane %v9431_v55, %v11597_v39  ;;  %v4900_v58 = vcombine.low %v4878_v6, %v4892_v41  ;;  %v4205_v16 = vcombine.high %v4182_v36, %v12562_v22  ;;  %v4241_v34 = vrot.slane %v10321_v56, %v11597_v39  ;;  %v3356_v6 = vld [vmem:[#allocation2 + $0xd0] sm:$0x7f]  ;;  %v3358_v54 = vld [vmem:[#allocation2 + $0xe0] sm:$0xfe]  ;;  %v3359_v23 = vld [vmem:[#allocation2 + $0xe8] sm:$0xfe] }
 0x275   :  { %v4899_v11 = vrot.slane %v9429_v21, %v11597_v39  ;;  %v9433_v10 = vcombine.high %v4149_v30, %v4204_v17  ;;  %v4955_v61 = vcombine.high %v4932_v45, %v4946_v60  ;;  %v4954_v33 = vcombine.low %v4932_v45, %v4946_v60  ;;  %v3360_v14 = vld [vmem:[#allocation2 + $0xf0] sm:$0x7f]  ;;  %v3361_v17 = vld [vmem:[#allocation2 + $0xf8] sm:$0x7f] }
 0x276   :  { %v4288_v32 = vrot.slane %v10322_v37, %v11597_v39  ;;  %v5000_v27 = vrot.slane %v4234_v44, %v11597_v39  ;;  %v9434_v49 = vcombine.low %v4205_v16, %v12556_v1  ;;  %v5040_v38 = vrot.slane %v4241_v34, %v11597_v39  ;;  %v10354_v21 = vld [vmem:[#allocation2 + $0xd4] ss:$8 sps:$4 sm:$0x33]  }
 0x277   :  { %v4903_v35 = vcombine.high %v4885_v47, %v4899_v11  ;;  %v4953_v46 = vrot.slane %v9433_v10, %v11597_v39  ;;  %v4902_v57 = vcombine.low %v4885_v47, %v4899_v11  ;;  %v12577_v30 = vpack.c.bf16 %v4955_v61, %v4901_v0 }
 0x278   :  { %v12579_v36 = vpack.c.bf16 %v4954_v33, %v4900_v58  ;;  %v5054_v7 = vrot.slane %v4288_v32, %v11597_v39  ;;  %v4986_v62 = vrot.slane %v9434_v49, %v11597_v39  ;;  %v3463_v13 = vrot.slane %v3354_v43, 1  ;;  %v10355_v58 = vld [vmem:[#allocation2 + $0xe0] ss:$8 sps:$4 sm:$0xff]  }
 0x279   :  { %v4957_v2 = vcombine.high %v4939_v25, %v4953_v46  ;;  %v4956_v51 = vcombine.low %v4939_v25, %v4953_v46  ;;  %6564 = vmatprep.mubr.bf16.mxu1 %v12577_v30  ;;  %v12585_v50 = vrot.slane %v3356_v6, 1  ;;  %v3466_v56 = vrot.slane %v3355_v26, 1 }
 0x27a   :  { %v5063_v41 = vcombine.high %v5040_v38, %v5054_v7  ;;  %v5062_v42 = vcombine.low %v5040_v38, %v5054_v7  ;;  %6565 = vmatmul.mubr.bf16.gmra.mxu1 %v12579_v36  ;;  %v5009_v37 = vcombine.high %v4986_v62, %v5000_v27  ;;  %v5008_v0 = vcombine.low %v4986_v62, %v5000_v27  ;;  %v10358_v38 = vld [vmem:[#allocation2 + $0xf0] ss:$8 sps:$4 sm:$0xff]   ;;  %v10360_v7 = vld [vmem:[#allocation2 + $0xf4] ss:$8 sps:$4 sm:$0x33]  }
 0x27b   :  { %v12587_v55 = vpack.c.bf16 %v4957_v2, %v4903_v35  ;;  %v12590_v44 = vpack.c.bf16 %v4956_v51, %v4902_v57  ;;  %v3465_v47 = vsel %vm3426_vm2, %v3463_v13, %v12585_v50  ;;  %v3467_v45 = vrot.slane %v3357_v15, 1 }
 0x27c   :  { %v4175_v60 = vcombine.high %v12517_v63, %v12526_v20  ;;  %v3469_v25 = vrot.slane %v3358_v54, 1  ;;  %v12597_v11 = vpack.c.bf16 %v5063_v41, %v5009_v37  ;;  %v12599_v10 = vpack.c.bf16 %v5062_v42, %v5008_v0  ;;  %v10357_v20 = vld [vmem:[#allocation2 + $0xe4] ss:$8 sps:$4 sm:$0xff]  }
 0x27d   :  { %6667 = vmatprep.mubr.bf16.mxu0 %v12587_v55  ;;  %v12601_v16 = vrot.slane %v3360_v14, 1  ;;  %v3472_v34 = vrot.slane %v3359_v23, 1  ;;  %v3468_v61 = vsel %vm3426_vm2, %v3466_v56, %v3467_v45  ;;  %v4280_v32 = vcombine.low %v12585_v50, %v3467_v45 }
 0x27e   :  { %6668 = vmatmul.mubr.bf16.gmra.mxu0 %v12590_v44  ;;  %v4203_v33 = vrot.slane %v4175_v60, %v11597_v39  ;;  %v3473_v63 = vrot.slane %v3361_v17, 1  ;;  %6574 = vmatprep.mubr.bf16.mxu1 %v12597_v11  ;;  %v4226_v27 = vcombine.low %v3465_v47, %v3468_v61  ;;  %v4227_v43 = vcombine.high %v3465_v47, %v3468_v61 }
 0x27f   :  { %v3471_v35 = vsel %vm3426_vm2, %v3469_v25, %v12601_v16  ;;  %v4295_v46 = vrot.slane %v10354_v21, %v11597_v39  ;;  %v4302_v49 = vrot.slane %v4280_v32, %v11597_v39  ;;  %v4340_v6 = vrot.slane %v10355_v58, %v11597_v39 }
 0x280   :  { %v4206_v57 = vcombine.low %v12556_v1, %v4203_v33  ;;  %v3474_v26 = vsel %vm3426_vm2, %v3472_v34, %v3473_v63  ;;  %v4248_v2 = vrot.slane %v4226_v27, %v11597_v39  ;;  %v4255_v51 = vrot.slane %v4227_v43, %v11597_v39 }
 0x281   :  { %v4332_v62 = vcombine.low %v3471_v35, %v3474_v26  ;;  %v4333_v15 = vcombine.high %v3471_v35, %v3474_v26  ;;  %v5061_v54 = vrot.slane %v4302_v49, %v11597_v39  ;;  %v4347_v1 = vrot.slane %v10357_v20, %v11597_v39 }
 0x282   :  { %v9435_v13 = vcombine.high %v12562_v22, %v4206_v57  ;;  %v4386_v41 = vcombine.low %v12601_v16, %v3473_v63  ;;  %6575 = vmatmul.mubr.bf16.gmra.mxu1 %v12599_v10  ;;  %v5007_v42 = vrot.slane %v4248_v2, %v11597_v39  ;;  %v5047_v56 = vrot.slane %v4255_v51, %v11597_v39  ;;  %v3362_v51 = vld [vmem:[#allocation2] sm:$0xfc] }
 0x283   :  { %v4354_v23 = vrot.slane %v4332_v62, %v11597_v39  ;;  %v4361_v14 = vrot.slane %v4333_v15, %v11597_v39  ;;  %v4394_v22 = vrot.slane %v10358_v38, %v11597_v39  ;;  %v4401_v0 = vrot.slane %v10360_v7, %v11597_v39  ;;  %v3364_v62 = vld [vmem:[#allocation2 + $0x10] sm:$0xff] }
 0x284   :  { %v4993_v37 = vrot.slane %v9435_v13, %v11597_v39  ;;  %v4408_v17 = vrot.slane %v4386_v41, %v11597_v39  ;;  %v5065_v21 = vcombine.high %v5047_v56, %v5061_v54  ;;  %v5064_v47 = vcombine.low %v5047_v56, %v5061_v54  ;;  %v3363_v41 = vld [vmem:[#allocation2 + $0x8] sm:$0xfc] }
 0x285   :  { %v4363_v60 = vcombine.high %v4340_v6, %v4354_v23  ;;  %v4365_v25 = vcombine.high %v4347_v1, %v4361_v14  ;;  %v9436_v33 = vcombine.low %v4295_v46, %v4340_v6  ;;  %v4281_v27 = vcombine.high %v12585_v50, %v3467_v45 }
 0x286   :  { %v5011_v58 = vcombine.high %v4993_v37, %v5007_v42  ;;  %v5010_v34 = vcombine.low %v4993_v37, %v5007_v42  ;;  %v4417_v61 = vcombine.high %v4394_v22, %v4408_v17  ;;  %v4364_v43 = vcombine.low %v4347_v1, %v4361_v14  ;;  %v3366_v37 = vld [vmem:[#allocation2 + $0x20] sm:$0xfc] }
 0x287   :  { %v9438_v32 = vcombine.low %v4363_v60, %v4347_v1  ;;  %v9440_v20 = vcombine.low %v4365_v25, %v4394_v22  ;;  %v5094_v49 = vrot.slane %v9436_v33, %v11597_v39  ;;  %v4309_v2 = vrot.slane %v4281_v27, %v11597_v39  ;;  %v3367_v60 = vld [vmem:[#allocation2 + $0x28] sm:$0xfc]  ;;  %v3368_v25 = vld [vmem:[#allocation2 + $0x30] sm:$0xff]  ;;  %v3370_v27 = vld [vmem:[#allocation2 + $0x40] sm:$0xfc] }
 0x288   :  { %v12631_v35 = vpack.c.bf16 %v5065_v21, %v5011_v58  ;;  %v12633_v57 = vpack.c.bf16 %v5064_v47, %v5010_v34  ;;  %v9442_v26 = vcombine.low %v4417_v61, %v4401_v0  ;;  %v4387_v46 = vcombine.high %v12601_v16, %v3473_v63  ;;  %v3365_v47 = vld [vmem:[#allocation2 + $0x18] sm:$0xff] }
 0x289   :  { %v5108_v38 = vrot.slane %v9438_v32, %v11597_v39  ;;  %v5148_v7 = vrot.slane %v9440_v20, %v11597_v39  ;;  %v4416_v45 = vcombine.low %v4394_v22, %v4408_v17  ;;  %v9439_v6 = vcombine.high %v4354_v23, %v4364_v43  ;;  %v3369_v32 = vld [vmem:[#allocation2 + $0x38] sm:$0xff] }
 0x28a   :  { %6677 = vmatprep.mubr.bf16.mxu0 %v12631_v35  ;;  %v5162_v50 = vrot.slane %v9442_v26, %v11597_v39  ;;  %v4415_v13 = vrot.slane %v4387_v46, %v11597_v39  ;;  %v9437_v54 = vcombine.low %v4309_v2, %v4354_v23  ;;  %v3508_v58 = vrot.slane %v3362_v51, 2 }
 0x28b   :  { %6678 = vmatmul.mubr.bf16.gmra.mxu0 %v12633_v57  ;;  %v5117_v15 = vcombine.high %v5094_v49, %v5108_v38  ;;  %v5116_v1 = vcombine.low %v5094_v49, %v5108_v38  ;;  %v5115_v16 = vrot.slane %v9439_v6, %v11597_v39  ;;  %v9441_v63 = vcombine.high %v4361_v14, %v4416_v45  ;;  %v3372_v14 = vld [vmem:[#allocation2 + $0x50] sm:$0xff] }
 0x28c   :  { %v5171_v42 = vcombine.high %v5148_v7, %v5162_v50  ;;  %v5170_v56 = vcombine.low %v5148_v7, %v5162_v50  ;;  %v4418_v21 = vcombine.low %v4401_v0, %v4415_v13  ;;  %v5101_v22 = vrot.slane %v9437_v54, %v11597_v39 }
 0x28d   :  { %v3509_v34 = vrot.slane %v3364_v62, 2  ;;  %v5155_v23 = vrot.slane %v9441_v63, %v11597_v39  ;;  %v3511_v20 = vrot.slane %v3363_v41, 2  ;;  %v3512_v38 = vrot.slane %v3365_v47, 2 }
 0x28e   :  { %v12646_v61 = vpack.c.bf16 %v5171_v42, %v5117_v15  ;;  %v12649_v33 = vpack.c.bf16 %v5170_v56, %v5116_v1  ;;  %v5119_v43 = vcombine.high %v5101_v22, %v5115_v16  ;;  %v9443_v49 = vcombine.high %v4408_v17, %v4418_v21 }
 0x28f   :  { %v5118_v0 = vcombine.low %v5101_v22, %v5115_v16  ;;  %v3510_v26 = vsel %vm3507_vm3, %v3508_v58, %v3509_v34  ;;  %v3514_v7 = vrot.slane %v3366_v37, 2  ;;  %v3515_v2 = vrot.slane %v3368_v25, 2  ;;  %v3371_v16 = vld [vmem:[#allocation2 + $0x48] sm:$0xfc]  ;;  %v3373_v22 = vld [vmem:[#allocation2 + $0x58] sm:$0xff] }
 0x290   :  { %6584 = vmatprep.mubr.bf16.mxu1 %v12646_v61  ;;  %v3517_v46 = vrot.slane %v3367_v60, 2  ;;  %v5169_v50 = vrot.slane %v9443_v49, %v11597_v39  ;;  %v3518_v45 = vrot.slane %v3369_v32, 2  ;;  %v3520_v6 = vrot.slane %v3370_v27, 2 }
 0x291   :  { %6585 = vmatmul.mubr.bf16.gmra.mxu1 %v12649_v33  ;;  %v12655_v51 = vrot.slane %v3372_v14, 2  ;;  %v3513_v62 = vsel %vm3507_vm3, %v3511_v20, %v3512_v38  ;;  %v3516_v17 = vsel %vm3507_vm3, %v3514_v7, %v3515_v2  ;;  %v3677_v15 = vcombine.low %v3509_v34, %v3512_v38 }
 0x292   :  { %v3678_v13 = vcombine.high %v3509_v34, %v3512_v38  ;;  %v5173_v54 = vcombine.high %v5155_v23, %v5169_v50  ;;  %v5172_v1 = vcombine.low %v5155_v23, %v5169_v50  ;;  %v3519_v41 = vsel %vm3507_vm3, %v3517_v46, %v3518_v45 }
 0x293   :  { %v3624_v42 = vcombine.low %v3510_v26, %v3513_v62  ;;  %v3625_v63 = vcombine.high %v3510_v26, %v3513_v62  ;;  %v3685_v56 = vrot.slane %v3677_v15, %v11597_v39  ;;  %v3730_v21 = vcombine.low %v3516_v17, %v3519_v41 }
 0x294   :  { %v3692_v37 = vrot.slane %v3678_v13, %v11597_v39  ;;  %v12662_v47 = vpack.c.bf16 %v5173_v54, %v5119_v43  ;;  %v12664_v60 = vpack.c.bf16 %v5172_v1, %v5118_v0  ;;  %v12669_v58 = vsel %vm3507_vm3, %v3520_v6, %v12655_v51  ;;  %v3374_v1 = vld [vmem:[#allocation2 + $0x60] sm:$0xfc] }
 0x295   :  { %v3632_v25 = vrot.slane %v3624_v42, %v11597_v39  ;;  %v3639_v34 = vrot.slane %v3625_v63, %v11597_v39  ;;  %v3693_v23 = vcombine.high %v3685_v56, %v3685_v56  ;;  %v3738_v32 = vrot.slane %v3730_v21, %v11597_v39  ;;  %v3376_v63 = vld [vmem:[#allocation2 + $0x70] sm:$0xff]  ;;  %v3375_v21 = vld [vmem:[#allocation2 + $0x68] sm:$0xfc] }
 0x296   :  { %v3523_v20 = vrot.slane %v3371_v16, 2  ;;  %6687 = vmatprep.mubr.bf16.mxu0 %v12662_v47  ;;  %v12674_v14 = vrot.slane %v3373_v22, 2  ;;  %v3731_v43 = vcombine.high %v3516_v17, %v3519_v41  ;;  %v3783_v49 = vcombine.low %v3515_v2, %v3518_v45  ;;  %v10376_v22 = vld [vmem:[#allocation5 + $0x4e8] ss:$16 sps:$4 sm:$0xff]  }
 0x297   :  { %v3640_v27 = vcombine.high %v3632_v25, %v3632_v25  ;;  %6688 = vmatmul.mubr.bf16.gmra.mxu0 %v12664_v60  ;;  %v3641_v0 = vcombine.high %v3639_v34, %v3639_v34  ;;  %v4526_v26 = vcombine.low %v3685_v56, %v3693_v23  ;;  %v4527_v38 = vcombine.low %v3692_v37, %v3738_v32 }
 0x298   :  { %v3746_v7 = vcombine.high %v3738_v32, %v3738_v32  ;;  %6833 = vmatprep.mubr.bf16.mxu0 %v12068_v12  ;;  %v12680_v50 = vsel %vm3507_vm3, %v3523_v20, %v12674_v14  ;;  %v3745_v6 = vrot.slane %v3731_v43, %v11597_v39  ;;  %v3784_v62 = vcombine.high %v3515_v2, %v3518_v45 }
 0x299   :  { %v4472_v46 = vcombine.low %v3632_v25, %v3640_v27  ;;  %v4473_v15 = vcombine.low %v3639_v34, %v3641_v0  ;;  %v4534_v17 = vrot.slane %v4526_v26, %v11597_v39  ;;  %v4541_v13 = vrot.slane %v4527_v38, %v11597_v39  ;;  %v3377_v0 = vld [vmem:[#allocation2 + $0x78] sm:$0xff] }
 0x29a   :  { %v3791_v54 = vrot.slane %v3783_v49, %v11597_v39  ;;  %v3747_v42 = vcombine.high %v3745_v6, %v3745_v6  ;;  %v3798_v12 = vrot.slane %v3784_v62, %v11597_v39  ;;  %v3836_v16 = vcombine.low %v12669_v58, %v12680_v50  ;;  %v10384_v49 = vld [vmem:[#allocation5 + $0x4cc] ss:$16 sps:$4 sm:$0xff]  }
 0x29b   :  { %v4480_v41 = vrot.slane %v4472_v46, %v11597_v39  ;;  %v4487_v56 = vrot.slane %v4473_v15, %v11597_v39  ;;  %v4542_v2 = vcombine.low %v4534_v17, %v4541_v13  ;;  %v4543_v45 = vcombine.high %v4534_v17, %v4541_v13  ;;  %v3378_v17 = vld [vmem:[#allocation2 + $0x80] sm:$0xfc] }
 0x29c   :  { %v3799_v37 = vcombine.high %v3791_v54, %v3791_v54  ;;  %v3844_v25 = vrot.slane %v3836_v16, %v11597_v39  ;;  %v4580_v34 = vcombine.low %v3746_v7, %v3745_v6  ;;  %v4581_v23 = vcombine.low %v3747_v42, %v3791_v54  ;;  %v10373_v7 = vld [vmem:[#allocation5 + $0x2e8] ss:$16 sps:$4 sm:$0xff]  }
 0x29d   :  { %v3526_v32 = vrot.slane %v3374_v1, 2  ;;  %v4488_v20 = vcombine.low %v4480_v41, %v4487_v56  ;;  %v4489_v27 = vcombine.high %v4480_v41, %v4487_v56  ;;  %v12692_v26 = vrot.slane %v3376_v63, 2  ;;  %v3379_v1 = vld [vmem:[#allocation2 + $0x88] sm:$0xfc]  ;;  %v3380_v41 = vld [vmem:[#allocation2 + $0x90] sm:$0xff] }
 0x29e   :  { %v4634_v43 = vcombine.low %v3799_v37, %v3798_v12  ;;  %v3852_v38 = vcombine.high %v3844_v25, %v3844_v25  ;;  %v4588_v46 = vrot.slane %v4580_v34, %v11597_v39  ;;  %v4595_v62 = vrot.slane %v4581_v23, %v11597_v39  ;;  %v10381_v63 = vld [vmem:[#allocation5 + $0x2cc] ss:$16 sps:$4 sm:$0xff]   ;;  %v10382_v56 = vld [vmem:[#allocation5 + $0x4c8] ss:$16 sps:$4 sm:$0xff]  }
 0x29f   :  { %v3529_v15 = vrot.slane %v3375_v21, 2  ;;  %v12696_v13 = vpack.c.bf16 %v4542_v2, %v4488_v20  ;;  %v12698_v16 = vpack.c.bf16 %v4543_v45, %v4489_v27  ;;  %6834 = vmatmul.mubr.bf16.vlgmr.msra.gmra.mxu0 %v12066_v59  ;;  %v3528_v54 = vsel %vm3507_vm3, %v3526_v32, %v12692_v26  ;;  %v10390_v59 = vld [vmem:[#allocation5 + $0x4ac] ss:$16 sps:$4 sm:$0xff]  }
 0x2a0   :  { %v4642_v6 = vrot.slane %v4634_v43, %v11597_v39  ;;  %7008 = vmatpush1.bf16.msra.mxu0 %v10376_v22  ;;  %v4597_v42 = vcombine.high %v4588_v46, %v4595_v62  ;;  %v4635_v12 = vcombine.low %v3844_v25, %v3852_v38  ;;  %6843 = vmatprep.mubr.bf16.mxu0 %v12232_v53  ;;  %v12705_v45 = vrot.slane %v3377_v0, 2  ;;  %v3381_v25 = vld [vmem:[#allocation2 + $0x98] sm:$0xff] }
 0x2a1   :  { %v4596_v2 = vcombine.low %v4588_v46, %v4595_v62  ;;  %6730 = vmatprep.mubr.bf16.mxu1 %v12698_v16  ;;  %7009 = vmatprep.subr.bf16.mxu0 %v10384_v49  ;;  %v3837_v37 = vcombine.high %v12669_v58, %v12680_v50  ;;  %v3889_v21 = vcombine.low %v12655_v51, %v12674_v14  ;;  %v3532_v53 = vrot.slane %v3378_v17, 2  ;;  %v10379_v58 = vld [vmem:[#allocation5 + $0x2c8] ss:$16 sps:$4 sm:$0xff]   ;;  %v10387_v49 = vld [vmem:[#allocation5 + $0x2ac] ss:$16 sps:$4 sm:$0xff]  }
 0x2a2   :  { %v3890_v22 = vcombine.high %v12655_v51, %v12674_v14  ;;  %6731 = vmatmul.mubr.bf16.vlgmr.msra.gmra.mxu1 %v12696_v13  ;;  %v4649_v34 = vrot.slane %v4635_v12, %v11597_v39  ;;  %v3531_v23 = vsel %vm3507_vm3, %v3529_v15, %v12705_v45  ;;  %v12718_v32 = vrot.slane %v3380_v41, 2  ;;  %v12725_v62 = vld [vmem:[#allocation2 + $0xa0] sm:$0xfc]  ;;  %v10388_v15 = vld [vmem:[#allocation5 + $0x4a8] ss:$16 sps:$4 sm:$0xff]   ;;  %v3384_v12 = vld [vmem:[#allocation2 + $0xb0] sm:$0xff] }
 0x2a3   :  { %v3535_v20 = vrot.slane %v3379_v1, 2  ;;  %6905 = vmatpush1.bf16.msra.mxu1 %v10373_v7  ;;  %v3851_v50 = vrot.slane %v3837_v37, %v11597_v39  ;;  %v3897_v27 = vrot.slane %v3889_v21, %v11597_v39  ;;  %v3942_v14 = vcombine.low %v3528_v54, %v3531_v23  ;;  %v3383_v21 = vld [vmem:[#allocation2 + $0xa8] sm:$0xfc] }
 0x2a4   :  { %v3904_v51 = vrot.slane %v3890_v22, %v11597_v39  ;;  %v4651_v43 = vcombine.high %v4642_v6, %v4649_v34  ;;  %6906 = vmatprep.subr.bf16.mxu1 %v10381_v63  ;;  %7010 = vmatpush1.bf16.msra.mxu0 %v10382_v56  ;;  %v4650_v0 = vcombine.low %v4642_v6, %v4649_v34  ;;  %v12723_v46 = vrot.slane %v3381_v25, 2 }
 0x2a5   :  { %v3943_v38 = vcombine.high %v3528_v54, %v3531_v23  ;;  %7011 = vmatprep.subr.bf16.mxu0 %v10390_v59  ;;  %v3853_v17 = vcombine.high %v3851_v50, %v3851_v50  ;;  %v3905_v7 = vcombine.high %v3897_v27, %v3897_v27  ;;  %v3950_v1 = vrot.slane %v3942_v14, %v11597_v39  ;;  %v10396_v54 = vld [vmem:[#allocation5 + $0x48c] ss:$16 sps:$4 sm:$0xff]   ;;  %v10385_v59 = vld [vmem:[#allocation5 + $0x2a8] ss:$16 sps:$4 sm:$0xff]  }
 0x2a6   :  { %v3534_v41 = vsel %vm3507_vm3, %v3532_v53, %v12718_v32  ;;  %v12730_v37 = vpack.c.bf16 %v4651_v43, %v4597_v42  ;;  %v12732_v63 = vpack.c.bf16 %v4650_v0, %v4596_v2  ;;  %v3537_v56 = vsel %vm3507_vm3, %v3535_v20, %v12723_v46  ;;  %v3385_v53 = vld [vmem:[#allocation2 + $0xb8] sm:$0xff] }
 0x2a7   :  { %v3957_v6 = vrot.slane %v3943_v38, %v11597_v39  ;;  %6907 = vmatpush1.bf16.msra.mxu1 %v10379_v58  ;;  %6844 = vmatmul.mubr.bf16.gmra.mxu0 %v12234_v48  ;;  %v3958_v22 = vcombine.high %v3950_v1, %v3950_v1  ;;  %v4688_v25 = vcombine.low %v3851_v50, %v3853_v17  ;;  %v3538_v42 = vrot.slane %v12725_v62, 2  ;;  %v10393_v23 = vld [vmem:[#allocation5 + $0x28c] ss:$16 sps:$4 sm:$0xff]  }
 0x2a8   :  { %v4689_v34 = vcombine.low %v3897_v27, %v3905_v7  ;;  %6740 = vmatprep.mubr.bf16.mxu1 %v12730_v37  ;;  %6908 = vmatprep.subr.bf16.mxu1 %v10387_v49  ;;  %v4742_v2 = vcombine.low %v3904_v51, %v3950_v1  ;;  %v3995_v20 = vcombine.low %v12692_v26, %v12705_v45  ;;  %v12742_v43 = vrot.slane %v3384_v12, 2  ;;  %v10394_v27 = vld [vmem:[#allocation5 + $0x488] ss:$16 sps:$4 sm:$0xff]   ;;  %v10402_v49 = vld [vmem:[#allocation5 + $0x46c] ss:$16 sps:$4 sm:$0xff]  }
 0x2a9   :  { %v3959_v14 = vcombine.high %v3957_v6, %v3957_v6  ;;  %7012 = vmatpush1.bf16.msra.mxu0 %v10388_v15  ;;  %v4696_v48 = vrot.slane %v4688_v25, %v11597_v39  ;;  %v4743_v50 = vcombine.low %v3958_v22, %v3957_v6  ;;  %6853 = vmatprep.mubr.bf16.mxu0 %v12453_v52  ;;  %v3541_v0 = vrot.slane %v3383_v21, 2  ;;  %v10391_v52 = vld [vmem:[#allocation5 + $0x288] ss:$16 sps:$4 sm:$0xff]   ;;  %v10399_v6 = vld [vmem:[#allocation5 + $0x26c] ss:$16 sps:$4 sm:$0xff]  }
 0x2aa   :  { %v4703_v58 = vrot.slane %v4689_v34, %v11597_v39  ;;  %6741 = vmatmul.mubr.bf16.gmra.mxu1 %v12732_v63  ;;  %v4750_v51 = vrot.slane %v4742_v2, %v11597_v39  ;;  %7013 = vmatprep.subr.bf16.mxu0 %v10396_v54  ;;  %v3996_v38 = vcombine.high %v12692_v26, %v12705_v45  ;;  %v12752_v15 = vrot.slane %v3385_v53, 2  ;;  %v3386_v34 = vld [vmem:[#allocation2 + $0xc0] sm:$0xfc]  ;;  %v10400_v45 = vld [vmem:[#allocation5 + $0x468] ss:$16 sps:$4 sm:$0xff]  }
 0x2ab   :  { %v4003_v62 = vrot.slane %v3995_v20, %v11597_v39  ;;  %6909 = vmatpush1.bf16.msra.mxu1 %v10385_v59  ;;  %v4757_v7 = vrot.slane %v4743_v50, %v11597_v39  ;;  %v4048_v12 = vcombine.low %v3534_v41, %v3537_v56  ;;  %v4049_v22 = vcombine.high %v3534_v41, %v3537_v56  ;;  %v3388_v20 = vld [vmem:[#allocation2 + $0xd0] sm:$0xff]  ;;  %v10408_v41 = vld [vmem:[#allocation5 + $0x44c] ss:$16 sps:$4 sm:$0xff]  }
 0x2ac   :  { %v4705_v17 = vcombine.high %v4696_v48, %v4703_v58  ;;  %v4704_v1 = vcombine.low %v4696_v48, %v4703_v58  ;;  %6910 = vmatprep.subr.bf16.mxu1 %v10393_v23  ;;  %v4010_v21 = vrot.slane %v3996_v38, %v11597_v39  ;;  %v3540_v2 = vsel %vm3507_vm3, %v3538_v42, %v12742_v43 }
 0x2ad   :  { %v4011_v54 = vcombine.high %v4003_v62, %v4003_v62  ;;  %v4796_v25 = vcombine.low %v3959_v14, %v4003_v62  ;;  %v4759_v26 = vcombine.high %v4750_v51, %v4757_v7  ;;  %7014 = vmatpush1.bf16.msra.mxu0 %v10394_v27  ;;  %v4758_v53 = vcombine.low %v4750_v51, %v4757_v7  ;;  %v3387_v14 = vld [vmem:[#allocation2 + $0xc8] sm:$0xfc] }
 0x2ae   :  { %v4056_v59 = vrot.slane %v4048_v12, %v11597_v39  ;;  %7015 = vmatprep.subr.bf16.mxu0 %v10402_v49  ;;  %v4063_v23 = vrot.slane %v4049_v22, %v11597_v39  ;;  %v3543_v56 = vsel %vm3507_vm3, %v3541_v0, %v12752_v15  ;;  %v10397_v27 = vld [vmem:[#allocation5 + $0x268] ss:$16 sps:$4 sm:$0xff]   ;;  %v3544_v38 = vrot.slane %v3386_v34, 2  ;;  %v10405_v12 = vld [vmem:[#allocation5 + $0x24c] ss:$16 sps:$4 sm:$0xff]  }
 0x2af   :  { %v4797_v48 = vcombine.low %v4011_v54, %v4010_v21  ;;  %v12761_v58 = vrot.slane %v4796_v25, %v11597_v39  ;;  %v12765_v50 = vpack.c.bf16 %v4759_v26, %v4705_v17  ;;  %6911 = vmatpush1.bf16.msra.mxu1 %v10391_v52  ;;  %v12767_v51 = vpack.c.bf16 %v4758_v53, %v4704_v1  ;;  %v3389_v49 = vld [vmem:[#allocation2 + $0xd8] sm:$0xff] }
 0x2b0   :  { %6854 = vmatmul.mubr.bf16.gmra.mxu0 %v12455_v8  ;;  %v4064_v42 = vcombine.high %v4056_v59, %v4056_v59  ;;  %6912 = vmatprep.subr.bf16.mxu1 %v10399_v6  ;;  %v4065_v62 = vcombine.high %v4063_v23, %v4063_v23  ;;  %v4101_v0 = vcombine.low %v12718_v32, %v12723_v46  ;;  %v12774_v17 = vrot.slane %v3388_v20, 2  ;;  %v10406_v8 = vld [vmem:[#allocation5 + $0x448] ss:$16 sps:$4 sm:$0xff]   ;;  %v10414_v22 = vld [vmem:[#allocation5 + $0x42c] ss:$16 sps:$4 sm:$0xff]  }
 0x2b1   :  { %v4811_v7 = vrot.slane %v4797_v48, %v11597_v39  ;;  %6863 = vmatprep.mubr.bf16.mxu0 %v12489_v29  ;;  %6750 = vmatprep.mubr.bf16.mxu1 %v12765_v50  ;;  %v4102_v1 = vcombine.high %v12718_v32, %v12723_v46  ;;  %v4154_v6 = vcombine.low %v3540_v2, %v3543_v56  ;;  %v3547_v21 = vrot.slane %v3387_v14, 2  ;;  %v10411_v20 = vld [vmem:[#allocation5 + $0x22c] ss:$16 sps:$4 sm:$0xff]   ;;  %v10412_v14 = vld [vmem:[#allocation5 + $0x428] ss:$16 sps:$4 sm:$0xff]  }
 0x2b2   :  { %7016 = vmatpush1.bf16.msra.mxu0 %v10400_v45  ;;  %v4850_v52 = vcombine.low %v4056_v59, %v4064_v42  ;;  %6751 = vmatmul.mubr.bf16.gmra.mxu1 %v12767_v51  ;;  %v4851_v54 = vcombine.low %v4063_v23, %v4065_v62  ;;  %v12782_v34 = vrot.slane %v3389_v49, 2  ;;  %v10403_v45 = vld [vmem:[#allocation5 + $0x248] ss:$16 sps:$4 sm:$0xff]   ;;  %v4109_v53 = vrot.slane %v4101_v0, %v11597_v39  ;;  %v3392_v49 = vld [vmem:[#allocation2 + $0xf0] sm:$0xff] }
 0x2b3   :  { %v4813_v29 = vcombine.high %v12761_v58, %v4811_v7  ;;  %7017 = vmatprep.subr.bf16.mxu0 %v10408_v41  ;;  %v4812_v25 = vcombine.low %v12761_v58, %v4811_v7  ;;  %6913 = vmatpush1.bf16.msra.mxu1 %v10397_v27  ;;  %v4116_v32 = vrot.slane %v4102_v1, %v11597_v39  ;;  %v3390_v41 = vld [vmem:[#allocation2 + $0xe0] sm:$0xfc] }
 0x2b4   :  { %v4858_v26 = vrot.slane %v4850_v52, %v11597_v39  ;;  %v4155_v46 = vcombine.high %v3540_v2, %v3543_v56  ;;  %v4865_v59 = vrot.slane %v4851_v54, %v11597_v39  ;;  %6914 = vmatprep.subr.bf16.mxu1 %v10405_v12  ;;  %v4162_v23 = vrot.slane %v4154_v6, %v11597_v39  ;;  %v3391_v6 = vld [vmem:[#allocation2 + $0xe8] sm:$0xfc] }
 0x2b5   :  { %v4207_v48 = vcombine.low %v12742_v43, %v12752_v15  ;;  %v3546_v58 = vsel %vm3507_vm3, %v3544_v38, %v12774_v17  ;;  %v4117_v27 = vcombine.high %v4109_v53, %v4109_v53  ;;  %v3549_v2 = vsel %vm3507_vm3, %v3547_v21, %v12782_v34  ;;  %v10420_v38 = vld [vmem:[#allocation5 + $0x40c] ss:$16 sps:$4 sm:$0xff]  }
 0x2b6   :  { %7018 = vmatpush1.bf16.msra.mxu0 %v10406_v8  ;;  %v4169_v42 = vrot.slane %v4155_v46, %v11597_v39  ;;  %v4208_v56 = vcombine.high %v12742_v43, %v12752_v15  ;;  %v4867_v62 = vcombine.high %v4858_v26, %v4865_v59  ;;  %v4866_v7 = vcombine.low %v4858_v26, %v4865_v59  ;;  %v10409_v46 = vld [vmem:[#allocation5 + $0x228] ss:$16 sps:$4 sm:$0xff]   ;;  %v10426_v59 = vld [vmem:[#allocation5 + $0x5ec] ss:$16 sps:$4 sm:$0xff]  }
 0x2b7   :  { %7019 = vmatprep.subr.bf16.mxu0 %v10414_v22  ;;  %v4170_v12 = vcombine.high %v4162_v23, %v4162_v23  ;;  %v4215_v0 = vrot.slane %v4207_v48, %v11597_v39  ;;  %6915 = vmatpush1.bf16.msra.mxu1 %v10403_v45  ;;  %v4904_v8 = vcombine.low %v4109_v53, %v4117_v27  ;;  %v3550_v54 = vrot.slane %v3390_v41, 2  ;;  %v10417_v53 = vld [vmem:[#allocation5 + $0x20c] ss:$16 sps:$4 sm:$0xff]  }
 0x2b8   :  { %6864 = vmatmul.mubr.bf16.gmra.mxu0 %v12491_v4  ;;  %v4171_v52 = vcombine.high %v4169_v42, %v4169_v42  ;;  %v4905_v1 = vcombine.low %v4116_v32, %v4162_v23  ;;  %v12800_v21 = vpack.c.bf16 %v4867_v62, %v4813_v29  ;;  %6916 = vmatprep.subr.bf16.mxu1 %v10411_v20  ;;  %v12805_v22 = vrot.slane %v3392_v49, 2  ;;  %v10418_v32 = vld [vmem:[#allocation5 + $0x408] ss:$16 sps:$4 sm:$0xff]  }
 0x2b9   :  { %v12802_v43 = vpack.c.bf16 %v4866_v7, %v4812_v25  ;;  %v4958_v15 = vcombine.low %v4170_v12, %v4169_v42  ;;  %6873 = vmatprep.mubr.bf16.mxu0 %v12577_v30  ;;  %v4912_v26 = vrot.slane %v4904_v8, %v11597_v39  ;;  %v4222_v29 = vrot.slane %v4208_v56, %v11597_v39  ;;  %v3393_v23 = vld [vmem:[#allocation2 + $0xf8] sm:$0xff] }
 0x2ba   :  { %7020 = vmatpush1.bf16.msra.mxu0 %v10412_v14  ;;  %v4919_v4 = vrot.slane %v4905_v1, %v11597_v39  ;;  %v4959_v45 = vcombine.low %v4171_v52, %v4215_v0  ;;  %6760 = vmatprep.mubr.bf16.mxu1 %v12800_v21  ;;  %v4223_v20 = vcombine.high %v4215_v0, %v4215_v0  ;;  %v3553_v48 = vrot.slane %v3391_v6, 2  ;;  %v10415_v49 = vld [vmem:[#allocation5 + $0x208] ss:$16 sps:$4 sm:$0xff]  }
 0x2bb   :  { %v4966_v25 = vrot.slane %v4958_v15, %v11597_v39  ;;  %7021 = vmatprep.subr.bf16.mxu0 %v10420_v38  ;;  %v4260_v30 = vcombine.low %v3546_v58, %v3549_v2  ;;  %6761 = vmatmul.mubr.bf16.gmra.mxu1 %v12802_v43  ;;  %v4261_v42 = vcombine.high %v3546_v58, %v3549_v2  ;;  %v10423_v38 = vld [vmem:[#allocation5 + $0x3ec] ss:$16 sps:$4 sm:$0xff]   ;;  %v3554_v1 = vrot.slane %v3393_v23, 2  ;;  %v10424_v58 = vld [vmem:[#allocation5 + $0x5e8] ss:$16 sps:$4 sm:$0xff]  }
 0x2bc   :  { %v4921_v41 = vcombine.high %v4912_v26, %v4919_v4  ;;  %v4973_v14 = vrot.slane %v4959_v45, %v11597_v39  ;;  %v4920_v27 = vcombine.low %v4912_v26, %v4919_v4  ;;  %6917 = vmatpush1.bf16.msra.mxu1 %v10409_v46  ;;  %v4313_v62 = vcombine.low %v12774_v17, %v12782_v34  ;;  %v10432_v45 = vld [vmem:[#allocation5 + $0x5cc] ss:$16 sps:$4 sm:$0xff]  }
 0x2bd   :  { %v4268_v56 = vrot.slane %v4260_v30, %v11597_v39  ;;  %v5012_v7 = vcombine.low %v4223_v20, %v4222_v29  ;;  %v3552_v12 = vsel %vm3507_vm3, %v3550_v54, %v12805_v22  ;;  %6918 = vmatprep.subr.bf16.mxu1 %v10417_v53  ;;  %v4275_v8 = vrot.slane %v4261_v42, %v11597_v39 }
 0x2be   :  { %v4975_v0 = vcombine.high %v4966_v25, %v4973_v14  ;;  %7022 = vmatpush1.bf16.msra.mxu0 %v10418_v32  ;;  %v4974_v52 = vcombine.low %v4966_v25, %v4973_v14  ;;  %v4321_v6 = vrot.slane %v4313_v62, %v11597_v39  ;;  %v4314_v15 = vcombine.high %v12774_v17, %v12782_v34  ;;  %v10421_v32 = vld [vmem:[#allocation5 + $0x3e8] ss:$16 sps:$4 sm:$0xff]   ;;  %v10429_v34 = vld [vmem:[#allocation5 + $0x3cc] ss:$16 sps:$4 sm:$0xff]  }
 0x2bf   :  { %7023 = vmatprep.subr.bf16.mxu0 %v10426_v59  ;;  %v4276_v2 = vcombine.high %v4268_v56, %v4268_v56  ;;  %v5020_v46 = vrot.slane %v5012_v7, %v11597_v39  ;;  %v4277_v4 = vcombine.high %v4275_v8, %v4275_v8  ;;  %v3555_v53 = vsel %vm3507_vm3, %v3553_v48, %v3554_v1  ;;  %v10430_v48 = vld [vmem:[#allocation5 + $0x5c8] ss:$16 sps:$4 sm:$0xff]  }
 0x2c0   :  { %v12824_v26 = vpack.c.bf16 %v4975_v0, %v4921_v41  ;;  %v12826_v54 = vpack.c.bf16 %v4974_v52, %v4920_v27  ;;  %6874 = vmatmul.mubr.bf16.gmra.mxu0 %v12579_v36  ;;  %6919 = vmatpush1.bf16.msra.mxu1 %v10415_v49  ;;  %v4329_v29 = vcombine.high %v4321_v6, %v4321_v6  ;;  %v10438_v27 = vld [vmem:[#allocation5 + $0x5ac] ss:$16 sps:$4 sm:$0xff]   ;;  %v10427_v7 = vld [vmem:[#allocation5 + $0x3c8] ss:$16 sps:$4 sm:$0xff]  }
 0x2c1   :  { %v5013_v25 = vcombine.low %v4268_v56, %v4276_v2  ;;  %6883 = vmatprep.mubr.bf16.mxu0 %v12597_v11  ;;  %v4328_v59 = vrot.slane %v4314_v15, %v11597_v39  ;;  %6920 = vmatprep.subr.bf16.mxu1 %v10423_v38  ;;  %v5066_v17 = vcombine.low %v4275_v8, %v4277_v4  ;;  %v10435_v0 = vld [vmem:[#allocation5 + $0x3ac] ss:$16 sps:$4 sm:$0xff]  }
 0x2c2   :  { %6770 = vmatprep.mubr.bf16.mxu1 %v12824_v26  ;;  %v4366_v20 = vcombine.low %v3552_v12, %v3555_v53  ;;  %v4367_v30 = vcombine.high %v3552_v12, %v3555_v53  ;;  %7024 = vmatpush2.bf16.msra.mxu0 %v10424_v58  ;;  %v5067_v23 = vcombine.low %v4321_v6, %v4329_v29  ;;  %v10436_v58 = vld [vmem:[#allocation5 + $0x5a8] ss:$16 sps:$4 sm:$0xff]   ;;  %v10444_v53 = vld [vmem:[#allocation5 + $0x58c] ss:$16 sps:$4 sm:$0xff]  }
 0x2c3   :  { %v5027_v36 = vrot.slane %v5013_v25, %v11597_v39  ;;  %v4419_v41 = vcombine.low %v12805_v22, %v3554_v1  ;;  %v4420_v14 = vcombine.high %v12805_v22, %v3554_v1  ;;  %6771 = vmatmul.mubr.bf16.gmra.mxu1 %v12826_v54  ;;  %v5074_v11 = vrot.slane %v5066_v17, %v11597_v39 }
 0x2c4   :  { %7025 = vmatprep.subr.bf16.mxu0 %v10432_v45  ;;  %v4374_v42 = vrot.slane %v4366_v20, %v11597_v39  ;;  %v4381_v49 = vrot.slane %v4367_v30, %v11597_v39  ;;  %6921 = vmatpush2.bf16.msra.mxu1 %v10421_v32  ;;  %v5081_v62 = vrot.slane %v5067_v23, %v11597_v39  ;;  %v10442_v30 = vld [vmem:[#allocation5 + $0x588] ss:$16 sps:$4 sm:$0xff]  }
 0x2c5   :  { %v5029_v56 = vcombine.high %v5020_v46, %v5027_v36  ;;  %v4427_v12 = vrot.slane %v4419_v41, %v11597_v39  ;;  %6922 = vmatprep.subr.bf16.mxu1 %v10429_v34  ;;  %v5028_v22 = vcombine.low %v5020_v46, %v5027_v36  ;;  %v4434_v6 = vrot.slane %v4420_v14, %v11597_v39  ;;  %v10433_v46 = vld [vmem:[#allocation5 + $0x3a8] ss:$16 sps:$4 sm:$0xff]   ;;  %v10447_v41 = vld [vmem:[#allocation5 + $0x36c] ss:$16 sps:$4 sm:$0xff]  }
 0x2c6   :  { %v4382_v38 = vcombine.high %v4374_v42, %v4374_v42  ;;  %v4383_v52 = vcombine.high %v4381_v49, %v4381_v49  ;;  %v5120_v8 = vcombine.low %v4328_v59, %v4374_v42  ;;  %v5083_v1 = vcombine.high %v5074_v11, %v5081_v62  ;;  %7026 = vmatpush2.bf16.msra.mxu0 %v10430_v48  ;;  %v10439_v48 = vld [vmem:[#allocation5 + $0x388] ss:$16 sps:$4 sm:$0xff]  }
 0x2c7   :  { %v5082_v2 = vcombine.low %v5074_v11, %v5081_v62  ;;  %v4435_v15 = vcombine.high %v4427_v12, %v4427_v12  ;;  %7027 = vmatprep.subr.bf16.mxu0 %v10438_v27  ;;  %v10448_v42 = vld [vmem:[#allocation5 + $0x568] ss:$16 sps:$4 sm:$0xff]  }
 0x2c8   :  { %6884 = vmatmul.mubr.bf16.gmra.mxu0 %v12599_v10  ;;  %v5121_v4 = vcombine.low %v4382_v38, %v4381_v49  ;;  %v5174_v45 = vcombine.low %v4383_v52, %v4427_v12  ;;  %v12844_v32 = vpack.c.bf16 %v5083_v1, %v5029_v56  ;;  %6923 = vmatpush2.bf16.msra.mxu1 %v10427_v7  ;;  %v10441_v10 = vld [vmem:[#allocation5 + $0x38c] ss:$16 sps:$4 sm:$0xff]   ;;  %v10445_v56 = vld [vmem:[#allocation5 + $0x368] ss:$16 sps:$4 sm:$0xff]   ;;  %v6526_v12 = vpop.f32.mrf.mxu1  ;;  %v13973_v1 = vld [vmem:[#allocation10_spill] sm:$0xff] }
 0x2c9   :  { %v5175_v29 = vcombine.low %v4435_v15, %v4434_v6  ;;  %6893 = vmatprep.mubr.bf16.mxu0 %v12646_v61  ;;  %6924 = vmatprep.subr.bf16.mxu1 %v10435_v0  ;;  %v12847_v25 = vpack.c.bf16 %v5082_v2, %v5028_v22  ;;  %v5128_v59 = vrot.slane %v5120_v8, %v11597_v39  ;;  %v10450_v61 = vld [vmem:[#allocation5 + $0x56c] ss:$16 sps:$4 sm:$0xff]   ;;  %v10454_v0 = vld [vmem:[#allocation5 + $0x548] ss:$16 sps:$4 sm:$0xff]  }
 0x2ca   :  { %v5135_v17 = vrot.slane %v5121_v4, %v11597_v39  ;;  %v5182_v34 = vrot.slane %v5174_v45, %v11597_v39  ;;  %6780 = vmatprep.mubr.bf16.mxu1 %v12844_v32  ;;  %7028 = vmatpush2.bf16.msra.mxu0 %v10436_v58  ;;  %v10456_v49 = vld [vmem:[#allocation5 + $0x54c] ss:$16 sps:$4 sm:$0xff]   ;;  %v10451_v38 = vld [vmem:[#allocation5 + $0x348] ss:$16 sps:$4 sm:$0xff]   ;;  %v13974_v58 = vsub.s32 0, %v13973_v1  ;;  %v13975_v4 = vsub.s32 1, %v13973_v1 }
 0x2cb   :  { %v5189_v20 = vrot.slane %v5175_v29, %v11597_v39  ;;  %6781 = vmatmul.mubr.bf16.gmra.mxu1 %v12847_v25  ;;  %7029 = vmatprep.subr.bf16.mxu0 %v10444_v53  ;;  %v10453_v7 = vld [vmem:[#allocation5 + $0x34c] ss:$16 sps:$4 sm:$0xff]   ;;  %v10460_v8 = vld [vmem:[#allocation5 + $0x528] ss:$16 sps:$4 sm:$0xff]  }
 0x2cc   :  { %v5137_v36 = vcombine.high %v5128_v59, %v5135_v17  ;;  %6925 = vmatpush2.bf16.msra.mxu1 %v10433_v46  ;;  %v5136_v14 = vcombine.low %v5128_v59, %v5135_v17  ;;  %v10462_v22 = vld [vmem:[#allocation5 + $0x52c] ss:$16 sps:$4 sm:$0xff]   ;;  %v10457_v15 = vld [vmem:[#allocation5 + $0x328] ss:$16 sps:$4 sm:$0xff]  }
 0x2cd   :  { %v5191_v23 = vcombine.high %v5182_v34, %v5189_v20  ;;  %6926 = vmatprep.subr.bf16.mxu1 %v10441_v10  ;;  %v5190_v11 = vcombine.low %v5182_v34, %v5189_v20  ;;  %v10459_v52 = vld [vmem:[#allocation5 + $0x32c] ss:$16 sps:$4 sm:$0xff]   ;;  %v10466_v46 = vld [vmem:[#allocation5 + $0x508] ss:$16 sps:$4 sm:$0xff]  }
 0x2ce   :  { %7030 = vmatpush2.bf16.msra.mxu0 %v10442_v30  ;;  %v10468_v6 = vld [vmem:[#allocation5 + $0x50c] ss:$16 sps:$4 sm:$0xff]   ;;  %v10463_v17 = vld [vmem:[#allocation5 + $0x308] ss:$16 sps:$4 sm:$0xff]  }
 0x2cf   :  { %v12855_v27 = vpack.c.bf16 %v5191_v23, %v5137_v36  ;;  %7031 = vmatprep.subr.bf16.mxu0 %v10450_v61  ;;  %v12859_v62 = vpack.c.bf16 %v5190_v11, %v5136_v14 }
 0x2d0   :  { %6894 = vmatmul.mubr.bf16.gmra.mxu0 %v12649_v33  ;;  %6927 = vmatpush2.bf16.msra.mxu1 %v10439_v48  ;;  %v12866_v33 = vld [vmem:[%s13764_s4] sm:$0xf] }
 0x2d1   :  { %6790 = vmatprep.mubr.bf16.mxu1 %v12855_v27  ;;  %6928 = vmatprep.subr.bf16.mxu1 %v10447_v41  ;;  %v12872_v2 = vrot.slane %v12866_v33, %v13974_v58  ;;  %v12877_v45 = vrot.slane %v12866_v33, %v13975_v4 }
 0x2d2   :  { %7039 = vmatprep.mubr.bf16.mxu0 %v12698_v16  ;;  %7032 = vmatpush2.bf16.msra.mxu0 %v10448_v42  ;;  %v6528_v16 = vpop.f32.mrf.mxu1 }
 0x2d3   :  { %6791 = vmatmul.mubr.bf16.gmra.mxu1 %v12859_v62  ;;  %7033 = vmatprep.subr.bf16.mxu0 %v10456_v49  ;;  %v6527_v29 = vadd.f32 %v6526_v12, %v12872_v2  ;;  %v6529_v34 = vadd.f32 %v6528_v16, %v12877_v45 }
 0x2d4   :  { %6929 = vmatpush2.bf16.msra.mxu1 %v10445_v56  ;;  %6936 = vmatprep.mubr.bf16.mxu1 %v12181_v31  ;;  %v10465_v31 = vld [vmem:[#allocation5 + $0x30c] ss:$16 sps:$4 sm:$0xff]   ;;  %v6530_v53 = vpop.f32.mrf.mxu1 }
 0x2d5   :  { %6930 = vmatprep.subr.bf16.mxu1 %v10453_v7  ;;  %v6531_v36 = vadd.f32 %v6530_v53, %v12872_v2 }
 0x2d6   :  { %7034 = vmatpush2.bf16.msra.mxu0 %v10454_v0  ;;  %v6629_v59 = vpop.f32.mrf.mxu0  ;;  %v6532_v20 = vpop.f32.mrf.mxu1 }
 0x2d7   :  { %7035 = vmatprep.subr.bf16.mxu0 %v10462_v22  ;;  %v12881_v10 = vadd.f32 %v6629_v59, %v6527_v29  ;;  %v6533_v48 = vadd.f32 %v6532_v20, %v12877_v45 }
 0x2d8   :  { %6931 = vmatpush2.bf16.msra.mxu1 %v10451_v38  ;;  %v6631_v30 = vpop.f32.mrf.mxu0 }
 0x2d9   :  { %6932 = vmatprep.subr.bf16.mxu1 %v10459_v52  ;;  %v12884_v61 = vadd.f32 %v6631_v30, %v6529_v34 }
 0x2da   :  { %7036 = vmatpush2.bf16.msra.mxu0 %v10460_v8  ;;  %v6633_v23 = vpop.f32.mrf.mxu0 }
 0x2db   :  { %7037 = vmatprep.subr.bf16.mxu0 %v10468_v6  ;;  %v12887_v41 = vadd.f32 %v6633_v23, %v6531_v36 }
 0x2dc   :  { %6933 = vmatpush2.bf16.msra.mxu1 %v10457_v15  ;;  %v6635_v14 = vpop.f32.mrf.mxu0 }
 0x2dd   :  { %6934 = vmatprep.subr.bf16.mxu1 %v10465_v31  ;;  %v12891_v11 = vadd.f32 %v6635_v14, %v6533_v48 }
 0x2de   :  { %7038 = vmatpush2.bf16.msra.mxu0 %v10466_v46  ;;  %v6536_v42 = vpop.f32.mrf.mxu1 }
 0x2e0   :  { %6935 = vmatpush2.bf16.msra.mxu1 %v10463_v17  ;;  %v6538_v49 = vpop.f32.mrf.mxu1 }
 0x2e1   :  { %7040 = vmatmul.mubr.bf16.vlgmr.msra.gmra.mxu0 %v12696_v13 }
 0x2e2   :  { %7049 = vmatprep.mubr.bf16.mxu0 %v12730_v37  ;;  %v6540_v13 = vpop.f32.mrf.mxu1  ;;  %v6539_v37 = vadd.f32 %v6538_v49, %v12877_v45 }
 0x2e3   :  { %6937 = vmatmul.mubr.bf16.vlgmr.msra.gmra.mxu1 %v12179_v18  ;;  %v6537_v18 = vadd.f32 %v6536_v42, %v12872_v2 }
 0x2e4   :  { %6946 = vmatprep.mubr.bf16.mxu1 %v12321_v5 }
 0x2e9   :  { %7050 = vmatmul.mubr.bf16.gmra.mxu0 %v12732_v63 }
 0x2ea   :  { %7059 = vmatprep.mubr.bf16.mxu0 %v12765_v50 }
 0x2eb   :  { %6947 = vmatmul.mubr.bf16.gmra.mxu1 %v12323_v28  ;;  %v6542_v28 = vpop.f32.mrf.mxu1 }
 0x2ec   :  { %6956 = vmatprep.mubr.bf16.mxu1 %v12472_v24  ;;  %v6541_v24 = vadd.f32 %v6540_v13, %v12872_v2 }
 0x2f1   :  { %7060 = vmatmul.mubr.bf16.gmra.mxu0 %v12767_v51 }
 0x2f2   :  { %7069 = vmatprep.mubr.bf16.mxu0 %v12800_v21  ;;  %v6639_v5 = vpop.f32.mrf.mxu0 }
 0x2f3   :  { %6957 = vmatmul.mubr.bf16.gmra.mxu1 %v12474_v19  ;;  %v12905_v63 = vadd.f32 %v6639_v5, %v6537_v18  ;;  %v6543_v19 = vadd.f32 %v6542_v28, %v12877_v45 }
 0x2f4   :  { %6966 = vmatprep.mubr.bf16.mxu1 %v12535_v9  ;;  %v6641_v50 = vpop.f32.mrf.mxu0 }
 0x2f5   :  { %v12908_v56 = vadd.f32 %v6641_v50, %v6539_v37 }
 0x2f6   :  { %v6643_v51 = vpop.f32.mrf.mxu0 }
 0x2f7   :  { %v12913_v9 = vadd.f32 %v6643_v51, %v6541_v24 }
 0x2f8   :  { %v6645_v21 = vpop.f32.mrf.mxu0 }
 0x2f9   :  { %7070 = vmatmul.mubr.bf16.gmra.mxu0 %v12802_v43  ;;  %v12917_v7 = vadd.f32 %v6645_v21, %v6543_v19 }
 0x2fa   :  { %7079 = vmatprep.mubr.bf16.mxu0 %v12824_v26 }
 0x2fb   :  { %6967 = vmatmul.mubr.bf16.gmra.mxu1 %v12537_v3 }
 0x2fc   :  { %6976 = vmatprep.mubr.bf16.mxu1 %v12587_v55 }
 0x301   :  { %7080 = vmatmul.mubr.bf16.gmra.mxu0 %v12826_v54 }
 0x302   :  { %7089 = vmatprep.mubr.bf16.mxu0 %v12844_v32 }
 0x303   :  { %6977 = vmatmul.mubr.bf16.gmra.mxu1 %v12590_v44 }
 0x304   :  { %6986 = vmatprep.mubr.bf16.mxu1 %v12631_v35 }
 0x309   :  { %7090 = vmatmul.mubr.bf16.gmra.mxu0 %v12847_v25 }
 0x30a   :  { %7099 = vmatprep.mubr.bf16.mxu0 %v12855_v27 }
 0x30b   :  { %6987 = vmatmul.mubr.bf16.gmra.mxu1 %v12633_v57 }
 0x30c   :  { %6996 = vmatprep.mubr.bf16.mxu1 %v12662_v47 }
 0x311   :  { %7100 = vmatmul.mubr.bf16.gmra.mxu0 %v12859_v62 }
 0x313   :  { %6997 = vmatmul.mubr.bf16.gmra.mxu1 %v12664_v60 }
 0x316   :  { %v6546_v3 = vpop.f32.mrf.mxu1 }
 0x317   :  { %v6547_v55 = vadd.f32 %v6546_v3, %v12872_v2 }
 0x318   :  { %v6548_v43 = vpop.f32.mrf.mxu1 }
 0x319   :  { %v6549_v44 = vadd.f32 %v6548_v43, %v12877_v45 }
 0x31a   :  { %v6550_v26 = vpop.f32.mrf.mxu1 }
 0x31b   :  { %v6649_v35 = vpop.f32.mrf.mxu0  ;;  %v6551_v32 = vadd.f32 %v6550_v26, %v12872_v2 }
 0x31c   :  { %v12931_v54 = vadd.f32 %v6649_v35, %v6547_v55  ;;  %v6552_v25 = vpop.f32.mrf.mxu1 }
 0x31d   :  { %v6651_v57 = vpop.f32.mrf.mxu0  ;;  %v6553_v47 = vadd.f32 %v6552_v25, %v12877_v45 }
 0x31e   :  { %v12934_v27 = vadd.f32 %v6651_v57, %v6549_v44 }
 0x31f   :  { %v6653_v62 = vpop.f32.mrf.mxu0  ;;  %v6556_v0 = vpop.f32.mrf.mxu1 }
 0x320   :  { %v12937_v60 = vadd.f32 %v6653_v62, %v6551_v32  ;;  %v6557_v16 = vadd.f32 %v6556_v0, %v12872_v2 }
 0x321   :  { %v6655_v12 = vpop.f32.mrf.mxu0  ;;  %v6558_v38 = vpop.f32.mrf.mxu1 }
 0x322   :  { %v12939_v22 = vadd.f32 %v6655_v12, %v6553_v47  ;;  %v6559_v8 = vadd.f32 %v6558_v38, %v12877_v45 }
 0x323   :  { %v6560_v52 = vpop.f32.mrf.mxu1 }
 0x324   :  { %v6561_v4 = vadd.f32 %v6560_v52, %v12872_v2 }
 0x325   :  { %v6562_v6 = vpop.f32.mrf.mxu1 }
 0x326   :  { %v6563_v46 = vadd.f32 %v6562_v6, %v12877_v45  ;;  %v10469_v6 = vld [vmem:[#allocation7 + $0x78] sm:$0xff]  }
 0x327   :  { %9758 = vmatprep.subr.bf16.mxu1 %v10469_v6  ;;  %v10476_v6 = vld [vmem:[#allocation7 + $0x20] sm:$0xff]  }
 0x32d   :  { %v6659_v58 = vpop.f32.mrf.mxu0 }
 0x32e   :  { %v12943_v15 = vadd.f32 %v6659_v58, %v6557_v16 }
 0x32f   :  { %v6661_v31 = vpop.f32.mrf.mxu0 }
 0x330   :  { %v12946_v53 = vadd.f32 %v6661_v31, %v6559_v8 }
 0x331   :  { %v6663_v29 = vpop.f32.mrf.mxu0 }
 0x332   :  { %v12949_v59 = vadd.f32 %v6663_v29, %v6561_v4  ;;  %v10470_v4 = vld [vmem:[#allocation7 + $0x38] sm:$0xff]  }
 0x333   :  { %v6665_v17 = vpop.f32.mrf.mxu0  ;;  %9759 = vmatpush3.bf16.msra.mxu1 %v10470_v4 }
 0x334   :  { %v12951_v34 = vadd.f32 %v6665_v17, %v6563_v46 }
 0x33a   :  { %v6566_v20 = vpop.f32.mrf.mxu1 }
 0x33b   :  { %v6567_v30 = vadd.f32 %v6566_v20, %v12872_v2 }
 0x33c   :  { %v6568_v36 = vpop.f32.mrf.mxu1 }
 0x33d   :  { %v6569_v48 = vadd.f32 %v6568_v36, %v12877_v45 }
 0x33e   :  { %v6669_v23 = vpop.f32.mrf.mxu0  ;;  %v6570_v42 = vpop.f32.mrf.mxu1 }
 0x33f   :  { %v12955_v14 = vadd.f32 %v6669_v23, %v6567_v30  ;;  %v6571_v13 = vadd.f32 %v6570_v42, %v12872_v2 }
 0x340   :  { %v6671_v49 = vpop.f32.mrf.mxu0  ;;  %v6572_v5 = vpop.f32.mrf.mxu1 }
 0x341   :  { %v12958_v18 = vadd.f32 %v6671_v49, %v6569_v48  ;;  %v6573_v28 = vadd.f32 %v6572_v5, %v12877_v45  ;;  %v10471_v49 = vld [vmem:[#allocation7 + $0x70] sm:$0xff]  }
 0x342   :  { %v6673_v37 = vpop.f32.mrf.mxu0  ;;  %v6576_v24 = vpop.f32.mrf.mxu1  ;;  %9760 = vmatprep.subr.bf16.mxu1 %v10471_v49 }
 0x343   :  { %v12961_v50 = vadd.f32 %v6673_v37, %v6571_v13  ;;  %v6577_v55 = vadd.f32 %v6576_v24, %v12872_v2  ;;  %v10472_v13 = vld [vmem:[#allocation7 + $0x30] sm:$0xff]  }
 0x344   :  { %v6675_v51 = vpop.f32.mrf.mxu0  ;;  %v6578_v21 = vpop.f32.mrf.mxu1  ;;  %9761 = vmatpush3.bf16.msra.mxu1 %v10472_v13 }
 0x345   :  { %v12963_v19 = vadd.f32 %v6675_v51, %v6573_v28  ;;  %v6579_v43 = vadd.f32 %v6578_v21, %v12877_v45 }
 0x346   :  { %v6580_v3 = vpop.f32.mrf.mxu1 }
 0x347   :  { %v6581_v32 = vadd.f32 %v6580_v3, %v12872_v2 }
 0x348   :  { %v6582_v26 = vpop.f32.mrf.mxu1 }
 0x349   :  { %v6583_v47 = vadd.f32 %v6582_v26, %v12877_v45  ;;  %v10474_v26 = vld [vmem:[#allocation7 + $0x28] sm:$0xff]  }
 0x34b   :  { %v6679_v44 = vpop.f32.mrf.mxu0 }
 0x34c   :  { %v12967_v35 = vadd.f32 %v6679_v44, %v6577_v55 }
 0x34d   :  { %v6681_v25 = vpop.f32.mrf.mxu0 }
 0x34e   :  { %v12970_v57 = vadd.f32 %v6681_v25, %v6579_v43  ;;  %v10473_v43 = vld [vmem:[#allocation7 + $0x68] sm:$0xff]  }
 0x34f   :  { %v6683_v62 = vpop.f32.mrf.mxu0  ;;  %9762 = vmatprep.subr.bf16.mxu1 %v10473_v43  ;;  %v10479_v43 = vld [vmem:[#allocation7 + $0xf0] sm:$0xff]  }
 0x350   :  { %v12973_v12 = vadd.f32 %v6683_v62, %v6581_v32  ;;  %9763 = vmatpush3.bf16.msra.mxu1 %v10474_v26 }
 0x351   :  { %v6685_v0 = vpop.f32.mrf.mxu0  ;;  %v6586_v38 = vpop.f32.mrf.mxu1 }
 0x352   :  { %v12975_v52 = vadd.f32 %v6685_v0, %v6583_v47  ;;  %v6587_v8 = vadd.f32 %v6586_v38, %v12872_v2 }
 0x353   :  { %v6588_v16 = vpop.f32.mrf.mxu1 }
 0x354   :  { %v6589_v31 = vadd.f32 %v6588_v16, %v12877_v45 }
 0x355   :  { %v6590_v58 = vpop.f32.mrf.mxu1 }
 0x356   :  { %v6591_v20 = vadd.f32 %v6590_v58, %v12872_v2  ;;  %v10475_v58 = vld [vmem:[#allocation7 + $0x60] sm:$0xff]  }
 0x357   :  { %v6689_v46 = vpop.f32.mrf.mxu0  ;;  %v6592_v29 = vpop.f32.mrf.mxu1  ;;  %9764 = vmatprep.subr.bf16.mxu1 %v10475_v58 }
 0x358   :  { %v12979_v17 = vadd.f32 %v6689_v46, %v6587_v8  ;;  %v6593_v23 = vadd.f32 %v6592_v29, %v12877_v45  ;;  %9765 = vmatpush3.bf16.msra.mxu1 %v10476_v6  ;;  %v10478_v29 = vld [vmem:[#allocation7 + $0xb8] sm:$0xff]  }
 0x359   :  { %v6691_v30 = vpop.f32.mrf.mxu0 }
 0x35a   :  { %v12982_v36 = vadd.f32 %v6691_v30, %v6589_v31 }
 0x35b   :  { %v6693_v48 = vpop.f32.mrf.mxu0 }
 0x35c   :  { %v12985_v42 = vadd.f32 %v6693_v48, %v6591_v20 }
 0x35d   :  { %v6695_v5 = vpop.f32.mrf.mxu0 }
 0x35e   :  { %13976 = vst [vmem:[#allocation35_spill] sm:$0xff] %v12985_v42  ;;  %v12987_v37 = vadd.f32 %v6695_v5, %v6593_v23 }
 0x35f   :  { %v12989_v28 = vpop.f32.mrf.mxu0 }
 0x360   :  { %13977 = vst [vmem:[#allocation36_spill] sm:$0xff] %v12987_v37  ;;  %v10496_v37 = vld [vmem:[#allocation7 + $0x88] sm:$0xff]  }
 0x361   :  { %v12991_v24 = vpop.f32.mrf.mxu0 }
 0x362   :  { %v6732_v2 = vpop.f32.mrf.mxu1 }
 0x363   :  { %v12994_v51 = vadd.f32 %v6732_v2, %v12881_v10  ;;  %v12996_v21 = vpop.f32.mrf.mxu0 }
 0x364   :  { %v6734_v45 = vpop.f32.mrf.mxu1 }
 0x365   :  { %v12999_v3 = vadd.f32 %v6734_v45, %v12884_v61  ;;  %v13001_v55 = vpop.f32.mrf.mxu0 }
 0x366   :  { %v6736_v44 = vpop.f32.mrf.mxu1 }
 0x367   :  { %v13004_v32 = vadd.f32 %v6736_v44, %v12887_v41  ;;  %v13006_v25 = vpop.f32.mrf.mxu0  ;;  %v10480_v44 = vld [vmem:[#allocation7 + $0x58] sm:$0xff]  }
 0x368   :  { %v6738_v47 = vpop.f32.mrf.mxu1  ;;  %9766 = vmatprep.subr.bf16.mxu1 %v10480_v44  ;;  %v10492_v44 = vld [vmem:[#allocation7 + $0x8] sm:$0xff]  }
 0x369   :  { %13978 = vst [vmem:[#allocation34_spill] sm:$0xff] %v13004_v32  ;;  %v13009_v10 = vadd.f32 %v6738_v47, %v12891_v11  ;;  %v13011_v62 = vpop.f32.mrf.mxu0 }
 0x36a   :  { %v6742_v61 = vpop.f32.mrf.mxu1 }
 0x36b   :  { %v13014_v0 = vadd.f32 %v6742_v61, %v12905_v63  ;;  %v13016_v38 = vpop.f32.mrf.mxu0  ;;  %v10477_v63 = vld [vmem:[#allocation7 + $0xf8] sm:$0xff]  }
 0x36c   :  { %v6744_v16 = vpop.f32.mrf.mxu1  ;;  %9780 = vmatprep.subr.bf16.mxu0 %v10477_v63  ;;  %v10482_v61 = vld [vmem:[#allocation7 + $0x18] sm:$0xff]   ;;  %v10491_v63 = vld [vmem:[#allocation7 + $0x48] sm:$0xff]  }
 0x36d   :  { %v13019_v41 = vadd.f32 %v6744_v16, %v12908_v56  ;;  %v13021_v8 = vpop.f32.mrf.mxu0  ;;  %9781 = vmatpush3.bf16.msra.mxu0 %v10478_v29  ;;  %v10485_v16 = vld [vmem:[#allocation7 + $0x50] sm:$0xff]   ;;  %9767 = vmatpush3.bf16.msra.mxu1 %v10482_v61  ;;  %v10497_v61 = vld [vmem:[#allocation7 + $0x40] sm:$0xff]  }
 0x36e   :  { %v6746_v4 = vpop.f32.mrf.mxu1  ;;  %9782 = vmatprep.subr.bf16.mxu0 %v10479_v43  ;;  %9768 = vmatprep.subr.bf16.mxu1 %v10485_v16  ;;  %v10488_v43 = vld [vmem:[#allocation7 + $0xa0] sm:$0xff]  }
 0x36f   :  { %v13024_v11 = vadd.f32 %v6746_v4, %v12913_v9  ;;  %v10487_v4 = vld [vmem:[#allocation7 + $0x10] sm:$0xff]  }
 0x370   :  { %v13026_v31 = vpop.f32.mrf.mxu0  ;;  %v6748_v46 = vpop.f32.mrf.mxu1 }
 0x371   :  { %13979 = vst [vmem:[#allocation37_spill] sm:$0xff] %v13024_v11  ;;  %v13029_v20 = vadd.f32 %v6748_v46, %v12917_v7  ;;  %9769 = vmatpush3.bf16.msra.mxu1 %v10487_v4  ;;  %v10498_v4 = vld [vmem:[#allocation7] sm:$0xff]  }
 0x372   :  { %v13031_v56 = vpop.f32.mrf.mxu0  ;;  %v6752_v30 = vpop.f32.mrf.mxu1  ;;  %9770 = vmatprep.subr.bf16.mxu1 %v10491_v63  ;;  %v10501_v63 = vld [vmem:[#allocation7 + $0x178] sm:$0xff]  }
 0x373   :  { %v13034_v23 = vadd.f32 %v6752_v30, %v12931_v54  ;;  %v10481_v54 = vld [vmem:[#allocation7 + $0xb0] sm:$0xff]  }
 0x374   :  { %v13036_v48 = vpop.f32.mrf.mxu0  ;;  %v6754_v9 = vpop.f32.mrf.mxu1  ;;  %9783 = vmatpush3.bf16.msra.mxu0 %v10481_v54  ;;  %v10489_v54 = vld [vmem:[#allocation7 + $0xd8] sm:$0xff]  }
 0x375   :  { %v13039_v49 = vadd.f32 %v6754_v9, %v12934_v27  ;;  %v10483_v27 = vld [vmem:[#allocation7 + $0xe8] sm:$0xff]   ;;  %9771 = vmatpush3.bf16.msra.mxu1 %v10492_v44 }
 0x376   :  { %v13041_v13 = vpop.f32.mrf.mxu0  ;;  %v6756_v5 = vpop.f32.mrf.mxu1  ;;  %9784 = vmatprep.subr.bf16.mxu0 %v10483_v27  ;;  %9772 = vmatprep.subr.bf16.mxu1 %v10497_v61 }
 0x377   :  { %v13044_v7 = vadd.f32 %v6756_v5, %v12937_v60  ;;  %v10484_v60 = vld [vmem:[#allocation7 + $0xa8] sm:$0xff]  }
 0x378   :  { %v13046_v2 = vpop.f32.mrf.mxu0  ;;  %v6758_v45 = vpop.f32.mrf.mxu1  ;;  %9785 = vmatpush3.bf16.msra.mxu0 %v10484_v60  ;;  %v10490_v60 = vld [vmem:[#allocation7 + $0x98] sm:$0xff]  }
 0x379   :  { %13980 = vst [vmem:[#allocation11_spill] sm:$0xff] %v13044_v7  ;;  %v13049_v26 = vadd.f32 %v6758_v45, %v12939_v22  ;;  %v10486_v22 = vld [vmem:[#allocation7 + $0xe0] sm:$0xff]   ;;  %9773 = vmatpush3.bf16.msra.mxu1 %v10498_v4 }
 0x37a   :  { %v13051_v47 = vpop.f32.mrf.mxu0  ;;  %9786 = vmatprep.subr.bf16.mxu0 %v10486_v22  ;;  %v10493_v22 = vld [vmem:[#allocation7 + $0xd0] sm:$0xff]   ;;  %9802 = vmatprep.subr.bf16.mxu1 %v10501_v63 }
 0x37b   :  { %v6762_v58 = vpop.f32.mrf.mxu1 }
 0x37c   :  { %v13053_v6 = vpop.f32.mrf.mxu0  ;;  %v13056_v46 = vadd.f32 %v6762_v58, %v12943_v15  ;;  %9787 = vmatpush3.bf16.msra.mxu0 %v10488_v43  ;;  %v10494_v43 = vld [vmem:[#allocation7 + $0x90] sm:$0xff]  }
 0x37d   :  { %v6764_v29 = vpop.f32.mrf.mxu1  ;;  %9788 = vmatprep.subr.bf16.mxu0 %v10489_v54 }
 0x37e   :  { %13981 = vst [vmem:[#allocation12_spill] sm:$0xff] %v13056_v46  ;;  %v13058_v30 = vpop.f32.mrf.mxu0  ;;  %v13061_v9 = vadd.f32 %v6764_v29, %v12946_v53 }
 0x37f   :  { %v6766_v5 = vpop.f32.mrf.mxu1 }
 0x380   :  { %13982 = vst [vmem:[#allocation13_spill] sm:$0xff] %v13061_v9  ;;  %v13063_v45 = vpop.f32.mrf.mxu0  ;;  %v13066_v15 = vadd.f32 %v6766_v5, %v12949_v59  ;;  %9789 = vmatpush3.bf16.msra.mxu0 %v10490_v60 }
 0x381   :  { %v6768_v27 = vpop.f32.mrf.mxu1  ;;  %9790 = vmatprep.subr.bf16.mxu0 %v10493_v22 }
 0x382   :  { %v13068_v16 = vpop.f32.mrf.mxu0  ;;  %v13071_v53 = vadd.f32 %v6768_v27, %v12951_v34 }
 0x383   :  { %v6772_v58 = vpop.f32.mrf.mxu1 }
 0x384   :  { %v13073_v29 = vpop.f32.mrf.mxu0  ;;  %v13076_v59 = vadd.f32 %v6772_v58, %v12955_v14  ;;  %v10495_v14 = vld [vmem:[#allocation7 + $0xc8] sm:$0xff]   ;;  %9791 = vmatpush3.bf16.msra.mxu0 %v10494_v43  ;;  %v10502_v43 = vld [vmem:[#allocation7 + $0x1f8] sm:$0xff]  }
 0x385   :  { %v6774_v5 = vpop.f32.mrf.mxu1  ;;  %9792 = vmatprep.subr.bf16.mxu0 %v10495_v14 }
 0x386   :  { %13983 = vst [vmem:[#allocation42_spill] sm:$0xff] %v13076_v59  ;;  %v13078_v39 = vpop.f32.mrf.mxu0  ;;  %v13081_v34 = vadd.f32 %v6774_v5, %v12958_v18 }
 0x387   :  { %v6776_v27 = vpop.f32.mrf.mxu1 }
 0x388   :  { %v13083_v40 = vpop.f32.mrf.mxu0  ;;  %v13086_v44 = vadd.f32 %v6776_v27, %v12961_v50  ;;  %v10499_v50 = vld [vmem:[#allocation7 + $0xc0] sm:$0xff]   ;;  %9793 = vmatpush3.bf16.msra.mxu0 %v10496_v37  ;;  %v13985_v37 = vsub.s32 2, %v13973_v1 }
 0x389   :  { %v6778_v54 = vpop.f32.mrf.mxu1  ;;  %9794 = vmatprep.subr.bf16.mxu0 %v10499_v50  ;;  %v13986_v50 = vsub.s32 3, %v13973_v1 }
 0x38a   :  { %v13088_v61 = vpop.f32.mrf.mxu0  ;;  %v13091_v58 = vadd.f32 %v6778_v54, %v12963_v19  ;;  %v10500_v19 = vld [vmem:[#allocation7 + $0x80] sm:$0xff]  }
 0x38b   :  { %v6782_v18 = vpop.f32.mrf.mxu1 }
 0x38c   :  { %13984 = vst [vmem:[#allocation14_spill] sm:$0xff] %v13091_v58  ;;  %v13093_v5 = vpop.f32.mrf.mxu0  ;;  %v13096_v60 = vadd.f32 %v6782_v18, %v12967_v35  ;;  %9795 = vmatpush3.bf16.msra.mxu0 %v10500_v19 }
 0x38d   :  { %v6784_v4 = vpop.f32.mrf.mxu1  ;;  %9824 = vmatprep.subr.bf16.mxu0 %v10502_v43 }
 0x38e   :  { %v13099_v22 = vadd.f32 %v6784_v4, %v12970_v57  ;;  %v13101_v27 = vpop.f32.mrf.mxu0 }
 0x38f   :  { %v6786_v63 = vpop.f32.mrf.mxu1 }
 0x390   :  { %v13104_v54 = vadd.f32 %v6786_v63, %v12973_v12  ;;  %v13109_v18 = vpop.f32.mrf.mxu0  ;;  %v13119_v12 = vrot.slane %v12866_v33, %v13985_v37 }
 0x391   :  { %v6788_v42 = vpop.f32.mrf.mxu1 }
 0x392   :  { %v13107_v35 = vadd.f32 %v6788_v42, %v12975_v52  ;;  %v13114_v4 = vpop.f32.mrf.mxu0  ;;  %v13124_v52 = vrot.slane %v12866_v33, %v13986_v50 }
 0x393   :  { %v6792_v14 = vpop.f32.mrf.mxu1 }
 0x394   :  { %v13112_v57 = vadd.f32 %v6792_v14, %v12979_v17  ;;  %v13128_v63 = vpop.f32.mrf.mxu0  ;;  %v6836_v17 = vadd.f32 %v12989_v28, %v13119_v12  ;;  %v6838_v43 = vadd.f32 %v12991_v24, %v13124_v52  ;;  %v6840_v14 = vadd.f32 %v12996_v21, %v13119_v12 }
 0x395   :  { %v13126_v42 = vpop.f32.mrf.mxu1  ;;  %v13139_v1 = vadd.f32 %v13001_v55, %v13124_v52  ;;  %v13147_v28 = vadd.f32 %v13006_v25, %v13119_v12  ;;  %v13151_v24 = vadd.f32 %v13011_v62, %v13124_v52  ;;  %v13157_v55 = vadd.f32 %v13016_v38, %v13119_v12 }
 0x396   :  { %v13161_v37 = vadd.f32 %v13021_v8, %v13124_v52  ;;  %v13163_v50 = vpop.f32.mrf.mxu0  ;;  %v13169_v62 = vadd.f32 %v13026_v31, %v13119_v12  ;;  %v13173_v19 = vadd.f32 %v13031_v56, %v13124_v52  ;;  %v13179_v8 = vadd.f32 %v13036_v48, %v13119_v12 }
 0x397   :  { %v13141_v33 = vpop.f32.mrf.mxu1  ;;  %v13183_v25 = vadd.f32 %v13041_v13, %v13124_v52  ;;  %v13189_v56 = vadd.f32 %v13046_v2, %v13119_v12  ;;  %v13193_v21 = vadd.f32 %v13051_v47, %v13124_v52  ;;  %v13199_v13 = vadd.f32 %v13053_v6, %v13119_v12 }
 0x398   :  { %13987 = vst [vmem:[#allocation15_spill] sm:$0xff] %v13169_v62  ;;  %v13203_v31 = vadd.f32 %v13058_v30, %v13124_v52  ;;  %v13209_v47 = vadd.f32 %v13063_v45, %v13119_v12  ;;  %v13215_v46 = vadd.f32 %v13068_v16, %v13124_v52  ;;  %v13219_v30 = vadd.f32 %v13073_v29, %v13119_v12 }
 0x399   :  { %v6798_v32 = vpop.f32.mrf.mxu1  ;;  %13988 = vst [vmem:[#allocation16_spill] sm:$0xff] %v13189_v56  ;;  %v13224_v45 = vadd.f32 %v13078_v39, %v13124_v52  ;;  %v13230_v16 = vadd.f32 %v13083_v40, %v13119_v12  ;;  %v13234_v29 = vadd.f32 %v13088_v61, %v13124_v52  ;;  %v13238_v39 = vadd.f32 %v13093_v5, %v13119_v12 }
 0x39a   :  { %v13244_v40 = vadd.f32 %v13101_v27, %v13124_v52  ;;  %v13248_v61 = vadd.f32 %v13109_v18, %v13119_v12  ;;  %v13990_v5 = vmax.f32 %v12994_v51, 0.0  ;;  %v13257_v27 = vadd.f32 %v13126_v42, %v12982_v36 }
 0x39b   :  { %13989 = vst [vmem:[#allocation43_spill] sm:$0xff] %v13238_v39  ;;  %v13261_v18 = vadd.f32 %v13114_v4, %v13124_v52  ;;  %v13991_v51 = vmax.f32 %v12999_v3, 0.0  ;;  %v13273_v36 = vadd.f32 %v13128_v63, %v13119_v12  ;;  %v13993_v4 = vld [vmem:[#allocation36_spill] sm:$0xff] }
 0x39c   :  { %v13276_v42 = vadd.f32 %v6798_v32, %v13993_v4  ;;  %v13998_v4 = vld [vmem:[#allocation38_spill] sm:$0xff] }
 0x39e   :  { %13994 = vst [vmem:[#allocation18_spill] sm:$0xff] %v13276_v42 }
 0x3a1   :  { %v7041_v11 = vpop.f32.mrf.mxu0 }
 0x3a3   :  { %v6938_v62 = vpop.f32.mrf.mxu1  ;;  %v7043_v7 = vpop.f32.mrf.mxu0 }
 0x3a4   :  { %v6939_v48 = vadd.f32 %v6938_v62, %v6836_v17 }
 0x3a5   :  { %v6940_v2 = vpop.f32.mrf.mxu1  ;;  %v7045_v9 = vpop.f32.mrf.mxu0 }
 0x3a6   :  { %v7042_v17 = vadd.f32 %v7041_v11, %v6939_v48  ;;  %v6941_v62 = vadd.f32 %v6940_v2, %v6838_v43 }
 0x3a7   :  { %v6942_v59 = vpop.f32.mrf.mxu1  ;;  %v7047_v56 = vpop.f32.mrf.mxu0 }
 0x3a8   :  { %v7112_v11 = vmax.f32 %v7042_v17, 0.0  ;;  %v7044_v43 = vadd.f32 %v7043_v7, %v6941_v62  ;;  %v6943_v48 = vadd.f32 %v6942_v59, %v6840_v14 }
 0x3a9   :  { %v6944_v6 = vpop.f32.mrf.mxu1  ;;  %v7051_v58 = vpop.f32.mrf.mxu0 }
 0x3aa   :  { %v7166_v39 = vmax.f32 %v13990_v5, %v7112_v11  ;;  %v7113_v17 = vmax.f32 %v7044_v43, 0.0  ;;  %v7046_v7 = vadd.f32 %v7045_v9, %v6943_v48  ;;  %v6945_v59 = vadd.f32 %v6944_v6, %v13139_v1  ;;  %v13992_v48 = vld [vmem:[#allocation35_spill] sm:$0xff] }
 0x3ab   :  { %v6948_v38 = vpop.f32.mrf.mxu1  ;;  %v7053_v2 = vpop.f32.mrf.mxu0  ;;  %v13269_v5 = vadd.f32 %v13141_v33, %v13992_v48  ;;  %v13283_v33 = vadd.f32 %v13163_v50, %v13124_v52 }
 0x3ac   :  { %v7167_v11 = vmax.f32 %v13991_v51, %v7113_v17  ;;  %v7116_v9 = vmax.f32 %v7046_v7, 0.0  ;;  %v7048_v43 = vadd.f32 %v7047_v56, %v6945_v59  ;;  %v6949_v1 = vadd.f32 %v6948_v38, %v13147_v28  ;;  %v13995_v56 = vld [vmem:[#allocation34_spill] sm:$0xff] }
 0x3ad   :  { %v6950_v62 = vpop.f32.mrf.mxu1  ;;  %v7055_v3 = vpop.f32.mrf.mxu0  ;;  %v13996_v59 = vmax.f32 %v13995_v56, 0.0  ;;  %13997 = vst [vmem:[#allocation19_spill] sm:$0xff] %v13283_v33 }
 0x3ae   :  { %v7222_v17 = vcombine.low %v7166_v39, %v7167_v11  ;;  %v7223_v7 = vcombine.high %v7166_v39, %v7167_v11  ;;  %v7117_v38 = vmax.f32 %v7048_v43, 0.0  ;;  %v7052_v48 = vadd.f32 %v7051_v58, %v6949_v1 }
 0x3af   :  { %v7168_v28 = vmax.f32 %v13996_v59, %v7116_v9  ;;  %v6951_v12 = vadd.f32 %v6950_v62, %v13151_v24  ;;  %v6952_v63 = vpop.f32.mrf.mxu1  ;;  %v7057_v32 = vpop.f32.mrf.mxu0  ;;  %v13999_v39 = vmax.f32 %v13009_v10, 0.0 }
 0x3b0   :  { %v7284_v6 = vrot.slane %v7222_v17, %v13998_v4  ;;  %v7291_v14 = vrot.slane %v7223_v7, %v13998_v4  ;;  %v6953_v9 = vadd.f32 %v6952_v63, %v13157_v55  ;;  %v7120_v52 = vmax.f32 %v7052_v48, 0.0 }
 0x3b1   :  { %v7169_v11 = vmax.f32 %v13999_v39, %v7117_v38  ;;  %v7054_v50 = vadd.f32 %v7053_v2, %v6951_v12  ;;  %v6954_v58 = vpop.f32.mrf.mxu1  ;;  %v7061_v1 = vpop.f32.mrf.mxu0  ;;  %v14000_v17 = vmax.f32 %v13014_v0, 0.0  ;;  %v14001_v12 = vmax.f32 %v13019_v41, 0.0 }
 0x3b2   :  { %v7502_v24 = vrot.slane %v7284_v6, 4  ;;  %v7503_v62 = vrot.slane %v7291_v14, 4  ;;  %v7056_v10 = vadd.f32 %v7055_v3, %v6953_v9  ;;  %v6955_v38 = vadd.f32 %v6954_v58, %v13161_v37 }
 0x3b3   :  { %v7224_v59 = vcombine.low %v7168_v28, %v7169_v11  ;;  %v7225_v51 = vcombine.high %v7168_v28, %v7169_v11  ;;  %v7170_v7 = vmax.f32 %v14000_v17, %v7120_v52  ;;  %v7121_v33 = vmax.f32 %v7054_v50, 0.0  ;;  %v6958_v55 = vpop.f32.mrf.mxu1  ;;  %v7063_v63 = vpop.f32.mrf.mxu0  ;;  %v14002_v11 = vld [vmem:[#allocation15_spill] sm:$0xff] }
 0x3b4   :  { %v7558_v39 = vmax.f32 %v7284_v6, %v7502_v24  ;;  %v7559_v43 = vmax.f32 %v7291_v14, %v7503_v62  ;;  %v7124_v42 = vmax.f32 %v7056_v10, 0.0  ;;  %v7058_v28 = vadd.f32 %v7057_v32, %v6955_v38  ;;  %v14003_v24 = vld [vmem:[#allocation37_spill] sm:$0xff] }
 0x3b5   :  { %v7298_v48 = vrot.slane %v7224_v59, %v13998_v4  ;;  %v7305_v2 = vrot.slane %v7225_v51, %v13998_v4  ;;  %v7171_v56 = vmax.f32 %v14001_v12, %v7121_v33  ;;  %v6959_v0 = vadd.f32 %v6958_v55, %v14002_v11  ;;  %v6960_v52 = vpop.f32.mrf.mxu1  ;;  %v7065_v50 = vpop.f32.mrf.mxu0  ;;  %v14005_v33 = vld [vmem:[#allocation40_spill] sm:$0xff] }
 0x3b6   :  { %v7614_v3 = vcombine.low %v7558_v39, %v7559_v43  ;;  %v6961_v58 = vadd.f32 %v6960_v52, %v13173_v19  ;;  %v14004_v62 = vmax.f32 %v14003_v24, 0.0  ;;  %v7125_v51 = vmax.f32 %v7058_v28, 0.0 }
 0x3b7   :  { %v7504_v9 = vrot.slane %v7298_v48, 4  ;;  %v7505_v37 = vrot.slane %v7305_v2, 4  ;;  %v7226_v6 = vcombine.low %v7170_v7, %v7171_v56  ;;  %v7227_v14 = vcombine.high %v7170_v7, %v7171_v56  ;;  %v6962_v17 = vpop.f32.mrf.mxu1  ;;  %v7067_v41 = vpop.f32.mrf.mxu0 }
 0x3b8   :  { %v7172_v59 = vmax.f32 %v14004_v62, %v7124_v42  ;;  %v7622_v10 = vrot.slane %v7614_v3, %v14005_v33  ;;  %v7062_v55 = vadd.f32 %v7061_v1, %v6959_v0  ;;  %v14006_v39 = vmax.f32 %v13029_v20, 0.0 }
 0x3b9   :  { %v7560_v32 = vmax.f32 %v7298_v48, %v7504_v9  ;;  %v7561_v38 = vmax.f32 %v7305_v2, %v7505_v37  ;;  %v7312_v12 = vrot.slane %v7226_v6, %v13998_v4  ;;  %v7319_v43 = vrot.slane %v7227_v14, %v13998_v4  ;;  %v6964_v56 = vpop.f32.mrf.mxu1  ;;  %v7071_v7 = vpop.f32.mrf.mxu0 }
 0x3ba   :  { %v7173_v19 = vmax.f32 %v14006_v39, %v7125_v51  ;;  %v7064_v11 = vadd.f32 %v7063_v63, %v6961_v58  ;;  %v7128_v42 = vmax.f32 %v7062_v55, 0.0  ;;  %v6963_v28 = vadd.f32 %v6962_v17, %v13179_v8 }
 0x3bb   :  { %v7615_v52 = vcombine.low %v7560_v32, %v7561_v38  ;;  %v6965_v24 = vadd.f32 %v6964_v56, %v13183_v25  ;;  %v7506_v3 = vrot.slane %v7312_v12, 4  ;;  %v7507_v48 = vrot.slane %v7319_v43, 4  ;;  %v6968_v0 = vpop.f32.mrf.mxu1  ;;  %v7073_v9 = vpop.f32.mrf.mxu0 }
 0x3bc   :  { %v7228_v2 = vcombine.low %v7172_v59, %v7173_v19  ;;  %v7229_v1 = vcombine.high %v7172_v59, %v7173_v19  ;;  %v14007_v20 = vmax.f32 %v13034_v23, 0.0  ;;  %v7129_v63 = vmax.f32 %v7064_v11, 0.0 }
 0x3bd   :  { %v7629_v37 = vrot.slane %v7615_v52, %v14005_v33  ;;  %v7066_v58 = vadd.f32 %v7065_v50, %v6963_v28  ;;  %v7562_v14 = vmax.f32 %v7312_v12, %v7506_v3  ;;  %v7563_v62 = vmax.f32 %v7319_v43, %v7507_v48  ;;  %v6970_v25 = vpop.f32.mrf.mxu1  ;;  %v7075_v17 = vpop.f32.mrf.mxu0  ;;  %v14011_v48 = vld [vmem:[#allocation16_spill] sm:$0xff] }
 0x3be   :  { %v7174_v6 = vmax.f32 %v14007_v20, %v7128_v42  ;;  %v7326_v51 = vrot.slane %v7228_v2, %v13998_v4  ;;  %v7333_v8 = vrot.slane %v7229_v1, %v13998_v4  ;;  %v14008_v38 = vmax.f32 %v13039_v49, 0.0  ;;  %v14009_v42 = vld [vmem:[#allocation11_spill] sm:$0xff] }
 0x3bf   :  { %v13316_v32 = vcombine.low %v7622_v10, %v7629_v37  ;;  %v13318_v59 = vcombine.high %v7622_v10, %v7629_v37  ;;  %v7132_v39 = vmax.f32 %v7066_v58, 0.0  ;;  %v7632_v23 = vcombine.low %v7562_v14, %v7563_v62  ;;  %v6972_v12 = vpop.f32.mrf.mxu1  ;;  %v7077_v43 = vpop.f32.mrf.mxu0 }
 0x3c0   :  { %v7175_v55 = vmax.f32 %v14008_v38, %v7129_v63  ;;  %v7508_v19 = vrot.slane %v7326_v51, 4  ;;  %v7509_v11 = vrot.slane %v7333_v8, 4  ;;  %v7068_v50 = vadd.f32 %v7067_v41, %v6965_v24 }
 0x3c1   :  { %v14010_v28 = vmax.f32 %v14009_v42, 0.0  ;;  %v6969_v2 = vadd.f32 %v6968_v0, %v14011_v48  ;;  %v7640_v10 = vrot.slane %v7632_v23, %v14005_v33  ;;  %v6974_v20 = vpop.f32.mrf.mxu1  ;;  %v7081_v63 = vpop.f32.mrf.mxu0  ;;  %v6971_v14 = vadd.f32 %v6970_v25, %v13193_v21 }
 0x3c2   :  { %v7230_v56 = vcombine.low %v7174_v6, %v7175_v55  ;;  %v7231_v52 = vcombine.high %v7174_v6, %v7175_v55  ;;  %v7564_v1 = vmax.f32 %v7326_v51, %v7508_v19  ;;  %v7565_v37 = vmax.f32 %v7333_v8, %v7509_v11 }
 0x3c3   :  { %v7176_v3 = vmax.f32 %v14010_v28, %v7132_v39  ;;  %v7133_v49 = vmax.f32 %v7068_v50, 0.0  ;;  %v7072_v24 = vadd.f32 %v7071_v7, %v6969_v2  ;;  %v14012_v62 = vmax.f32 %v13049_v26, 0.0  ;;  %v6978_v51 = vpop.f32.mrf.mxu1  ;;  %v7083_v8 = vpop.f32.mrf.mxu0  ;;  %v14013_v28 = vld [vmem:[#allocation12_spill] sm:$0xff] }
 0x3c4   :  { %v7340_v58 = vrot.slane %v7230_v56, %v13998_v4  ;;  %v7347_v41 = vrot.slane %v7231_v52, %v13998_v4  ;;  %v7633_v6 = vcombine.low %v7564_v1, %v7565_v37  ;;  %v6973_v0 = vadd.f32 %v6972_v12, %v13199_v13 }
 0x3c5   :  { %v7177_v38 = vmax.f32 %v14012_v62, %v7133_v49  ;;  %v6975_v55 = vadd.f32 %v6974_v20, %v13203_v31  ;;  %v7136_v19 = vmax.f32 %v7072_v24, 0.0  ;;  %v7074_v11 = vadd.f32 %v7073_v9, %v6971_v14  ;;  %v6980_v21 = vpop.f32.mrf.mxu1  ;;  %v7085_v25 = vpop.f32.mrf.mxu0 }
 0x3c6   :  { %v7510_v39 = vrot.slane %v7340_v58, 4  ;;  %v7511_v23 = vrot.slane %v7347_v41, 4  ;;  %v7647_v50 = vrot.slane %v7633_v6, %v14005_v33  ;;  %v7076_v52 = vadd.f32 %v7075_v17, %v6973_v0  ;;  %v14015_v17 = vld [vmem:[#allocation13_spill] sm:$0xff] }
 0x3c7   :  { %v7232_v56 = vcombine.low %v7176_v3, %v7177_v38  ;;  %v7233_v7 = vcombine.high %v7176_v3, %v7177_v38  ;;  %v14014_v48 = vmax.f32 %v14013_v28, 0.0  ;;  %v7137_v12 = vmax.f32 %v7074_v11, 0.0  ;;  %v6982_v37 = vpop.f32.mrf.mxu1  ;;  %v7087_v49 = vpop.f32.mrf.mxu0 }
 0x3c8   :  { %v7566_v42 = vmax.f32 %v7340_v58, %v7510_v39  ;;  %v7567_v26 = vmax.f32 %v7347_v41, %v7511_v23  ;;  %v13336_v31 = vcombine.low %v7640_v10, %v7647_v50  ;;  %v13338_v2 = vcombine.high %v7640_v10, %v7647_v50 }
 0x3c9   :  { %v7178_v13 = vmax.f32 %v14014_v48, %v7136_v19  ;;  %v7354_v1 = vrot.slane %v7232_v56, %v13998_v4  ;;  %v7361_v9 = vrot.slane %v7233_v7, %v13998_v4  ;;  %v14016_v20 = vmax.f32 %v14015_v17, 0.0  ;;  %v6984_v10 = vpop.f32.mrf.mxu1  ;;  %v7091_v0 = vpop.f32.mrf.mxu0 }
 0x3ca   :  { %v7650_v3 = vcombine.low %v7566_v42, %v7567_v26  ;;  %v7140_v58 = vmax.f32 %v7076_v52, 0.0  ;;  %v7078_v41 = vadd.f32 %v7077_v43, %v6975_v55  ;;  %v6979_v62 = vadd.f32 %v6978_v51, %v13209_v47 }
 0x3cb   :  { %v7179_v24 = vmax.f32 %v14016_v20, %v7137_v12  ;;  %v7512_v14 = vrot.slane %v7354_v1, 4  ;;  %v7513_v6 = vrot.slane %v7361_v9, 4  ;;  %v6981_v38 = vadd.f32 %v6980_v21, %v13215_v46  ;;  %v6988_v43 = vpop.f32.mrf.mxu1  ;;  %v7093_v55 = vpop.f32.mrf.mxu0 }
 0x3cc   :  { %v7658_v39 = vrot.slane %v7650_v3, %v14005_v33  ;;  %v14017_v11 = vmax.f32 %v13066_v15, 0.0  ;;  %v7141_v42 = vmax.f32 %v7078_v41, 0.0  ;;  %v7082_v52 = vadd.f32 %v7081_v63, %v6979_v62 }
 0x3cd   :  { %v7234_v23 = vcombine.low %v7178_v13, %v7179_v24  ;;  %v7235_v19 = vcombine.high %v7178_v13, %v7179_v24  ;;  %v7568_v56 = vmax.f32 %v7354_v1, %v7512_v14  ;;  %v7569_v7 = vmax.f32 %v7361_v9, %v7513_v6  ;;  %v6990_v12 = vpop.f32.mrf.mxu1 }
 0x3ce   :  { %v7180_v50 = vmax.f32 %v14017_v11, %v7140_v58  ;;  %v7084_v46 = vadd.f32 %v7083_v8, %v6981_v38  ;;  %v6983_v51 = vadd.f32 %v6982_v37, %v13219_v30  ;;  %v14018_v28 = vmax.f32 %v13071_v53, 0.0  ;;  %v14019_v58 = vld [vmem:[#allocation42_spill] sm:$0xff]  ;;  %v7095_v37 = vpop.f32.mrf.mxu0 }
 0x3cf   :  { %v7368_v26 = vrot.slane %v7234_v23, %v13998_v4  ;;  %v7375_v47 = vrot.slane %v7235_v19, %v13998_v4  ;;  %v7651_v21 = vcombine.low %v7568_v56, %v7569_v7  ;;  %v7144_v13 = vmax.f32 %v7082_v52, 0.0  ;;  %v6992_v30 = vpop.f32.mrf.mxu1 }
 0x3d0   :  { %v7181_v48 = vmax.f32 %v14018_v28, %v7141_v42  ;;  %v6985_v15 = vadd.f32 %v6984_v10, %v13224_v45  ;;  %v7145_v63 = vmax.f32 %v7084_v46, 0.0  ;;  %v7086_v3 = vadd.f32 %v7085_v25, %v6983_v51  ;;  %v7097_v46 = vpop.f32.mrf.mxu0 }
 0x3d1   :  { %v7514_v1 = vrot.slane %v7368_v26, 4  ;;  %v7515_v9 = vrot.slane %v7375_v47, 4  ;;  %v7665_v17 = vrot.slane %v7651_v21, %v14005_v33  ;;  %v14020_v8 = vmax.f32 %v14019_v58, 0.0  ;;  %v6994_v19 = vpop.f32.mrf.mxu1 }
 0x3d2   :  { %v7236_v20 = vcombine.low %v7180_v50, %v7181_v48  ;;  %v7237_v24 = vcombine.high %v7180_v50, %v7181_v48  ;;  %v14021_v6 = vmax.f32 %v13081_v34, 0.0  ;;  %v7148_v45 = vmax.f32 %v7086_v3, 0.0 }
 0x3d3   :  { %v7182_v41 = vmax.f32 %v14020_v8, %v7144_v13  ;;  %v7570_v14 = vmax.f32 %v7368_v26, %v7514_v1  ;;  %v7571_v53 = vmax.f32 %v7375_v47, %v7515_v9  ;;  %v13360_v38 = vcombine.low %v7658_v39, %v7665_v17  ;;  %v6998_v51 = vpop.f32.mrf.mxu1 }
 0x3d4   :  { %v7183_v62 = vmax.f32 %v14021_v6, %v7145_v63  ;;  %v13362_v10 = vcombine.high %v7658_v39, %v7665_v17  ;;  %v7382_v25 = vrot.slane %v7236_v20, %v13998_v4  ;;  %v7389_v23 = vrot.slane %v7237_v24, %v13998_v4 }
 0x3d5   :  { %v7668_v11 = vcombine.low %v7570_v14, %v7571_v53  ;;  %v14022_v7 = vmax.f32 %v13086_v44, 0.0  ;;  %v7088_v34 = vadd.f32 %v7087_v49, %v6985_v15  ;;  %v6989_v47 = vadd.f32 %v6988_v43, %v13230_v16  ;;  %v14023_v49 = vld [vmem:[#allocation43_spill] sm:$0xff]  ;;  %v14024_v43 = vld [vmem:[#allocation14_spill] sm:$0xff]  ;;  %v7000_v14 = vpop.f32.mrf.mxu1 }
 0x3d6   :  { %v7238_v50 = vcombine.low %v7182_v41, %v7183_v62  ;;  %v7239_v56 = vcombine.high %v7182_v41, %v7183_v62  ;;  %v7516_v52 = vrot.slane %v7382_v25, 4  ;;  %v7517_v26 = vrot.slane %v7389_v23, 4  ;;  %v7101_v41 = vpop.f32.mrf.mxu0 }
 0x3d7   :  { %v7184_v42 = vmax.f32 %v14022_v7, %v7148_v45  ;;  %v7676_v39 = vrot.slane %v7668_v11, %v14005_v33  ;;  %v6991_v48 = vadd.f32 %v6990_v12, %v13234_v29  ;;  %v7149_v9 = vmax.f32 %v7088_v34, 0.0 }
 0x3d8   :  { %v7396_v21 = vrot.slane %v7238_v50, %v13998_v4  ;;  %v7403_v28 = vrot.slane %v7239_v56, %v13998_v4  ;;  %v7572_v13 = vmax.f32 %v7382_v25, %v7516_v52  ;;  %v7573_v1 = vmax.f32 %v7389_v23, %v7517_v26  ;;  %v7103_v52 = vpop.f32.mrf.mxu0  ;;  %v7002_v26 = vpop.f32.mrf.mxu1 }
 0x3d9   :  { %v7092_v44 = vadd.f32 %v7091_v0, %v6989_v47  ;;  %v7094_v17 = vadd.f32 %v7093_v55, %v6991_v48  ;;  %v6993_v15 = vadd.f32 %v6992_v30, %v14023_v49  ;;  %v14025_v20 = vmax.f32 %v14024_v43, 0.0 }
 0x3da   :  { %v7518_v63 = vrot.slane %v7396_v21, 4  ;;  %v7519_v3 = vrot.slane %v7403_v28, 4  ;;  %v7669_v16 = vcombine.low %v7572_v13, %v7573_v1  ;;  %v6995_v8 = vadd.f32 %v6994_v19, %v13244_v40  ;;  %v7105_v49 = vpop.f32.mrf.mxu0 }
 0x3db   :  { %v7185_v24 = vmax.f32 %v14025_v20, %v7149_v9  ;;  %v7152_v58 = vmax.f32 %v7092_v44, 0.0  ;;  %v7153_v12 = vmax.f32 %v7094_v17, 0.0  ;;  %v7096_v6 = vadd.f32 %v7095_v37, %v6993_v15 }
 0x3dc   :  { %v7574_v53 = vmax.f32 %v7396_v21, %v7518_v63  ;;  %v7575_v29 = vmax.f32 %v7403_v28, %v7519_v3  ;;  %v7683_v0 = vrot.slane %v7669_v16, %v14005_v33  ;;  %v14026_v55 = vmax.f32 %v13096_v60, 0.0 }
 0x3dd   :  { %v7240_v62 = vcombine.low %v7184_v42, %v7185_v24  ;;  %v7241_v45 = vcombine.high %v7184_v42, %v7185_v24  ;;  %v14027_v23 = vmax.f32 %v13099_v22, 0.0  ;;  %v7156_v50 = vmax.f32 %v7096_v6, 0.0 }
 0x3de   :  { %v7186_v30 = vmax.f32 %v14026_v55, %v7152_v58  ;;  %v7686_v25 = vcombine.low %v7574_v53, %v7575_v29  ;;  %v7098_v56 = vadd.f32 %v7097_v46, %v6995_v8  ;;  %v13382_v40 = vcombine.low %v7676_v39, %v7683_v0  ;;  %v7004_v58 = vpop.f32.mrf.mxu1 }
 0x3df   :  { %v7187_v11 = vmax.f32 %v14027_v23, %v7153_v12  ;;  %v13384_v19 = vcombine.high %v7676_v39, %v7683_v0  ;;  %v7410_v7 = vrot.slane %v7240_v62, %v13998_v4  ;;  %v7417_v37 = vrot.slane %v7241_v45, %v13998_v4 }
 0x3e0   :  { %v7694_v42 = vrot.slane %v7686_v25, %v14005_v33  ;;  %v14028_v47 = vmax.f32 %v13104_v54, 0.0  ;;  %v7157_v46 = vmax.f32 %v7098_v56, 0.0  ;;  %v6999_v48 = vadd.f32 %v6998_v51, %v13248_v61  ;;  %v14033_v25 = vld [vmem:[#allocation19_spill] sm:$0xff] }
 0x3e1   :  { %v7242_v60 = vcombine.low %v7186_v30, %v7187_v11  ;;  %v7243_v34 = vcombine.high %v7186_v30, %v7187_v11  ;;  %v7520_v21 = vrot.slane %v7410_v7, 4  ;;  %v7521_v28 = vrot.slane %v7417_v37, 4 }
 0x3e2   :  { %v7188_v22 = vmax.f32 %v14028_v47, %v7156_v50  ;;  %v7001_v1 = vadd.f32 %v7000_v14, %v13261_v18  ;;  %v7003_v9 = vadd.f32 %v7002_v26, %v13273_v36  ;;  %v14029_v3 = vmax.f32 %v13107_v35, 0.0 }
 0x3e3   :  { %v7424_v39 = vrot.slane %v7242_v60, %v13998_v4  ;;  %v7431_v13 = vrot.slane %v7243_v34, %v13998_v4  ;;  %v7576_v44 = vmax.f32 %v7410_v7, %v7520_v21  ;;  %v7577_v63 = vmax.f32 %v7417_v37, %v7521_v28  ;;  %v7107_v37 = vpop.f32.mrf.mxu0 }
 0x3e4   :  { %v7189_v54 = vmax.f32 %v14029_v3, %v7157_v46  ;;  %v7102_v17 = vadd.f32 %v7101_v41, %v6999_v48  ;;  %v7104_v61 = vadd.f32 %v7103_v52, %v7001_v1  ;;  %v7106_v51 = vadd.f32 %v7105_v49, %v7003_v9 }
 0x3e5   :  { %v7522_v15 = vrot.slane %v7424_v39, 4  ;;  %v7523_v16 = vrot.slane %v7431_v13, 4  ;;  %v7687_v43 = vcombine.low %v7576_v44, %v7577_v63  ;;  %v14030_v12 = vmax.f32 %v13112_v57, 0.0  ;;  %v14034_v44 = vld [vmem:[#allocation18_spill] sm:$0xff] }
 0x3e6   :  { %v7244_v20 = vcombine.low %v7188_v22, %v7189_v54  ;;  %v7245_v24 = vcombine.high %v7188_v22, %v7189_v54  ;;  %v7160_v18 = vmax.f32 %v7102_v17, 0.0  ;;  %v7161_v14 = vmax.f32 %v7104_v61, 0.0 }
 0x3e7   :  { %v7578_v36 = vmax.f32 %v7424_v39, %v7522_v15  ;;  %v7579_v8 = vmax.f32 %v7431_v13, %v7523_v16  ;;  %v7164_v53 = vmax.f32 %v7106_v51, 0.0  ;;  %v7701_v35 = vrot.slane %v7687_v43, %v14005_v33 }
 0x3e8   :  { %v7438_v41 = vrot.slane %v7244_v20, %v13998_v4  ;;  %v7445_v29 = vrot.slane %v7245_v24, %v13998_v4  ;;  %v7190_v6 = vmax.f32 %v14030_v12, %v7160_v18  ;;  %v14031_v62 = vmax.f32 %v13257_v27, 0.0 }
 0x3e9   :  { %v7704_v0 = vcombine.low %v7578_v36, %v7579_v8  ;;  %v14032_v55 = vmax.f32 %v13269_v5, 0.0  ;;  %v7005_v23 = vadd.f32 %v7004_v58, %v14033_v25  ;;  %v13408_v11 = vcombine.low %v7694_v42, %v7701_v35 }
 0x3ea   :  { %v7191_v45 = vmax.f32 %v14031_v62, %v7161_v14  ;;  %v13410_v50 = vcombine.high %v7694_v42, %v7701_v35  ;;  %v7524_v56 = vrot.slane %v7438_v41, 4  ;;  %v7525_v7 = vrot.slane %v7445_v29, 4 }
 0x3eb   :  { %v7192_v30 = vmax.f32 %v14032_v55, %v7164_v53  ;;  %v7712_v57 = vrot.slane %v7704_v0, %v14005_v33  ;;  %v7108_v60 = vadd.f32 %v7107_v37, %v7005_v23  ;;  %v7775_v5 = vsel %vm3185_vm1, %v13318_v59, 0.0 }
 0x3ec   :  { %v7246_v52 = vcombine.low %v7190_v6, %v7191_v45  ;;  %v7247_v26 = vcombine.high %v7190_v6, %v7191_v45  ;;  %v7580_v27 = vmax.f32 %v7438_v41, %v7524_v56  ;;  %v7581_v34 = vmax.f32 %v7445_v29, %v7525_v7 }
 0x3ed   :  { %v7776_v47 = vrot.slane %v13318_v59, 6  ;;  %v7165_v21 = vmax.f32 %v7108_v60, 0.0  ;;  %v7778_v28 = vrot.slane %v13338_v2, 4  ;;  %v7780_v39 = vrot.slane %v13362_v10, 2 }
 0x3ee   :  { %v7452_v22 = vrot.slane %v7246_v52, %v13998_v4  ;;  %v7459_v42 = vrot.slane %v7247_v26, %v13998_v4  ;;  %v7705_v46 = vcombine.low %v7580_v27, %v7581_v34  ;;  %v7783_v13 = vrot.slane %v13410_v50, 6 }
 0x3ef   :  { %v7777_v48 = vsel %vm7756_vm4, %v7776_v47, %v7775_v5  ;;  %v14035_v63 = vmax.f32 %v14034_v44, 0.0  ;;  %v7805_v15 = vrot.slane %v13318_v59, 1  ;;  %v7807_v16 = vrot.slane %v13338_v2, 7 }
 0x3f0   :  { %v7526_v1 = vrot.slane %v7452_v22, 4  ;;  %v7527_v9 = vrot.slane %v7459_v42, 4  ;;  %v7779_v54 = vsel %vm7759_vm5, %v7778_v28, %v7777_v48  ;;  %v7719_v17 = vrot.slane %v7705_v46, %v14005_v33 }
 0x3f1   :  { %v7193_v3 = vmax.f32 %v14035_v63, %v7165_v21  ;;  %v7781_v49 = vsel %vm7762_vm6, %v7780_v39, %v7779_v54  ;;  %v7806_v36 = vsel %vm3185_vm1, %v7805_v15, 0.0  ;;  %v7809_v12 = vrot.slane %v13338_v2, 5 }
 0x3f2   :  { %v7582_v61 = vmax.f32 %v7452_v22, %v7526_v1  ;;  %v7583_v51 = vmax.f32 %v7459_v42, %v7527_v9  ;;  %v13435_v24 = vcombine.low %v7712_v57, %v7719_v17  ;;  %v13437_v18 = vcombine.high %v7712_v57, %v7719_v17 }
 0x3f3   :  { %v7248_v43 = vcombine.low %v7192_v30, %v7193_v3  ;;  %v7249_v20 = vcombine.high %v7192_v30, %v7193_v3  ;;  %v7782_v58 = vsel %vm7764_vm7, %v13384_v19, %v7781_v49  ;;  %v7808_v29 = vsel %vm7756_vm4, %v7807_v16, %v7806_v36 }
 0x3f4   :  { %v7722_v8 = vcombine.low %v7582_v61, %v7583_v51  ;;  %v7784_v35 = vsel %vm7767_vm8, %v7783_v13, %v7782_v58  ;;  %v7785_v41 = vrot.slane %v13437_v18, 4  ;;  %v7811_v6 = vrot.slane %v13362_v10, 3 }
 0x3f5   :  { %v7466_v14 = vrot.slane %v7248_v43, %v13998_v4  ;;  %v7473_v53 = vrot.slane %v7249_v20, %v13998_v4  ;;  %v7813_v55 = vrot.slane %v13384_v19, 1  ;;  %v7810_v30 = vsel %vm7759_vm5, %v7809_v12, %v7808_v29 }
 0x3f6   :  { %v7730_v0 = vrot.slane %v7722_v8, %v14005_v33  ;;  %v7786_v4 = vsel %vm7770_vm9, %v7785_v41, %v7784_v35  ;;  %v7815_v25 = vrot.slane %v13410_v50, 7  ;;  %v7817_v23 = vrot.slane %v13437_v18, 5 }
 0x3f7   :  { %v7528_v62 = vrot.slane %v7466_v14, 4  ;;  %v7529_v45 = vrot.slane %v7473_v53, 4  ;;  %v7812_v37 = vsel %vm7762_vm6, %v7811_v6, %v7810_v30  ;;  %v7754_v57 = vsel %vm3185_vm1, %v13316_v32, 0.0 }
 0x3f8   :  { %v7814_v52 = vsel %vm7764_vm7, %v7813_v55, %v7812_v37  ;;  %v7755_v26 = vrot.slane %v13316_v32, 6  ;;  %v7758_v60 = vrot.slane %v13336_v31, 4  ;;  %v7761_v27 = vrot.slane %v13360_v38, 2  ;;  %v10503_v37 = vld [vmem:[#allocation7 + $0x138] sm:$0xff]  }
 0x3f9   :  { %v7584_v56 = vmax.f32 %v7466_v14, %v7528_v62  ;;  %v7585_v7 = vmax.f32 %v7473_v53, %v7529_v45  ;;  %v7816_v5 = vsel %vm7767_vm8, %v7815_v25, %v7814_v52  ;;  %v7766_v22 = vrot.slane %v13408_v11, 6 }
 0x3fa   :  { %v7769_v42 = vrot.slane %v13435_v24, 4  ;;  %v7818_v21 = vsel %vm7770_vm9, %v7817_v23, %v7816_v5  ;;  %v7757_v46 = vsel %vm7756_vm4, %v7755_v26, %v7754_v57  ;;  %v7789_v48 = vrot.slane %v13316_v32, 1  ;;  %v10505_v5 = vld [vmem:[#allocation7 + $0x170] sm:$0xff]  }
 0x3fb   :  { %v7723_v34 = vcombine.low %v7584_v56, %v7585_v7  ;;  %v7791_v1 = vrot.slane %v13336_v31, 7  ;;  %v7760_v44 = vsel %vm7759_vm5, %v7758_v60, %v7757_v46  ;;  %v7793_v63 = vrot.slane %v13336_v31, 5  ;;  %v10504_v46 = vld [vmem:[#allocation7 + $0x1b8] sm:$0xff]  }
 0x3fc   :  { %v7795_v3 = vrot.slane %v13360_v38, 3  ;;  %v7763_v54 = vsel %vm7762_vm6, %v7761_v27, %v7760_v44  ;;  %v7790_v17 = vsel %vm3185_vm1, %v7789_v48, 0.0  ;;  %v7797_v49 = vrot.slane %v13382_v40, 1 }
 0x3fd   :  { %v7737_v9 = vrot.slane %v7723_v34, %v14005_v33  ;;  %v7799_v15 = vrot.slane %v13408_v11, 7  ;;  %v7765_v61 = vsel %vm7764_vm7, %v13382_v40, %v7763_v54  ;;  %v7792_v51 = vsel %vm7756_vm4, %v7791_v1, %v7790_v17  ;;  %v10506_v17 = vld [vmem:[#allocation7 + $0x1f0] sm:$0xff]  }
 0x3fe   :  { %v7768_v43 = vsel %vm7767_vm8, %v7766_v22, %v7765_v61  ;;  %v7794_v20 = vsel %vm7759_vm5, %v7793_v63, %v7792_v51  ;;  %v7801_v58 = vrot.slane %v13435_v24, 5  ;;  %v7835_v36 = vrot.slane %v13318_v59, 2 }
 0x3ff   :  { %v13487_v16 = vcombine.low %v7730_v0, %v7737_v9  ;;  %v13489_v33 = vcombine.high %v7730_v0, %v7737_v9  ;;  %v7771_v53 = vsel %vm7770_vm9, %v7769_v42, %v7768_v43  ;;  %v7796_v29 = vsel %vm7762_vm6, %v7795_v3, %v7794_v20  ;;  %v10507_v43 = vld [vmem:[#allocation7 + $0x130] sm:$0xff]  }
 0x400   :  { %v7836_v6 = vsel %vm3185_vm1, %v7835_v36, 0.0  ;;  %v7838_v0 = vrot.slane %v13362_v10, 6  ;;  %v7798_v30 = vsel %vm7764_vm7, %v7797_v49, %v7796_v29  ;;  %v7842_v34 = vrot.slane %v13384_v19, 2 }
 0x401   :  { %v7787_v8 = vrot.slane %v13489_v33, 2  ;;  %v7819_v14 = vrot.slane %v13489_v33, 3  ;;  %v7772_v35 = vrot.slane %v13487_v16, 2  ;;  %v7803_v12 = vrot.slane %v13487_v16, 3 }
 0x402   :  { %v7800_v7 = vsel %vm7767_vm8, %v7799_v15, %v7798_v30  ;;  %v7837_v52 = vsel %vm7756_vm4, %v13338_v2, %v7836_v6  ;;  %v7845_v1 = vrot.slane %v13437_v18, 6  ;;  %v7847_v9 = vrot.slane %v13489_v33, 4  ;;  %v10510_v30 = vld [vmem:[#allocation7 + $0x1e8] sm:$0xff]  }
 0x403   :  { %v7788_v62 = vsel %vm7773_vm10, %v7787_v8, %v7786_v4  ;;  %v7820_v45 = vsel %vm7773_vm10, %v7819_v14, %v7818_v21  ;;  %v7774_v55 = vsel %vm7773_vm10, %v7772_v35, %v7771_v53  ;;  %v7802_v57 = vsel %vm7770_vm9, %v7801_v58, %v7800_v7  ;;  %v10509_v53 = vld [vmem:[#allocation7 + $0x168] sm:$0xff]  }
 0x404   :  { %v7958_v25 = vpack.c.bf16 %v7788_v62, %v7788_v62  ;;  %v7960_v23 = vpack.c.bf16 %v7820_v45, %v7820_v45  ;;  %v7957_v56 = vpack.c.bf16 %v7774_v55, %v7774_v55  ;;  %v7840_v4 = vrot.slane %v13362_v10, 4 }
 0x405   :  { %v7804_v21 = vsel %vm7773_vm10, %v7803_v12, %v7802_v57  ;;  %v7839_v48 = vsel %vm7759_vm5, %v7838_v0, %v7837_v52  ;;  %v7865_v3 = vrot.slane %v13318_v59, 3  ;;  %v7867_v54 = vrot.slane %v13338_v2, 1  ;;  %v10508_v0 = vld [vmem:[#allocation7 + $0x1b0] sm:$0xff]  }
 0x406   :  { %8906 = vmatprep.mubr.bf16.mxu1 %v7958_v25  ;;  %8946 = vmatprep.mubr.bf16.mxu0 %v7960_v23  ;;  %v7959_v44 = vpack.c.bf16 %v7804_v21, %v7804_v21  ;;  %v7841_v63 = vsel %vm7762_vm6, %v7840_v4, %v7839_v48  ;;  %v7869_v15 = vrot.slane %v13362_v10, 7  ;;  %v7871_v61 = vrot.slane %v13384_v19, 5 }
 0x407   :  { %8907 = vmatmul.mubr.bf16.vlgmr.msra.gmra.mxu1 %v7957_v56  ;;  %v7843_v49 = vsel %vm7764_vm7, %v7842_v34, %v7841_v63  ;;  %v7873_v51 = vrot.slane %v13384_v19, 3  ;;  %v7866_v58 = vsel %vm3185_vm1, %v7865_v3, 0.0  ;;  %v7875_v36 = vrot.slane %v13410_v50, 1  ;;  %v10513_v34 = vld [vmem:[#allocation7 + $0x160] sm:$0xff]  }
 0x408   :  { %9803 = vmatpush3.bf16.msra.mxu1 %v10503_v37  ;;  %8947 = vmatmul.mubr.bf16.vlgmr.msra.gmra.mxu0 %v7959_v44  ;;  %v7844_v20 = vsel %vm7767_vm8, %v13410_v50, %v7843_v49  ;;  %v7877_v14 = vrot.slane %v13437_v18, 7  ;;  %v7868_v12 = vsel %vm7756_vm4, %v7867_v54, %v7866_v58  ;;  %v7879_v6 = vrot.slane %v13489_v33, 5  ;;  %v10511_v37 = vld [vmem:[#allocation7 + $0x128] sm:$0xff]   ;;  %v10514_v54 = vld [vmem:[#allocation7 + $0x1e0] sm:$0xff]  }
 0x409   :  { %9804 = vmatprep.subr.bf16.mxu1 %v10505_v5  ;;  %9825 = vmatpush3.bf16.msra.mxu0 %v10504_v46  ;;  %v7846_v29 = vsel %vm7770_vm9, %v7845_v1, %v7844_v20  ;;  %v7821_v62 = vrot.slane %v13316_v32, 2  ;;  %v7870_v55 = vsel %vm7759_vm5, %v7869_v15, %v7868_v12  ;;  %v7824_v25 = vrot.slane %v13360_v38, 6  ;;  %v10512_v1 = vld [vmem:[#allocation7 + $0x1a8] sm:$0xff]  }
 0x40a   :  { %v7848_v45 = vsel %vm7773_vm10, %v7847_v9, %v7846_v29  ;;  %9826 = vmatprep.subr.bf16.mxu0 %v10506_v17  ;;  %v7826_v23 = vrot.slane %v13360_v38, 4  ;;  %v7872_v7 = vsel %vm7762_vm6, %v7871_v61, %v7870_v55  ;;  %v7828_v52 = vrot.slane %v13382_v40, 2 }
 0x40b   :  { %v7962_v56 = vpack.c.bf16 %v7848_v45, %v7848_v45  ;;  %v7822_v57 = vsel %vm3185_vm1, %v7821_v62, 0.0  ;;  %v7874_v4 = vsel %vm7764_vm7, %v7873_v51, %v7872_v7  ;;  %v7831_v21 = vrot.slane %v13435_v24, 6  ;;  %v10515_v51 = vld [vmem:[#allocation7 + $0x120] sm:$0xff]  }
 0x40c   :  { %9805 = vmatpush3.bf16.msra.mxu1 %v10507_v43  ;;  %v7823_v5 = vsel %vm7756_vm4, %v13336_v31, %v7822_v57  ;;  %v7833_v46 = vrot.slane %v13487_v16, 4  ;;  %v7876_v48 = vsel %vm7767_vm8, %v7875_v36, %v7874_v4  ;;  %v7849_v44 = vrot.slane %v13316_v32, 3  ;;  %v10521_v4 = vld [vmem:[#allocation7 + $0x150] sm:$0xff]  }
 0x40d   :  { %9806 = vmatprep.subr.bf16.mxu1 %v10509_v53  ;;  %8986 = vmatprep.mubr.bf16.mxu1 %v7962_v56  ;;  %v7825_v9 = vsel %vm7759_vm5, %v7824_v25, %v7823_v5  ;;  %v7851_v63 = vrot.slane %v13336_v31, 1  ;;  %v7878_v3 = vsel %vm7770_vm9, %v7877_v14, %v7876_v48  ;;  %v7853_v49 = vrot.slane %v13360_v38, 7  ;;  %v10517_v14 = vld [vmem:[#allocation7 + $0x158] sm:$0xff]  }
 0x40e   :  { %9827 = vmatpush3.bf16.msra.mxu0 %v10508_v0  ;;  %v7827_v17 = vsel %vm7762_vm6, %v7826_v23, %v7825_v9  ;;  %v7855_v15 = vrot.slane %v13382_v40, 5  ;;  %v7880_v61 = vsel %vm7773_vm10, %v7879_v6, %v7878_v3  ;;  %v7850_v20 = vsel %vm3185_vm1, %v7849_v44, 0.0  ;;  %v10516_v6 = vld [vmem:[#allocation7 + $0x1a0] sm:$0xff]   ;;  %v10520_v48 = vld [vmem:[#allocation7 + $0x198] sm:$0xff]   ;;  %v10522_v3 = vld [vmem:[#allocation7 + $0x1d0] sm:$0xff]  }
 0x40f   :  { %9828 = vmatprep.subr.bf16.mxu0 %v10510_v30  ;;  %v7829_v43 = vsel %vm7764_vm7, %v7828_v52, %v7827_v17  ;;  %v7857_v58 = vrot.slane %v13382_v40, 3  ;;  %v7964_v36 = vpack.c.bf16 %v7880_v61, %v7880_v61  ;;  %v7852_v29 = vsel %vm7756_vm4, %v7851_v63, %v7850_v20  ;;  %v10518_v30 = vld [vmem:[#allocation7 + $0x1d8] sm:$0xff]   ;;  %v10523_v61 = vld [vmem:[#allocation7 + $0x110] sm:$0xff]  }
 0x410   :  { %9807 = vmatpush3.bf16.msra.mxu1 %v10511_v37  ;;  %v7830_v53 = vsel %vm7767_vm8, %v13408_v11, %v7829_v43  ;;  %v7859_v12 = vrot.slane %v13408_v11, 1  ;;  %v7854_v62 = vsel %vm7759_vm5, %v7853_v49, %v7852_v29  ;;  %v7861_v45 = vrot.slane %v13435_v24, 7  ;;  %v10519_v37 = vld [vmem:[#allocation7 + $0x118] sm:$0xff]  }
 0x411   :  { %9808 = vmatprep.subr.bf16.mxu1 %v10513_v34  ;;  %v7832_v0 = vsel %vm7770_vm9, %v7831_v21, %v7830_v53  ;;  %v7863_v55 = vrot.slane %v13487_v16, 5  ;;  %9026 = vmatprep.mubr.bf16.mxu0 %v7964_v36  ;;  %v7856_v23 = vsel %vm7762_vm6, %v7855_v15, %v7854_v62  ;;  %v7895_v56 = vrot.slane %v13318_v59, 4  ;;  %v10525_v36 = vld [vmem:[#allocation7 + $0x148] sm:$0xff]  }
 0x412   :  { %9829 = vmatpush3.bf16.msra.mxu0 %v10512_v1  ;;  %v13577_v25 = vsel %vm7773_vm10, %v7833_v46, %v7832_v0  ;;  %v7897_v7 = vrot.slane %v13338_v2, 2  ;;  %v7858_v57 = vsel %vm7764_vm7, %v7857_v58, %v7856_v23  ;;  %v7900_v52 = vrot.slane %v13384_v19, 6 }
 0x413   :  { %9830 = vmatprep.subr.bf16.mxu0 %v10514_v54  ;;  %v7860_v34 = vsel %vm7767_vm8, %v7859_v12, %v7858_v57  ;;  %v7896_v5 = vsel %vm3185_vm1, %v7895_v56, 0.0  ;;  %v7902_v21 = vrot.slane %v13410_v50, 4  ;;  %v7904_v46 = vrot.slane %v13410_v50, 2  ;;  %v10527_v57 = vld [vmem:[#allocation7 + $0x108] sm:$0xff]  }
 0x414   :  { %9809 = vmatpush3.bf16.msra.mxu1 %v10515_v51  ;;  %v7862_v1 = vsel %vm7770_vm9, %v7861_v45, %v7860_v34  ;;  %v7898_v9 = vsel %vm7756_vm4, %v7897_v7, %v7896_v5  ;;  %v7925_v44 = vrot.slane %v13318_v59, 5  ;;  %v7927_v63 = vrot.slane %v13338_v2, 3 }
 0x415   :  { %9810 = vmatprep.subr.bf16.mxu1 %v10517_v14  ;;  %v13593_v54 = vsel %vm7773_vm10, %v7863_v55, %v7862_v1  ;;  %v7899_v17 = vsel %vm7759_vm5, %v13362_v10, %v7898_v9  ;;  %v7929_v49 = vrot.slane %v13362_v10, 1  ;;  %v7931_v15 = vrot.slane %v13384_v19, 7  ;;  %v10528_v9 = vld [vmem:[#allocation7 + $0x188] sm:$0xff]   ;;  %v10538_v10 = vld [vmem:[#allocation7 + $0x2f0] sm:$0xff]  }
 0x416   :  { %9831 = vmatpush3.bf16.msra.mxu0 %v10516_v6  ;;  %v7901_v51 = vsel %vm7762_vm6, %v7900_v52, %v7899_v17  ;;  %v7907_v43 = vrot.slane %v13489_v33, 6  ;;  %v7926_v20 = vsel %vm3185_vm1, %v7925_v44, 0.0  ;;  %v7933_v58 = vrot.slane %v13410_v50, 5  ;;  %v10524_v6 = vld [vmem:[#allocation7 + $0x190] sm:$0xff]  }
 0x417   :  { %9832 = vmatprep.subr.bf16.mxu0 %v10518_v30  ;;  %v7903_v14 = vsel %vm7764_vm7, %v7902_v21, %v7901_v51  ;;  %v7928_v53 = vsel %vm7756_vm4, %v7927_v63, %v7926_v20  ;;  %v7935_v29 = vrot.slane %v13437_v18, 3  ;;  %v7937_v12 = vrot.slane %v13437_v18, 1  ;;  %v10526_v30 = vld [vmem:[#allocation7 + $0x1c8] sm:$0xff]   ;;  %v10529_v21 = vld [vmem:[#allocation7 + $0x140] sm:$0xff]  }
 0x418   :  { %9811 = vmatpush3.bf16.msra.mxu1 %v10519_v37  ;;  %v7905_v0 = vsel %vm7767_vm8, %v7904_v46, %v7903_v14  ;;  %v7930_v62 = vsel %vm7759_vm5, %v7929_v49, %v7928_v53  ;;  %v7939_v45 = vrot.slane %v13489_v33, 7  ;;  %v7881_v55 = vrot.slane %v13316_v32, 4  ;;  %v10530_v49 = vld [vmem:[#allocation7 + $0x1c0] sm:$0xff]   ;;  %v10533_v53 = vld [vmem:[#allocation7 + $0x278] sm:$0xff]  }
 0x419   :  { %9812 = vmatprep.subr.bf16.mxu1 %v10521_v4  ;;  %v7906_v23 = vsel %vm7770_vm9, %v13437_v18, %v7905_v0  ;;  %v7932_v56 = vsel %vm7762_vm6, %v7931_v15, %v7930_v62  ;;  %v7883_v7 = vrot.slane %v13336_v31, 2  ;;  %v7886_v37 = vrot.slane %v13382_v40, 6  ;;  %v10531_v20 = vld [vmem:[#allocation7 + $0x100] sm:$0xff]   ;;  %v10540_v18 = vld [vmem:[#allocation7 + $0x2b0] sm:$0xff]  }
 0x41a   :  { %9833 = vmatpush3.bf16.msra.mxu0 %v10520_v48  ;;  %v13617_v52 = vsel %vm7773_vm10, %v7907_v43, %v7906_v23  ;;  %v7934_v4 = vsel %vm7764_vm7, %v7933_v58, %v7932_v56  ;;  %v7882_v34 = vsel %vm3185_vm1, %v7881_v55, 0.0  ;;  %v7888_v5 = vrot.slane %v13408_v11, 4  ;;  %v10532_v62 = vld [vmem:[#allocation7 + $0x180] sm:$0xff]   ;;  %v10534_v56 = vld [vmem:[#allocation7 + $0x2f8] sm:$0xff]  }
 0x41b   :  { %9834 = vmatprep.subr.bf16.mxu0 %v10522_v3  ;;  %v7936_v46 = vsel %vm7767_vm8, %v7935_v29, %v7934_v4  ;;  %v7884_v48 = vsel %vm7756_vm4, %v7883_v7, %v7882_v34  ;;  %v7890_v1 = vrot.slane %v13408_v11, 2  ;;  %v7893_v3 = vrot.slane %v13487_v16, 6 }
 0x41c   :  { %9813 = vmatpush3.bf16.msra.mxu1 %v10523_v61  ;;  %v7938_v44 = vsel %vm7770_vm9, %v7937_v12, %v7936_v46  ;;  %v7885_v63 = vsel %vm7759_vm5, %v13360_v38, %v7884_v48  ;;  %v7909_v17 = vrot.slane %v13316_v32, 5  ;;  %v7911_v51 = vrot.slane %v13336_v31, 3 }
 0x41d   :  { %9814 = vmatprep.subr.bf16.mxu1 %v10525_v36  ;;  %v13631_v15 = vsel %vm7773_vm10, %v7939_v45, %v7938_v44  ;;  %v7887_v61 = vsel %vm7762_vm6, %v7886_v37, %v7885_v63  ;;  %v7913_v43 = vrot.slane %v13360_v38, 1  ;;  %v7915_v14 = vrot.slane %v13382_v40, 7  ;;  %v10547_v44 = vld [vmem:[#allocation7 + $0x220] sm:$0xff]   ;;  %v10549_v63 = vld [vmem:[#allocation7 + $0x258] sm:$0xff]  }
 0x41e   :  { %9835 = vmatpush3.bf16.msra.mxu0 %v10524_v6  ;;  %v7889_v58 = vsel %vm7764_vm7, %v7888_v5, %v7887_v61  ;;  %v7910_v36 = vsel %vm3185_vm1, %v7909_v17, 0.0  ;;  %v7917_v6 = vrot.slane %v13408_v11, 5  ;;  %v7919_v0 = vrot.slane %v13435_v24, 3  ;;  %v10535_v5 = vld [vmem:[#allocation7 + $0x238] sm:$0xff]   ;;  %v10553_v17 = vld [vmem:[#allocation7 + $0x250] sm:$0xff]  }
 0x41f   :  { %9836 = vmatprep.subr.bf16.mxu0 %v10526_v30  ;;  %v7891_v29 = vsel %vm7767_vm8, %v7890_v1, %v7889_v58  ;;  %v7912_v12 = vsel %vm7756_vm4, %v7911_v51, %v7910_v36  ;;  %v7921_v30 = vrot.slane %v13435_v24, 1  ;;  %v7923_v23 = vrot.slane %v13487_v16, 7  ;;  %v10543_v1 = vld [vmem:[#allocation7 + $0x228] sm:$0xff]   ;;  %v10555_v61 = vld [vmem:[#allocation7 + $0x210] sm:$0xff]   ;;  %v10561_v36 = vld [vmem:[#allocation7 + $0x240] sm:$0xff]  }
 0x420   :  { %9815 = vmatpush3.bf16.msra.mxu1 %v10527_v57  ;;  %v7892_v45 = vsel %vm7770_vm9, %v13435_v24, %v7891_v29  ;;  %v7914_v55 = vsel %vm7759_vm5, %v7913_v43, %v7912_v12  ;;  %v7949_v57 = vsel %vm3185_vm1, %v7776_v47, 0.0  ;;  %v7941_v4 = vsel %vm3185_vm1, %v7755_v26, 0.0  ;;  %v10537_v47 = vld [vmem:[#allocation7 + $0x270] sm:$0xff]   ;;  %v10557_v51 = vld [vmem:[#allocation7 + $0x248] sm:$0xff]   ;;  %v10563_v29 = vld [vmem:[#allocation7 + $0x200] sm:$0xff]  }
 0x421   :  { %9816 = vmatprep.subr.bf16.mxu1 %v10529_v21  ;;  %v13649_v7 = vsel %vm7773_vm10, %v7893_v3, %v7892_v45  ;;  %v7916_v37 = vsel %vm7762_vm6, %v7915_v14, %v7914_v55  ;;  %v7961_v34 = vpack.c.bf16 %v13577_v25, %v13577_v25  ;;  %v7950_v46 = vsel %vm7756_vm4, %v7778_v28, %v7949_v57  ;;  %v10536_v28 = vld [vmem:[#allocation7 + $0x2b8] sm:$0xff]   ;;  %v10556_v43 = vld [vmem:[#allocation7 + $0x290] sm:$0xff]   ;;  %v10559_v58 = vld [vmem:[#allocation7 + $0x208] sm:$0xff]  }
 0x422   :  { %9837 = vmatpush3.bf16.msra.mxu0 %v10528_v9  ;;  %v7918_v21 = vsel %vm7764_vm7, %v7917_v6, %v7916_v37  ;;  %v7942_v59 = vsel %vm7756_vm4, %v7758_v60, %v7941_v4  ;;  %v7963_v32 = vpack.c.bf16 %v13593_v54, %v13593_v54  ;;  %v7951_v25 = vsel %vm7759_vm5, %v7780_v39, %v7950_v46  ;;  %v10544_v9 = vld [vmem:[#allocation7 + $0x2a8] sm:$0xff]   ;;  %v10550_v3 = vld [vmem:[#allocation7 + $0x2d8] sm:$0xff]   ;;  %v10564_v6 = vld [vmem:[#allocation7 + $0x280] sm:$0xff]  }
 0x423   :  { %9838 = vmatprep.subr.bf16.mxu0 %v10530_v49  ;;  %v7920_v26 = vsel %vm7767_vm8, %v7919_v0, %v7918_v21  ;;  %v7943_v2 = vsel %vm7759_vm5, %v7761_v27, %v7942_v59  ;;  %v7966_v31 = vpack.c.bf16 %v13617_v52, %v13617_v52  ;;  %v7952_v54 = vsel %vm7762_vm6, %v13384_v19, %v7951_v25  ;;  %v10552_v49 = vld [vmem:[#allocation7 + $0x298] sm:$0xff]   ;;  %v10560_v14 = vld [vmem:[#allocation7 + $0x288] sm:$0xff]   ;;  %v10567_v45 = vld [vmem:[#allocation7 + $0x370] sm:$0xff]  }
 0x424   :  { %9817 = vmatpush3.bf16.msra.mxu1 %v10531_v20  ;;  %v7922_v60 = vsel %vm7770_vm9, %v7921_v30, %v7920_v26  ;;  %v7944_v48 = vsel %vm7762_vm6, %v13382_v40, %v7943_v2  ;;  %v7953_v39 = vsel %vm7764_vm7, %v7783_v13, %v7952_v54  ;;  %v7968_v19 = vpack.c.bf16 %v13631_v15, %v13631_v15  ;;  %v10539_v40 = vld [vmem:[#allocation7 + $0x230] sm:$0xff]   ;;  %v10541_v13 = vld [vmem:[#allocation7 + $0x268] sm:$0xff]   ;;  %v10565_v12 = vld [vmem:[#allocation7 + $0x378] sm:$0xff]  }
 0x425   :  { %9846 = vmatprep.subr.bf16.mxu1 %v10533_v53  ;;  %v13684_v38 = vsel %vm7773_vm10, %v7923_v23, %v7922_v60  ;;  %v7945_v27 = vsel %vm7764_vm7, %v7766_v22, %v7944_v48  ;;  %v7954_v52 = vsel %vm7767_vm8, %v7785_v41, %v7953_v39  ;;  %v10554_v15 = vld [vmem:[#allocation7 + $0x2d0] sm:$0xff]   ;;  %v10558_v20 = vld [vmem:[#allocation7 + $0x2c8] sm:$0xff]   ;;  %v10562_v53 = vld [vmem:[#allocation7 + $0x2c0] sm:$0xff]   ;;  %v14036_v23 = vmov 0.0  }
 0x426   :  { %9839 = vmatpush3.bf16.msra.mxu0 %v10532_v62  ;;  %v7946_v50 = vsel %vm7767_vm8, %v7769_v42, %v7945_v27  ;;  %v7955_v11 = vsel %vm7770_vm9, %v7787_v8, %v7954_v52  ;;  %v10542_v42 = vld [vmem:[#allocation7 + $0x2e8] sm:$0xff]   ;;  %v10545_v8 = vld [vmem:[#allocation7 + $0x260] sm:$0xff]   ;;  %v10566_v0 = vld [vmem:[#allocation7 + $0x338] sm:$0xff]   ;;  %v7965_v62 = vpack.c.bf16 %v13649_v7, %v13649_v7  ;;  %v7967_v30 = vpack.c.bf16 %v13684_v38, %v13684_v38 }
 0x427   :  { %8987 = vmatmul.mubr.bf16.vlgmr.msra.gmra.mxu1 %v7961_v34  ;;  %9868 = vmatprep.subr.bf16.mxu0 %v10534_v56  ;;  %v7947_v22 = vsel %vm7770_vm9, %v7772_v35, %v7946_v50  ;;  %v7956_v41 = vsel %vm7773_vm10, %v13489_v33, %v7955_v11  ;;  %v10546_v35 = vld [vmem:[#allocation7 + $0x2e0] sm:$0xff]   ;;  %v10568_v56 = vld [vmem:[#allocation7 + $0x330] sm:$0xff]   ;;  %v10569_v37 = vld [vmem:[#allocation7 + $0x368] sm:$0xff]  }
 0x428   :  { %9847 = vmatpush3.bf16.msra.mxu1 %v10535_v5  ;;  %9066 = vmatprep.mubr.bf16.mxu1 %v7966_v31  ;;  %v13710_v24 = vsel %vm7773_vm10, %v13487_v16, %v7947_v22  ;;  %v10548_v33 = vld [vmem:[#allocation7 + $0x2a0] sm:$0xff]   ;;  %v10551_v16 = vld [vmem:[#allocation7 + $0x218] sm:$0xff]   ;;  %v7970_v55 = vpack.c.bf16 %v7956_v41, %v7956_v41  ;;  %v10570_v57 = vld [vmem:[#allocation7 + $0x328] sm:$0xff]  }
 0x429   :  { %9027 = vmatmul.mubr.bf16.vlgmr.msra.gmra.mxu0 %v7963_v32  ;;  %9848 = vmatprep.subr.bf16.mxu1 %v10537_v47  ;;  %v10571_v7 = vld [vmem:[#allocation7 + $0x360] sm:$0xff]   ;;  %v10573_v34 = vld [vmem:[#allocation7 + $0x358] sm:$0xff]   ;;  %v10575_v21 = vld [vmem:[#allocation7 + $0x350] sm:$0xff]   ;;  %v7969_v25 = vpack.c.bf16 %v13710_v24, %v13710_v24 }
 0x42a   :  { %9869 = vmatpush3.bf16.msra.mxu0 %v10536_v28  ;;  %9106 = vmatprep.mubr.bf16.mxu0 %v7968_v19  ;;  %v10572_v4 = vld [vmem:[#allocation7 + $0x320] sm:$0xff]   ;;  %v10574_v5 = vld [vmem:[#allocation7 + $0x318] sm:$0xff]   ;;  %v10576_v46 = vld [vmem:[#allocation7 + $0x310] sm:$0xff]  }
 0x42b   :  { %9870 = vmatprep.subr.bf16.mxu0 %v10538_v10  ;;  %v10577_v59 = vld [vmem:[#allocation7 + $0x348] sm:$0xff]   ;;  %v10579_v47 = vld [vmem:[#allocation7 + $0x340] sm:$0xff]   ;;  %v10581_v2 = vld [vmem:[%s13767_s7 + $0x38] sm:$0xff]  }
 0x42c   :  { %9849 = vmatpush3.bf16.msra.mxu1 %v10539_v40  ;;  %v10578_v32 = vld [vmem:[#allocation7 + $0x308] sm:$0xff]   ;;  %v10580_v26 = vld [vmem:[#allocation7 + $0x300] sm:$0xff]   ;;  %v10582_v31 = vld [vmem:[%s13767_s7 + $0x30] sm:$0xff]  }
 0x42d   :  { %9850 = vmatprep.subr.bf16.mxu1 %v10541_v13  ;;  %v10583_v28 = vld [vmem:[%s13767_s7 + $0x28] sm:$0xff]   ;;  %v10584_v60 = vld [vmem:[%s13767_s7 + $0x20] sm:$0xff]   ;;  %v10585_v54 = vld [vmem:[%s13767_s7 + $0x18] sm:$0xff]  }
 0x42e   :  { %9871 = vmatpush3.bf16.msra.mxu0 %v10540_v18  ;;  %v10586_v48 = vld [vmem:[%s13767_s7 + $0x10] sm:$0xff]   ;;  %v10587_v10 = vld [vmem:[%s13767_s7 + $0x8] sm:$0xff]   ;;  %v10588_v38 = vld [vmem:[%s13767_s7] sm:$0xff]  }
 0x42f   :  { %9872 = vmatprep.subr.bf16.mxu0 %v10542_v42  ;;  %v9636_v19 = vld [vmem:[%s13766_s6] ss:$0 sm:$0xff] }
 0x430   :  { %9851 = vmatpush3.bf16.msra.mxu1 %v10543_v1 }
 0x431   :  { %9852 = vmatprep.subr.bf16.mxu1 %v10545_v8 }
 0x432   :  { %9873 = vmatpush3.bf16.msra.mxu0 %v10544_v9 }
 0x433   :  { %9874 = vmatprep.subr.bf16.mxu0 %v10546_v35 }
 0x434   :  { %9853 = vmatpush3.bf16.msra.mxu1 %v10547_v44 }
 0x435   :  { %9854 = vmatprep.subr.bf16.mxu1 %v10549_v63 }
 0x436   :  { %9875 = vmatpush3.bf16.msra.mxu0 %v10548_v33 }
 0x437   :  { %9876 = vmatprep.subr.bf16.mxu0 %v10550_v3 }
 0x438   :  { %9855 = vmatpush3.bf16.msra.mxu1 %v10551_v16 }
 0x439   :  { %9856 = vmatprep.subr.bf16.mxu1 %v10553_v17 }
 0x43a   :  { %9877 = vmatpush3.bf16.msra.mxu0 %v10552_v49 }
 0x43b   :  { %9878 = vmatprep.subr.bf16.mxu0 %v10554_v15 }
 0x43c   :  { %9857 = vmatpush3.bf16.msra.mxu1 %v10555_v61 }
 0x43d   :  { %9858 = vmatprep.subr.bf16.mxu1 %v10557_v51 }
 0x43e   :  { %9879 = vmatpush3.bf16.msra.mxu0 %v10556_v43 }
 0x43f   :  { %9880 = vmatprep.subr.bf16.mxu0 %v10558_v20 }
 0x440   :  { %9859 = vmatpush3.bf16.msra.mxu1 %v10559_v58 }
 0x441   :  { %9860 = vmatprep.subr.bf16.mxu1 %v10561_v36 }
 0x442   :  { %9881 = vmatpush3.bf16.msra.mxu0 %v10560_v14 }
 0x443   :  { %9882 = vmatprep.subr.bf16.mxu0 %v10562_v53 }
 0x444   :  { %9861 = vmatpush3.bf16.msra.mxu1 %v10563_v29 }
 0x445   :  { %9890 = vmatprep.subr.bf16.mxu1 %v10565_v12 }
 0x446   :  { %9883 = vmatpush3.bf16.msra.mxu0 %v10564_v6 }
 0x447   :  { %9067 = vmatmul.mubr.bf16.vlgmr.msra.gmra.mxu1 %v7965_v62  ;;  %9921 = vmatprep.subr.bf16.mxu0 %v14036_v23 }
 0x448   :  { %9891 = vmatpush3.bf16.msra.mxu1 %v10566_v0  ;;  %9146 = vmatprep.mubr.bf16.mxu1 %v7970_v55 }
 0x449   :  { %9107 = vmatmul.mubr.bf16.vlgmr.msra.gmra.mxu0 %v7967_v30  ;;  %9892 = vmatprep.subr.bf16.mxu1 %v10567_v45 }
 0x44a   :  { %9922 = vmatpush3.bf16.msra.mxu0 %v10581_v2  ;;  %9937 = vmatprep.mubr.msk.bf16.mxu0 %vm10668_vm11, %v14036_v23 }
 0x44b   :  { %9923 = vmatprep.subr.bf16.mxu0 %v14036_v23 }
 0x44c   :  { %9893 = vmatpush3.bf16.msra.mxu1 %v10568_v56 }
 0x44d   :  { %9894 = vmatprep.subr.bf16.mxu1 %v10569_v37 }
 0x44e   :  { %9924 = vmatpush3.bf16.msra.mxu0 %v10582_v31 }
 0x44f   :  { %9925 = vmatprep.subr.bf16.mxu0 %v14036_v23 }
 0x450   :  { %9895 = vmatpush3.bf16.msra.mxu1 %v10570_v57 }
 0x451   :  { %9896 = vmatprep.subr.bf16.mxu1 %v10571_v7  ;;  %v9749_v7 = vld [vmem:[%s13768_s8] ss:$0 sm:$0xff] }
 0x452   :  { %9926 = vmatpush3.bf16.msra.mxu0 %v10583_v28 }
 0x453   :  { %9927 = vmatprep.subr.bf16.mxu0 %v14036_v23 }
 0x454   :  { %9897 = vmatpush3.bf16.msra.mxu1 %v10572_v4 }
 0x455   :  { %9898 = vmatprep.subr.bf16.mxu1 %v10573_v34 }
 0x456   :  { %9928 = vmatpush3.bf16.msra.mxu0 %v10584_v60 }
 0x457   :  { %9929 = vmatprep.subr.bf16.mxu0 %v14036_v23 }
 0x458   :  { %9899 = vmatpush3.bf16.msra.mxu1 %v10574_v5 }
 0x459   :  { %9900 = vmatprep.subr.bf16.mxu1 %v10575_v21 }
 0x45a   :  { %9930 = vmatpush3.bf16.msra.mxu0 %v10585_v54 }
 0x45b   :  { %9931 = vmatprep.subr.bf16.mxu0 %v14036_v23 }
 0x45c   :  { %9901 = vmatpush3.bf16.msra.mxu1 %v10576_v46 }
 0x45d   :  { %9902 = vmatprep.subr.bf16.mxu1 %v10577_v59 }
 0x45e   :  { %9932 = vmatpush3.bf16.msra.mxu0 %v10586_v48 }
 0x45f   :  { %9933 = vmatprep.subr.bf16.mxu0 %v14036_v23 }
 0x460   :  { %9903 = vmatpush3.bf16.msra.mxu1 %v10578_v32 }
 0x461   :  { %9904 = vmatprep.subr.bf16.mxu1 %v10579_v47 }
 0x462   :  { %9934 = vmatpush3.bf16.msra.mxu0 %v10587_v10 }
 0x463   :  { %9935 = vmatprep.subr.bf16.mxu0 %v14036_v23 }
 0x464   :  { %9905 = vmatpush3.bf16.msra.mxu1 %v10580_v26 }
 0x466   :  { %9936 = vmatpush3.bf16.msra.mxu0 %v10588_v38 }
 0x467   :  { %9147 = vmatmul.mubr.bf16.vlgmr.msra.gmra.mxu1 %v7969_v25 }
 0x4c7   :  { %v9774_v39 = vpop.f32.mrf.mxu1 }
 0x4c8   :  { %v9796_v27 = vpop.f32.mrf.mxu0 }
 0x4c9   :  { %v9775_v40 = vpop.f32.mrf.mxu1 }
 0x4ca   :  { %v9776_v52 = vadd.f32 %v9775_v40, %v9774_v39  ;;  %v9797_v50 = vpop.f32.mrf.mxu0 }
 0x4cb   :  { %v9777_v13 = vpop.f32.mrf.mxu1  ;;  %v9798_v22 = vadd.f32 %v9797_v50, %v9796_v27 }
 0x4cc   :  { %v8909_v11 = vadd.f32 %v9776_v52, %v9636_v19  ;;  %v9799_v18 = vpop.f32.mrf.mxu0 }
 0x4cd   :  { %v9778_v41 = vpop.f32.mrf.mxu1 }
 0x4ce   :  { %v8949_v24 = vadd.f32 %v9798_v22, %v8909_v11  ;;  %v9800_v42 = vpop.f32.mrf.mxu0 }
 0x4e7   :  { %v9818_v1 = vpop.f32.mrf.mxu1 }
 0x4e9   :  { %v9840_v8 = vpop.f32.mrf.mxu0  ;;  %v9819_v9 = vpop.f32.mrf.mxu1 }
 0x4ea   :  { %v9820_v58 = vadd.f32 %v9819_v9, %v9818_v1 }
 0x4eb   :  { %v9841_v35 = vpop.f32.mrf.mxu0  ;;  %v9821_v44 = vpop.f32.mrf.mxu1 }
 0x4ec   :  { %v8989_v36 = vadd.f32 %v9820_v58, %v8949_v24  ;;  %v9842_v14 = vadd.f32 %v9841_v35, %v9840_v8 }
 0x4ed   :  { %v9843_v63 = vpop.f32.mrf.mxu0  ;;  %v9822_v33 = vpop.f32.mrf.mxu1 }
 0x4ee   :  { %v9029_v29 = vadd.f32 %v9842_v14, %v8989_v36 }
 0x4ef   :  { %v9844_v3 = vpop.f32.mrf.mxu0 }
 0x507   :  { %v9862_v16 = vpop.f32.mrf.mxu1 }
 0x509   :  { %v9884_v17 = vpop.f32.mrf.mxu0  ;;  %v9863_v49 = vpop.f32.mrf.mxu1 }
 0x50a   :  { %v9864_v53 = vadd.f32 %v9863_v49, %v9862_v16 }
 0x50b   :  { %v9885_v15 = vpop.f32.mrf.mxu0  ;;  %v9865_v61 = vpop.f32.mrf.mxu1 }
 0x50c   :  { %v9069_v12 = vadd.f32 %v9864_v53, %v9029_v29  ;;  %v9886_v0 = vadd.f32 %v9885_v15, %v9884_v17 }
 0x50d   :  { %v9887_v51 = vpop.f32.mrf.mxu0  ;;  %v9866_v43 = vpop.f32.mrf.mxu1 }
 0x50e   :  { %v9109_v45 = vadd.f32 %v9886_v0, %v9069_v12 }
 0x50f   :  { %v9888_v20 = vpop.f32.mrf.mxu0 }
 0x527   :  { %v9906_v6 = vpop.f32.mrf.mxu1 }
 0x529   :  { %v9907_v62 = vpop.f32.mrf.mxu1 }
 0x52a   :  { %v9908_v55 = vadd.f32 %v9907_v62, %v9906_v6 }
 0x52b   :  { %v9909_v30 = vpop.f32.mrf.mxu1 }
 0x52c   :  { %v9149_v23 = vadd.f32 %v9908_v55, %v9109_v45 }
 0x52d   :  { %v9910_v56 = vpop.f32.mrf.mxu1 }
 0x52e   :  { %v9154_v37 = vmax.f32 %v9149_v23, 0.0 }
 0x530   :  { %v9155_v57 = vpack.c.bf16 %v9154_v37, %v9154_v37 }
 0x532   :  { %9938 = vmatmul.mubr.bf16.vlgmr.msra.gmra.mxu0 %v9155_v57 }
 0x5f2   :  { %v9261_v4 = vpop.f32.mrf.mxu0 }
 0x5f3   :  { %v9262_v34 = vadd.f32 %v9749_v7, %v9261_v4 }
 0x5f4   :  { %v9939_v5 = vpop.f32.mrf.mxu0 }
 0x5f5   :  { %9267 = vmax.xlane.f32.xlu0 %v9262_v34 }
 0x5f6   :  { %v9264_v21 = vpop.f32.mrf.mxu0 }
 0x5f8   :  { %v9940_v46 = vpop.f32.mrf.mxu0 }
 0x67e   :  { %v9268_v59 = vpop.xlane.xlu0 %9267 }
 0x67f   :  { %v9269_v32 = vsub.f32 %v9262_v34, %v9268_v59 }
 0x681   :  { %v9270_v47 = vmul.f32 1.442695, %v9269_v32 }
 0x683   :  { %10589 = vpow2.f32 %v9270_v47 }
 0x690   :  { %v10590_v26 = vpop.eup %10589 }
 0x691   :  { %9272 = vadd.xlane.f32.xlu0 %v10590_v26 }
 0x71a   :  { %v9273_v25 = vpop.xlane.xlu0 %9272 }
 0x71b   :  { %10591 = vlog2.f32 %v9273_v25 }
 0x728   :  { %v10592_v2 = vpop.eup %10591 }
 0x729   :  { %v9275_v31 = vmul.f32 0.6931472, %v10592_v2 }
 0x72b   :  { %v9276_v28 = vsub.f32 %v9269_v32, %v9275_v31 }
 0x72d   :  { %9277 = vst [vmem:[%s13769_s9] sm:$0xff] %v9276_v28 }
 0x72e   :  { %9282 = vsyncpa [#allocation4], 1 }
 0x72f   :  { %9283 = vsyncpa [#allocation6], 1 }

</bundles_post_ra>
